<compile_context>
chip_gen: v6e
topology: v6e:2x2x1
jax: 0.10.0
libtpu: 0.0.40
codegen_flags: <defaults>
</compile_context>

<pallas_src>
import functools

import jax
import jax.numpy as jnp
from jax.experimental import pallas as pl
from jax.experimental.pallas import tpu as pltpu

K_IN = 784
K_PAD = 896      # 7 * 128, zero-padded contraction dim for layer 1
HID = 1024
N_OUT = 10
N_OUT_PAD = 128  # lane-dense padded output width


def _mlp_kernel(x_ref, w1_ref, b1_ref, w2_ref, b2_ref, w3_ref, b3_ref, o_ref):
    # Layer 1: (TB,896)bf16 @ (896,1024)bf16 -> f32 acc; bias+ReLU in f32; back to bf16.
    h1 = jnp.dot(x_ref[...], w1_ref[...], preferred_element_type=jnp.float32)
    h1 = jnp.maximum(h1 + b1_ref[...], 0.0).astype(jnp.bfloat16)
    # Layer 2: (TB,1024)bf16 @ (1024,1024)bf16 -> f32 acc; bias+ReLU in f32; back to bf16.
    h2 = jnp.dot(h1, w2_ref[...], preferred_element_type=jnp.float32)
    h2 = jnp.maximum(h2 + b2_ref[...], 0.0).astype(jnp.bfloat16)
    # Layer 3: (TB,1024)bf16 @ (1024,128)bf16 -> f32; lane-dense 128-wide store.
    o_ref[...] = (jnp.dot(h2, w3_ref[...], preferred_element_type=jnp.float32)
                  + b3_ref[...]).astype(o_ref.dtype)


@functools.partial(jax.jit, static_argnames=())
def mnist_fc_forward(x, w1, b1, w2, b2, w3, b3):
    """x: (B, 1, 28, 28) float32 (NCHW). Returns logits (B, 10) float32."""
    B = x.shape[0]

    # Batch tile: MXU-friendly M. 128 for small batches, 256 otherwise.
    TB = 128 if B <= 128 else 256
    B_pad = ((B + TB - 1) // TB) * TB
    grid = (B_pad // TB,)

    # Flatten, zero-pad batch rows and the 784 -> 896 contraction dim, cast to bf16.
    x2d = x.reshape(B, K_IN)
    x2d = jnp.pad(x2d, ((0, B_pad - B), (0, K_PAD - K_IN))).astype(jnp.bfloat16)

    # Weights -> bf16 (padded where needed); biases stay f32, presented as 2-D rows so
    # they broadcast along the sublane (batch) axis.
    w1p = jnp.pad(w1, ((0, K_PAD - K_IN), (0, 0))).astype(jnp.bfloat16)   # (896, 1024)
    w2b = w2.astype(jnp.bfloat16)                                         # (1024, 1024)
    w3p = jnp.pad(w3, ((0, 0), (0, N_OUT_PAD - N_OUT))).astype(jnp.bfloat16)  # (1024, 128)
    b1r = b1.reshape(1, HID)
    b2r = b2.reshape(1, HID)
    b3r = jnp.pad(b3, (0, N_OUT_PAD - N_OUT)).reshape(1, N_OUT_PAD)

    # Weights/biases: constant index_map -> VMEM-resident across grid steps.
    resident = lambda shape: pl.BlockSpec(shape, lambda i: (0, 0))

    out = pl.pallas_call(
        _mlp_kernel,
        out_shape=jax.ShapeDtypeStruct((B_pad, N_OUT_PAD), jnp.float32),
        grid=grid,
        in_specs=[
            pl.BlockSpec((TB, K_PAD), lambda i: (i, 0)),   # x tile (streams per grid step)
            resident((K_PAD, HID)),                        # w1
            resident((1, HID)),                            # b1
            resident((HID, HID)),                          # w2
            resident((1, HID)),                            # b2
            resident((HID, N_OUT_PAD)),                    # w3
            resident((1, N_OUT_PAD)),                      # b3
        ],
        out_specs=pl.BlockSpec((TB, N_OUT_PAD), lambda i: (i, 0)),
        compiler_params=pltpu.CompilerParams(
            dimension_semantics=("parallel",),             # shard batch across TCs (v7x)
            vmem_limit_bytes=32 << 20,                     # safe on v5e/v6e/v7x
        ),
    )(x2d, w1p, b1r, w2b, b2r, w3p, b3r)

    return out[:B, :N_OUT]


def init_params(key):
    """Deterministic PyTorch-Linear-style init: U(-1/sqrt(fan_in), 1/sqrt(fan_in)).

    Weights stored as (in_features, out_features)."""
    def linear(key, fan_in, fan_out):
        kw, kb = jax.random.split(key)
        bound = 1.0 / jnp.sqrt(fan_in)
        w = jax.random.uniform(kw, (fan_in, fan_out), jnp.float32, -bound, bound)
        b = jax.random.uniform(kb, (fan_out,), jnp.float32, -bound, bound)
        return w, b

    k1, k2, k3 = jax.random.split(key, 3)
    w1, b1 = linear(k1, K_IN, HID)
    w2, b2 = linear(k2, HID, HID)
    w3, b3 = linear(k3, HID, N_OUT)
    return w1, b1, w2, b2, w3, b3


if __name__ == "__main__":
    key = jax.random.PRNGKey(0)
    k_params, k_x = jax.random.split(key)

    w1, b1, w2, b2, w3, b3 = init_params(k_params)

    # Small MNIST-shaped batch: (B=2, C=1, H=28, W=28), NCHW like PyTorch.
    x = jax.random.normal(k_x, (2, 1, 28, 28), jnp.float32)

    logits = mnist_fc_forward(x, w1, b1, w2, b2, w3, b3)
    logits = jax.block_until_ready(logits)
    assert logits.shape == (2, 10)

    # Reference in plain JAX with the same bf16-weight / f32-accumulate recipe.
    xf = x.reshape(2, K_IN).astype(jnp.bfloat16)
    h1 = jnp.maximum(
        jnp.dot(xf, w1.astype(jnp.bfloat16), preferred_element_type=jnp.float32) + b1, 0.0
    ).astype(jnp.bfloat16)
    h2 = jnp.maximum(
        jnp.dot(h1, w2.astype(jnp.bfloat16), preferred_element_type=jnp.float32) + b2, 0.0
    ).astype(jnp.bfloat16)
    ref = jnp.dot(h2, w3.astype(jnp.bfloat16), preferred_element_type=jnp.float32) + b3
    assert jnp.allclose(logits, ref, atol=1e-2, rtol=1e-2), (
        f"max abs err {jnp.max(jnp.abs(logits - ref))}")

    # Sanity vs full-f32 math (bf16 rounding only): loose tolerance.
    xf32 = x.reshape(2, K_IN)
    r1 = jnp.maximum(xf32 @ w1 + b1, 0.0)
    r2 = jnp.maximum(r1 @ w2 + b2, 0.0)
    ref32 = r2 @ w3 + b3
    assert jnp.allclose(logits, ref32, atol=5e-2, rtol=5e-2)

    print("KERNEL_OK")
</pallas_src>

<mosaic_0001>
module attributes {stable_mosaic.version = 11 : i64} {
  func.func @_mlp_kernel(%arg0: i32, %arg1: memref<128x896xbf16, #tpu.memory_space<vmem>>, %arg2: memref<896x1024xbf16, #tpu.memory_space<vmem>>, %arg3: memref<1x1024xf32, #tpu.memory_space<vmem>>, %arg4: memref<1024x1024xbf16, #tpu.memory_space<vmem>>, %arg5: memref<1x1024xf32, #tpu.memory_space<vmem>>, %arg6: memref<1024x128xbf16, #tpu.memory_space<vmem>>, %arg7: memref<1x128xf32, #tpu.memory_space<vmem>>, %arg8: memref<128x128xf32, #tpu.memory_space<vmem>>) attributes {dimension_semantics = [#tpu.dimension_semantics<parallel>], iteration_bounds = array<i64: 1>, scalar_prefetch = 0 : i64, scratch_operands = 0 : i64, tpu.core_type = #tpu.core_type<tc>, window_params = [{transform_indices = @transform_0, window_bounds = array<i64: 128, 896>}, {pipeline_mode = #tpu.pipeline_mode<synchronous>, transform_indices = @transform_1, window_bounds = array<i64: 896, 1024>}, {pipeline_mode = #tpu.pipeline_mode<synchronous>, transform_indices = @transform_2, window_bounds = array<i64: 1, 1024>}, {pipeline_mode = #tpu.pipeline_mode<synchronous>, transform_indices = @transform_3, window_bounds = array<i64: 1024, 1024>}, {pipeline_mode = #tpu.pipeline_mode<synchronous>, transform_indices = @transform_4, window_bounds = array<i64: 1, 1024>}, {pipeline_mode = #tpu.pipeline_mode<synchronous>, transform_indices = @transform_5, window_bounds = array<i64: 1024, 128>}, {pipeline_mode = #tpu.pipeline_mode<synchronous>, transform_indices = @transform_6, window_bounds = array<i64: 1, 128>}, {transform_indices = @transform_7, window_bounds = array<i64: 128, 128>}]} {
    %c0 = arith.constant 0 : index
    %c0_0 = arith.constant 0 : index
    %0 = vector.load %arg1[%c0, %c0_0] : memref<128x896xbf16, #tpu.memory_space<vmem>>, vector<128x896xbf16>
    %c0_1 = arith.constant 0 : index
    %c0_2 = arith.constant 0 : index
    %1 = vector.load %arg2[%c0_1, %c0_2] : memref<896x1024xbf16, #tpu.memory_space<vmem>>, vector<896x1024xbf16>
    %cst = arith.constant dense<0.000000e+00> : vector<128x1024xf32>
    %2 = tpu.matmul %0, %1, %cst {dimension_numbers = #tpu.dot_dimension_numbers<[1], [0], [0], [1], [0, 0, 1, 1], [], []>} : vector<128x896xbf16>, vector<896x1024xbf16>, vector<128x1024xf32> -> vector<128x1024xf32>
    %c0_3 = arith.constant 0 : index
    %c0_4 = arith.constant 0 : index
    %3 = vector.load %arg3[%c0_3, %c0_4] : memref<1x1024xf32, #tpu.memory_space<vmem>>, vector<1x1024xf32>
    %4 = vector.broadcast %3 : vector<1x1024xf32> to vector<128x1024xf32>
    %5 = arith.addf %2, %4 : vector<128x1024xf32>
    %cst_5 = arith.constant 0.000000e+00 : f32
    %6 = vector.broadcast %cst_5 : f32 to vector<128x1024xf32>
    %7 = arith.maximumf %5, %6 : vector<128x1024xf32>
    %8 = arith.truncf %7 : vector<128x1024xf32> to vector<128x1024xbf16>
    %c0_6 = arith.constant 0 : index
    %c0_7 = arith.constant 0 : index
    %9 = vector.load %arg4[%c0_6, %c0_7] : memref<1024x1024xbf16, #tpu.memory_space<vmem>>, vector<1024x1024xbf16>
    %cst_8 = arith.constant dense<0.000000e+00> : vector<128x1024xf32>
    %10 = tpu.matmul %8, %9, %cst_8 {dimension_numbers = #tpu.dot_dimension_numbers<[1], [0], [0], [1], [0, 0, 1, 1], [], []>} : vector<128x1024xbf16>, vector<1024x1024xbf16>, vector<128x1024xf32> -> vector<128x1024xf32>
    %c0_9 = arith.constant 0 : index
    %c0_10 = arith.constant 0 : index
    %11 = vector.load %arg5[%c0_9, %c0_10] : memref<1x1024xf32, #tpu.memory_space<vmem>>, vector<1x1024xf32>
    %12 = vector.broadcast %11 : vector<1x1024xf32> to vector<128x1024xf32>
    %13 = arith.addf %10, %12 : vector<128x1024xf32>
    %cst_11 = arith.constant 0.000000e+00 : f32
    %14 = vector.broadcast %cst_11 : f32 to vector<128x1024xf32>
    %15 = arith.maximumf %13, %14 : vector<128x1024xf32>
    %16 = arith.truncf %15 : vector<128x1024xf32> to vector<128x1024xbf16>
    %c0_12 = arith.constant 0 : index
    %c0_13 = arith.constant 0 : index
    %17 = vector.load %arg6[%c0_12, %c0_13] : memref<1024x128xbf16, #tpu.memory_space<vmem>>, vector<1024x128xbf16>
    %cst_14 = arith.constant dense<0.000000e+00> : vector<128x128xf32>
    %18 = tpu.matmul %16, %17, %cst_14 {dimension_numbers = #tpu.dot_dimension_numbers<[1], [0], [0], [1], [0, 0, 1, 1], [], []>} : vector<128x1024xbf16>, vector<1024x128xbf16>, vector<128x128xf32> -> vector<128x128xf32>
    %c0_15 = arith.constant 0 : index
    %c0_16 = arith.constant 0 : index
    %19 = vector.load %arg7[%c0_15, %c0_16] : memref<1x128xf32, #tpu.memory_space<vmem>>, vector<1x128xf32>
    %20 = vector.broadcast %19 : vector<1x128xf32> to vector<128x128xf32>
    %21 = arith.addf %18, %20 : vector<128x128xf32>
    %c0_17 = arith.constant 0 : index
    %c0_18 = arith.constant 0 : index
    %22 = vector.load %arg8[%c0_17, %c0_18] : memref<128x128xf32, #tpu.memory_space<vmem>>, vector<128x128xf32>
    tpu.vector_store %arg8[%c0_17, %c0_18], %21 {strides = array<i32>} : memref<128x128xf32, #tpu.memory_space<vmem>>, vector<128x128xf32>,
    return
  }
  func.func @transform_0(%arg0: i32) -> (i32, i32) {
    %c0_i32 = arith.constant 0 : i32
    %c0_i32_0 = arith.constant 0 : i32
    return %arg0, %c0_i32 : i32, i32
  }
  func.func @transform_1(%arg0: i32) -> (i32, i32) {
    %c0_i32 = arith.constant 0 : i32
    %c0_i32_0 = arith.constant 0 : i32
    %c0_i32_1 = arith.constant 0 : i32
    return %c0_i32, %c0_i32_0 : i32, i32
  }
  func.func @transform_2(%arg0: i32) -> (i32, i32) {
    %c0_i32 = arith.constant 0 : i32
    %c0_i32_0 = arith.constant 0 : i32
    %c0_i32_1 = arith.constant 0 : i32
    return %c0_i32, %c0_i32_0 : i32, i32
  }
  func.func @transform_3(%arg0: i32) -> (i32, i32) {
    %c0_i32 = arith.constant 0 : i32
    %c0_i32_0 = arith.constant 0 : i32
    %c0_i32_1 = arith.constant 0 : i32
    return %c0_i32, %c0_i32_0 : i32, i32
  }
  func.func @transform_4(%arg0: i32) -> (i32, i32) {
    %c0_i32 = arith.constant 0 : i32
    %c0_i32_0 = arith.constant 0 : i32
    %c0_i32_1 = arith.constant 0 : i32
    return %c0_i32, %c0_i32_0 : i32, i32
  }
  func.func @transform_5(%arg0: i32) -> (i32, i32) {
    %c0_i32 = arith.constant 0 : i32
    %c0_i32_0 = arith.constant 0 : i32
    %c0_i32_1 = arith.constant 0 : i32
    return %c0_i32, %c0_i32_0 : i32, i32
  }
  func.func @transform_6(%arg0: i32) -> (i32, i32) {
    %c0_i32 = arith.constant 0 : i32
    %c0_i32_0 = arith.constant 0 : i32
    %c0_i32_1 = arith.constant 0 : i32
    return %c0_i32, %c0_i32_0 : i32, i32
  }
  func.func @transform_7(%arg0: i32) -> (i32, i32) {
    %c0_i32 = arith.constant 0 : i32
    %c0_i32_0 = arith.constant 0 : i32
    return %arg0, %c0_i32 : i32, i32
  }
}

</mosaic_0001>

<bundles_post_ra>
// kernel: mnist_fc_forward.1
= control target key start
LH: loop header
LB: loop body
LE: loop exit
PB: predicated region body
PF: predicated region fallthrough
CT: control target
= control target key end

     0   :  { %s20021_s1 = inlined_call_operand.vmem [shape: bf16[896,1024], index: 1, kind: input, shape index: {}]   ;;  %s20022_s0 = inlined_call_operand.vmem [shape: bf16[128,896], index: 0, kind: input, shape index: {}]   ;;  %s20023_s2 = inlined_call_operand.vmem [shape: f32[1,1024], index: 2, kind: input, shape index: {}]   ;;  %s20024_s3 = inlined_call_operand.vmem [shape: bf16[1024,1024], index: 3, kind: input, shape index: {}]   ;;  %s20025_s4 = inlined_call_operand.vmem [shape: f32[1,1024], index: 4, kind: input, shape index: {}]   ;;  %s20026_s5 = inlined_call_operand.vmem [shape: bf16[1024,128], index: 5, kind: input, shape index: {}]   ;;  %s20027_s6 = inlined_call_operand.vmem [shape: f32[1,128], index: 6, kind: input, shape index: {}]   ;;  %s20028_s7 = inlined_call_operand.vmem [shape: f32[128,128], index: 7, kind: output, shape index: {}]  }
   0x1   :  { %v147_v0 = vld [vmem:[%s20021_s1 + $0x1c0] sm:$0xff]  ;;  %v12490_v59 = vld [vmem:[%s20022_s0 + $0xc] ss:$28 sps:$4 sm:$0xff]  }
   0x2   :  { %v151_v1 = vld [vmem:[%s20021_s1 + $0x1e0] sm:$0xff]  ;;  %3254 = vmatprep.mubr.bf16.mxu1 %v12490_v59 }
   0x3   :  { %v275_v2 = vld [vmem:[%s20021_s1 + $0x5c0] sm:$0xff]  ;;  %v11263_v3 = vcombine.high %v147_v0, %v151_v1  ;;  %v11262_v5 = vcombine.low %v147_v0, %v151_v1 }
   0x4   :  { %v279_v4 = vld [vmem:[%s20021_s1 + $0x5e0] sm:$0xff] }
   0x5   :  { %v139_v6 = vld [vmem:[%s20021_s1 + $0x180] sm:$0xff]  ;;  %v11391_v8 = vcombine.high %v275_v2, %v279_v4  ;;  %v11390_v9 = vcombine.low %v275_v2, %v279_v4  ;;  %3109 = vmatprep.subr.bf16.mxu0 %v11263_v3 }
   0x6   :  { %v143_v7 = vld [vmem:[%s20021_s1 + $0x1a0] sm:$0xff]  ;;  %3110 = vmatpush1.bf16.msra.mxu0 %v11262_v5 }
   0x7   :  { %v11255_v10 = vcombine.high %v139_v6, %v143_v7  ;;  %v267_v11 = vld [vmem:[%s20021_s1 + $0x580] sm:$0xff]  ;;  %3222 = vmatprep.subr.bf16.mxu1 %v11391_v8  ;;  %v11254_v18 = vcombine.low %v139_v6, %v143_v7 }
   0x8   :  { %v271_v12 = vld [vmem:[%s20021_s1 + $0x5a0] sm:$0xff]  ;;  %3223 = vmatpush1.bf16.msra.mxu1 %v11390_v9 }
   0x9   :  { %v131_v13 = vld [vmem:[%s20021_s1 + $0x140] sm:$0xff]  ;;  %v11383_v14 = vcombine.high %v267_v11, %v271_v12  ;;  %3111 = vmatprep.subr.bf16.mxu0 %v11255_v10  ;;  %v11382_v19 = vcombine.low %v267_v11, %v271_v12 }
   0xa   :  { %v135_v15 = vld [vmem:[%s20021_s1 + $0x160] sm:$0xff]  ;;  %3112 = vmatpush1.bf16.msra.mxu0 %v11254_v18 }
   0xb   :  { %v259_v16 = vld [vmem:[%s20021_s1 + $0x540] sm:$0xff]  ;;  %v11247_v20 = vcombine.high %v131_v13, %v135_v15  ;;  %3224 = vmatprep.subr.bf16.mxu1 %v11383_v14  ;;  %v11246_v26 = vcombine.low %v131_v13, %v135_v15 }
   0xc   :  { %v263_v17 = vld [vmem:[%s20021_s1 + $0x560] sm:$0xff]  ;;  %3225 = vmatpush1.bf16.msra.mxu1 %v11382_v19 }
   0xd   :  { %v11375_v21 = vcombine.high %v259_v16, %v263_v17  ;;  %v123_v22 = vld [vmem:[%s20021_s1 + $0x100] sm:$0xff]  ;;  %3113 = vmatprep.subr.bf16.mxu0 %v11247_v20  ;;  %v11374_v27 = vcombine.low %v259_v16, %v263_v17 }
   0xe   :  { %v127_v23 = vld [vmem:[%s20021_s1 + $0x120] sm:$0xff]  ;;  %3114 = vmatpush1.bf16.msra.mxu0 %v11246_v26 }
   0xf   :  { %v251_v24 = vld [vmem:[%s20021_s1 + $0x500] sm:$0xff]  ;;  %v11239_v28 = vcombine.high %v123_v22, %v127_v23  ;;  %3226 = vmatprep.subr.bf16.mxu1 %v11375_v21  ;;  %v11238_v34 = vcombine.low %v123_v22, %v127_v23 }
  0x10   :  { %v255_v25 = vld [vmem:[%s20021_s1 + $0x520] sm:$0xff]  ;;  %3227 = vmatpush1.bf16.msra.mxu1 %v11374_v27 }
  0x11   :  { %v11367_v29 = vcombine.high %v251_v24, %v255_v25  ;;  %v115_v30 = vld [vmem:[%s20021_s1 + $0xc0] sm:$0xff]  ;;  %3115 = vmatprep.subr.bf16.mxu0 %v11239_v28  ;;  %v11366_v35 = vcombine.low %v251_v24, %v255_v25 }
  0x12   :  { %v119_v31 = vld [vmem:[%s20021_s1 + $0xe0] sm:$0xff]  ;;  %3116 = vmatpush1.bf16.msra.mxu0 %v11238_v34 }
  0x13   :  { %v243_v32 = vld [vmem:[%s20021_s1 + $0x4c0] sm:$0xff]  ;;  %v11231_v36 = vcombine.high %v115_v30, %v119_v31  ;;  %3228 = vmatprep.subr.bf16.mxu1 %v11367_v29  ;;  %v11230_v42 = vcombine.low %v115_v30, %v119_v31 }
  0x14   :  { %v247_v33 = vld [vmem:[%s20021_s1 + $0x4e0] sm:$0xff]  ;;  %3229 = vmatpush1.bf16.msra.mxu1 %v11366_v35 }
  0x15   :  { %v11359_v37 = vcombine.high %v243_v32, %v247_v33  ;;  %v107_v38 = vld [vmem:[%s20021_s1 + $0x80] sm:$0xff]  ;;  %3117 = vmatprep.subr.bf16.mxu0 %v11231_v36  ;;  %v11358_v43 = vcombine.low %v243_v32, %v247_v33 }
  0x16   :  { %v111_v39 = vld [vmem:[%s20021_s1 + $0xa0] sm:$0xff]  ;;  %3118 = vmatpush1.bf16.msra.mxu0 %v11230_v42 }
  0x17   :  { %v235_v40 = vld [vmem:[%s20021_s1 + $0x480] sm:$0xff]  ;;  %v11223_v44 = vcombine.high %v107_v38, %v111_v39  ;;  %3230 = vmatprep.subr.bf16.mxu1 %v11359_v37  ;;  %v11222_v50 = vcombine.low %v107_v38, %v111_v39 }
  0x18   :  { %v239_v41 = vld [vmem:[%s20021_s1 + $0x4a0] sm:$0xff]  ;;  %3231 = vmatpush1.bf16.msra.mxu1 %v11358_v43 }
  0x19   :  { %v11351_v45 = vcombine.high %v235_v40, %v239_v41  ;;  %v99_v46 = vld [vmem:[%s20021_s1 + $0x40] sm:$0xff]  ;;  %3119 = vmatprep.subr.bf16.mxu0 %v11223_v44  ;;  %v11350_v52 = vcombine.low %v235_v40, %v239_v41 }
  0x1a   :  { %v103_v47 = vld [vmem:[%s20021_s1 + $0x60] sm:$0xff]  ;;  %3120 = vmatpush1.bf16.msra.mxu0 %v11222_v50 }
  0x1b   :  { %v227_v48 = vld [vmem:[%s20021_s1 + $0x440] sm:$0xff]  ;;  %v11215_v53 = vcombine.high %v99_v46, %v103_v47  ;;  %3232 = vmatprep.subr.bf16.mxu1 %v11351_v45  ;;  %v11214_v60 = vcombine.low %v99_v46, %v103_v47 }
  0x1c   :  { %v231_v49 = vld [vmem:[%s20021_s1 + $0x460] sm:$0xff]  ;;  %3233 = vmatpush1.bf16.msra.mxu1 %v11350_v52 }
  0x1d   :  { %v91_v51 = vld [vmem:[%s20021_s1] sm:$0xff]  ;;  %v11343_v55 = vcombine.high %v227_v48, %v231_v49  ;;  %3121 = vmatprep.subr.bf16.mxu0 %v11215_v53  ;;  %v11342_v61 = vcombine.low %v227_v48, %v231_v49 }
  0x1e   :  { %v95_v54 = vld [vmem:[%s20021_s1 + $0x20] sm:$0xff]  ;;  %3122 = vmatpush1.bf16.msra.mxu0 %v11214_v60 }
  0x1f   :  { %v12488_v56 = vld [vmem:[%s20022_s0 + $0x4] ss:$28 sps:$4 sm:$0xff]   ;;  %v11207_v62 = vcombine.high %v91_v51, %v95_v54  ;;  %3234 = vmatprep.subr.bf16.mxu1 %v11343_v55  ;;  %v11206_v4 = vcombine.low %v91_v51, %v95_v54 }
  0x20   :  { %v219_v57 = vld [vmem:[%s20021_s1 + $0x400] sm:$0xff]  ;;  %3141 = vmatprep.mubr.bf16.mxu0 %v12488_v56  ;;  %3235 = vmatpush1.bf16.msra.mxu1 %v11342_v61 }
  0x21   :  { %v223_v58 = vld [vmem:[%s20021_s1 + $0x420] sm:$0xff]  ;;  %3123 = vmatprep.subr.bf16.mxu0 %v11207_v62 }
  0x22   :  { %v211_v63 = vld [vmem:[%s20021_s1 + $0x3c0] sm:$0xff]  ;;  %v11335_v1 = vcombine.high %v219_v57, %v223_v58  ;;  %v11334_v5 = vcombine.low %v219_v57, %v223_v58  ;;  %3124 = vmatpush1.bf16.msra.mxu0 %v11206_v4 }
  0x23   :  { %v215_v0 = vld [vmem:[%s20021_s1 + $0x3e0] sm:$0xff] }
  0x24   :  { %v339_v2 = vld [vmem:[%s20021_s1 + $0x7c0] sm:$0xff]  ;;  %v11327_v6 = vcombine.high %v211_v63, %v215_v0  ;;  %3236 = vmatprep.subr.bf16.mxu1 %v11335_v1  ;;  %v11326_v12 = vcombine.low %v211_v63, %v215_v0 }
  0x25   :  { %v343_v3 = vld [vmem:[%s20021_s1 + $0x7e0] sm:$0xff]  ;;  %3237 = vmatpush1.bf16.msra.mxu1 %v11334_v5 }
  0x26   :  { %v203_v7 = vld [vmem:[%s20021_s1 + $0x380] sm:$0xff]  ;;  %v11455_v8 = vcombine.high %v339_v2, %v343_v3  ;;  %3125 = vmatprep.subr.bf16.mxu0 %v11327_v6  ;;  %v11454_v13 = vcombine.low %v339_v2, %v343_v3 }
  0x27   :  { %v207_v9 = vld [vmem:[%s20021_s1 + $0x3a0] sm:$0xff]  ;;  %3126 = vmatpush2.bf16.msra.mxu0 %v11326_v12 }
  0x28   :  { %v331_v10 = vld [vmem:[%s20021_s1 + $0x780] sm:$0xff]  ;;  %v11319_v14 = vcombine.high %v203_v7, %v207_v9  ;;  %3238 = vmatprep.subr.bf16.mxu1 %v11455_v8  ;;  %v11318_v20 = vcombine.low %v203_v7, %v207_v9 }
  0x29   :  { %v335_v11 = vld [vmem:[%s20021_s1 + $0x7a0] sm:$0xff]  ;;  %3239 = vmatpush2.bf16.msra.mxu1 %v11454_v13 }
  0x2a   :  { %v11447_v15 = vcombine.high %v331_v10, %v335_v11  ;;  %v195_v16 = vld [vmem:[%s20021_s1 + $0x340] sm:$0xff]  ;;  %3127 = vmatprep.subr.bf16.mxu0 %v11319_v14  ;;  %v11446_v21 = vcombine.low %v331_v10, %v335_v11 }
  0x2b   :  { %v199_v17 = vld [vmem:[%s20021_s1 + $0x360] sm:$0xff]  ;;  %3128 = vmatpush2.bf16.msra.mxu0 %v11318_v20 }
  0x2c   :  { %v323_v18 = vld [vmem:[%s20021_s1 + $0x740] sm:$0xff]  ;;  %v11311_v22 = vcombine.high %v195_v16, %v199_v17  ;;  %3240 = vmatprep.subr.bf16.mxu1 %v11447_v15  ;;  %v11310_v28 = vcombine.low %v195_v16, %v199_v17  ;;  %v13033_v17 = vld [vmem:[%s20022_s0 + $0x3c] ss:$28 sps:$4 sm:$0xff]  }
  0x2d   :  { %v327_v19 = vld [vmem:[%s20021_s1 + $0x760] sm:$0xff]  ;;  %3241 = vmatpush2.bf16.msra.mxu1 %v11446_v21 }
  0x2e   :  { %v11439_v23 = vcombine.high %v323_v18, %v327_v19  ;;  %v187_v24 = vld [vmem:[%s20021_s1 + $0x300] sm:$0xff]  ;;  %3129 = vmatprep.subr.bf16.mxu0 %v11311_v22  ;;  %v11438_v29 = vcombine.low %v323_v18, %v327_v19 }
  0x2f   :  { %v191_v25 = vld [vmem:[%s20021_s1 + $0x320] sm:$0xff]  ;;  %3130 = vmatpush2.bf16.msra.mxu0 %v11310_v28 }
  0x30   :  { %v315_v26 = vld [vmem:[%s20021_s1 + $0x700] sm:$0xff]  ;;  %v11303_v30 = vcombine.high %v187_v24, %v191_v25  ;;  %3242 = vmatprep.subr.bf16.mxu1 %v11439_v23  ;;  %v11302_v36 = vcombine.low %v187_v24, %v191_v25 }
  0x31   :  { %v319_v27 = vld [vmem:[%s20021_s1 + $0x720] sm:$0xff]  ;;  %3243 = vmatpush2.bf16.msra.mxu1 %v11438_v29 }
  0x32   :  { %v11431_v31 = vcombine.high %v315_v26, %v319_v27  ;;  %v179_v32 = vld [vmem:[%s20021_s1 + $0x2c0] sm:$0xff]  ;;  %3131 = vmatprep.subr.bf16.mxu0 %v11303_v30  ;;  %v11430_v37 = vcombine.low %v315_v26, %v319_v27  ;;  %v13065_v30 = vld [vmem:[%s20022_s0 + $0x38] ss:$28 sps:$4 sm:$0xff]  }
  0x33   :  { %v183_v33 = vld [vmem:[%s20021_s1 + $0x2e0] sm:$0xff]  ;;  %3132 = vmatpush2.bf16.msra.mxu0 %v11302_v36  ;;  %v13081_v36 = vld [vmem:[%s20022_s0 + $0x74] ss:$28 sps:$4 sm:$0xff]  }
  0x34   :  { %v307_v34 = vld [vmem:[%s20021_s1 + $0x6c0] sm:$0xff]  ;;  %v11295_v38 = vcombine.high %v179_v32, %v183_v33  ;;  %3244 = vmatprep.subr.bf16.mxu1 %v11431_v31  ;;  %v11294_v44 = vcombine.low %v179_v32, %v183_v33 }
  0x35   :  { %v311_v35 = vld [vmem:[%s20021_s1 + $0x6e0] sm:$0xff]  ;;  %3245 = vmatpush2.bf16.msra.mxu1 %v11430_v37  ;;  %v13086_v37 = vld [vmem:[%s20022_s0 + $0x7c] ss:$28 sps:$4 sm:$0xff]  }
  0x36   :  { %v11423_v39 = vcombine.high %v307_v34, %v311_v35  ;;  %v171_v40 = vld [vmem:[%s20021_s1 + $0x280] sm:$0xff]  ;;  %3133 = vmatprep.subr.bf16.mxu0 %v11295_v38  ;;  %v11422_v45 = vcombine.low %v307_v34, %v311_v35 }
  0x37   :  { %v175_v41 = vld [vmem:[%s20021_s1 + $0x2a0] sm:$0xff]  ;;  %3134 = vmatpush2.bf16.msra.mxu0 %v11294_v44 }
  0x38   :  { %v299_v42 = vld [vmem:[%s20021_s1 + $0x680] sm:$0xff]  ;;  %v11287_v46 = vcombine.high %v171_v40, %v175_v41  ;;  %3246 = vmatprep.subr.bf16.mxu1 %v11423_v39  ;;  %v11286_v52 = vcombine.low %v171_v40, %v175_v41 }
  0x39   :  { %v303_v43 = vld [vmem:[%s20021_s1 + $0x6a0] sm:$0xff]  ;;  %3247 = vmatpush2.bf16.msra.mxu1 %v11422_v45  ;;  %v13106_v45 = vld [vmem:[%s20022_s0 + $0x70] ss:$28 sps:$4 sm:$0xff]  }
  0x3a   :  { %v163_v47 = vld [vmem:[%s20021_s1 + $0x240] sm:$0xff]  ;;  %v11415_v48 = vcombine.high %v299_v42, %v303_v43  ;;  %3135 = vmatprep.subr.bf16.mxu0 %v11287_v46  ;;  %v11414_v53 = vcombine.low %v299_v42, %v303_v43 }
  0x3b   :  { %v167_v49 = vld [vmem:[%s20021_s1 + $0x260] sm:$0xff]  ;;  %3136 = vmatpush2.bf16.msra.mxu0 %v11286_v52 }
  0x3c   :  { %v291_v50 = vld [vmem:[%s20021_s1 + $0x640] sm:$0xff]  ;;  %v11279_v54 = vcombine.high %v163_v47, %v167_v49  ;;  %3248 = vmatprep.subr.bf16.mxu1 %v11415_v48  ;;  %v11278_v60 = vcombine.low %v163_v47, %v167_v49 }
  0x3d   :  { %v295_v51 = vld [vmem:[%s20021_s1 + $0x660] sm:$0xff]  ;;  %3249 = vmatpush2.bf16.msra.mxu1 %v11414_v53 }
  0x3e   :  { %v155_v55 = vld [vmem:[%s20021_s1 + $0x200] sm:$0xff]  ;;  %v11407_v57 = vcombine.high %v291_v50, %v295_v51  ;;  %3137 = vmatprep.subr.bf16.mxu0 %v11279_v54  ;;  %v11406_v61 = vcombine.low %v291_v50, %v295_v51  ;;  %v13118_v50 = vld [vmem:[%s20022_s0 + $0x78] ss:$28 sps:$4 sm:$0xff]  }
  0x3f   :  { %v159_v56 = vld [vmem:[%s20021_s1 + $0x220] sm:$0xff]  ;;  %3138 = vmatpush2.bf16.msra.mxu0 %v11278_v60 }
  0x40   :  { %v283_v58 = vld [vmem:[%s20021_s1 + $0x600] sm:$0xff]  ;;  %v11271_v62 = vcombine.high %v155_v55, %v159_v56  ;;  %3250 = vmatprep.subr.bf16.mxu1 %v11407_v57  ;;  %v11270_v4 = vcombine.low %v155_v55, %v159_v56  ;;  %v13129_v56 = vld [vmem:[%s20022_s0 + $0xac] ss:$28 sps:$4 sm:$0xff]   ;;  %v13134_v57 = vld [vmem:[%s20022_s0 + $0xb4] ss:$28 sps:$4 sm:$0xff]  }
  0x41   :  { %v287_v59 = vld [vmem:[%s20021_s1 + $0x620] sm:$0xff]  ;;  %3251 = vmatpush2.bf16.msra.mxu1 %v11406_v61 }
  0x42   :  { %v11399_v63 = vcombine.high %v283_v58, %v287_v59  ;;  %v403_v0 = vld [vmem:[%s20021_s1 + $0x9c0] sm:$0xff]  ;;  %3139 = vmatprep.subr.bf16.mxu0 %v11271_v62  ;;  %v11398_v5 = vcombine.low %v283_v58, %v287_v59 }
  0x43   :  { %v407_v1 = vld [vmem:[%s20021_s1 + $0x9e0] sm:$0xff]  ;;  %3140 = vmatpush2.bf16.msra.mxu0 %v11270_v4 }
  0x44   :  { %v531_v2 = vld [vmem:[%s20021_s1 + $0xdc0] sm:$0xff]  ;;  %v11519_v6 = vcombine.high %v403_v0, %v407_v1  ;;  %3252 = vmatprep.subr.bf16.mxu1 %v11399_v63  ;;  %v11518_v12 = vcombine.low %v403_v0, %v407_v1 }
  0x45   :  { %v535_v3 = vld [vmem:[%s20021_s1 + $0xde0] sm:$0xff]  ;;  %3253 = vmatpush2.bf16.msra.mxu1 %v11398_v5 }
  0x46   :  { %v11647_v7 = vcombine.high %v531_v2, %v535_v3  ;;  %v395_v8 = vld [vmem:[%s20021_s1 + $0x980] sm:$0xff]  ;;  %3335 = vmatprep.subr.bf16.mxu0 %v11519_v6  ;;  %v11646_v15 = vcombine.low %v531_v2, %v535_v3  ;;  %v13166_v6 = vld [vmem:[%s20022_s0 + $0xb0] ss:$28 sps:$4 sm:$0xff]  }
  0x47   :  { %v399_v9 = vld [vmem:[%s20021_s1 + $0x9a0] sm:$0xff] }
  0x48   :  { %v13017_v10 = vld [vmem:[%s20022_s0] ss:$28 sps:$4 sm:$0xff]   ;;  %v13022_v11 = vld [vmem:[%s20022_s0 + $0x8] ss:$28 sps:$4 sm:$0xff]   ;;  %v11511_v16 = vcombine.high %v395_v8, %v399_v9  ;;  %3448 = vmatprep.subr.bf16.mxu1 %v11647_v7  ;;  %v11510_v24 = vcombine.low %v395_v8, %v399_v9 }
  0x49   :  { %v523_v13 = vld [vmem:[%s20021_s1 + $0xd80] sm:$0xff]  ;;  %3142 = vmatmul.mubr.bf16.vlgmr.msra.gmra.mxu0 %v13017_v10  ;;  %3255 = vmatmul.mubr.bf16.vlgmr.msra.gmra.mxu1 %v13022_v11 }
  0x4a   :  { %v527_v14 = vld [vmem:[%s20021_s1 + $0xda0] sm:$0xff]  ;;  %3336 = vmatpush1.bf16.msra.mxu0 %v11518_v12  ;;  %3449 = vmatpush1.bf16.msra.mxu1 %v11646_v15  ;;  %v13182_v15 = vld [vmem:[%s20022_s0 + $0xec] ss:$28 sps:$4 sm:$0xff]  }
  0x4b   :  { %v13038_v18 = vld [vmem:[%s20022_s0 + $0x44] ss:$28 sps:$4 sm:$0xff]   ;;  %v11639_v21 = vcombine.high %v523_v13, %v527_v14  ;;  %3337 = vmatprep.subr.bf16.mxu0 %v11511_v16  ;;  %v11638_v26 = vcombine.low %v523_v13, %v527_v14  ;;  %3151 = vmatprep.mubr.bf16.mxu0 %v13033_v17 }
  0x4c   :  { %v387_v19 = vld [vmem:[%s20021_s1 + $0x940] sm:$0xff]  ;;  %3264 = vmatprep.mubr.bf16.mxu1 %v13038_v18 }
  0x4d   :  { %v391_v20 = vld [vmem:[%s20021_s1 + $0x960] sm:$0xff]  ;;  %3450 = vmatprep.subr.bf16.mxu1 %v11639_v21 }
  0x4e   :  { %v515_v22 = vld [vmem:[%s20021_s1 + $0xd40] sm:$0xff]  ;;  %v11503_v25 = vcombine.high %v387_v19, %v391_v20  ;;  %3338 = vmatpush1.bf16.msra.mxu0 %v11510_v24  ;;  %v11502_v32 = vcombine.low %v387_v19, %v391_v20  ;;  %3451 = vmatpush1.bf16.msra.mxu1 %v11638_v26  ;;  %v13200_v24 = vld [vmem:[%s20021_s1 + $0x5e8] sm:$0xff] }
  0x4f   :  { %v519_v23 = vld [vmem:[%s20021_s1 + $0xd60] sm:$0xff] }
  0x50   :  { %v379_v27 = vld [vmem:[%s20021_s1 + $0x900] sm:$0xff]  ;;  %v11631_v29 = vcombine.high %v515_v22, %v519_v23  ;;  %3339 = vmatprep.subr.bf16.mxu0 %v11503_v25  ;;  %v11630_v40 = vcombine.low %v515_v22, %v519_v23  ;;  %v13195_v23 = vld [vmem:[%s20021_s1 + $0x5c8] sm:$0xff] }
  0x51   :  { %v383_v28 = vld [vmem:[%s20021_s1 + $0x920] sm:$0xff]  ;;  %3152 = vmatmul.mubr.bf16.gmra.mxu0 %v13065_v30 }
  0x52   :  { %v13070_v31 = vld [vmem:[%s20022_s0 + $0x40] ss:$28 sps:$4 sm:$0xff]   ;;  %v11495_v35 = vcombine.high %v379_v27, %v383_v28  ;;  %3452 = vmatprep.subr.bf16.mxu1 %v11631_v29  ;;  %3340 = vmatpush1.bf16.msra.mxu0 %v11502_v32  ;;  %v11494_v42 = vcombine.low %v379_v27, %v383_v28  ;;  %v13161_v5 = vld [vmem:[%s20022_s0 + $0xa8] ss:$28 sps:$4 sm:$0xff]   ;;  %v11393_v32 = vcombine.high %v13195_v23, %v13200_v24 }
  0x53   :  { %v507_v33 = vld [vmem:[%s20021_s1 + $0xd00] sm:$0xff]  ;;  %3265 = vmatmul.mubr.bf16.gmra.mxu1 %v13070_v31  ;;  %3161 = vmatprep.mubr.bf16.mxu0 %v13081_v36 }
  0x54   :  { %v511_v34 = vld [vmem:[%s20021_s1 + $0xd20] sm:$0xff]  ;;  %3341 = vmatprep.subr.bf16.mxu0 %v11495_v35  ;;  %3274 = vmatprep.mubr.bf16.mxu1 %v13086_v37 }
  0x55   :  { %v371_v38 = vld [vmem:[%s20021_s1 + $0x8c0] sm:$0xff]  ;;  %v11623_v41 = vcombine.high %v507_v33, %v511_v34  ;;  %3453 = vmatpush1.bf16.msra.mxu1 %v11630_v40  ;;  %v11622_v49 = vcombine.low %v507_v33, %v511_v34 }
  0x56   :  { %v375_v39 = vld [vmem:[%s20021_s1 + $0x8e0] sm:$0xff]  ;;  %3342 = vmatpush1.bf16.msra.mxu0 %v11494_v42 }
  0x57   :  { %v499_v43 = vld [vmem:[%s20021_s1 + $0xcc0] sm:$0xff]  ;;  %v11487_v46 = vcombine.high %v371_v38, %v375_v39  ;;  %3454 = vmatprep.subr.bf16.mxu1 %v11623_v41  ;;  %v11486_v53 = vcombine.low %v371_v38, %v375_v39  ;;  %v13225_v38 = vld [vmem:[%s20022_s0 + $0x11c] ss:$28 sps:$4 sm:$0xff]  }
  0x58   :  { %v503_v44 = vld [vmem:[%s20021_s1 + $0xce0] sm:$0xff] }
  0x59   :  { %v363_v47 = vld [vmem:[%s20021_s1 + $0x880] sm:$0xff]  ;;  %v11615_v51 = vcombine.high %v499_v43, %v503_v44  ;;  %3343 = vmatprep.subr.bf16.mxu0 %v11487_v46  ;;  %3455 = vmatpush1.bf16.msra.mxu1 %v11622_v49  ;;  %v11614_v60 = vcombine.low %v499_v43, %v503_v44 }
  0x5a   :  { %v367_v48 = vld [vmem:[%s20021_s1 + $0x8a0] sm:$0xff]  ;;  %3162 = vmatmul.mubr.bf16.gmra.mxu0 %v13106_v45 }
  0x5b   :  { %v491_v52 = vld [vmem:[%s20021_s1 + $0xc80] sm:$0xff]  ;;  %v11479_v55 = vcombine.high %v363_v47, %v367_v48  ;;  %3456 = vmatprep.subr.bf16.mxu1 %v11615_v51  ;;  %3275 = vmatmul.mubr.bf16.gmra.mxu1 %v13118_v50  ;;  %v11478_v62 = vcombine.low %v363_v47, %v367_v48  ;;  %v13251_v47 = vld [vmem:[%s20022_s0 + $0x118] ss:$28 sps:$4 sm:$0xff]  }
  0x5c   :  { %v495_v54 = vld [vmem:[%s20021_s1 + $0xca0] sm:$0xff]  ;;  %3344 = vmatpush1.bf16.msra.mxu0 %v11486_v53  ;;  %3171 = vmatprep.mubr.bf16.mxu0 %v13129_v56  ;;  %v13266_v53 = vld [vmem:[%s20022_s0 + $0x15c] ss:$28 sps:$4 sm:$0xff]  }
  0x5d   :  { %v355_v58 = vld [vmem:[%s20021_s1 + $0x840] sm:$0xff]  ;;  %v11607_v61 = vcombine.high %v491_v52, %v495_v54  ;;  %3345 = vmatprep.subr.bf16.mxu0 %v11479_v55  ;;  %3284 = vmatprep.mubr.bf16.mxu1 %v13134_v57  ;;  %v11606_v4 = vcombine.low %v491_v52, %v495_v54  ;;  %v13261_v52 = vld [vmem:[%s20022_s0 + $0x154] ss:$28 sps:$4 sm:$0xff]  }
  0x5e   :  { %v359_v59 = vld [vmem:[%s20021_s1 + $0x860] sm:$0xff]  ;;  %3457 = vmatpush1.bf16.msra.mxu1 %v11614_v60 }
  0x5f   :  { %v483_v63 = vld [vmem:[%s20021_s1 + $0xc40] sm:$0xff]  ;;  %v11471_v1 = vcombine.high %v355_v58, %v359_v59  ;;  %3458 = vmatprep.subr.bf16.mxu1 %v11607_v61  ;;  %v11470_v9 = vcombine.low %v355_v58, %v359_v59 }
  0x60   :  { %v487_v0 = vld [vmem:[%s20021_s1 + $0xc60] sm:$0xff]  ;;  %3346 = vmatpush1.bf16.msra.mxu0 %v11478_v62  ;;  %v13287_v62 = vld [vmem:[%s20022_s0 + $0x150] ss:$28 sps:$4 sm:$0xff]  }
  0x61   :  { %v347_v2 = vld [vmem:[%s20021_s1 + $0x800] sm:$0xff]  ;;  %v11599_v8 = vcombine.high %v483_v63, %v487_v0  ;;  %3347 = vmatprep.subr.bf16.mxu0 %v11471_v1  ;;  %v11598_v20 = vcombine.low %v483_v63, %v487_v0  ;;  %v13292_v63 = vld [vmem:[%s20022_s0 + $0x158] ss:$28 sps:$4 sm:$0xff]  }
  0x62   :  { %v351_v3 = vld [vmem:[%s20021_s1 + $0x820] sm:$0xff]  ;;  %3459 = vmatpush1.bf16.msra.mxu1 %v11606_v4  ;;  %3172 = vmatmul.mubr.bf16.gmra.mxu0 %v13161_v5 }
  0x63   :  { %v13171_v7 = vld [vmem:[%s20022_s0 + $0xe4] ss:$28 sps:$4 sm:$0xff]   ;;  %v11463_v14 = vcombine.high %v347_v2, %v351_v3  ;;  %3460 = vmatprep.subr.bf16.mxu1 %v11599_v8  ;;  %3285 = vmatmul.mubr.bf16.gmra.mxu1 %v13166_v6  ;;  %v11462_v22 = vcombine.low %v347_v2, %v351_v3  ;;  %v13297_v2 = vld [vmem:[%s20022_s0 + $0x18c] ss:$28 sps:$4 sm:$0xff]   ;;  %v13302_v3 = vld [vmem:[%s20022_s0 + $0x194] ss:$28 sps:$4 sm:$0xff]  }
  0x64   :  { %v475_v12 = vld [vmem:[%s20021_s1 + $0xc00] sm:$0xff]  ;;  %3348 = vmatpush1.bf16.msra.mxu0 %v11470_v9  ;;  %3181 = vmatprep.mubr.bf16.mxu0 %v13171_v7 }
  0x65   :  { %v479_v13 = vld [vmem:[%s20021_s1 + $0xc20] sm:$0xff]  ;;  %3349 = vmatprep.subr.bf16.mxu0 %v11463_v14  ;;  %3294 = vmatprep.mubr.bf16.mxu1 %v13182_v15 }
  0x66   :  { %v467_v16 = vld [vmem:[%s20021_s1 + $0xbc0] sm:$0xff]  ;;  %v11591_v21 = vcombine.high %v475_v12, %v479_v13  ;;  %3461 = vmatpush1.bf16.msra.mxu1 %v11598_v20  ;;  %v11590_v28 = vcombine.low %v475_v12, %v479_v13 }
  0x67   :  { %v471_v19 = vld [vmem:[%s20021_s1 + $0xbe0] sm:$0xff] }
  0x68   :  { %v11583_v25 = vcombine.high %v467_v16, %v471_v19  ;;  %v459_v26 = vld [vmem:[%s20021_s1 + $0xb80] sm:$0xff]  ;;  %3462 = vmatprep.subr.bf16.mxu1 %v11591_v21  ;;  %3350 = vmatpush1.bf16.msra.mxu0 %v11462_v22  ;;  %v11582_v34 = vcombine.low %v467_v16, %v471_v19  ;;  %v13328_v19 = vld [vmem:[%s20022_s0 + $0x190] ss:$28 sps:$4 sm:$0xff]  }
  0x69   :  { %v463_v27 = vld [vmem:[%s20021_s1 + $0xba0] sm:$0xff]  ;;  %v13333_v22 = vld [vmem:[%s20022_s0 + $0x14] ss:$28 sps:$4 sm:$0xff]  }
  0x6a   :  { %v13213_v29 = vld [vmem:[%s20022_s0 + $0xe0] ss:$28 sps:$4 sm:$0xff]   ;;  %v13220_v33 = vld [vmem:[%s20022_s0 + $0xe8] ss:$28 sps:$4 sm:$0xff]   ;;  %3351 = vmatprep.subr.bf16.mxu0 %v11583_v25  ;;  %v11575_v35 = vcombine.high %v459_v26, %v463_v27  ;;  %3463 = vmatpush1.bf16.msra.mxu1 %v11590_v28  ;;  %v11574_v42 = vcombine.low %v459_v26, %v463_v27 }
  0x6b   :  { %v13230_v39 = vld [vmem:[%s20022_s0 + $0x124] ss:$28 sps:$4 sm:$0xff]   ;;  %3182 = vmatmul.mubr.bf16.gmra.mxu0 %v13213_v29  ;;  %3674 = vmatprep.subr.bf16.mxu1 %v11393_v32  ;;  %v148_v25 = vld [vmem:[%s20021_s1 + $0x1c8] sm:$0xff]  ;;  %v20029_v32 = vmov 0  }
  0x6c   :  { %v451_v40 = vld [vmem:[%s20021_s1 + $0xb40] sm:$0xff]  ;;  %3295 = vmatmul.mubr.bf16.gmra.mxu1 %v13220_v33  ;;  %3352 = vmatpush2.bf16.msra.mxu0 %v11582_v34  ;;  %v152_v26 = vld [vmem:[%s20021_s1 + $0x1e8] sm:$0xff] }
  0x6d   :  { %v455_v41 = vld [vmem:[%s20021_s1 + $0xb60] sm:$0xff]  ;;  %3353 = vmatprep.subr.bf16.mxu0 %v11575_v35  ;;  %3191 = vmatprep.mubr.bf16.mxu0 %v13225_v38  ;;  %v11265_v28 = vcombine.high %v148_v25, %v152_v26  ;;  %v140_v34 = vld [vmem:[%s20021_s1 + $0x188] sm:$0xff] }
  0x6e   :  { %v11567_v43 = vcombine.high %v451_v40, %v455_v41  ;;  %3304 = vmatprep.mubr.bf16.mxu1 %v13230_v39  ;;  %v443_v44 = vld [vmem:[%s20021_s1 + $0xb00] sm:$0xff]  ;;  %v11566_v49 = vcombine.low %v451_v40, %v455_v41  ;;  %v144_v35 = vld [vmem:[%s20021_s1 + $0x1a8] sm:$0xff] }
  0x6f   :  { %v447_v46 = vld [vmem:[%s20021_s1 + $0xb20] sm:$0xff]  ;;  %v13354_v40 = vld [vmem:[%s20022_s0 + $0x10] ss:$28 sps:$4 sm:$0xff]  }
  0x70   :  { %3354 = vmatpush2.bf16.msra.mxu0 %v11574_v42  ;;  %v13256_v48 = vld [vmem:[%s20022_s0 + $0x120] ss:$28 sps:$4 sm:$0xff]   ;;  %v11559_v51 = vcombine.high %v443_v44, %v447_v46  ;;  %v11558_v58 = vcombine.low %v443_v44, %v447_v46  ;;  %v13323_v16 = vld [vmem:[%s20022_s0 + $0x188] ss:$28 sps:$4 sm:$0xff]   ;;  %v11264_v44 = vcombine.low %v148_v25, %v152_v26  ;;  %v11392_v46 = vcombine.low %v13195_v23, %v13200_v24 }
  0x71   :  { %3355 = vmatprep.subr.bf16.mxu0 %v11567_v43  ;;  %v435_v54 = vld [vmem:[%s20021_s1 + $0xac0] sm:$0xff]  ;;  %v268_v41 = vld [vmem:[%s20021_s1 + $0x588] sm:$0xff]  ;;  %v13365_v43 = vld [vmem:[%s20022_s0 + $0x18] ss:$28 sps:$4 sm:$0xff]  }
  0x72   :  { %v439_v55 = vld [vmem:[%s20021_s1 + $0xae0] sm:$0xff]  ;;  %v272_v42 = vld [vmem:[%s20021_s1 + $0x5a8] sm:$0xff] }
  0x73   :  { %3192 = vmatmul.mubr.bf16.gmra.mxu0 %v13251_v47  ;;  %v11551_v59 = vcombine.high %v435_v54, %v439_v55  ;;  %v427_v60 = vld [vmem:[%s20021_s1 + $0xa80] sm:$0xff]  ;;  %v11550_v0 = vcombine.low %v435_v54, %v439_v55  ;;  %v13372_v54 = vld [vmem:[%s20022_s0 + $0x4c] ss:$28 sps:$4 sm:$0xff]  }
  0x74   :  { %3305 = vmatmul.mubr.bf16.gmra.mxu1 %v13256_v48  ;;  %3356 = vmatpush2.bf16.msra.mxu0 %v11566_v49  ;;  %v431_v61 = vld [vmem:[%s20021_s1 + $0xaa0] sm:$0xff]  ;;  %v11257_v49 = vcombine.high %v140_v34, %v144_v35  ;;  %v132_v55 = vld [vmem:[%s20021_s1 + $0x148] sm:$0xff] }
  0x75   :  { %3357 = vmatprep.subr.bf16.mxu0 %v11559_v51  ;;  %3201 = vmatprep.mubr.bf16.mxu0 %v13261_v52  ;;  %v11543_v1 = vcombine.high %v427_v60, %v431_v61  ;;  %v419_v4 = vld [vmem:[%s20021_s1 + $0xa40] sm:$0xff]  ;;  %v11542_v9 = vcombine.low %v427_v60, %v431_v61  ;;  %v11385_v51 = vcombine.high %v268_v41, %v272_v42  ;;  %v260_v23 = vld [vmem:[%s20021_s1 + $0x548] sm:$0xff] }
  0x76   :  { %3314 = vmatprep.mubr.bf16.mxu1 %v13266_v53  ;;  %v423_v8 = vld [vmem:[%s20021_s1 + $0xa60] sm:$0xff]  ;;  %v264_v24 = vld [vmem:[%s20021_s1 + $0x568] sm:$0xff]  ;;  %v11384_v60 = vcombine.low %v268_v41, %v272_v42 }
  0x77   :  { %v11535_v12 = vcombine.high %v419_v4, %v423_v8  ;;  %v411_v13 = vld [vmem:[%s20021_s1 + $0xa00] sm:$0xff]  ;;  %v11534_v20 = vcombine.low %v419_v4, %v423_v8  ;;  %v128_v4 = vld [vmem:[%s20021_s1 + $0x128] sm:$0xff] }
  0x78   :  { %3358 = vmatpush2.bf16.msra.mxu0 %v11558_v58  ;;  %v415_v14 = vld [vmem:[%s20021_s1 + $0xa20] sm:$0xff]  ;;  %v136_v58 = vld [vmem:[%s20021_s1 + $0x168] sm:$0xff] }
  0x79   :  { %3359 = vmatprep.subr.bf16.mxu0 %v11551_v59  ;;  %v11527_v21 = vcombine.high %v411_v13, %v415_v14  ;;  %v11526_v27 = vcombine.low %v411_v13, %v415_v14  ;;  %v11256_v59 = vcombine.low %v140_v34, %v144_v35  ;;  %v11249_v61 = vcombine.high %v132_v55, %v136_v58  ;;  %v13399_v8 = vld [vmem:[%s20022_s0 + $0x48] ss:$28 sps:$4 sm:$0xff]   ;;  %v13410_v13 = vld [vmem:[%s20022_s0 + $0x50] ss:$28 sps:$4 sm:$0xff]  }
  0x7a   :  { %v11248_v14 = vcombine.low %v132_v55, %v136_v58  ;;  %v13415_v26 = vld [vmem:[%s20022_s0 + $0x84] ss:$28 sps:$4 sm:$0xff]   ;;  %v244_v34 = vld [vmem:[%s20021_s1 + $0x4c8] sm:$0xff] }
  0x7b   :  { %3202 = vmatmul.mubr.bf16.gmra.mxu0 %v13287_v62  ;;  %v248_v35 = vld [vmem:[%s20021_s1 + $0x4e8] sm:$0xff]  ;;  %v13442_v55 = vld [vmem:[%s20022_s0 + $0x80] ss:$28 sps:$4 sm:$0xff]  }
  0x7c   :  { %3315 = vmatmul.mubr.bf16.gmra.mxu1 %v13292_v63  ;;  %3360 = vmatpush2.bf16.msra.mxu0 %v11550_v0  ;;  %v11377_v0 = vcombine.high %v260_v23, %v264_v24  ;;  %v236_v58 = vld [vmem:[%s20021_s1 + $0x488] sm:$0xff] }
  0x7d   :  { %3361 = vmatprep.subr.bf16.mxu0 %v11543_v1  ;;  %3211 = vmatprep.mubr.bf16.mxu0 %v13297_v2  ;;  %v124_v1 = vld [vmem:[%s20021_s1 + $0x108] sm:$0xff] }
  0x7e   :  { %3324 = vmatprep.mubr.bf16.mxu1 %v13302_v3  ;;  %v11240_v41 = vcombine.low %v124_v1, %v128_v4 }
  0x80   :  { %3362 = vmatpush2.bf16.msra.mxu0 %v11542_v9  ;;  %v252_v9 = vld [vmem:[%s20021_s1 + $0x508] sm:$0xff] }
  0x81   :  { %3363 = vmatprep.subr.bf16.mxu0 %v11535_v12  ;;  %v256_v12 = vld [vmem:[%s20021_s1 + $0x528] sm:$0xff] }
  0x82   :  { %v11369_v25 = vcombine.high %v252_v9, %v256_v12  ;;  %v11368_v42 = vcombine.low %v252_v9, %v256_v12  ;;  %v104_v9 = vld [vmem:[%s20021_s1 + $0x68] sm:$0xff] }
  0x83   :  { %3212 = vmatmul.mubr.bf16.gmra.mxu0 %v13323_v16  ;;  %v228_v12 = vld [vmem:[%s20021_s1 + $0x448] sm:$0xff] }
  0x84   :  { %3325 = vmatmul.mubr.bf16.gmra.mxu1 %v13328_v19  ;;  %3364 = vmatpush2.bf16.msra.mxu0 %v11534_v20  ;;  %v11376_v20 = vcombine.low %v260_v23, %v264_v24  ;;  %v240_v23 = vld [vmem:[%s20021_s1 + $0x4a8] sm:$0xff] }
  0x85   :  { %3365 = vmatprep.subr.bf16.mxu0 %v11527_v21  ;;  %3367 = vmatprep.mubr.bf16.mxu0 %v13333_v22  ;;  %v11241_v21 = vcombine.high %v124_v1, %v128_v4  ;;  %v13453_v24 = vld [vmem:[%s20022_s0 + $0x88] ss:$28 sps:$4 sm:$0xff]   ;;  %v13458_v1 = vld [vmem:[%s20022_s0 + $0xbc] ss:$28 sps:$4 sm:$0xff]  }
  0x86   :  { %3480 = vmatprep.mubr.bf16.mxu1 %v20029_v32  ;;  %v100_v4 = vld [vmem:[%s20021_s1 + $0x48] sm:$0xff] }
  0x88   :  { %3366 = vmatpush2.bf16.msra.mxu0 %v11526_v27  ;;  %v116_v27 = vld [vmem:[%s20021_s1 + $0xc8] sm:$0xff] }
  0x89   :  { %3561 = vmatprep.subr.bf16.mxu0 %v11265_v28  ;;  %v120_v28 = vld [vmem:[%s20021_s1 + $0xe8] sm:$0xff] }
  0x8b   :  { %3368 = vmatmul.mubr.bf16.vlgmr.msra.gmra.mxu0 %v13354_v40 }
  0x8c   :  { %3481 = vmatmul.mubr.bf16.vlgmr.msra.gmra.mxu1 %v13365_v43  ;;  %3562 = vmatpush1.bf16.msra.mxu0 %v11264_v44  ;;  %v11233_v44 = vcombine.high %v116_v27, %v120_v28 }
  0x8d   :  { %3675 = vmatpush1.bf16.msra.mxu1 %v11392_v46  ;;  %3563 = vmatprep.subr.bf16.mxu0 %v11257_v49  ;;  %v11361_v46 = vcombine.high %v244_v34, %v248_v35  ;;  %v108_v49 = vld [vmem:[%s20021_s1 + $0x88] sm:$0xff] }
  0x8e   :  { %3676 = vmatprep.subr.bf16.mxu1 %v11385_v51  ;;  %3377 = vmatprep.mubr.bf16.mxu0 %v13372_v54  ;;  %v112_v51 = vld [vmem:[%s20021_s1 + $0xa8] sm:$0xff] }
  0x8f   :  { %3490 = vmatprep.mubr.bf16.mxu1 %v20029_v32 }
  0x90   :  { %3564 = vmatpush1.bf16.msra.mxu0 %v11256_v59  ;;  %v11232_v59 = vcombine.low %v116_v27, %v120_v28  ;;  %v92_v28 = vld [vmem:[%s20021_s1 + $0x8] sm:$0xff] }
  0x91   :  { %3677 = vmatpush1.bf16.msra.mxu1 %v11384_v60  ;;  %3565 = vmatprep.subr.bf16.mxu0 %v11249_v61  ;;  %v11360_v60 = vcombine.low %v244_v34, %v248_v35  ;;  %v11225_v61 = vcombine.high %v108_v49, %v112_v51  ;;  %v96_v34 = vld [vmem:[%s20021_s1 + $0x28] sm:$0xff]  ;;  %v13485_v35 = vld [vmem:[%s20022_s0 + $0xb8] ss:$28 sps:$4 sm:$0xff]  }
  0x92   :  { %3678 = vmatprep.subr.bf16.mxu1 %v11377_v0  ;;  %v11353_v0 = vcombine.high %v236_v58, %v240_v23 }
  0x93   :  { %3378 = vmatmul.mubr.bf16.gmra.mxu0 %v13399_v8 }
  0x94   :  { %3491 = vmatmul.mubr.bf16.gmra.mxu1 %v13410_v13  ;;  %3566 = vmatpush1.bf16.msra.mxu0 %v11248_v14  ;;  %v232_v14 = vld [vmem:[%s20021_s1 + $0x468] sm:$0xff] }
  0x95   :  { %3679 = vmatpush1.bf16.msra.mxu1 %v11376_v20  ;;  %3567 = vmatprep.subr.bf16.mxu0 %v11241_v21  ;;  %v11224_v20 = vcombine.low %v108_v49, %v112_v51  ;;  %v11352_v21 = vcombine.low %v236_v58, %v240_v23  ;;  %v11345_v27 = vcombine.high %v228_v12, %v232_v14  ;;  %v13501_v23 = vld [vmem:[%s20022_s0 + $0xf4] ss:$28 sps:$4 sm:$0xff]  }
  0x96   :  { %3680 = vmatprep.subr.bf16.mxu1 %v11369_v25  ;;  %3387 = vmatprep.mubr.bf16.mxu0 %v13415_v26  ;;  %v11217_v25 = vcombine.high %v100_v4, %v104_v9  ;;  %v11344_v49 = vcombine.low %v228_v12, %v232_v14  ;;  %v11209_v51 = vcombine.high %v92_v28, %v96_v34 }
  0x97   :  { %3500 = vmatprep.mubr.bf16.mxu1 %v20029_v32 }
  0x98   :  { %3568 = vmatpush1.bf16.msra.mxu0 %v11240_v41  ;;  %v220_v41 = vld [vmem:[%s20021_s1 + $0x408] sm:$0xff] }
  0x99   :  { %3681 = vmatpush1.bf16.msra.mxu1 %v11368_v42  ;;  %3569 = vmatprep.subr.bf16.mxu0 %v11233_v44  ;;  %v224_v42 = vld [vmem:[%s20021_s1 + $0x428] sm:$0xff]  ;;  %v13496_v44 = vld [vmem:[%s20022_s0 + $0xc0] ss:$28 sps:$4 sm:$0xff]  }
  0x9a   :  { %3682 = vmatprep.subr.bf16.mxu1 %v11361_v46  ;;  %v11216_v46 = vcombine.low %v100_v4, %v104_v9  ;;  %v11337_v58 = vcombine.high %v220_v41, %v224_v42  ;;  %v11208_v4 = vcombine.low %v92_v28, %v96_v34  ;;  %v11336_v9 = vcombine.low %v220_v41, %v224_v42  ;;  %v336_v28 = vld [vmem:[%s20021_s1 + $0x7a8] sm:$0xff]  ;;  %v13539_v34 = vld [vmem:[%s20022_s0 + $0xf8] ss:$28 sps:$4 sm:$0xff]  }
  0x9b   :  { %3388 = vmatmul.mubr.bf16.gmra.mxu0 %v13442_v55  ;;  %20165 = vst [vmem:[#allocation3_spill] sm:$0xff] %v13539_v34 }
  0x9c   :  { %3501 = vmatmul.mubr.bf16.gmra.mxu1 %v13453_v24  ;;  %3570 = vmatpush1.bf16.msra.mxu0 %v11232_v59  ;;  %v212_v59 = vld [vmem:[%s20021_s1 + $0x3c8] sm:$0xff] }
  0x9d   :  { %3683 = vmatpush1.bf16.msra.mxu1 %v11360_v60  ;;  %3571 = vmatprep.subr.bf16.mxu0 %v11225_v61  ;;  %v216_v60 = vld [vmem:[%s20021_s1 + $0x3e8] sm:$0xff] }
  0x9e   :  { %3684 = vmatprep.subr.bf16.mxu1 %v11353_v0  ;;  %3397 = vmatprep.mubr.bf16.mxu0 %v13458_v1  ;;  %v340_v61 = vld [vmem:[%s20021_s1 + $0x7c8] sm:$0xff]  ;;  %v11329_v12 = vcombine.high %v212_v59, %v216_v60  ;;  %v11328_v41 = vcombine.low %v212_v59, %v216_v60 }
  0x9f   :  { %3510 = vmatprep.mubr.bf16.mxu1 %v20029_v32  ;;  %v344_v0 = vld [vmem:[%s20021_s1 + $0x7e8] sm:$0xff] }
  0xa0   :  { %3572 = vmatpush1.bf16.msra.mxu0 %v11224_v20  ;;  %v11457_v14 = vcombine.high %v340_v61, %v344_v0  ;;  %v204_v20 = vld [vmem:[%s20021_s1 + $0x388] sm:$0xff]  ;;  %v11456_v42 = vcombine.low %v340_v61, %v344_v0 }
  0xa1   :  { %3685 = vmatpush1.bf16.msra.mxu1 %v11352_v21  ;;  %3573 = vmatprep.subr.bf16.mxu0 %v11217_v25  ;;  %v208_v21 = vld [vmem:[%s20021_s1 + $0x3a8] sm:$0xff] }
  0xa2   :  { %3686 = vmatprep.subr.bf16.mxu1 %v11345_v27  ;;  %v13528_v25 = vld [vmem:[%s20022_s0 + $0xf0] ss:$28 sps:$4 sm:$0xff]   ;;  %v11320_v61 = vcombine.low %v204_v20, %v208_v21 }
  0xa3   :  { %3398 = vmatmul.mubr.bf16.gmra.mxu0 %v13485_v35  ;;  %20164 = vst [vmem:[#allocation2_spill] sm:$0xff] %v13528_v25  ;;  %v332_v27 = vld [vmem:[%s20021_s1 + $0x788] sm:$0xff] }
  0xa4   :  { %3511 = vmatmul.mubr.bf16.gmra.mxu1 %v13496_v44  ;;  %3574 = vmatpush1.bf16.msra.mxu0 %v11216_v46  ;;  %v11321_v46 = vcombine.high %v204_v20, %v208_v21  ;;  %v324_v59 = vld [vmem:[%s20021_s1 + $0x748] sm:$0xff]  ;;  %v11448_v0 = vcombine.low %v332_v27, %v336_v28 }
  0xa5   :  { %3687 = vmatpush1.bf16.msra.mxu1 %v11344_v49  ;;  %3575 = vmatprep.subr.bf16.mxu0 %v11209_v51  ;;  %v11449_v49 = vcombine.high %v332_v27, %v336_v28  ;;  %v13544_v51 = vld [vmem:[%s20022_s0 + $0x12c] ss:$28 sps:$4 sm:$0xff]  }
  0xa6   :  { %3688 = vmatprep.subr.bf16.mxu1 %v11337_v58  ;;  %3407 = vmatprep.mubr.bf16.mxu0 %v13501_v23  ;;  %20166 = vst [vmem:[#allocation4_spill] sm:$0xff] %v13544_v51  ;;  %v196_v58 = vld [vmem:[%s20021_s1 + $0x348] sm:$0xff] }
  0xa7   :  { %3520 = vmatprep.mubr.bf16.mxu1 %v20029_v32  ;;  %v328_v60 = vld [vmem:[%s20021_s1 + $0x768] sm:$0xff] }
  0xa8   :  { %3576 = vmatpush1.bf16.msra.mxu0 %v11208_v4  ;;  %v200_v4 = vld [vmem:[%s20021_s1 + $0x368] sm:$0xff] }
  0xa9   :  { %3689 = vmatpush1.bf16.msra.mxu1 %v11336_v9  ;;  %3577 = vmatprep.subr.bf16.mxu0 %v11329_v12  ;;  %v11313_v9 = vcombine.high %v196_v58, %v200_v4  ;;  %v11441_v12 = vcombine.high %v324_v59, %v328_v60  ;;  %v192_v32 = vld [vmem:[%s20021_s1 + $0x328] sm:$0xff] }
  0xaa   :  { %3690 = vmatprep.subr.bf16.mxu1 %v11457_v14  ;;  %v188_v14 = vld [vmem:[%s20021_s1 + $0x308] sm:$0xff] }
  0xab   :  { %3408 = vmatmul.mubr.bf16.gmra.mxu0 %v13528_v25  ;;  %v20167_v25 = vmov 0   ;;  %v13571_v20 = vld [vmem:[%s20022_s0 + $0x128] ss:$28 sps:$4 sm:$0xff]   ;;  %v13582_v28 = vld [vmem:[%s20022_s0 + $0x130] ss:$28 sps:$4 sm:$0xff]  }
  0xac   :  { %3521 = vmatmul.mubr.bf16.gmra.mxu1 %v13539_v34  ;;  %3578 = vmatpush2.bf16.msra.mxu0 %v11328_v41  ;;  %20168 = vst [vmem:[#allocation5_spill] sm:$0xff] %v13571_v20  ;;  %v316_v21 = vld [vmem:[%s20021_s1 + $0x708] sm:$0xff]  ;;  %20169 = vst [vmem:[#allocation6_spill] sm:$0xff] %v13582_v28  ;;  %v11312_v41 = vcombine.low %v196_v58, %v200_v4 }
  0xad   :  { %3691 = vmatpush2.bf16.msra.mxu1 %v11456_v42  ;;  %3579 = vmatprep.subr.bf16.mxu0 %v11321_v46  ;;  %v320_v27 = vld [vmem:[%s20021_s1 + $0x728] sm:$0xff]  ;;  %v11440_v42 = vcombine.low %v324_v59, %v328_v60  ;;  %v11305_v46 = vcombine.high %v188_v14, %v192_v32  ;;  %v11304_v59 = vcombine.low %v188_v14, %v192_v32  ;;  %v12562_v32 = vld [vmem:[%s20022_s0 + $0x160] ss:$28 sps:$4 sm:$0xff]  }
  0xae   :  { %3692 = vmatprep.subr.bf16.mxu1 %v11449_v49  ;;  %3417 = vmatprep.mubr.bf16.mxu0 %v13544_v51  ;;  %v11433_v49 = vcombine.high %v316_v21, %v320_v27  ;;  %v12560_v51 = vld [vmem:[%s20022_s0 + $0x164] ss:$28 sps:$4 sm:$0xff]   ;;  %v184_v34 = vld [vmem:[%s20021_s1 + $0x2e8] sm:$0xff]  ;;  %v11432_v60 = vcombine.low %v316_v21, %v320_v27 }
  0xaf   :  { %3530 = vmatprep.mubr.bf16.mxu1 %v20167_v25  ;;  %v308_v58 = vld [vmem:[%s20021_s1 + $0x6c8] sm:$0xff] }
  0xb0   :  { %3580 = vmatpush2.bf16.msra.mxu0 %v11320_v61  ;;  %v180_v61 = vld [vmem:[%s20021_s1 + $0x2c8] sm:$0xff] }
  0xb1   :  { %3693 = vmatpush2.bf16.msra.mxu1 %v11448_v0  ;;  %3581 = vmatprep.subr.bf16.mxu0 %v11313_v9  ;;  %v312_v4 = vld [vmem:[%s20021_s1 + $0x6e8] sm:$0xff]  ;;  %v11297_v0 = vcombine.high %v180_v61, %v184_v34  ;;  %v11296_v27 = vcombine.low %v180_v61, %v184_v34 }
  0xb2   :  { %3694 = vmatprep.subr.bf16.mxu1 %v11441_v12  ;;  %v11425_v9 = vcombine.high %v308_v58, %v312_v4  ;;  %v172_v12 = vld [vmem:[%s20021_s1 + $0x288] sm:$0xff] }
  0xb3   :  { %3418 = vmatmul.mubr.bf16.gmra.mxu0 %v13571_v20  ;;  %v176_v20 = vld [vmem:[%s20021_s1 + $0x2a8] sm:$0xff] }
  0xb4   :  { %3531 = vmatmul.mubr.bf16.gmra.mxu1 %v13582_v28  ;;  %3582 = vmatpush2.bf16.msra.mxu0 %v11312_v41  ;;  %v300_v14 = vld [vmem:[%s20021_s1 + $0x688] sm:$0xff]  ;;  %v11424_v41 = vcombine.low %v308_v58, %v312_v4  ;;  %v11288_v58 = vcombine.low %v172_v12, %v176_v20 }
  0xb5   :  { %3695 = vmatpush2.bf16.msra.mxu1 %v11440_v42  ;;  %3583 = vmatprep.subr.bf16.mxu0 %v11305_v46  ;;  %v12563_v21 = vld [vmem:[%s20022_s0 + $0x168] ss:$28 sps:$4 sm:$0xff]   ;;  %v11289_v42 = vcombine.high %v172_v12, %v176_v20  ;;  %v12566_v20 = vld [vmem:[%s20022_s0 + $0x198] ss:$28 sps:$4 sm:$0xff]  }
  0xb6   :  { %3696 = vmatprep.subr.bf16.mxu1 %v11433_v49  ;;  %3427 = vmatprep.mubr.bf16.mxu0 %v12560_v51  ;;  %v304_v51 = vld [vmem:[%s20021_s1 + $0x6a8] sm:$0xff]  ;;  %v12564_v49 = vld [vmem:[%s20022_s0 + $0x19c] ss:$28 sps:$4 sm:$0xff]  }
  0xb7   :  { %3540 = vmatprep.mubr.bf16.mxu1 %v20167_v25  ;;  %v11417_v46 = vcombine.high %v300_v14, %v304_v51  ;;  %v164_v28 = vld [vmem:[%s20021_s1 + $0x248] sm:$0xff]  ;;  %v11416_v4 = vcombine.low %v300_v14, %v304_v51  ;;  %v12567_v51 = vld [vmem:[%s20022_s0 + $0x1a0] ss:$28 sps:$4 sm:$0xff]  }
  0xb8   :  { %3584 = vmatpush2.bf16.msra.mxu0 %v11304_v59  ;;  %v168_v59 = vld [vmem:[%s20021_s1 + $0x268] sm:$0xff] }
  0xb9   :  { %3697 = vmatpush2.bf16.msra.mxu1 %v11432_v60  ;;  %3585 = vmatprep.subr.bf16.mxu0 %v11297_v0  ;;  %v292_v34 = vld [vmem:[%s20021_s1 + $0x648] sm:$0xff]  ;;  %v11281_v60 = vcombine.high %v164_v28, %v168_v59 }
  0xba   :  { %3698 = vmatprep.subr.bf16.mxu1 %v11425_v9  ;;  %v296_v61 = vld [vmem:[%s20021_s1 + $0x668] sm:$0xff] }
  0xbb   :  { %3428 = vmatmul.mubr.bf16.gmra.mxu0 %v12562_v32  ;;  %v11409_v0 = vcombine.high %v292_v34, %v296_v61  ;;  %v156_v9 = vld [vmem:[%s20021_s1 + $0x208] sm:$0xff] }
  0xbc   :  { %3541 = vmatmul.mubr.bf16.gmra.mxu1 %v12563_v21  ;;  %3586 = vmatpush2.bf16.msra.mxu0 %v11296_v27  ;;  %v160_v32 = vld [vmem:[%s20021_s1 + $0x228] sm:$0xff]  ;;  %v11280_v21 = vcombine.low %v164_v28, %v168_v59  ;;  %v11408_v27 = vcombine.low %v292_v34, %v296_v61 }
  0xbd   :  { %3699 = vmatpush2.bf16.msra.mxu1 %v11424_v41  ;;  %3587 = vmatprep.subr.bf16.mxu0 %v11289_v42  ;;  %v284_v12 = vld [vmem:[%s20021_s1 + $0x608] sm:$0xff]  ;;  %v11273_v41 = vcombine.high %v156_v9, %v160_v32  ;;  %v11272_v59 = vcombine.low %v156_v9, %v160_v32 }
  0xbe   :  { %3700 = vmatprep.subr.bf16.mxu1 %v11417_v46  ;;  %3437 = vmatprep.mubr.bf16.mxu0 %v12564_v49  ;;  %v288_v14 = vld [vmem:[%s20021_s1 + $0x628] sm:$0xff] }
  0xbf   :  { %3550 = vmatprep.mubr.bf16.mxu1 %v20167_v25  ;;  %v11401_v42 = vcombine.high %v284_v12, %v288_v14  ;;  %v404_v46 = vld [vmem:[%s20021_s1 + $0x9c8] sm:$0xff]  ;;  %v11400_v34 = vcombine.low %v284_v12, %v288_v14 }
  0xc0   :  { %3588 = vmatpush2.bf16.msra.mxu0 %v11288_v58  ;;  %v408_v49 = vld [vmem:[%s20021_s1 + $0x9e8] sm:$0xff] }
  0xc1   :  { %3701 = vmatpush2.bf16.msra.mxu1 %v11416_v4  ;;  %3589 = vmatprep.subr.bf16.mxu0 %v11281_v60  ;;  %v532_v58 = vld [vmem:[%s20021_s1 + $0xdc8] sm:$0xff]  ;;  %v11521_v61 = vcombine.high %v404_v46, %v408_v49  ;;  %v12632_v4 = vld [vmem:[%s20022_s0 + $0x4] ss:$28 sps:$4 sm:$0xff]   ;;  %v11520_v32 = vcombine.low %v404_v46, %v408_v49 }
  0xc2   :  { %3702 = vmatprep.subr.bf16.mxu1 %v11409_v0  ;;  %v536_v28 = vld [vmem:[%s20021_s1 + $0xde8] sm:$0xff] }
  0xc3   :  { %3438 = vmatmul.mubr.bf16.gmra.mxu0 %v12566_v20  ;;  %v11649_v60 = vcombine.high %v532_v58, %v536_v28  ;;  %v396_v0 = vld [vmem:[%s20021_s1 + $0x988] sm:$0xff] }
  0xc4   :  { %3551 = vmatmul.mubr.bf16.gmra.mxu1 %v12567_v51  ;;  %3590 = vmatpush2.bf16.msra.mxu0 %v11280_v21  ;;  %v400_v20 = vld [vmem:[%s20021_s1 + $0x9a8] sm:$0xff]  ;;  %v11648_v51 = vcombine.low %v532_v58, %v536_v28 }
  0xc5   :  { %3703 = vmatpush2.bf16.msra.mxu1 %v11408_v27  ;;  %3591 = vmatprep.subr.bf16.mxu0 %v11273_v41  ;;  %v12633_v9 = vld [vmem:[%s20022_s0 + $0xc] ss:$28 sps:$4 sm:$0xff]   ;;  %v11513_v21 = vcombine.high %v396_v0, %v400_v20  ;;  %v11512_v58 = vcombine.low %v396_v0, %v400_v20 }
  0xc6   :  { %3704 = vmatprep.subr.bf16.mxu1 %v11401_v42  ;;  %3593 = vmatprep.mubr.bf16.mxu0 %v12632_v4  ;;  %v524_v12 = vld [vmem:[%s20021_s1 + $0xd88] sm:$0xff] }
  0xc7   :  { %3706 = vmatprep.mubr.bf16.mxu1 %v12633_v9  ;;  %v528_v14 = vld [vmem:[%s20021_s1 + $0xda8] sm:$0xff] }
  0xc8   :  { %3592 = vmatpush2.bf16.msra.mxu0 %v11272_v59  ;;  %v388_v27 = vld [vmem:[%s20021_s1 + $0x948] sm:$0xff]  ;;  %v11641_v42 = vcombine.high %v524_v12, %v528_v14  ;;  %v11640_v59 = vcombine.low %v524_v12, %v528_v14 }
  0xc9   :  { %3705 = vmatpush2.bf16.msra.mxu1 %v11400_v34  ;;  %3787 = vmatprep.subr.bf16.mxu0 %v11521_v61  ;;  %v392_v41 = vld [vmem:[%s20021_s1 + $0x968] sm:$0xff] }
  0xca   :  { %3900 = vmatprep.subr.bf16.mxu1 %v11649_v60  ;;  %v516_v46 = vld [vmem:[%s20021_s1 + $0xd48] sm:$0xff]  ;;  %v11505_v28 = vcombine.high %v388_v27, %v392_v41 }
  0xcb   :  { %3594 = vmatmul.mubr.bf16.vlgmr.msra.gmra.mxu0 %v13017_v10  ;;  %v520_v49 = vld [vmem:[%s20021_s1 + $0xd68] sm:$0xff] }
  0xcc   :  { %3707 = vmatmul.mubr.bf16.vlgmr.msra.gmra.mxu1 %v13022_v11  ;;  %3788 = vmatpush1.bf16.msra.mxu0 %v11520_v32  ;;  %v380_v10 = vld [vmem:[%s20021_s1 + $0x908] sm:$0xff]  ;;  %v11633_v61 = vcombine.high %v516_v46, %v520_v49  ;;  %v11504_v11 = vcombine.low %v388_v27, %v392_v41  ;;  %v11632_v20 = vcombine.low %v516_v46, %v520_v49 }
  0xcd   :  { %3901 = vmatpush1.bf16.msra.mxu1 %v11648_v51  ;;  %3789 = vmatprep.subr.bf16.mxu0 %v11513_v21  ;;  %v384_v34 = vld [vmem:[%s20021_s1 + $0x928] sm:$0xff] }
  0xce   :  { %3603 = vmatprep.mubr.bf16.mxu0 %v13033_v17  ;;  %3716 = vmatprep.mubr.bf16.mxu1 %v13038_v18  ;;  %v508_v4 = vld [vmem:[%s20021_s1 + $0xd08] sm:$0xff]  ;;  %v11497_v18 = vcombine.high %v380_v10, %v384_v34  ;;  %v11496_v32 = vcombine.low %v380_v10, %v384_v34 }
  0xcf   :  { %3902 = vmatprep.subr.bf16.mxu1 %v11641_v42  ;;  %v512_v17 = vld [vmem:[%s20021_s1 + $0xd28] sm:$0xff] }
  0xd0   :  { %3790 = vmatpush1.bf16.msra.mxu0 %v11512_v58  ;;  %v372_v60 = vld [vmem:[%s20021_s1 + $0x8c8] sm:$0xff]  ;;  %v11625_v9 = vcombine.high %v508_v4, %v512_v17  ;;  %v11624_v21 = vcombine.low %v508_v4, %v512_v17 }
  0xd1   :  { %3791 = vmatprep.subr.bf16.mxu0 %v11505_v28  ;;  %3903 = vmatpush1.bf16.msra.mxu1 %v11640_v59  ;;  %v376_v0 = vld [vmem:[%s20021_s1 + $0x8e8] sm:$0xff] }
  0xd2   :  { %3904 = vmatprep.subr.bf16.mxu1 %v11633_v61  ;;  %v500_v12 = vld [vmem:[%s20021_s1 + $0xcc8] sm:$0xff]  ;;  %v11489_v51 = vcombine.high %v372_v60, %v376_v0  ;;  %v11488_v41 = vcombine.low %v372_v60, %v376_v0 }
  0xd3   :  { %3604 = vmatmul.mubr.bf16.gmra.mxu0 %v13065_v30  ;;  %v504_v14 = vld [vmem:[%s20021_s1 + $0xce8] sm:$0xff] }
  0xd4   :  { %3717 = vmatmul.mubr.bf16.gmra.mxu1 %v13070_v31  ;;  %3792 = vmatpush1.bf16.msra.mxu0 %v11504_v11  ;;  %v364_v30 = vld [vmem:[%s20021_s1 + $0x888] sm:$0xff]  ;;  %v11617_v27 = vcombine.high %v500_v12, %v504_v14  ;;  %v11616_v58 = vcombine.low %v500_v12, %v504_v14  ;;  %v13779_v12 = vld [vmem:[%s20021_s1 + $0x5d0] sm:$0xff] }
  0xd5   :  { %3793 = vmatprep.subr.bf16.mxu0 %v11497_v18  ;;  %3613 = vmatprep.mubr.bf16.mxu0 %v13081_v36  ;;  %v368_v31 = vld [vmem:[%s20021_s1 + $0x8a8] sm:$0xff]  ;;  %v13784_v14 = vld [vmem:[%s20021_s1 + $0x5f0] sm:$0xff] }
  0xd6   :  { %3726 = vmatprep.mubr.bf16.mxu1 %v13086_v37  ;;  %3905 = vmatpush1.bf16.msra.mxu1 %v11632_v20  ;;  %v492_v36 = vld [vmem:[%s20021_s1 + $0xc88] sm:$0xff]  ;;  %v11481_v42 = vcombine.high %v364_v30, %v368_v31  ;;  %v11480_v59 = vcombine.low %v364_v30, %v368_v31  ;;  %v11395_v31 = vcombine.high %v13779_v12, %v13784_v14 }
  0xd7   :  { %3906 = vmatprep.subr.bf16.mxu1 %v11625_v9  ;;  %v496_v37 = vld [vmem:[%s20021_s1 + $0xca8] sm:$0xff] }
  0xd8   :  { %3794 = vmatpush1.bf16.msra.mxu0 %v11496_v32  ;;  %v356_v46 = vld [vmem:[%s20021_s1 + $0x848] sm:$0xff]  ;;  %v11609_v28 = vcombine.high %v492_v36, %v496_v37  ;;  %v11608_v11 = vcombine.low %v492_v36, %v496_v37 }
  0xd9   :  { %3795 = vmatprep.subr.bf16.mxu0 %v11489_v51  ;;  %v360_v49 = vld [vmem:[%s20021_s1 + $0x868] sm:$0xff] }
  0xda   :  { %3907 = vmatpush1.bf16.msra.mxu1 %v11624_v21  ;;  %v484_v10 = vld [vmem:[%s20021_s1 + $0xc48] sm:$0xff]  ;;  %v11473_v61 = vcombine.high %v356_v46, %v360_v49  ;;  %v11472_v17 = vcombine.low %v356_v46, %v360_v49 }
  0xdb   :  { %3614 = vmatmul.mubr.bf16.gmra.mxu0 %v13106_v45  ;;  %3908 = vmatprep.subr.bf16.mxu1 %v11617_v27  ;;  %v488_v34 = vld [vmem:[%s20021_s1 + $0xc68] sm:$0xff] }
  0xdc   :  { %3727 = vmatmul.mubr.bf16.gmra.mxu1 %v13118_v50  ;;  %3796 = vmatpush1.bf16.msra.mxu0 %v11488_v41  ;;  %v348_v45 = vld [vmem:[%s20021_s1 + $0x808] sm:$0xff]  ;;  %v11601_v4 = vcombine.high %v484_v10, %v488_v34  ;;  %v11600_v20 = vcombine.low %v484_v10, %v488_v34  ;;  %v541_v10 = vlaneseq }
  0xdd   :  { %3797 = vmatprep.subr.bf16.mxu0 %v11481_v42  ;;  %3623 = vmatprep.mubr.bf16.mxu0 %v13129_v56  ;;  %v352_v50 = vld [vmem:[%s20021_s1 + $0x828] sm:$0xff] }
  0xde   :  { %3736 = vmatprep.mubr.bf16.mxu1 %v13134_v57  ;;  %3909 = vmatpush1.bf16.msra.mxu1 %v11616_v58  ;;  %v476_v56 = vld [vmem:[%s20021_s1 + $0xc08] sm:$0xff]  ;;  %v11465_v18 = vcombine.high %v348_v45, %v352_v50  ;;  %v11464_v32 = vcombine.low %v348_v45, %v352_v50 }
  0xdf   :  { %3910 = vmatprep.subr.bf16.mxu1 %v11609_v28  ;;  %v480_v57 = vld [vmem:[%s20021_s1 + $0xc28] sm:$0xff] }
  0xe0   :  { %3798 = vmatpush1.bf16.msra.mxu0 %v11480_v59  ;;  %v468_v60 = vld [vmem:[%s20021_s1 + $0xbc8] sm:$0xff]  ;;  %v11593_v9 = vcombine.high %v476_v56, %v480_v57  ;;  %v11592_v30 = vcombine.low %v476_v56, %v480_v57 }
  0xe1   :  { %3799 = vmatprep.subr.bf16.mxu0 %v11473_v61  ;;  %v472_v0 = vld [vmem:[%s20021_s1 + $0xbe8] sm:$0xff] }
  0xe2   :  { %3911 = vmatpush1.bf16.msra.mxu1 %v11608_v11  ;;  %v464_v51 = vld [vmem:[%s20021_s1 + $0xba8] sm:$0xff]  ;;  %v11584_v21 = vcombine.low %v468_v60, %v472_v0 }
  0xe3   :  { %3624 = vmatmul.mubr.bf16.gmra.mxu0 %v13161_v5  ;;  %3912 = vmatprep.subr.bf16.mxu1 %v11601_v4  ;;  %v11585_v5 = vcombine.high %v468_v60, %v472_v0  ;;  %v456_v27 = vld [vmem:[%s20021_s1 + $0xb68] sm:$0xff] }
  0xe4   :  { %3737 = vmatmul.mubr.bf16.gmra.mxu1 %v13166_v6  ;;  %3800 = vmatpush1.bf16.msra.mxu0 %v11472_v17  ;;  %v460_v6 = vld [vmem:[%s20021_s1 + $0xb88] sm:$0xff]  ;;  %v539_v17 = vld [vmem:[%s20023_s2] sm:$0xff] }
  0xe5   :  { %3801 = vmatprep.subr.bf16.mxu0 %v11465_v18  ;;  %3633 = vmatprep.mubr.bf16.mxu0 %v13171_v7  ;;  %v11577_v7 = vcombine.high %v460_v6, %v464_v51  ;;  %v11576_v41 = vcombine.low %v460_v6, %v464_v51  ;;  %v444_v37 = vld [vmem:[%s20021_s1 + $0xb08] sm:$0xff]  ;;  %v273_v18 = vld [vmem:[%s20021_s1 + $0x5b0] sm:$0xff] }
  0xe6   :  { %3746 = vmatprep.mubr.bf16.mxu1 %v13182_v15  ;;  %3913 = vmatpush1.bf16.msra.mxu1 %v11600_v20  ;;  %v452_v15 = vld [vmem:[%s20021_s1 + $0xb48] sm:$0xff]  ;;  %v11394_v20 = vcombine.low %v13779_v12, %v13784_v14  ;;  %v133_v6 = vld [vmem:[%s20021_s1 + $0x150] sm:$0xff] }
  0xe7   :  { %3914 = vmatprep.subr.bf16.mxu1 %v11593_v9  ;;  %v11569_v36 = vcombine.high %v452_v15, %v456_v27  ;;  %v448_v42 = vld [vmem:[%s20021_s1 + $0xb28] sm:$0xff]  ;;  %v137_v51 = vld [vmem:[%s20021_s1 + $0x170] sm:$0xff] }
  0xe8   :  { %3802 = vmatpush1.bf16.msra.mxu0 %v11464_v32  ;;  %v436_v46 = vld [vmem:[%s20021_s1 + $0xac8] sm:$0xff]  ;;  %v261_v12 = vld [vmem:[%s20021_s1 + $0x550] sm:$0xff] }
  0xe9   :  { %3803 = vmatprep.subr.bf16.mxu0 %v11585_v5  ;;  %v428_v58 = vld [vmem:[%s20021_s1 + $0xa88] sm:$0xff]  ;;  %v265_v14 = vld [vmem:[%s20021_s1 + $0x570] sm:$0xff] }
  0xea   :  { %3915 = vmatpush1.bf16.msra.mxu1 %v11592_v30  ;;  %v432_v28 = vld [vmem:[%s20021_s1 + $0xaa8] sm:$0xff] }
  0xeb   :  { %3634 = vmatmul.mubr.bf16.gmra.mxu0 %v13213_v29  ;;  %4126 = vmatprep.subr.bf16.mxu1 %v11395_v31  ;;  %v11568_v29 = vcombine.low %v452_v15, %v456_v27  ;;  %v420_v59 = vld [vmem:[%s20021_s1 + $0xa48] sm:$0xff] }
  0xec   :  { %3747 = vmatmul.mubr.bf16.gmra.mxu1 %v13220_v33  ;;  %3804 = vmatpush2.bf16.msra.mxu0 %v11584_v21  ;;  %v11561_v33 = vcombine.high %v444_v37, %v448_v42  ;;  %v412_v61 = vld [vmem:[%s20021_s1 + $0xa08] sm:$0xff] }
  0xed   :  { %3805 = vmatprep.subr.bf16.mxu0 %v11577_v7  ;;  %3643 = vmatprep.mubr.bf16.mxu0 %v13225_v38  ;;  %v440_v38 = vld [vmem:[%s20021_s1 + $0xae8] sm:$0xff] }
  0xee   :  { %3756 = vmatprep.mubr.bf16.mxu1 %v13230_v39  ;;  %v11560_v39 = vcombine.low %v444_v37, %v448_v42  ;;  %v11553_v49 = vcombine.high %v436_v46, %v440_v38  ;;  %v416_v45 = vld [vmem:[%s20021_s1 + $0xa28] sm:$0xff]  ;;  %v11379_v42 = vcombine.high %v261_v12, %v265_v14 }
  0xef   :  { %v11529_v50 = vcombine.high %v412_v61, %v416_v45  ;;  %v11528_v11 = vcombine.low %v412_v61, %v416_v45  ;;  %v121_v61 = vld [vmem:[%s20021_s1 + $0xf0] sm:$0xff] }
  0xf0   :  { %3806 = vmatpush2.bf16.msra.mxu0 %v11576_v41 }
  0xf1   :  { %3807 = vmatprep.subr.bf16.mxu0 %v11569_v36 }
  0xf3   :  { %3644 = vmatmul.mubr.bf16.gmra.mxu0 %v13251_v47  ;;  %v11552_v47 = vcombine.low %v436_v46, %v440_v38  ;;  %v253_v46 = vld [vmem:[%s20021_s1 + $0x510] sm:$0xff] }
  0xf4   :  { %3757 = vmatmul.mubr.bf16.gmra.mxu1 %v13256_v48  ;;  %3808 = vmatpush2.bf16.msra.mxu0 %v11568_v29  ;;  %v11545_v48 = vcombine.high %v428_v58, %v432_v28  ;;  %v129_v29 = vld [vmem:[%s20021_s1 + $0x130] sm:$0xff] }
  0xf5   :  { %3809 = vmatprep.subr.bf16.mxu0 %v11561_v33  ;;  %3653 = vmatprep.mubr.bf16.mxu0 %v13261_v52  ;;  %v424_v52 = vld [vmem:[%s20021_s1 + $0xa68] sm:$0xff] }
  0xf6   :  { %3766 = vmatprep.mubr.bf16.mxu1 %v13266_v53  ;;  %v11544_v53 = vcombine.low %v428_v58, %v432_v28  ;;  %v11537_v34 = vcombine.high %v420_v59, %v424_v52  ;;  %v11250_v58 = vcombine.low %v133_v6, %v137_v51 }
  0xf8   :  { %3810 = vmatpush2.bf16.msra.mxu0 %v11560_v39 }
  0xf9   :  { %3811 = vmatprep.subr.bf16.mxu0 %v11553_v49 }
  0xfb   :  { %3654 = vmatmul.mubr.bf16.gmra.mxu0 %v13287_v62  ;;  %v11536_v62 = vcombine.low %v420_v59, %v424_v52 }
  0xfc   :  { %3767 = vmatmul.mubr.bf16.gmra.mxu1 %v13292_v63  ;;  %3812 = vmatpush2.bf16.msra.mxu0 %v11552_v47  ;;  %v13844_v63 = vshrl.u32 %v541_v10, 7  ;;  %v11378_v47 = vcombine.low %v261_v12, %v265_v14 }
  0xfd   :  { %3813 = vmatprep.subr.bf16.mxu0 %v11545_v48  ;;  %3663 = vmatprep.mubr.bf16.mxu0 %v13297_v2  ;;  %v149_v2 = vld [vmem:[%s20021_s1 + $0x1d0] sm:$0xff] }
  0xfe   :  { %3776 = vmatprep.mubr.bf16.mxu1 %v13302_v3  ;;  %20170 = vst [vmem:[#allocation7_spill] sm:$0xff] %v13844_v63  ;;  %v153_v3 = vld [vmem:[%s20021_s1 + $0x1f0] sm:$0xff]  ;;  %v20039_v4 = vsub.s32 0, %v13844_v63  ;;  %v20038_v57 = vsub.s32 1, %v13844_v63 }
  0xff   :  { %v11267_v56 = vcombine.high %v149_v2, %v153_v3  ;;  %v11266_v0 = vcombine.low %v149_v2, %v153_v3 }
 0x100   :  { %3814 = vmatpush2.bf16.msra.mxu0 %v11544_v53  ;;  %v13875_v60 = vrot.slane %v539_v17, %v20039_v4  ;;  %v13881_v32 = vrot.slane %v539_v17, %v20038_v57 }
 0x101   :  { %3815 = vmatprep.subr.bf16.mxu0 %v11537_v34  ;;  %v117_v34 = vld [vmem:[%s20021_s1 + $0xd0] sm:$0xff] }
 0x102   :  { %v11234_v12 = vcombine.low %v117_v34, %v121_v61 }
 0x103   :  { %3664 = vmatmul.mubr.bf16.gmra.mxu0 %v13323_v16  ;;  %v141_v16 = vld [vmem:[%s20021_s1 + $0x190] sm:$0xff] }
 0x104   :  { %3777 = vmatmul.mubr.bf16.gmra.mxu1 %v13328_v19  ;;  %3816 = vmatpush2.bf16.msra.mxu0 %v11536_v62  ;;  %v145_v19 = vld [vmem:[%s20021_s1 + $0x1b0] sm:$0xff] }
 0x105   :  { %3817 = vmatprep.subr.bf16.mxu0 %v11529_v50  ;;  %3819 = vmatprep.mubr.bf16.mxu0 %v13333_v22  ;;  %v269_v22 = vld [vmem:[%s20021_s1 + $0x590] sm:$0xff]  ;;  %v11259_v9 = vcombine.high %v141_v16, %v145_v19  ;;  %v11258_v7 = vcombine.low %v141_v16, %v145_v19  ;;  %v11235_v16 = vcombine.high %v117_v34, %v121_v61 }
 0x106   :  { %3932 = vmatprep.mubr.bf16.mxu1 %v20167_v25  ;;  %v11387_v5 = vcombine.high %v269_v22, %v273_v18  ;;  %v11386_v27 = vcombine.low %v269_v22, %v273_v18  ;;  %v245_v62 = vld [vmem:[%s20021_s1 + $0x4d0] sm:$0xff] }
 0x107   :  { %v249_v50 = vld [vmem:[%s20021_s1 + $0x4f0] sm:$0xff] }
 0x108   :  { %3818 = vmatpush2.bf16.msra.mxu0 %v11528_v11  ;;  %v221_v34 = vld [vmem:[%s20021_s1 + $0x410] sm:$0xff] }
 0x109   :  { %4013 = vmatprep.subr.bf16.mxu0 %v11267_v56  ;;  %v3143_v30 = vpop.f32.mrf.mxu0  ;;  %v3256_v21 = vpop.f32.mrf.mxu1 }
 0x10a   :  { %v3144_v31 = vadd.f32 %v3143_v30, %v13875_v60 }
 0x10b   :  { %3820 = vmatmul.mubr.bf16.vlgmr.msra.gmra.mxu0 %v13354_v40  ;;  %v3145_v15 = vpop.f32.mrf.mxu0  ;;  %v11251_v40 = vcombine.high %v133_v6, %v137_v51  ;;  %v3258_v37 = vpop.f32.mrf.mxu1 }
 0x10c   :  { %3933 = vmatmul.mubr.bf16.vlgmr.msra.gmra.mxu1 %v13365_v43  ;;  %4014 = vmatpush1.bf16.msra.mxu0 %v11266_v0  ;;  %v13898_v41 = vadd.f32 %v3256_v21, %v3144_v31  ;;  %v3146_v36 = vadd.f32 %v3145_v15, %v13881_v32  ;;  %v125_v43 = vld [vmem:[%s20021_s1 + $0x110] sm:$0xff]  ;;  %v11363_v0 = vcombine.high %v245_v62, %v249_v50 }
 0x10d   :  { %4127 = vmatpush1.bf16.msra.mxu1 %v11394_v20  ;;  %4015 = vmatprep.subr.bf16.mxu0 %v11259_v9  ;;  %v3147_v33 = vpop.f32.mrf.mxu0  ;;  %v3260_v49 = vpop.f32.mrf.mxu1  ;;  %v11243_v48 = vcombine.high %v125_v43, %v129_v29  ;;  %v11242_v17 = vcombine.low %v125_v43, %v129_v29  ;;  %v113_v20 = vld [vmem:[%s20021_s1 + $0xb0] sm:$0xff]  ;;  %v11362_v31 = vcombine.low %v245_v62, %v249_v50 }
 0x10e   :  { %4128 = vmatprep.subr.bf16.mxu1 %v11387_v5  ;;  %3829 = vmatprep.mubr.bf16.mxu0 %v13372_v54  ;;  %v257_v54 = vld [vmem:[%s20021_s1 + $0x530] sm:$0xff]  ;;  %v13915_v38 = vadd.f32 %v3258_v37, %v3146_v36  ;;  %v3148_v39 = vadd.f32 %v3147_v33, %v13875_v60 }
 0x10f   :  { %3942 = vmatprep.mubr.bf16.mxu1 %v20167_v25  ;;  %v3149_v28 = vpop.f32.mrf.mxu0  ;;  %v3262_v53 = vpop.f32.mrf.mxu1  ;;  %v11371_v10 = vcombine.high %v253_v46, %v257_v54  ;;  %v237_v5 = vld [vmem:[%s20021_s1 + $0x490] sm:$0xff] }
 0x110   :  { %4016 = vmatpush1.bf16.msra.mxu0 %v11258_v7  ;;  %v13918_v59 = vadd.f32 %v3260_v49, %v3148_v39  ;;  %v3150_v52 = vadd.f32 %v3149_v28, %v13881_v32  ;;  %v101_v36 = vld [vmem:[%s20021_s1 + $0x50] sm:$0xff] }
 0x111   :  { %4129 = vmatpush1.bf16.msra.mxu1 %v11386_v27  ;;  %4017 = vmatprep.subr.bf16.mxu0 %v11251_v40  ;;  %v3153_v45 = vpop.f32.mrf.mxu0  ;;  %v105_v37 = vld [vmem:[%s20021_s1 + $0x70] sm:$0xff] }
 0x112   :  { %4130 = vmatprep.subr.bf16.mxu1 %v11379_v42  ;;  %v13934_v2 = vadd.f32 %v3262_v53, %v3150_v52  ;;  %v3154_v3 = vadd.f32 %v3153_v45, %v13875_v60  ;;  %v229_v43 = vld [vmem:[%s20021_s1 + $0x450] sm:$0xff]  ;;  %v11218_v50 = vcombine.low %v101_v36, %v105_v37 }
 0x113   :  { %3830 = vmatmul.mubr.bf16.gmra.mxu0 %v13399_v8  ;;  %v3266_v11 = vpop.f32.mrf.mxu1  ;;  %v3155_v56 = vpop.f32.mrf.mxu0  ;;  %v11370_v8 = vcombine.low %v253_v46, %v257_v54  ;;  %v233_v29 = vld [vmem:[%s20021_s1 + $0x470] sm:$0xff] }
 0x114   :  { %3943 = vmatmul.mubr.bf16.gmra.mxu1 %v13410_v13  ;;  %4018 = vmatpush1.bf16.msra.mxu0 %v11250_v58  ;;  %v13938_v19 = vadd.f32 %v3266_v11, %v3154_v3  ;;  %v3156_v22 = vadd.f32 %v3155_v56, %v13881_v32  ;;  %v109_v13 = vld [vmem:[%s20021_s1 + $0x90] sm:$0xff]  ;;  %v11219_v58 = vcombine.high %v101_v36, %v105_v37 }
 0x115   :  { %4131 = vmatpush1.bf16.msra.mxu1 %v11378_v47  ;;  %4019 = vmatprep.subr.bf16.mxu0 %v11243_v48  ;;  %v3268_v18 = vpop.f32.mrf.mxu1  ;;  %v3157_v9 = vpop.f32.mrf.mxu0  ;;  %v11227_v21 = vcombine.high %v109_v13, %v113_v20  ;;  %v11226_v39 = vcombine.low %v109_v13, %v113_v20  ;;  %v11347_v52 = vcombine.high %v229_v43, %v233_v29  ;;  %v97_v53 = vld [vmem:[%s20021_s1 + $0x30] sm:$0xff] }
 0x116   :  { %4132 = vmatprep.subr.bf16.mxu1 %v11371_v10  ;;  %3839 = vmatprep.mubr.bf16.mxu0 %v13415_v26  ;;  %v241_v26 = vld [vmem:[%s20021_s1 + $0x4b0] sm:$0xff]  ;;  %v13955_v6 = vadd.f32 %v3268_v18, %v3156_v22  ;;  %v3158_v51 = vadd.f32 %v3157_v9, %v13875_v60  ;;  %v11346_v11 = vcombine.low %v229_v43, %v233_v29 }
 0x117   :  { %3952 = vmatprep.mubr.bf16.mxu1 %v20167_v25  ;;  %v3270_v30 = vpop.f32.mrf.mxu1  ;;  %v3159_v14 = vpop.f32.mrf.mxu0  ;;  %v11355_v40 = vcombine.high %v237_v5, %v241_v26  ;;  %v213_v18 = vld [vmem:[%s20021_s1 + $0x3d0] sm:$0xff] }
 0x118   :  { %4020 = vmatpush1.bf16.msra.mxu0 %v11242_v17  ;;  %v13958_v7 = vadd.f32 %v3270_v30, %v3158_v51  ;;  %v3160_v15 = vadd.f32 %v3159_v14, %v13881_v32  ;;  %v341_v20 = vld [vmem:[%s20021_s1 + $0x7d0] sm:$0xff] }
 0x119   :  { %4133 = vmatpush1.bf16.msra.mxu1 %v11370_v8  ;;  %4021 = vmatprep.subr.bf16.mxu0 %v11235_v16  ;;  %v3272_v27 = vpop.f32.mrf.mxu1  ;;  %v345_v9 = vld [vmem:[%s20021_s1 + $0x7f0] sm:$0xff] }
 0x11a   :  { %4134 = vmatprep.subr.bf16.mxu1 %v11363_v0  ;;  %v3163_v42 = vpop.f32.mrf.mxu0  ;;  %v13974_v33 = vadd.f32 %v3272_v27, %v3160_v15  ;;  %v217_v0 = vld [vmem:[%s20021_s1 + $0x3f0] sm:$0xff]  ;;  %v11459_v27 = vcombine.high %v341_v20, %v345_v9 }
 0x11b   :  { %3840 = vmatmul.mubr.bf16.gmra.mxu0 %v13442_v55  ;;  %v3164_v46 = vadd.f32 %v3163_v42, %v13875_v60  ;;  %v3276_v54 = vpop.f32.mrf.mxu1  ;;  %v11354_v55 = vcombine.low %v237_v5, %v241_v26  ;;  %v11331_v14 = vcombine.high %v213_v18, %v217_v0  ;;  %v333_v37 = vld [vmem:[%s20021_s1 + $0x790] sm:$0xff] }
 0x11c   :  { %3953 = vmatmul.mubr.bf16.gmra.mxu1 %v13453_v24  ;;  %4022 = vmatpush1.bf16.msra.mxu0 %v11234_v12  ;;  %v3165_v49 = vpop.f32.mrf.mxu0  ;;  %v93_v24 = vld [vmem:[%s20021_s1 + $0x10] sm:$0xff] }
 0x11d   :  { %4135 = vmatpush1.bf16.msra.mxu1 %v11362_v31  ;;  %4023 = vmatprep.subr.bf16.mxu0 %v11227_v21  ;;  %v13978_v28 = vadd.f32 %v3276_v54, %v3164_v46  ;;  %v3166_v47 = vadd.f32 %v3165_v49, %v13881_v32  ;;  %v3278_v48 = vpop.f32.mrf.mxu1  ;;  %v11211_v17 = vcombine.high %v93_v24, %v97_v53 }
 0x11e   :  { %4136 = vmatprep.subr.bf16.mxu1 %v11355_v40  ;;  %3849 = vmatprep.mubr.bf16.mxu0 %v13458_v1  ;;  %v3167_v10 = vpop.f32.mrf.mxu0  ;;  %v225_v1 = vld [vmem:[%s20021_s1 + $0x430] sm:$0xff]  ;;  %v11210_v30 = vcombine.low %v93_v24, %v97_v53  ;;  %v11330_v46 = vcombine.low %v213_v18, %v217_v0 }
 0x11f   :  { %3962 = vmatprep.mubr.bf16.mxu1 %v20167_v25  ;;  %v13995_v61 = vadd.f32 %v3278_v48, %v3166_v47  ;;  %v3168_v45 = vadd.f32 %v3167_v10, %v13875_v60  ;;  %v3280_v62 = vpop.f32.mrf.mxu1  ;;  %v11339_v22 = vcombine.high %v221_v34, %v225_v1  ;;  %v209_v40 = vld [vmem:[%s20021_s1 + $0x3b0] sm:$0xff]  ;;  %v20171_v10 = vld [vmem:[#allocation2_spill] sm:$0xff] }
 0x120   :  { %4024 = vmatpush1.bf16.msra.mxu0 %v11226_v39  ;;  %v3169_v3 = vpop.f32.mrf.mxu0  ;;  %v11458_v39 = vcombine.low %v341_v20, %v345_v9  ;;  %v201_v24 = vld [vmem:[%s20021_s1 + $0x370] sm:$0xff] }
 0x121   :  { %4137 = vmatpush1.bf16.msra.mxu1 %v11354_v55  ;;  %4025 = vmatprep.subr.bf16.mxu0 %v11219_v58  ;;  %v13998_v56 = vadd.f32 %v3280_v62, %v3168_v45  ;;  %v3170_v8 = vadd.f32 %v3169_v3, %v13881_v32  ;;  %v3282_v16 = vpop.f32.mrf.mxu1  ;;  %v20172_v3 = vld [vmem:[#allocation3_spill] sm:$0xff]  ;;  %v189_v9 = vld [vmem:[%s20021_s1 + $0x310] sm:$0xff] }
 0x122   :  { %4138 = vmatprep.subr.bf16.mxu1 %v11347_v52  ;;  %v3173_v13 = vpop.f32.mrf.mxu0  ;;  %v197_v52 = vld [vmem:[%s20021_s1 + $0x350] sm:$0xff] }
 0x123   :  { %3850 = vmatmul.mubr.bf16.gmra.mxu0 %v13485_v35  ;;  %v14014_v5 = vadd.f32 %v3282_v16, %v3170_v8  ;;  %v3174_v26 = vadd.f32 %v3173_v13, %v13875_v60  ;;  %v3286_v51 = vpop.f32.mrf.mxu1  ;;  %v11338_v35 = vcombine.low %v221_v34, %v225_v1  ;;  %v325_v34 = vld [vmem:[%s20021_s1 + $0x750] sm:$0xff]  ;;  %v11315_v16 = vcombine.high %v197_v52, %v201_v24 }
 0x124   :  { %3963 = vmatmul.mubr.bf16.gmra.mxu1 %v13496_v44  ;;  %4026 = vmatpush1.bf16.msra.mxu0 %v11218_v50  ;;  %v3175_v12 = vpop.f32.mrf.mxu0  ;;  %v205_v44 = vld [vmem:[%s20021_s1 + $0x390] sm:$0xff] }
 0x125   :  { %4139 = vmatpush1.bf16.msra.mxu1 %v11346_v11  ;;  %4027 = vmatprep.subr.bf16.mxu0 %v11211_v17  ;;  %v14018_v31 = vadd.f32 %v3286_v51, %v3174_v26  ;;  %v3176_v21 = vadd.f32 %v3175_v12, %v13881_v32  ;;  %v3288_v15 = vpop.f32.mrf.mxu1  ;;  %v11323_v49 = vcombine.high %v205_v44, %v209_v40  ;;  %v329_v1 = vld [vmem:[%s20021_s1 + $0x770] sm:$0xff] }
 0x126   :  { %4140 = vmatprep.subr.bf16.mxu1 %v11339_v22  ;;  %3859 = vmatprep.mubr.bf16.mxu0 %v13501_v23  ;;  %v3177_v36 = vpop.f32.mrf.mxu0  ;;  %v337_v23 = vld [vmem:[%s20021_s1 + $0x7b0] sm:$0xff]  ;;  %v11322_v11 = vcombine.low %v205_v44, %v209_v40  ;;  %v11443_v20 = vcombine.high %v325_v34, %v329_v1  ;;  %v11442_v44 = vcombine.low %v325_v34, %v329_v1 }
 0x127   :  { %3972 = vmatprep.mubr.bf16.mxu1 %v20167_v25  ;;  %v14035_v42 = vadd.f32 %v3288_v15, %v3176_v21  ;;  %v3178_v43 = vadd.f32 %v3177_v36, %v13875_v60  ;;  %v3290_v29 = vpop.f32.mrf.mxu1  ;;  %v11451_v48 = vcombine.high %v333_v37, %v337_v23  ;;  %v11450_v8 = vcombine.low %v333_v37, %v337_v23  ;;  %v20173_v13 = vld [vmem:[#allocation4_spill] sm:$0xff] }
 0x128   :  { %4028 = vmatpush1.bf16.msra.mxu0 %v11210_v30  ;;  %v3179_v54 = vpop.f32.mrf.mxu0  ;;  %v193_v26 = vld [vmem:[%s20021_s1 + $0x330] sm:$0xff]  ;;  %v11314_v15 = vcombine.low %v197_v52, %v201_v24  ;;  %v20175_v24 = vld [vmem:[#allocation6_spill] sm:$0xff] }
 0x129   :  { %4141 = vmatpush1.bf16.msra.mxu1 %v11338_v35  ;;  %4029 = vmatprep.subr.bf16.mxu0 %v11331_v14  ;;  %v14038_v55 = vadd.f32 %v3290_v29, %v3178_v43  ;;  %v3180_v58 = vadd.f32 %v3179_v54, %v13881_v32  ;;  %v3292_v47 = vpop.f32.mrf.mxu1  ;;  %v317_v30 = vld [vmem:[%s20021_s1 + $0x710] sm:$0xff]  ;;  %v11307_v40 = vcombine.high %v189_v9, %v193_v26 }
 0x12a   :  { %4142 = vmatprep.subr.bf16.mxu1 %v11459_v27  ;;  %v321_v12 = vld [vmem:[%s20021_s1 + $0x730] sm:$0xff] }
 0x12b   :  { %v3183_v53 = vpop.f32.mrf.mxu0  ;;  %3860 = vmatmul.mubr.bf16.gmra.mxu0 %v20171_v10  ;;  %v14054_v45 = vadd.f32 %v3292_v47, %v3180_v58  ;;  %v11435_v43 = vcombine.high %v317_v30, %v321_v12  ;;  %v181_v29 = vld [vmem:[%s20021_s1 + $0x2d0] sm:$0xff]  ;;  %v11434_v34 = vcombine.low %v317_v30, %v321_v12 }
 0x12c   :  { %v3184_v62 = vadd.f32 %v3183_v53, %v13875_v60  ;;  %v3296_v50 = vpop.f32.mrf.mxu1  ;;  %3973 = vmatmul.mubr.bf16.gmra.mxu1 %v20172_v3  ;;  %4030 = vmatpush2.bf16.msra.mxu0 %v11330_v46  ;;  %v185_v46 = vld [vmem:[%s20021_s1 + $0x2f0] sm:$0xff]  ;;  %v11306_v53 = vcombine.low %v189_v9, %v193_v26 }
 0x12d   :  { %4143 = vmatpush2.bf16.msra.mxu1 %v11458_v39  ;;  %v3185_v17 = vpop.f32.mrf.mxu0  ;;  %4031 = vmatprep.subr.bf16.mxu0 %v11323_v49  ;;  %v20174_v39 = vld [vmem:[#allocation5_spill] sm:$0xff]  ;;  %v309_v49 = vld [vmem:[%s20021_s1 + $0x6d0] sm:$0xff]  ;;  %v11299_v1 = vcombine.high %v181_v29, %v185_v46 }
 0x12e   :  { %v14058_v22 = vadd.f32 %v3296_v50, %v3184_v62  ;;  %v3186_v18 = vadd.f32 %v3185_v17, %v13881_v32  ;;  %v3298_v0 = vpop.f32.mrf.mxu1  ;;  %4144 = vmatprep.subr.bf16.mxu1 %v11451_v48  ;;  %3869 = vmatprep.mubr.bf16.mxu0 %v20173_v13  ;;  %v313_v58 = vld [vmem:[%s20021_s1 + $0x6f0] sm:$0xff] }
 0x12f   :  { %v3187_v51 = vpop.f32.mrf.mxu0  ;;  %3982 = vmatprep.mubr.bf16.mxu1 %v20167_v25  ;;  %v11427_v17 = vcombine.high %v309_v49, %v313_v58  ;;  %v305_v13 = vld [vmem:[%s20021_s1 + $0x6b0] sm:$0xff]  ;;  %v11426_v12 = vcombine.low %v309_v49, %v313_v58  ;;  %v12636_v58 = vld [vmem:[%s20022_s0 + $0x168] ss:$28 sps:$4 sm:$0xff]  }
 0x130   :  { %v14075_v35 = vadd.f32 %v3298_v0, %v3186_v18  ;;  %v3188_v14 = vadd.f32 %v3187_v51, %v13875_v60  ;;  %v3300_v21 = vpop.f32.mrf.mxu1  ;;  %4032 = vmatpush2.bf16.msra.mxu0 %v11322_v11  ;;  %v12634_v11 = vld [vmem:[%s20022_s0 + $0x164] ss:$28 sps:$4 sm:$0xff]   ;;  %v301_v0 = vld [vmem:[%s20021_s1 + $0x690] sm:$0xff]  ;;  %v11298_v51 = vcombine.low %v181_v29, %v185_v46 }
 0x131   :  { %4145 = vmatpush2.bf16.msra.mxu1 %v11450_v8  ;;  %v3189_v27 = vpop.f32.mrf.mxu0  ;;  %4033 = vmatprep.subr.bf16.mxu0 %v11315_v16  ;;  %v173_v8 = vld [vmem:[%s20021_s1 + $0x290] sm:$0xff] }
 0x132   :  { %v14078_v36 = vadd.f32 %v3300_v21, %v3188_v14  ;;  %v3190_v37 = vadd.f32 %v3189_v27, %v13881_v32  ;;  %v3302_v23 = vpop.f32.mrf.mxu1  ;;  %4146 = vmatprep.subr.bf16.mxu1 %v11443_v20  ;;  %v177_v16 = vld [vmem:[%s20021_s1 + $0x2b0] sm:$0xff] }
 0x133   :  { %v3193_v54 = vpop.f32.mrf.mxu0  ;;  %3870 = vmatmul.mubr.bf16.gmra.mxu0 %v20174_v39  ;;  %v11291_v14 = vcombine.high %v173_v8, %v177_v16  ;;  %v293_v29 = vld [vmem:[%s20021_s1 + $0x650] sm:$0xff] }
 0x134   :  { %v14094_v47 = vadd.f32 %v3302_v23, %v3190_v37  ;;  %v3194_v48 = vadd.f32 %v3193_v54, %v13875_v60  ;;  %v3306_v52 = vpop.f32.mrf.mxu1  ;;  %3983 = vmatmul.mubr.bf16.gmra.mxu1 %v20175_v24  ;;  %4034 = vmatpush2.bf16.msra.mxu0 %v11314_v15  ;;  %v169_v37 = vld [vmem:[%s20021_s1 + $0x270] sm:$0xff]  ;;  %v11418_v24 = vcombine.low %v301_v0, %v305_v13 }
 0x135   :  { %4147 = vmatpush2.bf16.msra.mxu1 %v11442_v44  ;;  %v3195_v10 = vpop.f32.mrf.mxu0  ;;  %4035 = vmatprep.subr.bf16.mxu0 %v11307_v40  ;;  %v11419_v44 = vcombine.high %v301_v0, %v305_v13  ;;  %v165_v40 = vld [vmem:[%s20021_s1 + $0x250] sm:$0xff] }
 0x136   :  { %v14098_v62 = vadd.f32 %v3306_v52, %v3194_v48  ;;  %v3196_v50 = vadd.f32 %v3195_v10, %v13881_v32  ;;  %v3308_v3 = vpop.f32.mrf.mxu1  ;;  %4148 = vmatprep.subr.bf16.mxu1 %v11435_v43  ;;  %3879 = vmatprep.mubr.bf16.mxu0 %v12634_v11  ;;  %v12635_v43 = vld [vmem:[%s20022_s0 + $0x160] ss:$28 sps:$4 sm:$0xff]   ;;  %v297_v46 = vld [vmem:[%s20021_s1 + $0x670] sm:$0xff]  ;;  %v11290_v48 = vcombine.low %v173_v8, %v177_v16 }
 0x137   :  { %v3197_v18 = vpop.f32.mrf.mxu0  ;;  %3992 = vmatprep.mubr.bf16.mxu1 %v20167_v25  ;;  %v157_v11 = vld [vmem:[%s20021_s1 + $0x210] sm:$0xff] }
 0x138   :  { %v14117_v20 = vadd.f32 %v3308_v3, %v3196_v50  ;;  %v3198_v9 = vadd.f32 %v3197_v18, %v13875_v60  ;;  %v3310_v26 = vpop.f32.mrf.mxu1  ;;  %4036 = vmatpush2.bf16.msra.mxu0 %v11306_v53  ;;  %v11283_v53 = vcombine.high %v165_v40, %v169_v37  ;;  %v12637_v50 = vld [vmem:[%s20022_s0 + $0x19c] ss:$28 sps:$4 sm:$0xff]   ;;  %v11411_v3 = vcombine.high %v293_v29, %v297_v46  ;;  %v285_v16 = vld [vmem:[%s20021_s1 + $0x610] sm:$0xff] }
 0x139   :  { %4149 = vmatpush2.bf16.msra.mxu1 %v11434_v34  ;;  %v3199_v30 = vpop.f32.mrf.mxu0  ;;  %4037 = vmatprep.subr.bf16.mxu0 %v11299_v1  ;;  %v289_v18 = vld [vmem:[%s20021_s1 + $0x630] sm:$0xff] }
 0x13a   :  { %v14120_v21 = vadd.f32 %v3310_v26, %v3198_v9  ;;  %v3200_v15 = vadd.f32 %v3199_v30, %v13881_v32  ;;  %v3312_v27 = vpop.f32.mrf.mxu1  ;;  %4150 = vmatprep.subr.bf16.mxu1 %v11427_v17  ;;  %v161_v17 = vld [vmem:[%s20021_s1 + $0x230] sm:$0xff]  ;;  %v11282_v26 = vcombine.low %v165_v40, %v169_v37  ;;  %v11410_v30 = vcombine.low %v293_v29, %v297_v46 }
 0x13b   :  { %v3203_v23 = vpop.f32.mrf.mxu0  ;;  %3880 = vmatmul.mubr.bf16.gmra.mxu0 %v12635_v43  ;;  %v409_v40 = vld [vmem:[%s20021_s1 + $0x9f0] sm:$0xff] }
 0x13c   :  { %v14138_v54 = vadd.f32 %v3312_v27, %v3200_v15  ;;  %v3204_v39 = vadd.f32 %v3203_v23, %v13875_v60  ;;  %v3316_v49 = vpop.f32.mrf.mxu1  ;;  %3993 = vmatmul.mubr.bf16.gmra.mxu1 %v12636_v58  ;;  %4038 = vmatpush2.bf16.msra.mxu0 %v11298_v51  ;;  %v405_v23 = vld [vmem:[%s20021_s1 + $0x9d0] sm:$0xff] }
 0x13d   :  { %4151 = vmatpush2.bf16.msra.mxu1 %v11426_v12  ;;  %v3205_v52 = vpop.f32.mrf.mxu0  ;;  %4039 = vmatprep.subr.bf16.mxu0 %v11291_v14  ;;  %v11275_v12 = vcombine.high %v157_v11, %v161_v17  ;;  %v12638_v43 = vld [vmem:[%s20022_s0 + $0x198] ss:$28 sps:$4 sm:$0xff]  }
 0x13e   :  { %v14144_v10 = vadd.f32 %v3316_v49, %v3204_v39  ;;  %v3206_v34 = vadd.f32 %v3205_v52, %v13881_v32  ;;  %v3318_v1 = vpop.f32.mrf.mxu1  ;;  %4152 = vmatprep.subr.bf16.mxu1 %v11419_v44  ;;  %3889 = vmatprep.mubr.bf16.mxu0 %v12637_v50  ;;  %v11403_v44 = vcombine.high %v285_v16, %v289_v18  ;;  %v533_v29 = vld [vmem:[%s20021_s1 + $0xdd0] sm:$0xff] }
 0x13f   :  { %v3207_v8 = vpop.f32.mrf.mxu0  ;;  %4002 = vmatprep.mubr.bf16.mxu1 %v20167_v25  ;;  %v537_v46 = vld [vmem:[%s20021_s1 + $0xdf0] sm:$0xff]  ;;  %v11274_v52 = vcombine.low %v157_v11, %v161_v17 }
 0x140   :  { %v14163_v0 = vadd.f32 %v3318_v1, %v3206_v34  ;;  %v3208_v13 = vadd.f32 %v3207_v8, %v13875_v60  ;;  %v3320_v9 = vpop.f32.mrf.mxu1  ;;  %4040 = vmatpush2.bf16.msra.mxu0 %v11290_v48  ;;  %v12639_v48 = vld [vmem:[%s20022_s0 + $0x1a0] ss:$28 sps:$4 sm:$0xff]   ;;  %v11523_v34 = vcombine.high %v405_v23, %v409_v40  ;;  %v397_v11 = vld [vmem:[%s20021_s1 + $0x990] sm:$0xff] }
 0x141   :  { %4153 = vmatpush2.bf16.msra.mxu1 %v11418_v24  ;;  %v3209_v51 = vpop.f32.mrf.mxu0  ;;  %4041 = vmatprep.subr.bf16.mxu0 %v11283_v53  ;;  %v11402_v53 = vcombine.low %v285_v16, %v289_v18  ;;  %v12640_v8 = vld [vmem:[%s20022_s0 + $0x4] ss:$28 sps:$4 sm:$0xff]   ;;  %v401_v17 = vld [vmem:[%s20021_s1 + $0x9b0] sm:$0xff]  ;;  %v12641_v18 = vld [vmem:[%s20022_s0 + $0xc] ss:$28 sps:$4 sm:$0xff]  }
 0x142   :  { %v14166_v14 = vadd.f32 %v3320_v9, %v3208_v13  ;;  %v3210_v15 = vadd.f32 %v3209_v51, %v13881_v32  ;;  %v3322_v27 = vpop.f32.mrf.mxu1  ;;  %4154 = vmatprep.subr.bf16.mxu1 %v11411_v3  ;;  %v11651_v13 = vcombine.high %v533_v29, %v537_v46 }
 0x143   :  { %v3213_v37 = vpop.f32.mrf.mxu0  ;;  %3890 = vmatmul.mubr.bf16.gmra.mxu0 %v12638_v43 }
 0x144   :  { %v14184_v39 = vadd.f32 %v3322_v27, %v3210_v15  ;;  %v3214_v49 = vadd.f32 %v3213_v37, %v13875_v60  ;;  %v3326_v58 = vpop.f32.mrf.mxu1  ;;  %4003 = vmatmul.mubr.bf16.gmra.mxu1 %v12639_v48  ;;  %4042 = vmatpush2.bf16.msra.mxu0 %v11282_v26  ;;  %v529_v15 = vld [vmem:[%s20021_s1 + $0xdb0] sm:$0xff]  ;;  %v11515_v37 = vcombine.high %v397_v11, %v401_v17 }
 0x145   :  { %4155 = vmatpush2.bf16.msra.mxu1 %v11410_v30  ;;  %v3215_v24 = vpop.f32.mrf.mxu0  ;;  %4043 = vmatprep.subr.bf16.mxu0 %v11275_v12  ;;  %v11522_v30 = vcombine.low %v405_v23, %v409_v40  ;;  %v525_v12 = vld [vmem:[%s20021_s1 + $0xd90] sm:$0xff] }
 0x146   :  { %v14190_v1 = vadd.f32 %v3326_v58, %v3214_v49  ;;  %v3216_v50 = vadd.f32 %v3215_v24, %v13881_v32  ;;  %v3328_v3 = vpop.f32.mrf.mxu1  ;;  %4156 = vmatprep.subr.bf16.mxu1 %v11403_v44  ;;  %4045 = vmatprep.mubr.bf16.mxu0 %v12640_v8  ;;  %v11650_v44 = vcombine.low %v533_v29, %v537_v46  ;;  %v389_v23 = vld [vmem:[%s20021_s1 + $0x950] sm:$0xff]  ;;  %v12642_v29 = vld [vmem:[%s20022_s0] ss:$28 sps:$4 sm:$0xff]  }
 0x147   :  { %v3217_v16 = vpop.f32.mrf.mxu0  ;;  %4158 = vmatprep.mubr.bf16.mxu1 %v12641_v18  ;;  %v393_v40 = vld [vmem:[%s20021_s1 + $0x970] sm:$0xff]  ;;  %v11643_v46 = vcombine.high %v525_v12, %v529_v15 }
 0x148   :  { %v14205_v9 = vadd.f32 %v3328_v3, %v3216_v50  ;;  %v3218_v26 = vadd.f32 %v3217_v16, %v13875_v60  ;;  %v3330_v51 = vpop.f32.mrf.mxu1  ;;  %4044 = vmatpush2.bf16.msra.mxu0 %v11274_v52  ;;  %v14234_v48 = vld [vmem:[%s20021_s1 + $0xd70] sm:$0xff]  ;;  %v11514_v50 = vcombine.low %v397_v11, %v401_v17  ;;  %v11507_v8 = vcombine.high %v389_v23, %v393_v40 }
 0x149   :  { %4157 = vmatpush2.bf16.msra.mxu1 %v11402_v53  ;;  %v3219_v27 = vpop.f32.mrf.mxu0  ;;  %4239 = vmatprep.subr.bf16.mxu0 %v11523_v34  ;;  %v12643_v34 = vld [vmem:[%s20022_s0 + $0x8] ss:$28 sps:$4 sm:$0xff]   ;;  %v381_v11 = vld [vmem:[%s20021_s1 + $0x910] sm:$0xff] }
 0x14a   :  { %v14214_v43 = vadd.f32 %v3330_v51, %v3218_v26  ;;  %v3220_v60 = vadd.f32 %v3219_v27, %v13881_v32  ;;  %v3332_v49 = vpop.f32.mrf.mxu1  ;;  %4352 = vmatprep.subr.bf16.mxu1 %v11651_v13  ;;  %v14229_v32 = vld [vmem:[%s20021_s1 + $0xd50] sm:$0xff]  ;;  %v11642_v13 = vcombine.low %v525_v12, %v529_v15  ;;  %v12645_v51 = vld [vmem:[%s20022_s0 + $0x44] ss:$28 sps:$4 sm:$0xff]  }
 0x14b   :  { %v3369_v58 = vpop.f32.mrf.mxu0  ;;  %4046 = vmatmul.mubr.bf16.vlgmr.msra.gmra.mxu0 %v12642_v29  ;;  %v385_v17 = vld [vmem:[%s20021_s1 + $0x930] sm:$0xff] }
 0x14c   :  { %v14236_v52 = vadd.f32 %v3332_v49, %v3220_v60  ;;  %v3370_v24 = vadd.f32 %v3369_v58, %v13898_v41  ;;  %v3482_v53 = vpop.f32.mrf.mxu1  ;;  %4159 = vmatmul.mubr.bf16.vlgmr.msra.gmra.mxu1 %v12643_v34  ;;  %4240 = vmatpush1.bf16.msra.mxu0 %v11522_v30  ;;  %v12644_v41 = vld [vmem:[%s20022_s0 + $0x3c] ss:$28 sps:$4 sm:$0xff]   ;;  %v14266_v60 = vld [vmem:[%s20021_s1 + $0xd30] sm:$0xff]  ;;  %v11499_v58 = vcombine.high %v381_v11, %v385_v17 }
 0x14d   :  { %v3371_v3 = vpop.f32.mrf.mxu0  ;;  %4353 = vmatpush1.bf16.msra.mxu1 %v11650_v44  ;;  %4241 = vmatprep.subr.bf16.mxu0 %v11515_v37  ;;  %v11506_v44 = vcombine.low %v389_v23, %v393_v40  ;;  %v14261_v37 = vld [vmem:[%s20021_s1 + $0xd10] sm:$0xff]  ;;  %v11498_v34 = vcombine.low %v381_v11, %v385_v17 }
 0x14e   :  { %v3483_v16 = vadd.f32 %v3482_v53, %v3370_v24  ;;  %v3372_v18 = vadd.f32 %v3371_v3, %v13915_v38  ;;  %v3484_v26 = vpop.f32.mrf.mxu1  ;;  %4055 = vmatprep.mubr.bf16.mxu0 %v12644_v41  ;;  %4168 = vmatprep.mubr.bf16.mxu1 %v12645_v51  ;;  %v11635_v38 = vcombine.high %v14229_v32, %v14234_v48  ;;  %v14272_v23 = vld [vmem:[%s20021_s1 + $0x8d0] sm:$0xff] }
 0x14f   :  { %v3373_v30 = vpop.f32.mrf.mxu0  ;;  %4354 = vmatprep.subr.bf16.mxu1 %v11643_v46  ;;  %v14277_v40 = vld [vmem:[%s20021_s1 + $0x8f0] sm:$0xff]  ;;  %v11634_v24 = vcombine.low %v14229_v32, %v14234_v48  ;;  %v12647_v32 = vld [vmem:[%s20022_s0 + $0x40] ss:$28 sps:$4 sm:$0xff]   ;;  %v11626_v17 = vcombine.low %v14261_v37, %v14266_v60 }
 0x150   :  { %v3485_v12 = vadd.f32 %v3484_v26, %v3372_v18  ;;  %v3374_v15 = vadd.f32 %v3373_v30, %v13918_v59  ;;  %v3486_v27 = vpop.f32.mrf.mxu1  ;;  %4242 = vmatpush1.bf16.msra.mxu0 %v11514_v50  ;;  %v11627_v50 = vcombine.high %v14261_v37, %v14266_v60  ;;  %v4917_v3 = vmax.f32 %v3483_v16, 0.0  ;;  %v14293_v48 = vld [vmem:[%s20021_s1 + $0xcd0] sm:$0xff] }
 0x151   :  { %v3375_v49 = vpop.f32.mrf.mxu0  ;;  %4243 = vmatprep.subr.bf16.mxu0 %v11507_v8  ;;  %4355 = vmatpush1.bf16.msra.mxu1 %v11642_v13  ;;  %v14298_v16 = vld [vmem:[%s20021_s1 + $0xcf0] sm:$0xff]  ;;  %v11491_v11 = vcombine.high %v14272_v23, %v14277_v40 }
 0x152   :  { %v3487_v29 = vadd.f32 %v3486_v27, %v3374_v15  ;;  %v3376_v59 = vadd.f32 %v3375_v49, %v13934_v2  ;;  %v3488_v46 = vpop.f32.mrf.mxu1  ;;  %4356 = vmatprep.subr.bf16.mxu1 %v11635_v38  ;;  %v12646_v2 = vld [vmem:[%s20022_s0 + $0x38] ss:$28 sps:$4 sm:$0xff]   ;;  %v4918_v41 = vmax.f32 %v3485_v12, 0.0 }
 0x153   :  { %v3379_v53 = vpop.f32.mrf.mxu0  ;;  %4056 = vmatmul.mubr.bf16.gmra.mxu0 %v12646_v2  ;;  %v14316_v49 = vld [vmem:[%s20021_s1 + $0x890] sm:$0xff] }
 0x154   :  { %v4925_v8 = vmax.f32 %v3487_v29, 0.0  ;;  %v3489_v13 = vadd.f32 %v3488_v46, %v3376_v59  ;;  %v3380_v18 = vadd.f32 %v3379_v53, %v13938_v19  ;;  %v3492_v26 = vpop.f32.mrf.mxu1  ;;  %4169 = vmatmul.mubr.bf16.gmra.mxu1 %v12647_v32  ;;  %4244 = vmatpush1.bf16.msra.mxu0 %v11506_v44  ;;  %v12648_v19 = vld [vmem:[%s20022_s0 + $0x74] ss:$28 sps:$4 sm:$0xff]   ;;  %v12649_v44 = vld [vmem:[%s20022_s0 + $0x7c] ss:$28 sps:$4 sm:$0xff]  }
 0x155   :  { %v3381_v51 = vpop.f32.mrf.mxu0  ;;  %4245 = vmatprep.subr.bf16.mxu0 %v11499_v58  ;;  %4065 = vmatprep.mubr.bf16.mxu0 %v12648_v19  ;;  %v369_v37 = vld [vmem:[%s20021_s1 + $0x8b0] sm:$0xff] }
 0x156   :  { %v14307_v38 = vpack.c.bf16 %v4925_v8, %v4917_v3  ;;  %v4926_v30 = vmax.f32 %v3489_v13, 0.0  ;;  %v3493_v15 = vadd.f32 %v3492_v26, %v3380_v18  ;;  %v3382_v27 = vadd.f32 %v3381_v51, %v13955_v6  ;;  %v3494_v12 = vpop.f32.mrf.mxu1  ;;  %4178 = vmatprep.mubr.bf16.mxu1 %v12649_v44  ;;  %4357 = vmatpush1.bf16.msra.mxu1 %v11634_v24  ;;  %v14331_v53 = vld [vmem:[%s20021_s1 + $0xc90] sm:$0xff] }
 0x157   :  { %v3383_v60 = vpop.f32.mrf.mxu0  ;;  %4358 = vmatprep.subr.bf16.mxu1 %v11627_v50  ;;  %v11619_v6 = vcombine.high %v14293_v48, %v14298_v16  ;;  %v11490_v24 = vcombine.low %v14272_v23, %v14277_v40  ;;  %v14336_v2 = vld [vmem:[%s20021_s1 + $0xcb0] sm:$0xff]  ;;  %v11483_v3 = vcombine.high %v14316_v49, %v369_v37  ;;  %v11618_v13 = vcombine.low %v14293_v48, %v14298_v16 }
 0x158   :  { %20176 = vst [vmem:[#allocation2_spill] sm:$0xff] %v14307_v38  ;;  %v14323_v58 = vpack.c.bf16 %v4926_v30, %v4918_v41  ;;  %v3495_v29 = vadd.f32 %v3494_v12, %v3382_v27  ;;  %v3384_v59 = vadd.f32 %v3383_v60, %v13958_v7  ;;  %v3496_v46 = vpop.f32.mrf.mxu1  ;;  %4246 = vmatpush1.bf16.msra.mxu0 %v11498_v34  ;;  %v14343_v23 = vld [vmem:[%s20021_s1 + $0x850] sm:$0xff]  ;;  %v4933_v41 = vmax.f32 %v3493_v15, 0.0 }
 0x159   :  { %v3385_v50 = vpop.f32.mrf.mxu0  ;;  %4247 = vmatprep.subr.bf16.mxu0 %v11491_v11  ;;  %v14348_v40 = vld [vmem:[%s20021_s1 + $0x870] sm:$0xff]  ;;  %v11482_v26 = vcombine.low %v14316_v49, %v369_v37  ;;  %v11611_v32 = vcombine.high %v14331_v53, %v14336_v2  ;;  %v11610_v44 = vcombine.low %v14331_v53, %v14336_v2 }
 0x15a   :  { %20177 = vst [vmem:[#allocation3_spill] sm:$0xff] %v14323_v58  ;;  %v3497_v7 = vadd.f32 %v3496_v46, %v3384_v59  ;;  %v3386_v34 = vadd.f32 %v3385_v50, %v13974_v33  ;;  %v3498_v8 = vpop.f32.mrf.mxu1  ;;  %4359 = vmatpush1.bf16.msra.mxu1 %v11626_v17  ;;  %v12650_v33 = vld [vmem:[%s20022_s0 + $0x70] ss:$28 sps:$4 sm:$0xff]   ;;  %v12651_v48 = vld [vmem:[%s20022_s0 + $0x78] ss:$28 sps:$4 sm:$0xff]   ;;  %v4934_v15 = vmax.f32 %v3495_v29, 0.0  ;;  %v11475_v12 = vcombine.high %v14343_v23, %v14348_v40 }
 0x15b   :  { %v3389_v18 = vpop.f32.mrf.mxu0  ;;  %4066 = vmatmul.mubr.bf16.gmra.mxu0 %v12650_v33  ;;  %4360 = vmatprep.subr.bf16.mxu1 %v11619_v6  ;;  %v14365_v16 = vld [vmem:[%s20021_s1 + $0xc50] sm:$0xff] }
 0x15c   :  { %v4941_v51 = vmax.f32 %v3497_v7, 0.0  ;;  %v3499_v19 = vadd.f32 %v3498_v8, %v3386_v34  ;;  %v3390_v11 = vadd.f32 %v3389_v18, %v13978_v28  ;;  %v3502_v17 = vpop.f32.mrf.mxu1  ;;  %4179 = vmatmul.mubr.bf16.gmra.mxu1 %v12651_v48  ;;  %4248 = vmatpush1.bf16.msra.mxu0 %v11490_v24  ;;  %v14370_v30 = vld [vmem:[%s20021_s1 + $0xc70] sm:$0xff]  ;;  %v12652_v28 = vld [vmem:[%s20022_s0 + $0xac] ss:$28 sps:$4 sm:$0xff]   ;;  %v11474_v34 = vcombine.low %v14343_v23, %v14348_v40 }
 0x15d   :  { %v3391_v27 = vpop.f32.mrf.mxu0  ;;  %4249 = vmatprep.subr.bf16.mxu0 %v11483_v3  ;;  %4075 = vmatprep.mubr.bf16.mxu0 %v12652_v28  ;;  %v12653_v59 = vld [vmem:[%s20022_s0 + $0xb4] ss:$28 sps:$4 sm:$0xff]  }
 0x15e   :  { %v14379_v49 = vpack.c.bf16 %v4941_v51, %v4933_v41  ;;  %v4942_v37 = vmax.f32 %v3499_v19, 0.0  ;;  %v3503_v60 = vadd.f32 %v3502_v17, %v3390_v11  ;;  %v3392_v6 = vadd.f32 %v3391_v27, %v13995_v61  ;;  %v3504_v29 = vpop.f32.mrf.mxu1  ;;  %4188 = vmatprep.mubr.bf16.mxu1 %v12653_v59  ;;  %v14388_v46 = vld [vmem:[%s20021_s1 + $0x810] sm:$0xff]  ;;  %4361 = vmatpush1.bf16.msra.mxu1 %v11618_v13 }
 0x15f   :  { %v14393_v24 = vld [vmem:[%s20021_s1 + $0x830] sm:$0xff]  ;;  %v3393_v53 = vpop.f32.mrf.mxu0  ;;  %4362 = vmatprep.subr.bf16.mxu1 %v11611_v32  ;;  %v11603_v61 = vcombine.high %v14365_v16, %v14370_v30  ;;  %v11602_v41 = vcombine.low %v14365_v16, %v14370_v30  ;;  %v14435_v30 = vld [vmem:[%s20021_s1 + $0x5d8] sm:$0xff] }
 0x160   :  { %v14397_v2 = vpack.c.bf16 %v4942_v37, %v4934_v15  ;;  %v3505_v50 = vadd.f32 %v3504_v29, %v3392_v6  ;;  %v3394_v3 = vadd.f32 %v3393_v53, %v13998_v56  ;;  %v3506_v7 = vpop.f32.mrf.mxu1  ;;  %4250 = vmatpush1.bf16.msra.mxu0 %v11482_v26  ;;  %v477_v8 = vld [vmem:[%s20021_s1 + $0xc10] sm:$0xff]  ;;  %v11467_v33 = vcombine.high %v14388_v46, %v14393_v24 }
 0x161   :  { %v481_v13 = vld [vmem:[%s20021_s1 + $0xc30] sm:$0xff]  ;;  %v3395_v18 = vpop.f32.mrf.mxu0  ;;  %4251 = vmatprep.subr.bf16.mxu0 %v11475_v12  ;;  %v11466_v19 = vcombine.low %v14388_v46, %v14393_v24  ;;  %v4949_v17 = vmax.f32 %v3503_v60, 0.0  ;;  %v14440_v12 = vld [vmem:[%s20021_s1 + $0x5f8] sm:$0xff] }
 0x162   :  { %20178 = vst [vmem:[#allocation4_spill] sm:$0xff] %v14397_v2  ;;  %v3507_v32 = vadd.f32 %v3506_v7, %v3394_v3  ;;  %v3396_v56 = vadd.f32 %v3395_v18, %v14014_v5  ;;  %v3508_v26 = vpop.f32.mrf.mxu1  ;;  %v14414_v23 = vld [vmem:[%s20021_s1 + $0xbd0] sm:$0xff]  ;;  %4363 = vmatpush1.bf16.msra.mxu1 %v11610_v44  ;;  %v12654_v5 = vld [vmem:[%s20022_s0 + $0xa8] ss:$28 sps:$4 sm:$0xff]   ;;  %v11595_v11 = vcombine.high %v477_v8, %v481_v13  ;;  %v4950_v44 = vmax.f32 %v3505_v50, 0.0 }
 0x163   :  { %v14419_v40 = vld [vmem:[%s20021_s1 + $0xbf0] sm:$0xff]  ;;  %v3399_v51 = vpop.f32.mrf.mxu0  ;;  %4076 = vmatmul.mubr.bf16.gmra.mxu0 %v12654_v5  ;;  %4364 = vmatprep.subr.bf16.mxu1 %v11603_v61  ;;  %v11594_v6 = vcombine.low %v477_v8, %v481_v13  ;;  %v12657_v61 = vld [vmem:[%s20022_s0 + $0xec] ss:$28 sps:$4 sm:$0xff]  }
 0x164   :  { %v4957_v48 = vmax.f32 %v3507_v32, 0.0  ;;  %v3509_v15 = vadd.f32 %v3508_v26, %v3396_v56  ;;  %v3400_v27 = vadd.f32 %v3399_v51, %v14018_v31  ;;  %v3512_v28 = vpop.f32.mrf.mxu1  ;;  %v12655_v16 = vld [vmem:[%s20022_s0 + $0xb0] ss:$28 sps:$4 sm:$0xff]   ;;  %4252 = vmatpush1.bf16.msra.mxu0 %v11474_v34  ;;  %v12656_v31 = vld [vmem:[%s20022_s0 + $0xe4] ss:$28 sps:$4 sm:$0xff]   ;;  %v11587_v60 = vcombine.high %v14414_v23, %v14419_v40 }
 0x165   :  { %4189 = vmatmul.mubr.bf16.gmra.mxu1 %v12655_v16  ;;  %v3401_v37 = vpop.f32.mrf.mxu0  ;;  %4253 = vmatprep.subr.bf16.mxu0 %v11467_v33  ;;  %v461_v50 = vld [vmem:[%s20021_s1 + $0xb90] sm:$0xff]  ;;  %v11586_v33 = vcombine.low %v14414_v23, %v14419_v40  ;;  %v12658_v23 = vld [vmem:[%s20022_s0 + $0xe0] ss:$28 sps:$4 sm:$0xff]  }
 0x166   :  { %4085 = vmatprep.mubr.bf16.mxu0 %v12656_v31  ;;  %v14447_v29 = vpack.c.bf16 %v4957_v48, %v4949_v17  ;;  %v4958_v59 = vmax.f32 %v3509_v15, 0.0  ;;  %v3513_v46 = vadd.f32 %v3512_v28, %v3400_v27  ;;  %v3402_v24 = vadd.f32 %v3401_v37, %v14035_v42  ;;  %v3514_v53 = vpop.f32.mrf.mxu1  ;;  %4198 = vmatprep.mubr.bf16.mxu1 %v12657_v61  ;;  %v465_v3 = vld [vmem:[%s20021_s1 + $0xbb0] sm:$0xff]  ;;  %v12659_v27 = vld [vmem:[%s20022_s0 + $0xe8] ss:$28 sps:$4 sm:$0xff]  }
 0x167   :  { %4365 = vmatpush1.bf16.msra.mxu1 %v11602_v41  ;;  %v3403_v7 = vpop.f32.mrf.mxu0  ;;  %v11397_v42 = vcombine.high %v14435_v30, %v14440_v12  ;;  %v11579_v56 = vcombine.high %v461_v50, %v465_v3  ;;  %v453_v5 = vld [vmem:[%s20021_s1 + $0xb50] sm:$0xff]  ;;  %v11578_v40 = vcombine.low %v461_v50, %v465_v3 }
 0x168   :  { %20179 = vst [vmem:[#allocation5_spill] sm:$0xff] %v14447_v29  ;;  %4366 = vmatprep.subr.bf16.mxu1 %v11595_v11  ;;  %v14461_v34 = vpack.c.bf16 %v4958_v59, %v4950_v44  ;;  %v3515_v8 = vadd.f32 %v3514_v53, %v3402_v24  ;;  %v3404_v13 = vadd.f32 %v3403_v7, %v14038_v55  ;;  %v3516_v18 = vpop.f32.mrf.mxu1  ;;  %v457_v55 = vld [vmem:[%s20021_s1 + $0xb70] sm:$0xff]  ;;  %v4965_v11 = vmax.f32 %v3513_v46, 0.0  ;;  %v12660_v44 = vld [vmem:[%s20022_s0 + $0x11c] ss:$28 sps:$4 sm:$0xff]  }
 0x169   :  { %4254 = vmatpush1.bf16.msra.mxu0 %v11466_v19  ;;  %v3405_v32 = vpop.f32.mrf.mxu0  ;;  %v11571_v37 = vcombine.high %v453_v5, %v457_v55  ;;  %v12661_v46 = vld [vmem:[%s20022_s0 + $0x124] ss:$28 sps:$4 sm:$0xff]   ;;  %v445_v24 = vld [vmem:[%s20021_s1 + $0xb10] sm:$0xff] }
 0x16a   :  { %4255 = vmatprep.subr.bf16.mxu0 %v11587_v60  ;;  %v3517_v26 = vadd.f32 %v3516_v18, %v3404_v13  ;;  %v3406_v41 = vadd.f32 %v3405_v32, %v14054_v45  ;;  %v3518_v51 = vpop.f32.mrf.mxu1  ;;  %v4966_v28 = vmax.f32 %v3515_v8, 0.0  ;;  %v449_v53 = vld [vmem:[%s20021_s1 + $0xb30] sm:$0xff] }
 0x16b   :  { %4367 = vmatpush1.bf16.msra.mxu1 %v11594_v6  ;;  %v3409_v19 = vpop.f32.mrf.mxu0  ;;  %4086 = vmatmul.mubr.bf16.gmra.mxu0 %v12658_v23  ;;  %v11563_v13 = vcombine.high %v445_v24, %v449_v53 }
 0x16c   :  { %4578 = vmatprep.subr.bf16.mxu1 %v11397_v42  ;;  %v4973_v45 = vmax.f32 %v3517_v26, 0.0  ;;  %v3519_v17 = vadd.f32 %v3518_v51, %v3406_v41  ;;  %v3410_v48 = vadd.f32 %v3409_v19, %v14058_v22  ;;  %v3522_v15 = vpop.f32.mrf.mxu1  ;;  %4095 = vmatprep.mubr.bf16.mxu0 %v12660_v44  ;;  %v11570_v42 = vcombine.low %v453_v5, %v457_v55  ;;  %v441_v26 = vld [vmem:[%s20021_s1 + $0xaf0] sm:$0xff]  ;;  %v12665_v44 = vld [vmem:[%s20022_s0 + $0x15c] ss:$28 sps:$4 sm:$0xff]  }
 0x16d   :  { %4199 = vmatmul.mubr.bf16.gmra.mxu1 %v12659_v27  ;;  %4256 = vmatpush2.bf16.msra.mxu0 %v11586_v33  ;;  %v3411_v16 = vpop.f32.mrf.mxu0  ;;  %v11562_v51 = vcombine.low %v445_v24, %v449_v53 }
 0x16e   :  { %4257 = vmatprep.subr.bf16.mxu0 %v11579_v56  ;;  %v14483_v31 = vpack.c.bf16 %v4973_v45, %v4965_v11  ;;  %v4974_v60 = vmax.f32 %v3519_v17, 0.0  ;;  %v3523_v22 = vadd.f32 %v3522_v15, %v3410_v48  ;;  %v3412_v6 = vadd.f32 %v3411_v16, %v14075_v35  ;;  %v3524_v59 = vpop.f32.mrf.mxu1  ;;  %4208 = vmatprep.mubr.bf16.mxu1 %v12661_v46  ;;  %v437_v56 = vld [vmem:[%s20021_s1 + $0xad0] sm:$0xff] }
 0x16f   :  { %v3413_v61 = vpop.f32.mrf.mxu0  ;;  %v12664_v17 = vld [vmem:[%s20022_s0 + $0x154] ss:$28 sps:$4 sm:$0xff]   ;;  %v11555_v48 = vcombine.high %v437_v56, %v441_v26  ;;  %v11554_v24 = vcombine.low %v437_v56, %v441_v26 }
 0x170   :  { %20180 = vst [vmem:[#allocation6_spill] sm:$0xff] %v14483_v31  ;;  %v14495_v50 = vpack.c.bf16 %v4974_v60, %v4966_v28  ;;  %v3525_v3 = vadd.f32 %v3524_v59, %v3412_v6  ;;  %v3414_v35 = vadd.f32 %v3413_v61, %v14078_v36  ;;  %v3526_v7 = vpop.f32.mrf.mxu1  ;;  %v12662_v36 = vld [vmem:[%s20022_s0 + $0x118] ss:$28 sps:$4 sm:$0xff]   ;;  %v4981_v5 = vmax.f32 %v3523_v22, 0.0 }
 0x171   :  { %4258 = vmatpush2.bf16.msra.mxu0 %v11578_v40  ;;  %v3415_v8 = vpop.f32.mrf.mxu0  ;;  %v12663_v40 = vld [vmem:[%s20022_s0 + $0x120] ss:$28 sps:$4 sm:$0xff]   ;;  %v433_v60 = vld [vmem:[%s20021_s1 + $0xab0] sm:$0xff] }
 0x172   :  { %20181 = vst [vmem:[#allocation8_spill] sm:$0xff] %v14495_v50  ;;  %4259 = vmatprep.subr.bf16.mxu0 %v11571_v37  ;;  %v3527_v18 = vadd.f32 %v3526_v7, %v3414_v35  ;;  %v3416_v33 = vadd.f32 %v3415_v8, %v14094_v47  ;;  %v3528_v32 = vpop.f32.mrf.mxu1  ;;  %v4982_v11 = vmax.f32 %v3525_v3, 0.0  ;;  %v429_v37 = vld [vmem:[%s20021_s1 + $0xa90] sm:$0xff] }
 0x173   :  { %v3419_v41 = vpop.f32.mrf.mxu0  ;;  %4096 = vmatmul.mubr.bf16.gmra.mxu0 %v12662_v36  ;;  %v11547_v61 = vcombine.high %v429_v37, %v433_v60  ;;  %v425_v8 = vld [vmem:[%s20021_s1 + $0xa70] sm:$0xff] }
 0x174   :  { %v4989_v55 = vmax.f32 %v3527_v18, 0.0  ;;  %v3529_v19 = vadd.f32 %v3528_v32, %v3416_v33  ;;  %v3420_v47 = vadd.f32 %v3419_v41, %v14098_v62  ;;  %v3532_v23 = vpop.f32.mrf.mxu1  ;;  %4105 = vmatprep.mubr.bf16.mxu0 %v12664_v17  ;;  %v11546_v18 = vcombine.low %v429_v37, %v433_v60  ;;  %v12667_v41 = vld [vmem:[%s20022_s0 + $0x158] ss:$28 sps:$4 sm:$0xff]  }
 0x175   :  { %4209 = vmatmul.mubr.bf16.gmra.mxu1 %v12663_v40  ;;  %4260 = vmatpush2.bf16.msra.mxu0 %v11570_v42  ;;  %v3421_v45 = vpop.f32.mrf.mxu0  ;;  %v421_v42 = vld [vmem:[%s20021_s1 + $0xa50] sm:$0xff] }
 0x176   :  { %4261 = vmatprep.subr.bf16.mxu0 %v11563_v13  ;;  %v14515_v15 = vpack.c.bf16 %v4989_v55, %v4981_v5  ;;  %v4990_v27 = vmax.f32 %v3529_v19, 0.0  ;;  %v3533_v62 = vadd.f32 %v3532_v23, %v3420_v47  ;;  %v3422_v28 = vadd.f32 %v3421_v45, %v14117_v20  ;;  %v3534_v16 = vpop.f32.mrf.mxu1  ;;  %4218 = vmatprep.mubr.bf16.mxu1 %v12665_v44  ;;  %v12668_v5 = vld [vmem:[%s20022_s0 + $0x18c] ss:$28 sps:$4 sm:$0xff]   ;;  %v413_v45 = vld [vmem:[%s20021_s1 + $0xa10] sm:$0xff] }
 0x177   :  { %v3423_v22 = vpop.f32.mrf.mxu0  ;;  %v11539_v55 = vcombine.high %v421_v42, %v425_v8  ;;  %v417_v17 = vld [vmem:[%s20021_s1 + $0xa30] sm:$0xff] }
 0x178   :  { %20182 = vst [vmem:[#allocation9_spill] sm:$0xff] %v14515_v15  ;;  %v14527_v6 = vpack.c.bf16 %v4990_v27, %v4982_v11  ;;  %v3535_v59 = vadd.f32 %v3534_v16, %v3422_v28  ;;  %v3424_v20 = vadd.f32 %v3423_v22, %v14120_v21  ;;  %v3536_v46 = vpop.f32.mrf.mxu1  ;;  %v12666_v21 = vld [vmem:[%s20022_s0 + $0x150] ss:$28 sps:$4 sm:$0xff]   ;;  %v4997_v33 = vmax.f32 %v3533_v62, 0.0 }
 0x179   :  { %4262 = vmatpush2.bf16.msra.mxu0 %v11562_v51  ;;  %v3425_v53 = vpop.f32.mrf.mxu0  ;;  %v12669_v11 = vld [vmem:[%s20022_s0 + $0x194] ss:$28 sps:$4 sm:$0xff]   ;;  %v11538_v16 = vcombine.low %v421_v42, %v425_v8  ;;  %v11531_v37 = vcombine.high %v413_v45, %v417_v17 }
 0x17a   :  { %20183 = vst [vmem:[#allocation10_spill] sm:$0xff] %v14527_v6  ;;  %4263 = vmatprep.subr.bf16.mxu0 %v11555_v48  ;;  %v3537_v3 = vadd.f32 %v3536_v46, %v3424_v20  ;;  %v3426_v35 = vadd.f32 %v3425_v53, %v14138_v54  ;;  %v3538_v7 = vpop.f32.mrf.mxu1  ;;  %v4998_v36 = vmax.f32 %v3535_v59, 0.0  ;;  %v14566_v20 = vld [vmem:[%s20021_s1 + $0x1d8] sm:$0xff]  ;;  %v11530_v53 = vcombine.low %v413_v45, %v417_v17  ;;  %v12671_v8 = vld [vmem:[%s20022_s0 + $0x190] ss:$28 sps:$4 sm:$0xff]  }
 0x17b   :  { %v3429_v13 = vpop.f32.mrf.mxu0  ;;  %4106 = vmatmul.mubr.bf16.gmra.mxu0 %v12666_v21  ;;  %v14571_v46 = vld [vmem:[%s20021_s1 + $0x1f8] sm:$0xff] }
 0x17c   :  { %v5005_v32 = vmax.f32 %v3537_v3, 0.0  ;;  %v3539_v56 = vadd.f32 %v3538_v7, %v3426_v35  ;;  %v3430_v54 = vadd.f32 %v3429_v13, %v14144_v10  ;;  %v3542_v26 = vpop.f32.mrf.mxu1  ;;  %4115 = vmatprep.mubr.bf16.mxu0 %v12668_v5  ;;  %v11268_v17 = vcombine.low %v14566_v20, %v14571_v46 }
 0x17d   :  { %4219 = vmatmul.mubr.bf16.gmra.mxu1 %v12667_v41  ;;  %4264 = vmatpush2.bf16.msra.mxu0 %v11554_v24  ;;  %v3431_v51 = vpop.f32.mrf.mxu0  ;;  %v12670_v24 = vld [vmem:[%s20022_s0 + $0x188] ss:$28 sps:$4 sm:$0xff]  }
 0x17e   :  { %4265 = vmatprep.subr.bf16.mxu0 %v11547_v61  ;;  %v14547_v19 = vpack.c.bf16 %v5005_v32, %v4997_v33  ;;  %v5006_v47 = vmax.f32 %v3539_v56, 0.0  ;;  %v3543_v10 = vadd.f32 %v3542_v26, %v3430_v54  ;;  %v3432_v23 = vadd.f32 %v3431_v51, %v14163_v0  ;;  %v3544_v40 = vpop.f32.mrf.mxu1  ;;  %4228 = vmatprep.mubr.bf16.mxu1 %v12669_v11  ;;  %v146_v51 = vld [vmem:[%s20021_s1 + $0x1b8] sm:$0xff] }
 0x17f   :  { %v3433_v48 = vpop.f32.mrf.mxu0  ;;  %v11269_v33 = vcombine.high %v14566_v20, %v14571_v46 }
 0x180   :  { %20184 = vst [vmem:[#allocation11_spill] sm:$0xff] %v14547_v19  ;;  %v14559_v27 = vpack.c.bf16 %v5006_v47, %v4998_v36  ;;  %v3545_v62 = vadd.f32 %v3544_v40, %v3432_v23  ;;  %v3434_v0 = vadd.f32 %v3433_v48, %v14166_v14  ;;  %v3546_v28 = vpop.f32.mrf.mxu1  ;;  %v5013_v61 = vmax.f32 %v3543_v10, 0.0  ;;  %v14594_v36 = vld [vmem:[%s20021_s1 + $0x198] sm:$0xff] }
 0x181   :  { %4266 = vmatpush2.bf16.msra.mxu0 %v11546_v18  ;;  %v3435_v44 = vpop.f32.mrf.mxu0  ;;  %v12672_v18 = vld [vmem:[%s20022_s0 + $0x14] ss:$28 sps:$4 sm:$0xff]   ;;  %v270_v47 = vld [vmem:[%s20021_s1 + $0x598] sm:$0xff]  ;;  %v11260_v20 = vcombine.low %v14594_v36, %v146_v51 }
 0x182   :  { %20185 = vst [vmem:[#allocation12_spill] sm:$0xff] %v14559_v27  ;;  %4267 = vmatprep.subr.bf16.mxu0 %v11539_v55  ;;  %v3547_v60 = vadd.f32 %v3546_v28, %v3434_v0  ;;  %v3436_v22 = vadd.f32 %v3435_v44, %v14184_v39  ;;  %v3548_v59 = vpop.f32.mrf.mxu1  ;;  %v20037_v39 = vsub.s32 2, %v13844_v63  ;;  %v5014_v13 = vmax.f32 %v3545_v62, 0.0  ;;  %v12673_v55 = vld [vmem:[%s20023_s2] sm:$0xff]  ;;  %v274_v10 = vld [vmem:[%s20021_s1 + $0x5b8] sm:$0xff] }
 0x183   :  { %v3439_v14 = vpop.f32.mrf.mxu0  ;;  %4116 = vmatmul.mubr.bf16.gmra.mxu0 %v12670_v24  ;;  %v11396_v62 = vcombine.low %v14435_v30, %v14440_v12  ;;  %v11261_v0 = vcombine.high %v14594_v36, %v146_v51  ;;  %v14623_v28 = vld [vmem:[%s20021_s1 + $0x158] sm:$0xff] }
 0x184   :  { %v5021_v3 = vmax.f32 %v3547_v60, 0.0  ;;  %v3549_v35 = vadd.f32 %v3548_v59, %v3436_v22  ;;  %v3440_v7 = vadd.f32 %v3439_v14, %v14190_v1  ;;  %v3552_v42 = vpop.f32.mrf.mxu1  ;;  %4271 = vmatprep.mubr.bf16.mxu0 %v12672_v18  ;;  %v20036_v1 = vsub.s32 3, %v13844_v63  ;;  %v14633_v30 = vld [vmem:[%s20021_s1 + $0x178] sm:$0xff]  ;;  %v12674_v59 = vld [vmem:[%s20022_s0 + $0x10] ss:$28 sps:$4 sm:$0xff]  }
 0x185   :  { %4229 = vmatmul.mubr.bf16.gmra.mxu1 %v12671_v8  ;;  %4268 = vmatpush2.bf16.msra.mxu0 %v11538_v16  ;;  %v3441_v21 = vpop.f32.mrf.mxu0  ;;  %v11389_v60 = vcombine.high %v270_v47, %v274_v10  ;;  %v14638_v12 = vld [vmem:[%s20021_s1 + $0x558] sm:$0xff]  ;;  %v11253_v8 = vcombine.high %v14623_v28, %v14633_v30 }
 0x186   :  { %4269 = vmatprep.subr.bf16.mxu0 %v11531_v37  ;;  %v14587_v32 = vpack.c.bf16 %v5021_v3, %v5013_v61  ;;  %v5022_v56 = vmax.f32 %v3549_v35, 0.0  ;;  %v3553_v54 = vadd.f32 %v3552_v42, %v3440_v7  ;;  %v3442_v26 = vadd.f32 %v3441_v21, %v14205_v9  ;;  %v3554_v41 = vpop.f32.mrf.mxu1  ;;  %4384 = vmatprep.mubr.bf16.mxu1 %v20167_v25  ;;  %v12675_v3 = vld [vmem:[%s20022_s0 + $0x18] ss:$28 sps:$4 sm:$0xff]  }
 0x187   :  { %v3443_v5 = vpop.f32.mrf.mxu0  ;;  %v14604_v9 = vrot.slane %v12673_v55, %v20037_v39  ;;  %v14628_v37 = vrot.slane %v12673_v55, %v20036_v1  ;;  %v11388_v42 = vcombine.low %v270_v47, %v274_v10  ;;  %v130_v36 = vld [vmem:[%s20021_s1 + $0x138] sm:$0xff] }
 0x188   :  { %20186 = vst [vmem:[#allocation13_spill] sm:$0xff] %v14587_v32  ;;  %v14612_v23 = vpack.c.bf16 %v5022_v56, %v5014_v13  ;;  %v3555_v40 = vadd.f32 %v3554_v41, %v3442_v26  ;;  %v3444_v11 = vadd.f32 %v3443_v5, %v14214_v43  ;;  %v3556_v45 = vpop.f32.mrf.mxu1  ;;  %v5029_v46 = vmax.f32 %v3553_v54, 0.0  ;;  %v12676_v26 = vld [vmem:[%s20022_s0 + $0x4c] ss:$28 sps:$4 sm:$0xff]   ;;  %v126_v41 = vld [vmem:[%s20021_s1 + $0x118] sm:$0xff] }
 0x189   :  { %4270 = vmatpush2.bf16.msra.mxu0 %v11530_v53  ;;  %v3445_v48 = vpop.f32.mrf.mxu0  ;;  %v254_v5 = vld [vmem:[%s20021_s1 + $0x518] sm:$0xff] }
 0x18a   :  { %20187 = vst [vmem:[#allocation14_spill] sm:$0xff] %v14612_v23  ;;  %4465 = vmatprep.subr.bf16.mxu0 %v11269_v33  ;;  %v3557_v16 = vadd.f32 %v3556_v45, %v3444_v11  ;;  %v3446_v43 = vadd.f32 %v3445_v48, %v14236_v52  ;;  %v3558_v44 = vpop.f32.mrf.mxu1  ;;  %v14643_v52 = vld [vmem:[%s20021_s1 + $0x578] sm:$0xff]  ;;  %v5030_v35 = vmax.f32 %v3555_v40, 0.0  ;;  %v11252_v45 = vcombine.low %v14623_v28, %v14633_v30 }
 0x18b   :  { %v3595_v22 = vpop.f32.mrf.mxu0  ;;  %v11381_v13 = vcombine.high %v14638_v12, %v14643_v52  ;;  %v258_v55 = vld [vmem:[%s20021_s1 + $0x538] sm:$0xff]  ;;  %v11380_v48 = vcombine.low %v14638_v12, %v14643_v52  ;;  %v12677_v12 = vld [vmem:[%s20022_s0 + $0x48] ss:$28 sps:$4 sm:$0xff]  }
 0x18c   :  { %4272 = vmatmul.mubr.bf16.vlgmr.msra.gmra.mxu0 %v12674_v59  ;;  %v5037_v14 = vmax.f32 %v3557_v16, 0.0  ;;  %v3559_v24 = vadd.f32 %v3558_v44, %v3446_v43  ;;  %v3596_v53 = vadd.f32 %v3595_v22, %v14604_v9  ;;  %v3708_v61 = vpop.f32.mrf.mxu1  ;;  %v11373_v44 = vcombine.high %v254_v5, %v258_v55  ;;  %v122_v28 = vld [vmem:[%s20021_s1 + $0xf8] sm:$0xff] }
 0x18d   :  { %4385 = vmatmul.mubr.bf16.vlgmr.msra.gmra.mxu1 %v12675_v3  ;;  %4466 = vmatpush1.bf16.msra.mxu0 %v11268_v17  ;;  %v3597_v7 = vpop.f32.mrf.mxu0  ;;  %v246_v52 = vld [vmem:[%s20021_s1 + $0x4d8] sm:$0xff] }
 0x18e   :  { %4579 = vmatpush1.bf16.msra.mxu1 %v11396_v62  ;;  %4467 = vmatprep.subr.bf16.mxu0 %v11261_v0  ;;  %v14657_v21 = vpack.c.bf16 %v5037_v14, %v5029_v46  ;;  %v5038_v18 = vmax.f32 %v3559_v24, 0.0  ;;  %v14659_v33 = vadd.f32 %v3708_v61, %v3596_v53  ;;  %v3598_v56 = vadd.f32 %v3597_v7, %v14628_v37  ;;  %v3710_v54 = vpop.f32.mrf.mxu1  ;;  %v250_v22 = vld [vmem:[%s20021_s1 + $0x4f8] sm:$0xff]  ;;  %v12678_v14 = vld [vmem:[%s20022_s0 + $0x50] ss:$28 sps:$4 sm:$0xff]  }
 0x18f   :  { %4580 = vmatprep.subr.bf16.mxu1 %v11389_v60  ;;  %4281 = vmatprep.mubr.bf16.mxu0 %v12676_v26  ;;  %v3599_v51 = vpop.f32.mrf.mxu0  ;;  %v11245_v62 = vcombine.high %v126_v41, %v130_v36  ;;  %v118_v60 = vld [vmem:[%s20021_s1 + $0xd8] sm:$0xff]  ;;  %v11244_v24 = vcombine.low %v126_v41, %v130_v36  ;;  %v11372_v61 = vcombine.low %v254_v5, %v258_v55 }
 0x190   :  { %20188 = vst [vmem:[#allocation15_spill] sm:$0xff] %v14657_v21  ;;  %4394 = vmatprep.mubr.bf16.mxu1 %v20167_v25  ;;  %v14678_v47 = vpack.c.bf16 %v5038_v18, %v5030_v35  ;;  %v14680_v10 = vadd.f32 %v3710_v54, %v3598_v56  ;;  %v3600_v40 = vadd.f32 %v3599_v51, %v14604_v9  ;;  %v3712_v11 = vpop.f32.mrf.mxu1  ;;  %v110_v18 = vld [vmem:[%s20021_s1 + $0x98] sm:$0xff] }
 0x191   :  { %4468 = vmatpush1.bf16.msra.mxu0 %v11260_v20  ;;  %v3601_v17 = vpop.f32.mrf.mxu0  ;;  %v11237_v3 = vcombine.high %v118_v60, %v122_v28  ;;  %v114_v56 = vld [vmem:[%s20021_s1 + $0xb8] sm:$0xff]  ;;  %v11236_v55 = vcombine.low %v118_v60, %v122_v28 }
 0x192   :  { %20189 = vst [vmem:[#allocation16_spill] sm:$0xff] %v14678_v47  ;;  %4581 = vmatpush1.bf16.msra.mxu1 %v11388_v42  ;;  %4469 = vmatprep.subr.bf16.mxu0 %v11253_v8  ;;  %v14687_v0 = vadd.f32 %v3712_v11, %v3600_v40  ;;  %v3602_v16 = vadd.f32 %v3601_v17, %v14628_v37  ;;  %v3714_v43 = vpop.f32.mrf.mxu1  ;;  %v12679_v8 = vld [vmem:[%s20022_s0 + $0x84] ss:$28 sps:$4 sm:$0xff]   ;;  %v238_v26 = vld [vmem:[%s20021_s1 + $0x498] sm:$0xff] }
 0x193   :  { %4582 = vmatprep.subr.bf16.mxu1 %v11381_v13  ;;  %v3605_v30 = vpop.f32.mrf.mxu0  ;;  %v11365_v13 = vcombine.high %v246_v52, %v250_v22  ;;  %v242_v41 = vld [vmem:[%s20021_s1 + $0x4b8] sm:$0xff]  ;;  %v11364_v11 = vcombine.low %v246_v52, %v250_v22 }
 0x194   :  { %4282 = vmatmul.mubr.bf16.gmra.mxu0 %v12677_v12  ;;  %v14705_v59 = vadd.f32 %v3714_v43, %v3602_v16  ;;  %v3606_v20 = vadd.f32 %v3605_v30, %v14604_v9  ;;  %v3718_v46 = vpop.f32.mrf.mxu1  ;;  %v11357_v16 = vcombine.high %v238_v26, %v242_v41  ;;  %v102_v43 = vld [vmem:[%s20021_s1 + $0x58] sm:$0xff] }
 0x195   :  { %4395 = vmatmul.mubr.bf16.gmra.mxu1 %v12678_v14  ;;  %4470 = vmatpush1.bf16.msra.mxu0 %v11252_v45  ;;  %v3607_v53 = vpop.f32.mrf.mxu0  ;;  %v11229_v45 = vcombine.high %v110_v18, %v114_v56  ;;  %v12680_v28 = vld [vmem:[%s20022_s0 + $0x80] ss:$28 sps:$4 sm:$0xff]   ;;  %v11228_v14 = vcombine.low %v110_v18, %v114_v56 }
 0x196   :  { %4583 = vmatpush1.bf16.msra.mxu1 %v11380_v48  ;;  %4471 = vmatprep.subr.bf16.mxu0 %v11245_v62  ;;  %v14711_v35 = vadd.f32 %v3718_v46, %v3606_v20  ;;  %v3608_v7 = vadd.f32 %v3607_v53, %v14628_v37  ;;  %v3720_v42 = vpop.f32.mrf.mxu1  ;;  %v230_v30 = vld [vmem:[%s20021_s1 + $0x458] sm:$0xff]  ;;  %v12681_v46 = vld [vmem:[%s20022_s0 + $0x88] ss:$28 sps:$4 sm:$0xff]   ;;  %v11356_v53 = vcombine.low %v238_v26, %v242_v41 }
 0x197   :  { %4584 = vmatprep.subr.bf16.mxu1 %v11373_v44  ;;  %4291 = vmatprep.mubr.bf16.mxu0 %v12679_v8  ;;  %v3609_v54 = vpop.f32.mrf.mxu0  ;;  %v106_v44 = vld [vmem:[%s20021_s1 + $0x78] sm:$0xff] }
 0x198   :  { %4404 = vmatprep.mubr.bf16.mxu1 %v20167_v25  ;;  %v14730_v36 = vadd.f32 %v3720_v42, %v3608_v7  ;;  %v3610_v51 = vadd.f32 %v3609_v54, %v14604_v9  ;;  %v3722_v5 = vpop.f32.mrf.mxu1  ;;  %v234_v12 = vld [vmem:[%s20021_s1 + $0x478] sm:$0xff] }
 0x199   :  { %4472 = vmatpush1.bf16.msra.mxu0 %v11244_v24  ;;  %v3611_v40 = vpop.f32.mrf.mxu0  ;;  %v12682_v8 = vld [vmem:[%s20022_s0 + $0xbc] ss:$28 sps:$4 sm:$0xff]  }
 0x19a   :  { %4585 = vmatpush1.bf16.msra.mxu1 %v11372_v61  ;;  %4473 = vmatprep.subr.bf16.mxu0 %v11237_v3  ;;  %v14733_v17 = vadd.f32 %v3722_v5, %v3610_v51  ;;  %v3612_v48 = vadd.f32 %v3611_v40, %v14628_v37  ;;  %v3724_v62 = vpop.f32.mrf.mxu1  ;;  %v11221_v61 = vcombine.high %v102_v43, %v106_v44  ;;  %v94_v18 = vld [vmem:[%s20021_s1 + $0x18] sm:$0xff] }
 0x19b   :  { %4586 = vmatprep.subr.bf16.mxu1 %v11365_v13  ;;  %v3615_v60 = vpop.f32.mrf.mxu0  ;;  %v11349_v13 = vcombine.high %v230_v30, %v234_v12  ;;  %v98_v56 = vld [vmem:[%s20021_s1 + $0x38] sm:$0xff]  ;;  %v11220_v40 = vcombine.low %v102_v43, %v106_v44 }
 0x19c   :  { %4292 = vmatmul.mubr.bf16.gmra.mxu0 %v12680_v28  ;;  %v14751_v52 = vadd.f32 %v3724_v62, %v3612_v48  ;;  %v3616_v22 = vadd.f32 %v3615_v60, %v14604_v9  ;;  %v3728_v20 = vpop.f32.mrf.mxu1  ;;  %v222_v26 = vld [vmem:[%s20021_s1 + $0x418] sm:$0xff]  ;;  %v11213_v48 = vcombine.high %v94_v18, %v98_v56 }
 0x19d   :  { %4405 = vmatmul.mubr.bf16.gmra.mxu1 %v12681_v46  ;;  %4474 = vmatpush1.bf16.msra.mxu0 %v11236_v55  ;;  %v3617_v24 = vpop.f32.mrf.mxu0  ;;  %v226_v41 = vld [vmem:[%s20021_s1 + $0x438] sm:$0xff] }
 0x19e   :  { %4587 = vmatpush1.bf16.msra.mxu1 %v11364_v11  ;;  %4475 = vmatprep.subr.bf16.mxu0 %v11229_v45  ;;  %v14757_v3 = vadd.f32 %v3728_v20, %v3616_v22  ;;  %v3618_v7 = vadd.f32 %v3617_v24, %v14628_v37  ;;  %v3730_v42 = vpop.f32.mrf.mxu1  ;;  %v11348_v45 = vcombine.low %v230_v30, %v234_v12  ;;  %v214_v22 = vld [vmem:[%s20021_s1 + $0x3d8] sm:$0xff] }
 0x19f   :  { %4588 = vmatprep.subr.bf16.mxu1 %v11357_v16  ;;  %4301 = vmatprep.mubr.bf16.mxu0 %v12682_v8  ;;  %v3619_v54 = vpop.f32.mrf.mxu0  ;;  %v11341_v28 = vcombine.high %v222_v26, %v226_v41  ;;  %v218_v43 = vld [vmem:[%s20021_s1 + $0x3f8] sm:$0xff] }
 0x1a0   :  { %4414 = vmatprep.mubr.bf16.mxu1 %v20167_v25  ;;  %v14776_v51 = vadd.f32 %v3730_v42, %v3618_v7  ;;  %v3620_v5 = vadd.f32 %v3619_v54, %v14604_v9  ;;  %v3732_v55 = vpop.f32.mrf.mxu1  ;;  %v12683_v30 = vld [vmem:[%s20022_s0 + $0xb8] ss:$28 sps:$4 sm:$0xff]   ;;  %v11340_v42 = vcombine.low %v222_v26, %v226_v41  ;;  %v11333_v8 = vcombine.high %v214_v22, %v218_v43 }
 0x1a1   :  { %4476 = vmatpush1.bf16.msra.mxu0 %v11228_v14  ;;  %v3621_v11 = vpop.f32.mrf.mxu0  ;;  %v342_v12 = vld [vmem:[%s20021_s1 + $0x7d8] sm:$0xff] }
 0x1a2   :  { %4589 = vmatpush1.bf16.msra.mxu1 %v11356_v53  ;;  %4477 = vmatprep.subr.bf16.mxu0 %v11221_v61  ;;  %v14779_v62 = vadd.f32 %v3732_v55, %v3620_v5  ;;  %v3622_v16 = vadd.f32 %v3621_v11, %v14628_v37  ;;  %v3734_v60 = vpop.f32.mrf.mxu1  ;;  %v346_v20 = vld [vmem:[%s20021_s1 + $0x7f8] sm:$0xff]  ;;  %v11212_v61 = vcombine.low %v94_v18, %v98_v56  ;;  %v12685_v55 = vld [vmem:[%s20022_s0 + $0xf4] ss:$28 sps:$4 sm:$0xff]  }
 0x1a3   :  { %4590 = vmatprep.subr.bf16.mxu1 %v11349_v13  ;;  %v3625_v44 = vpop.f32.mrf.mxu0  ;;  %v12684_v53 = vld [vmem:[%s20022_s0 + $0xc0] ss:$28 sps:$4 sm:$0xff]   ;;  %v11461_v11 = vcombine.high %v342_v12, %v346_v20 }
 0x1a4   :  { %4302 = vmatmul.mubr.bf16.gmra.mxu0 %v12683_v30  ;;  %v14797_v46 = vadd.f32 %v3734_v60, %v3622_v16  ;;  %v3626_v14 = vadd.f32 %v3625_v44, %v14604_v9  ;;  %v3738_v24 = vpop.f32.mrf.mxu1  ;;  %v206_v18 = vld [vmem:[%s20021_s1 + $0x398] sm:$0xff]  ;;  %v11332_v60 = vcombine.low %v214_v22, %v218_v43  ;;  %v11460_v44 = vcombine.low %v342_v12, %v346_v20  ;;  %v12686_v12 = vld [vmem:[%s20022_s0 + $0xf0] ss:$28 sps:$4 sm:$0xff]  }
 0x1a5   :  { %4415 = vmatmul.mubr.bf16.gmra.mxu1 %v12684_v53  ;;  %4478 = vmatpush1.bf16.msra.mxu0 %v11220_v40  ;;  %v3627_v7 = vpop.f32.mrf.mxu0  ;;  %v210_v56 = vld [vmem:[%s20021_s1 + $0x3b8] sm:$0xff] }
 0x1a6   :  { %4591 = vmatpush1.bf16.msra.mxu1 %v11348_v45  ;;  %4479 = vmatprep.subr.bf16.mxu0 %v11213_v48  ;;  %v14803_v13 = vadd.f32 %v3738_v24, %v3626_v14  ;;  %v3628_v54 = vadd.f32 %v3627_v7, %v14628_v37  ;;  %v3740_v5 = vpop.f32.mrf.mxu1  ;;  %v334_v41 = vld [vmem:[%s20021_s1 + $0x798] sm:$0xff]  ;;  %v11325_v30 = vcombine.high %v206_v18, %v210_v56 }
 0x1a7   :  { %4592 = vmatprep.subr.bf16.mxu1 %v11341_v28  ;;  %4311 = vmatprep.mubr.bf16.mxu0 %v12685_v55  ;;  %v3629_v26 = vpop.f32.mrf.mxu0  ;;  %v338_v40 = vld [vmem:[%s20021_s1 + $0x7b8] sm:$0xff] }
 0x1a8   :  { %4424 = vmatprep.mubr.bf16.mxu1 %v20167_v25  ;;  %v14822_v45 = vadd.f32 %v3740_v5, %v3628_v54  ;;  %v3630_v48 = vadd.f32 %v3629_v26, %v14604_v9  ;;  %v3742_v16 = vpop.f32.mrf.mxu1  ;;  %v11453_v7 = vcombine.high %v334_v41, %v338_v40  ;;  %v198_v54 = vld [vmem:[%s20021_s1 + $0x358] sm:$0xff] }
 0x1a9   :  { %4480 = vmatpush1.bf16.msra.mxu0 %v11212_v61  ;;  %v3631_v28 = vpop.f32.mrf.mxu0  ;;  %v202_v22 = vld [vmem:[%s20021_s1 + $0x378] sm:$0xff] }
 0x1aa   :  { %4593 = vmatpush1.bf16.msra.mxu1 %v11340_v42  ;;  %4481 = vmatprep.subr.bf16.mxu0 %v11333_v8  ;;  %v14825_v14 = vadd.f32 %v3742_v16, %v3630_v48  ;;  %v3632_v24 = vadd.f32 %v3631_v28, %v14628_v37  ;;  %v3744_v53 = vpop.f32.mrf.mxu1  ;;  %v326_v20 = vld [vmem:[%s20021_s1 + $0x758] sm:$0xff]  ;;  %v11452_v48 = vcombine.low %v334_v41, %v338_v40 }
 0x1ab   :  { %4594 = vmatprep.subr.bf16.mxu1 %v11461_v11  ;;  %v3635_v43 = vpop.f32.mrf.mxu0  ;;  %v330_v61 = vld [vmem:[%s20021_s1 + $0x778] sm:$0xff]  ;;  %v11324_v11 = vcombine.low %v206_v18, %v210_v56  ;;  %v11317_v16 = vcombine.high %v198_v54, %v202_v22 }
 0x1ac   :  { %4312 = vmatmul.mubr.bf16.gmra.mxu0 %v12686_v12  ;;  %v14843_v42 = vadd.f32 %v3744_v53, %v3632_v24  ;;  %v3636_v8 = vadd.f32 %v3635_v43, %v14604_v9  ;;  %v3748_v5 = vpop.f32.mrf.mxu1  ;;  %v12687_v55 = vld [vmem:[%s20022_s0 + $0xf8] ss:$28 sps:$4 sm:$0xff]   ;;  %v12688_v43 = vld [vmem:[%s20022_s0 + $0x12c] ss:$28 sps:$4 sm:$0xff]   ;;  %v11445_v12 = vcombine.high %v326_v20, %v330_v61 }
 0x1ad   :  { %4425 = vmatmul.mubr.bf16.gmra.mxu1 %v12687_v55  ;;  %4482 = vmatpush2.bf16.msra.mxu0 %v11332_v60  ;;  %v3637_v26 = vpop.f32.mrf.mxu0  ;;  %v190_v18 = vld [vmem:[%s20021_s1 + $0x318] sm:$0xff]  ;;  %v11444_v55 = vcombine.low %v326_v20, %v330_v61  ;;  %v12689_v20 = vld [vmem:[%s20022_s0 + $0x128] ss:$28 sps:$4 sm:$0xff]  }
 0x1ae   :  { %4595 = vmatpush2.bf16.msra.mxu1 %v11460_v44  ;;  %4483 = vmatprep.subr.bf16.mxu0 %v11325_v30  ;;  %v14849_v28 = vadd.f32 %v3748_v5, %v3636_v8  ;;  %v3638_v24 = vadd.f32 %v3637_v26, %v14628_v37  ;;  %v3750_v53 = vpop.f32.mrf.mxu1  ;;  %v194_v56 = vld [vmem:[%s20021_s1 + $0x338] sm:$0xff]  ;;  %v11316_v8 = vcombine.low %v198_v54, %v202_v22 }
 0x1af   :  { %4596 = vmatprep.subr.bf16.mxu1 %v11453_v7  ;;  %4321 = vmatprep.mubr.bf16.mxu0 %v12688_v43  ;;  %v3639_v41 = vpop.f32.mrf.mxu0  ;;  %v318_v40 = vld [vmem:[%s20021_s1 + $0x718] sm:$0xff]  ;;  %v11309_v26 = vcombine.high %v190_v18, %v194_v56 }
 0x1b0   :  { %4434 = vmatprep.mubr.bf16.mxu1 %v20167_v25  ;;  %v322_v60 = vld [vmem:[%s20021_s1 + $0x738] sm:$0xff]  ;;  %v14868_v44 = vadd.f32 %v3750_v53, %v3638_v24  ;;  %v3640_v30 = vadd.f32 %v3639_v41, %v14604_v9  ;;  %v3752_v7 = vpop.f32.mrf.mxu1  ;;  %v11308_v41 = vcombine.low %v190_v18, %v194_v56 }
 0x1b1   :  { %4484 = vmatpush2.bf16.msra.mxu0 %v11324_v11  ;;  %v3641_v5 = vpop.f32.mrf.mxu0  ;;  %v11437_v57 = vcombine.high %v318_v40, %v322_v60  ;;  %v182_v24 = vld [vmem:[%s20021_s1 + $0x2d8] sm:$0xff] }
 0x1b2   :  { %4597 = vmatpush2.bf16.msra.mxu1 %v11452_v48  ;;  %4485 = vmatprep.subr.bf16.mxu0 %v11317_v16  ;;  %v14871_v43 = vadd.f32 %v3752_v7, %v3640_v30  ;;  %v3642_v1 = vadd.f32 %v3641_v5, %v14628_v37  ;;  %v3754_v39 = vpop.f32.mrf.mxu1  ;;  %v186_v54 = vld [vmem:[%s20021_s1 + $0x2f8] sm:$0xff]  ;;  %v11436_v7 = vcombine.low %v318_v40, %v322_v60 }
 0x1b3   :  { %4598 = vmatprep.subr.bf16.mxu1 %v11445_v12  ;;  %v3645_v22 = vpop.f32.mrf.mxu0  ;;  %v310_v61 = vld [vmem:[%s20021_s1 + $0x6d8] sm:$0xff]  ;;  %v12690_v12 = vld [vmem:[%s20022_s0 + $0x130] ss:$28 sps:$4 sm:$0xff]   ;;  %v11301_v5 = vcombine.high %v182_v24, %v186_v54 }
 0x1b4   :  { %4322 = vmatmul.mubr.bf16.gmra.mxu0 %v12689_v20  ;;  %v314_v11 = vld [vmem:[%s20021_s1 + $0x6f8] sm:$0xff]  ;;  %v14889_v48 = vadd.f32 %v3754_v39, %v3642_v1  ;;  %v3646_v16 = vadd.f32 %v3645_v22, %v14604_v9  ;;  %v3758_v53 = vpop.f32.mrf.mxu1  ;;  %v12691_v22 = vld [vmem:[%s20022_s0 + $0x164] ss:$28 sps:$4 sm:$0xff]  }
 0x1b5   :  { %4435 = vmatmul.mubr.bf16.gmra.mxu1 %v12690_v12  ;;  %4486 = vmatpush2.bf16.msra.mxu0 %v11316_v8  ;;  %v3647_v30 = vpop.f32.mrf.mxu0  ;;  %v11429_v4 = vcombine.high %v310_v61, %v314_v11  ;;  %v174_v18 = vld [vmem:[%s20021_s1 + $0x298] sm:$0xff]  ;;  %v11428_v12 = vcombine.low %v310_v61, %v314_v11 }
 0x1b6   :  { %4599 = vmatpush2.bf16.msra.mxu1 %v11444_v55  ;;  %4487 = vmatprep.subr.bf16.mxu0 %v11309_v26  ;;  %v14895_v20 = vadd.f32 %v3758_v53, %v3646_v16  ;;  %v3648_v39 = vadd.f32 %v3647_v30, %v14628_v37  ;;  %v3760_v1 = vpop.f32.mrf.mxu1  ;;  %v178_v56 = vld [vmem:[%s20021_s1 + $0x2b8] sm:$0xff]  ;;  %v11300_v16 = vcombine.low %v182_v24, %v186_v54 }
 0x1b7   :  { %4600 = vmatprep.subr.bf16.mxu1 %v11437_v57  ;;  %4331 = vmatprep.mubr.bf16.mxu0 %v12691_v22  ;;  %v3649_v40 = vpop.f32.mrf.mxu0  ;;  %v302_v57 = vld [vmem:[%s20021_s1 + $0x698] sm:$0xff]  ;;  %v11293_v30 = vcombine.high %v174_v18, %v178_v56 }
 0x1b8   :  { %4444 = vmatprep.mubr.bf16.mxu1 %v20167_v25  ;;  %v306_v60 = vld [vmem:[%s20021_s1 + $0x6b8] sm:$0xff]  ;;  %v14914_v8 = vadd.f32 %v3760_v1, %v3648_v39  ;;  %v3650_v55 = vadd.f32 %v3649_v40, %v14604_v9  ;;  %v3762_v26 = vpop.f32.mrf.mxu1  ;;  %v12693_v1 = vld [vmem:[%s20022_s0 + $0x168] ss:$28 sps:$4 sm:$0xff]   ;;  %v11292_v40 = vcombine.low %v174_v18, %v178_v56 }
 0x1b9   :  { %4488 = vmatpush2.bf16.msra.mxu0 %v11308_v41  ;;  %v3651_v53 = vpop.f32.mrf.mxu0  ;;  %v11421_v32 = vcombine.high %v302_v57, %v306_v60  ;;  %v166_v39 = vld [vmem:[%s20021_s1 + $0x258] sm:$0xff] }
 0x1ba   :  { %4601 = vmatpush2.bf16.msra.mxu1 %v11436_v7  ;;  %4489 = vmatprep.subr.bf16.mxu0 %v11301_v5  ;;  %v14917_v22 = vadd.f32 %v3762_v26, %v3650_v55  ;;  %v3652_v21 = vadd.f32 %v3651_v53, %v14628_v37  ;;  %v3764_v47 = vpop.f32.mrf.mxu1  ;;  %v170_v24 = vld [vmem:[%s20021_s1 + $0x278] sm:$0xff]  ;;  %v11420_v26 = vcombine.low %v302_v57, %v306_v60 }
 0x1bb   :  { %4602 = vmatprep.subr.bf16.mxu1 %v11429_v4  ;;  %v3655_v54 = vpop.f32.mrf.mxu0  ;;  %v12692_v61 = vld [vmem:[%s20022_s0 + $0x160] ss:$28 sps:$4 sm:$0xff]   ;;  %v11285_v53 = vcombine.high %v166_v39, %v170_v24 }
 0x1bc   :  { %4332 = vmatmul.mubr.bf16.gmra.mxu0 %v12692_v61  ;;  %v294_v11 = vld [vmem:[%s20021_s1 + $0x658] sm:$0xff]  ;;  %v14935_v41 = vadd.f32 %v3764_v47, %v3652_v21  ;;  %v3656_v7 = vadd.f32 %v3655_v54, %v14604_v9  ;;  %v3768_v5 = vpop.f32.mrf.mxu1 }
 0x1bd   :  { %v298_v4 = vld [vmem:[%s20021_s1 + $0x678] sm:$0xff]  ;;  %4445 = vmatmul.mubr.bf16.gmra.mxu1 %v12693_v1  ;;  %4490 = vmatpush2.bf16.msra.mxu0 %v11300_v16  ;;  %v3657_v55 = vpop.f32.mrf.mxu0 }
 0x1be   :  { %4603 = vmatpush2.bf16.msra.mxu1 %v11428_v12  ;;  %4491 = vmatprep.subr.bf16.mxu0 %v11293_v30  ;;  %v14941_v61 = vadd.f32 %v3768_v5, %v3656_v7  ;;  %v3658_v21 = vadd.f32 %v3657_v55, %v14628_v37  ;;  %v3770_v47 = vpop.f32.mrf.mxu1  ;;  %v12694_v54 = vld [vmem:[%s20022_s0 + $0x19c] ss:$28 sps:$4 sm:$0xff]   ;;  %v11413_v23 = vcombine.high %v294_v11, %v298_v4 }
 0x1bf   :  { %4604 = vmatprep.subr.bf16.mxu1 %v11421_v32  ;;  %4341 = vmatprep.mubr.bf16.mxu0 %v12694_v54  ;;  %v158_v18 = vld [vmem:[%s20021_s1 + $0x218] sm:$0xff]  ;;  %v3659_v57 = vpop.f32.mrf.mxu0  ;;  %v11284_v7 = vcombine.low %v166_v39, %v170_v24  ;;  %v11412_v1 = vcombine.low %v294_v11, %v298_v4 }
 0x1c0   :  { %v162_v56 = vld [vmem:[%s20021_s1 + $0x238] sm:$0xff]  ;;  %4454 = vmatprep.mubr.bf16.mxu1 %v20167_v25  ;;  %v14960_v16 = vadd.f32 %v3770_v47, %v3658_v21  ;;  %v3660_v12 = vadd.f32 %v3659_v57, %v14604_v9  ;;  %v3772_v30 = vpop.f32.mrf.mxu1 }
 0x1c1   :  { %v286_v32 = vld [vmem:[%s20021_s1 + $0x618] sm:$0xff]  ;;  %4492 = vmatpush2.bf16.msra.mxu0 %v11292_v40  ;;  %v3661_v5 = vpop.f32.mrf.mxu0  ;;  %v11277_v55 = vcombine.high %v158_v18, %v162_v56  ;;  %v11276_v57 = vcombine.low %v158_v18, %v162_v56 }
 0x1c2   :  { %v290_v60 = vld [vmem:[%s20021_s1 + $0x638] sm:$0xff]  ;;  %4605 = vmatpush2.bf16.msra.mxu1 %v11420_v26  ;;  %4493 = vmatprep.subr.bf16.mxu0 %v11285_v53  ;;  %v14963_v54 = vadd.f32 %v3772_v30, %v3660_v12  ;;  %v3662_v19 = vadd.f32 %v3661_v5, %v14628_v37  ;;  %v3774_v27 = vpop.f32.mrf.mxu1 }
 0x1c3   :  { %4606 = vmatprep.subr.bf16.mxu1 %v11413_v23  ;;  %v11405_v15 = vcombine.high %v286_v32, %v290_v60  ;;  %v406_v21 = vld [vmem:[%s20021_s1 + $0x9d8] sm:$0xff]  ;;  %v3665_v24 = vpop.f32.mrf.mxu0  ;;  %v11404_v30 = vcombine.low %v286_v32, %v290_v60  ;;  %v12698_v60 = vld [vmem:[%s20022_s0 + $0xc] ss:$28 sps:$4 sm:$0xff]  }
 0x1c4   :  { %v410_v39 = vld [vmem:[%s20021_s1 + $0x9f8] sm:$0xff]  ;;  %v14981_v40 = vadd.f32 %v3774_v27, %v3662_v19  ;;  %v3666_v26 = vadd.f32 %v3665_v24, %v14604_v9  ;;  %v3778_v53 = vpop.f32.mrf.mxu1  ;;  %v12697_v24 = vld [vmem:[%s20022_s0 + $0x4] ss:$28 sps:$4 sm:$0xff]  }
 0x1c5   :  { %v12695_v11 = vld [vmem:[%s20022_s0 + $0x198] ss:$28 sps:$4 sm:$0xff]   ;;  %v12696_v47 = vld [vmem:[%s20022_s0 + $0x1a0] ss:$28 sps:$4 sm:$0xff]   ;;  %4494 = vmatpush2.bf16.msra.mxu0 %v11284_v7  ;;  %v3667_v12 = vpop.f32.mrf.mxu0  ;;  %v11525_v5 = vcombine.high %v406_v21, %v410_v39 }
 0x1c6   :  { %4342 = vmatmul.mubr.bf16.gmra.mxu0 %v12695_v11  ;;  %v534_v4 = vld [vmem:[%s20021_s1 + $0xdd8] sm:$0xff]  ;;  %4455 = vmatmul.mubr.bf16.gmra.mxu1 %v12696_v47  ;;  %v14987_v11 = vadd.f32 %v3778_v53, %v3666_v26  ;;  %v3668_v19 = vadd.f32 %v3667_v12, %v14628_v37  ;;  %v3780_v27 = vpop.f32.mrf.mxu1 }
 0x1c7   :  { %v538_v23 = vld [vmem:[%s20021_s1 + $0xdf8] sm:$0xff]  ;;  %4607 = vmatpush2.bf16.msra.mxu1 %v11412_v1  ;;  %4495 = vmatprep.subr.bf16.mxu0 %v11277_v55  ;;  %v3669_v32 = vpop.f32.mrf.mxu0  ;;  %v11524_v55 = vcombine.low %v406_v21, %v410_v39 }
 0x1c8   :  { %4608 = vmatprep.subr.bf16.mxu1 %v11405_v15  ;;  %4497 = vmatprep.mubr.bf16.mxu0 %v12697_v24  ;;  %v11653_v6 = vcombine.high %v534_v4, %v538_v23  ;;  %v398_v18 = vld [vmem:[%s20021_s1 + $0x998] sm:$0xff]  ;;  %v15002_v15 = vadd.f32 %v3780_v27, %v3668_v19  ;;  %v3670_v7 = vadd.f32 %v3669_v32, %v14604_v9  ;;  %v3782_v1 = vpop.f32.mrf.mxu1 }
 0x1c9   :  { %v402_v56 = vld [vmem:[%s20021_s1 + $0x9b8] sm:$0xff]  ;;  %4610 = vmatprep.mubr.bf16.mxu1 %v12698_v60  ;;  %4496 = vmatpush2.bf16.msra.mxu0 %v11276_v57  ;;  %v3671_v47 = vpop.f32.mrf.mxu0  ;;  %v11652_v12 = vcombine.low %v534_v4, %v538_v23  ;;  %v12700_v60 = vld [vmem:[%s20022_s0 + $0x8] ss:$28 sps:$4 sm:$0xff]  }
 0x1ca   :  { %v526_v26 = vld [vmem:[%s20021_s1 + $0xd98] sm:$0xff]  ;;  %4691 = vmatprep.subr.bf16.mxu0 %v11525_v5  ;;  %v11517_v24 = vcombine.high %v398_v18, %v402_v56  ;;  %v15011_v19 = vadd.f32 %v3782_v1, %v3670_v7  ;;  %v3672_v9 = vadd.f32 %v3671_v47, %v14628_v37  ;;  %v3784_v27 = vpop.f32.mrf.mxu1  ;;  %v11516_v7 = vcombine.low %v398_v18, %v402_v56 }
 0x1cb   :  { %v530_v53 = vld [vmem:[%s20021_s1 + $0xdb8] sm:$0xff]  ;;  %4609 = vmatpush2.bf16.msra.mxu1 %v11404_v30  ;;  %v3821_v57 = vpop.f32.mrf.mxu0 }
 0x1cc   :  { %4804 = vmatprep.subr.bf16.mxu1 %v11653_v6  ;;  %v390_v21 = vld [vmem:[%s20021_s1 + $0x958] sm:$0xff]  ;;  %v11645_v23 = vcombine.high %v526_v26, %v530_v53  ;;  %v15033_v30 = vadd.f32 %v3784_v27, %v3672_v9  ;;  %v3822_v5 = vadd.f32 %v3821_v57, %v14659_v33  ;;  %v3934_v32 = vpop.f32.mrf.mxu1  ;;  %v12702_v27 = vld [vmem:[%s20022_s0 + $0x44] ss:$28 sps:$4 sm:$0xff]  }
 0x1cd   :  { %v394_v39 = vld [vmem:[%s20021_s1 + $0x978] sm:$0xff]  ;;  %v3823_v1 = vpop.f32.mrf.mxu0 }
 0x1ce   :  { %v12699_v4 = vld [vmem:[%s20022_s0] ss:$28 sps:$4 sm:$0xff]   ;;  %4611 = vmatmul.mubr.bf16.vlgmr.msra.gmra.mxu1 %v12700_v60  ;;  %v11509_v47 = vcombine.high %v390_v21, %v394_v39  ;;  %v3935_v31 = vadd.f32 %v3934_v32, %v3822_v5  ;;  %v3824_v50 = vadd.f32 %v3823_v1, %v14680_v10  ;;  %v3936_v9 = vpop.f32.mrf.mxu1 }
 0x1cf   :  { %4498 = vmatmul.mubr.bf16.vlgmr.msra.gmra.mxu0 %v12699_v4  ;;  %v15026_v37 = vld [vmem:[%s20021_s1 + $0xd58] sm:$0xff]  ;;  %4805 = vmatpush1.bf16.msra.mxu1 %v11652_v12  ;;  %v11644_v4 = vcombine.low %v526_v26, %v530_v53 }
 0x1d0   :  { %v15031_v6 = vld [vmem:[%s20021_s1 + $0xd78] sm:$0xff]  ;;  %4692 = vmatpush1.bf16.msra.mxu0 %v11524_v55  ;;  %4620 = vmatprep.mubr.bf16.mxu1 %v12702_v27  ;;  %v3825_v55 = vpop.f32.mrf.mxu0  ;;  %v3937_v26 = vadd.f32 %v3936_v9, %v3824_v50  ;;  %v3938_v12 = vpop.f32.mrf.mxu1  ;;  %v4919_v9 = vmax.f32 %v3935_v31, 0.0 }
 0x1d1   :  { %4693 = vmatprep.subr.bf16.mxu0 %v11517_v24  ;;  %v12701_v33 = vld [vmem:[%s20022_s0 + $0x3c] ss:$28 sps:$4 sm:$0xff]   ;;  %v11637_v10 = vcombine.high %v15026_v37, %v15031_v6  ;;  %4806 = vmatprep.subr.bf16.mxu1 %v11645_v23  ;;  %v3826_v53 = vadd.f32 %v3825_v55, %v14687_v0  ;;  %v11508_v24 = vcombine.low %v390_v21, %v394_v39 }
 0x1d2   :  { %4507 = vmatprep.mubr.bf16.mxu0 %v12701_v33  ;;  %v382_v18 = vld [vmem:[%s20021_s1 + $0x918] sm:$0xff]  ;;  %v3827_v32 = vpop.f32.mrf.mxu0  ;;  %v3940_v60 = vpop.f32.mrf.mxu1 }
 0x1d3   :  { %v386_v56 = vld [vmem:[%s20021_s1 + $0x938] sm:$0xff]  ;;  %4807 = vmatpush1.bf16.msra.mxu1 %v11644_v4  ;;  %v3939_v50 = vadd.f32 %v3938_v12, %v3826_v53  ;;  %v3828_v0 = vadd.f32 %v3827_v32, %v14705_v59 }
 0x1d4   :  { %4694 = vmatpush1.bf16.msra.mxu0 %v11516_v7  ;;  %v15058_v57 = vld [vmem:[%s20021_s1 + $0xd18] sm:$0xff]  ;;  %v11501_v23 = vcombine.high %v382_v18, %v386_v56  ;;  %v11636_v7 = vcombine.low %v15026_v37, %v15031_v6  ;;  %4808 = vmatprep.subr.bf16.mxu1 %v11637_v10  ;;  %v3831_v1 = vpop.f32.mrf.mxu0  ;;  %v3944_v53 = vpop.f32.mrf.mxu1 }
 0x1d5   :  { %v15063_v5 = vld [vmem:[%s20021_s1 + $0xd38] sm:$0xff]  ;;  %4695 = vmatprep.subr.bf16.mxu0 %v11509_v47  ;;  %v11500_v47 = vcombine.low %v382_v18, %v386_v56  ;;  %v4927_v33 = vmax.f32 %v3939_v50, 0.0  ;;  %v3941_v27 = vadd.f32 %v3940_v60, %v3828_v0  ;;  %v3832_v55 = vadd.f32 %v3831_v1, %v14711_v35  ;;  %v12705_v35 = vld [vmem:[%s20022_s0 + $0x74] ss:$28 sps:$4 sm:$0xff]  }
 0x1d6   :  { %v15069_v21 = vld [vmem:[%s20021_s1 + $0x8d8] sm:$0xff]  ;;  %v11629_v4 = vcombine.high %v15058_v57, %v15063_v5  ;;  %v4920_v18 = vmax.f32 %v3937_v26, 0.0  ;;  %v3833_v56 = vpop.f32.mrf.mxu0  ;;  %v11628_v12 = vcombine.low %v15058_v57, %v15063_v5  ;;  %v3946_v26 = vpop.f32.mrf.mxu1 }
 0x1d7   :  { %v15074_v39 = vld [vmem:[%s20021_s1 + $0x8f8] sm:$0xff]  ;;  %v4928_v32 = vmax.f32 %v3941_v27, 0.0  ;;  %v3945_v50 = vadd.f32 %v3944_v53, %v3832_v55  ;;  %v3834_v0 = vadd.f32 %v3833_v56, %v14730_v36  ;;  %4809 = vmatpush1.bf16.msra.mxu1 %v11636_v7 }
 0x1d8   :  { %v12703_v59 = vld [vmem:[%s20022_s0 + $0x38] ss:$28 sps:$4 sm:$0xff]   ;;  %v12704_v37 = vld [vmem:[%s20022_s0 + $0x40] ss:$28 sps:$4 sm:$0xff]   ;;  %4696 = vmatpush1.bf16.msra.mxu0 %v11508_v24  ;;  %v11493_v10 = vcombine.high %v15069_v21, %v15074_v39  ;;  %v15104_v24 = vpack.c.bf16 %v4927_v33, %v4919_v9  ;;  %v3835_v5 = vpop.f32.mrf.mxu0  ;;  %4810 = vmatprep.subr.bf16.mxu1 %v11629_v4  ;;  %v3948_v7 = vpop.f32.mrf.mxu1  ;;  %v11492_v33 = vcombine.low %v15069_v21, %v15074_v39 }
 0x1d9   :  { %4508 = vmatmul.mubr.bf16.gmra.mxu0 %v12703_v59  ;;  %4621 = vmatmul.mubr.bf16.gmra.mxu1 %v12704_v37  ;;  %v15090_v6 = vld [vmem:[%s20021_s1 + $0xcd8] sm:$0xff]  ;;  %v15120_v1 = vpack.c.bf16 %v4928_v32, %v4920_v18  ;;  %v3947_v59 = vadd.f32 %v3946_v26, %v3834_v0  ;;  %v3836_v9 = vadd.f32 %v3835_v5, %v14733_v17  ;;  %v4935_v32 = vmax.f32 %v3945_v50, 0.0 }
 0x1da   :  { %v15095_v31 = vld [vmem:[%s20021_s1 + $0xcf8] sm:$0xff]  ;;  %4697 = vmatprep.subr.bf16.mxu0 %v11501_v23  ;;  %4517 = vmatprep.mubr.bf16.mxu0 %v12705_v35  ;;  %20190 = vst [vmem:[#allocation17_spill] sm:$0xff] %v15104_v24  ;;  %v3837_v55 = vpop.f32.mrf.mxu0  ;;  %v3950_v37 = vpop.f32.mrf.mxu1 }
 0x1db   :  { %v12706_v23 = vld [vmem:[%s20022_s0 + $0x7c] ss:$28 sps:$4 sm:$0xff]   ;;  %v11621_v36 = vcombine.high %v15090_v6, %v15095_v31  ;;  %20191 = vst [vmem:[#allocation18_spill] sm:$0xff] %v15120_v1  ;;  %v3949_v17 = vadd.f32 %v3948_v7, %v3836_v9  ;;  %4811 = vmatpush1.bf16.msra.mxu1 %v11628_v12  ;;  %v11620_v18 = vcombine.low %v15090_v6, %v15095_v31 }
 0x1dc   :  { %4630 = vmatprep.mubr.bf16.mxu1 %v12706_v23  ;;  %v15113_v60 = vld [vmem:[%s20021_s1 + $0x898] sm:$0xff]  ;;  %4698 = vmatpush1.bf16.msra.mxu0 %v11500_v47  ;;  %v3838_v47 = vadd.f32 %v3837_v55, %v14751_v52  ;;  %v3841_v56 = vpop.f32.mrf.mxu0  ;;  %v12707_v52 = vld [vmem:[%s20022_s0 + $0x70] ss:$28 sps:$4 sm:$0xff]   ;;  %v3954_v23 = vpop.f32.mrf.mxu1 }
 0x1dd   :  { %v370_v57 = vld [vmem:[%s20021_s1 + $0x8b8] sm:$0xff]  ;;  %4699 = vmatprep.subr.bf16.mxu0 %v11493_v10  ;;  %4812 = vmatprep.subr.bf16.mxu1 %v11621_v36  ;;  %v4943_v0 = vmax.f32 %v3949_v17, 0.0  ;;  %v3842_v12 = vadd.f32 %v3841_v56, %v14757_v3  ;;  %v12709_v3 = vld [vmem:[%s20022_s0 + $0xac] ss:$28 sps:$4 sm:$0xff]  }
 0x1de   :  { %v15128_v27 = vld [vmem:[%s20021_s1 + $0xc98] sm:$0xff]  ;;  %v11485_v53 = vcombine.high %v15113_v60, %v370_v57  ;;  %v11484_v35 = vcombine.low %v15113_v60, %v370_v57  ;;  %v3951_v26 = vadd.f32 %v3950_v37, %v3838_v47  ;;  %v4936_v60 = vmax.f32 %v3947_v59, 0.0  ;;  %v3843_v57 = vpop.f32.mrf.mxu0  ;;  %v3956_v59 = vpop.f32.mrf.mxu1 }
 0x1df   :  { %v15133_v4 = vld [vmem:[%s20021_s1 + $0xcb8] sm:$0xff]  ;;  %v15176_v9 = vpack.c.bf16 %v4943_v0, %v4935_v32  ;;  %v3844_v55 = vadd.f32 %v3843_v57, %v14776_v51  ;;  %4813 = vmatpush1.bf16.msra.mxu1 %v11620_v18 }
 0x1e0   :  { %v15140_v21 = vld [vmem:[%s20021_s1 + $0x858] sm:$0xff]  ;;  %v11613_v10 = vcombine.high %v15128_v27, %v15133_v4  ;;  %4700 = vmatpush1.bf16.msra.mxu0 %v11492_v33  ;;  %v11612_v36 = vcombine.low %v15128_v27, %v15133_v4  ;;  %v4944_v7 = vmax.f32 %v3951_v26, 0.0  ;;  %v3955_v33 = vadd.f32 %v3954_v23, %v3842_v12  ;;  %v3845_v4 = vpop.f32.mrf.mxu0 }
 0x1e1   :  { %v15145_v39 = vld [vmem:[%s20021_s1 + $0x878] sm:$0xff]  ;;  %4518 = vmatmul.mubr.bf16.gmra.mxu0 %v12707_v52  ;;  %4701 = vmatprep.subr.bf16.mxu0 %v11485_v53  ;;  %20192 = vst [vmem:[#allocation19_spill] sm:$0xff] %v15176_v9  ;;  %v12710_v53 = vld [vmem:[%s20022_s0 + $0xb4] ss:$28 sps:$4 sm:$0xff]   ;;  %v3957_v37 = vadd.f32 %v3956_v59, %v3844_v55  ;;  %v3846_v56 = vadd.f32 %v3845_v4, %v14779_v62  ;;  %v3958_v52 = vpop.f32.mrf.mxu1 }
 0x1e2   :  { %v12708_v6 = vld [vmem:[%s20022_s0 + $0x78] ss:$28 sps:$4 sm:$0xff]   ;;  %4527 = vmatprep.mubr.bf16.mxu0 %v12709_v3  ;;  %v11477_v5 = vcombine.high %v15140_v21, %v15145_v39  ;;  %4814 = vmatprep.subr.bf16.mxu1 %v11613_v10  ;;  %v15194_v47 = vpack.c.bf16 %v4944_v7, %v4936_v60  ;;  %v11476_v32 = vcombine.low %v15140_v21, %v15145_v39  ;;  %v3847_v10 = vpop.f32.mrf.mxu0  ;;  %v4951_v3 = vmax.f32 %v3955_v33, 0.0  ;;  %v15240_v33 = vld [vmem:[%s20024_s3 + $0x5e0] sm:$0xff] }
 0x1e3   :  { %4631 = vmatmul.mubr.bf16.gmra.mxu1 %v12708_v6  ;;  %v15162_v31 = vld [vmem:[%s20021_s1 + $0xc58] sm:$0xff]  ;;  %v3959_v62 = vadd.f32 %v3958_v52, %v3846_v56  ;;  %v3960_v12 = vpop.f32.mrf.mxu1  ;;  %v4952_v59 = vmax.f32 %v3957_v37, 0.0  ;;  %v12714_v37 = vld [vmem:[%s20022_s0 + $0xec] ss:$28 sps:$4 sm:$0xff]  }
 0x1e4   :  { %v15167_v50 = vld [vmem:[%s20021_s1 + $0xc78] sm:$0xff]  ;;  %4640 = vmatprep.mubr.bf16.mxu1 %v12710_v53  ;;  %20193 = vst [vmem:[#allocation20_spill] sm:$0xff] %v15194_v47  ;;  %4702 = vmatpush1.bf16.msra.mxu0 %v11484_v35  ;;  %v3848_v35 = vadd.f32 %v3847_v10, %v14797_v46  ;;  %v3851_v6 = vpop.f32.mrf.mxu0  ;;  %v12711_v46 = vld [vmem:[%s20022_s0 + $0xa8] ss:$28 sps:$4 sm:$0xff]  }
 0x1e5   :  { %v15185_v17 = vld [vmem:[%s20021_s1 + $0x818] sm:$0xff]  ;;  %v11605_v51 = vcombine.high %v15162_v31, %v15167_v50  ;;  %4703 = vmatprep.subr.bf16.mxu0 %v11477_v5  ;;  %4815 = vmatpush1.bf16.msra.mxu1 %v11612_v36  ;;  %v11604_v23 = vcombine.low %v15162_v31, %v15167_v50  ;;  %v4959_v5 = vmax.f32 %v3959_v62, 0.0  ;;  %v3852_v36 = vadd.f32 %v3851_v6, %v14803_v13  ;;  %v3964_v55 = vpop.f32.mrf.mxu1  ;;  %v12712_v31 = vld [vmem:[%s20022_s0 + $0xb0] ss:$28 sps:$4 sm:$0xff]   ;;  %v15235_v50 = vld [vmem:[%s20024_s3 + $0x5c0] sm:$0xff] }
 0x1e6   :  { %v15190_v27 = vld [vmem:[%s20021_s1 + $0x838] sm:$0xff]  ;;  %v3961_v7 = vadd.f32 %v3960_v12, %v3848_v35  ;;  %v3853_v53 = vpop.f32.mrf.mxu0  ;;  %v12713_v13 = vld [vmem:[%s20022_s0 + $0xe4] ss:$28 sps:$4 sm:$0xff]  }
 0x1e7   :  { %v15202_v0 = vld [vmem:[%s20021_s1 + $0xc18] sm:$0xff]  ;;  %v11469_v26 = vcombine.high %v15185_v17, %v15190_v27  ;;  %v11468_v60 = vcombine.low %v15185_v17, %v15190_v27  ;;  %4816 = vmatprep.subr.bf16.mxu1 %v11605_v51  ;;  %v15248_v4 = vpack.c.bf16 %v4959_v5, %v4951_v3  ;;  %v3965_v56 = vadd.f32 %v3964_v55, %v3852_v36 }
 0x1e8   :  { %v482_v18 = vld [vmem:[%s20021_s1 + $0xc38] sm:$0xff]  ;;  %4704 = vmatpush1.bf16.msra.mxu0 %v11476_v32  ;;  %v4960_v51 = vmax.f32 %v3961_v7, 0.0  ;;  %v3854_v52 = vadd.f32 %v3853_v53, %v14822_v45  ;;  %v3966_v32 = vpop.f32.mrf.mxu1  ;;  %v11839_v45 = vcombine.high %v15235_v50, %v15240_v33  ;;  %v12716_v53 = vld [vmem:[%s20022_s0 + $0xe8] ss:$28 sps:$4 sm:$0xff]  }
 0x1e9   :  { %v15213_v21 = vld [vmem:[%s20021_s1 + $0xbd8] sm:$0xff]  ;;  %4528 = vmatmul.mubr.bf16.gmra.mxu0 %v12711_v46  ;;  %v11597_v57 = vcombine.high %v15202_v0, %v482_v18  ;;  %4705 = vmatprep.subr.bf16.mxu0 %v11469_v26  ;;  %v11596_v27 = vcombine.low %v15202_v0, %v482_v18  ;;  %20194 = vst [vmem:[#allocation21_spill] sm:$0xff] %v15248_v4  ;;  %v3855_v18 = vpop.f32.mrf.mxu0  ;;  %v4967_v36 = vmax.f32 %v3965_v56, 0.0 }
 0x1ea   :  { %v15218_v39 = vld [vmem:[%s20021_s1 + $0xbf8] sm:$0xff]  ;;  %4537 = vmatprep.mubr.bf16.mxu0 %v12713_v13  ;;  %4817 = vmatpush1.bf16.msra.mxu1 %v11604_v23  ;;  %v15262_v26 = vpack.c.bf16 %v4960_v51, %v4952_v59  ;;  %v3967_v62 = vadd.f32 %v3966_v32, %v3854_v52  ;;  %v3856_v35 = vadd.f32 %v3855_v18, %v14825_v14  ;;  %v3968_v12 = vpop.f32.mrf.mxu1 }
 0x1eb   :  { %4641 = vmatmul.mubr.bf16.gmra.mxu1 %v12712_v31  ;;  %v11589_v17 = vcombine.high %v15213_v21, %v15218_v39  ;;  %v462_v10 = vld [vmem:[%s20021_s1 + $0xb98] sm:$0xff]  ;;  %4818 = vmatprep.subr.bf16.mxu1 %v11597_v57  ;;  %v11588_v6 = vcombine.low %v15213_v21, %v15218_v39  ;;  %v3857_v46 = vpop.f32.mrf.mxu0 }
 0x1ec   :  { %4650 = vmatprep.mubr.bf16.mxu1 %v12714_v37  ;;  %v466_v0 = vld [vmem:[%s20021_s1 + $0xbb8] sm:$0xff]  ;;  %20195 = vst [vmem:[#allocation22_spill] sm:$0xff] %v15262_v26  ;;  %4706 = vmatpush1.bf16.msra.mxu0 %v11468_v60  ;;  %v3969_v5 = vadd.f32 %v3968_v12, %v3856_v35  ;;  %v3858_v23 = vadd.f32 %v3857_v46, %v14843_v42  ;;  %v3970_v57 = vpop.f32.mrf.mxu1  ;;  %v4968_v13 = vmax.f32 %v3967_v62, 0.0 }
 0x1ed   :  { %4707 = vmatprep.subr.bf16.mxu0 %v11589_v17  ;;  %v11581_v3 = vcombine.high %v462_v10, %v466_v0  ;;  %v454_v7 = vld [vmem:[%s20021_s1 + $0xb58] sm:$0xff]  ;;  %v3861_v60 = vpop.f32.mrf.mxu0  ;;  %v11580_v39 = vcombine.low %v462_v10, %v466_v0  ;;  %v12718_v10 = vld [vmem:[%s20022_s0 + $0x124] ss:$28 sps:$4 sm:$0xff]  }
 0x1ee   :  { %v458_v14 = vld [vmem:[%s20021_s1 + $0xb78] sm:$0xff]  ;;  %4819 = vmatpush1.bf16.msra.mxu1 %v11596_v27  ;;  %v4975_v42 = vmax.f32 %v3969_v5, 0.0  ;;  %v3971_v55 = vadd.f32 %v3970_v57, %v3858_v23  ;;  %v3862_v31 = vadd.f32 %v3861_v60, %v14849_v28  ;;  %v3974_v59 = vpop.f32.mrf.mxu1 }
 0x1ef   :  { %v12715_v21 = vld [vmem:[%s20022_s0 + $0xe0] ss:$28 sps:$4 sm:$0xff]   ;;  %8336 = vmatprep.subr.bf16.mxu1 %v11839_v45  ;;  %v3863_v17 = vpop.f32.mrf.mxu0  ;;  %v11573_v51 = vcombine.high %v454_v7, %v458_v14 }
 0x1f0   :  { %4708 = vmatpush2.bf16.msra.mxu0 %v11588_v6  ;;  %v12717_v27 = vld [vmem:[%s20022_s0 + $0x11c] ss:$28 sps:$4 sm:$0xff]   ;;  %v15284_v56 = vpack.c.bf16 %v4975_v42, %v4967_v36  ;;  %v4976_v52 = vmax.f32 %v3971_v55, 0.0  ;;  %v3975_v28 = vadd.f32 %v3974_v59, %v3862_v31  ;;  %v3864_v32 = vadd.f32 %v3863_v17, %v14868_v44  ;;  %v3976_v37 = vpop.f32.mrf.mxu1 }
 0x1f1   :  { %4538 = vmatmul.mubr.bf16.gmra.mxu0 %v12715_v21  ;;  %4709 = vmatprep.subr.bf16.mxu0 %v11581_v3  ;;  %v446_v0 = vld [vmem:[%s20021_s1 + $0xb18] sm:$0xff]  ;;  %v3865_v45 = vpop.f32.mrf.mxu0  ;;  %v11572_v6 = vcombine.low %v454_v7, %v458_v14 }
 0x1f2   :  { %4547 = vmatprep.mubr.bf16.mxu0 %v12717_v27  ;;  %20196 = vst [vmem:[#allocation23_spill] sm:$0xff] %v15284_v56  ;;  %v450_v18 = vld [vmem:[%s20021_s1 + $0xb38] sm:$0xff]  ;;  %v15296_v62 = vpack.c.bf16 %v4976_v52, %v4968_v13  ;;  %v3977_v35 = vadd.f32 %v3976_v37, %v3864_v32  ;;  %v3866_v44 = vadd.f32 %v3865_v45, %v14871_v43  ;;  %v3978_v12 = vpop.f32.mrf.mxu1  ;;  %v4983_v14 = vmax.f32 %v3975_v28, 0.0  ;;  %v12721_v13 = vld [vmem:[%s20022_s0 + $0x154] ss:$28 sps:$4 sm:$0xff]  }
 0x1f3   :  { %4651 = vmatmul.mubr.bf16.gmra.mxu1 %v12716_v53  ;;  %v3867_v46 = vpop.f32.mrf.mxu0  ;;  %v11565_v3 = vcombine.high %v446_v0, %v450_v18  ;;  %v438_v60 = vld [vmem:[%s20021_s1 + $0xad8] sm:$0xff]  ;;  %v11564_v7 = vcombine.low %v446_v0, %v450_v18 }
 0x1f4   :  { %4660 = vmatprep.mubr.bf16.mxu1 %v12718_v10  ;;  %20197 = vst [vmem:[#allocation24_spill] sm:$0xff] %v15296_v62  ;;  %4710 = vmatpush2.bf16.msra.mxu0 %v11580_v39  ;;  %v3979_v5 = vadd.f32 %v3978_v12, %v3866_v44  ;;  %v3868_v23 = vadd.f32 %v3867_v46, %v14889_v48  ;;  %v3980_v57 = vpop.f32.mrf.mxu1  ;;  %v442_v21 = vld [vmem:[%s20021_s1 + $0xaf8] sm:$0xff]  ;;  %v4984_v59 = vmax.f32 %v3977_v35, 0.0 }
 0x1f5   :  { %4711 = vmatprep.subr.bf16.mxu0 %v11573_v51  ;;  %v3871_v36 = vpop.f32.mrf.mxu0  ;;  %v12719_v43 = vld [vmem:[%s20022_s0 + $0x118] ss:$28 sps:$4 sm:$0xff]   ;;  %v12720_v31 = vld [vmem:[%s20022_s0 + $0x120] ss:$28 sps:$4 sm:$0xff]   ;;  %v11557_v17 = vcombine.high %v438_v60, %v442_v21  ;;  %v11556_v44 = vcombine.low %v438_v60, %v442_v21 }
 0x1f6   :  { %v4991_v39 = vmax.f32 %v3979_v5, 0.0  ;;  %v3981_v42 = vadd.f32 %v3980_v57, %v3868_v23  ;;  %v3872_v48 = vadd.f32 %v3871_v36, %v14895_v20  ;;  %v3984_v55 = vpop.f32.mrf.mxu1  ;;  %v12722_v32 = vld [vmem:[%s20022_s0 + $0x15c] ss:$28 sps:$4 sm:$0xff]  }
 0x1f7   :  { %v3873_v53 = vpop.f32.mrf.mxu0  ;;  %v430_v37 = vld [vmem:[%s20021_s1 + $0xa98] sm:$0xff] }
 0x1f8   :  { %4712 = vmatpush2.bf16.msra.mxu0 %v11572_v6  ;;  %v15316_v27 = vpack.c.bf16 %v4991_v39, %v4983_v14  ;;  %v4992_v51 = vmax.f32 %v3981_v42, 0.0  ;;  %v3985_v20 = vadd.f32 %v3984_v55, %v3872_v48  ;;  %v3874_v52 = vadd.f32 %v3873_v53, %v14914_v8  ;;  %v3986_v28 = vpop.f32.mrf.mxu1  ;;  %v434_v10 = vld [vmem:[%s20021_s1 + $0xab8] sm:$0xff]  ;;  %v12725_v55 = vld [vmem:[%s20022_s0 + $0x18c] ss:$28 sps:$4 sm:$0xff]  }
 0x1f9   :  { %4548 = vmatmul.mubr.bf16.gmra.mxu0 %v12719_v43  ;;  %4713 = vmatprep.subr.bf16.mxu0 %v11565_v3  ;;  %v3875_v0 = vpop.f32.mrf.mxu0  ;;  %v11549_v6 = vcombine.high %v430_v37, %v434_v10  ;;  %v422_v23 = vld [vmem:[%s20021_s1 + $0xa58] sm:$0xff]  ;;  %v11548_v60 = vcombine.low %v430_v37, %v434_v10 }
 0x1fa   :  { %4557 = vmatprep.mubr.bf16.mxu0 %v12721_v13  ;;  %20198 = vst [vmem:[#allocation25_spill] sm:$0xff] %v15316_v27  ;;  %v15328_v18 = vpack.c.bf16 %v4992_v51, %v4984_v59  ;;  %v3987_v45 = vadd.f32 %v3986_v28, %v3874_v52  ;;  %v3876_v8 = vadd.f32 %v3875_v0, %v14917_v22  ;;  %v3988_v35 = vpop.f32.mrf.mxu1  ;;  %v426_v57 = vld [vmem:[%s20021_s1 + $0xa78] sm:$0xff]  ;;  %v12723_v22 = vld [vmem:[%s20022_s0 + $0x150] ss:$28 sps:$4 sm:$0xff]   ;;  %v4999_v21 = vmax.f32 %v3985_v20, 0.0 }
 0x1fb   :  { %4661 = vmatmul.mubr.bf16.gmra.mxu1 %v12720_v31  ;;  %v3877_v12 = vpop.f32.mrf.mxu0  ;;  %v12724_v39 = vld [vmem:[%s20022_s0 + $0x158] ss:$28 sps:$4 sm:$0xff]   ;;  %v11541_v31 = vcombine.high %v422_v23, %v426_v57  ;;  %v11540_v0 = vcombine.low %v422_v23, %v426_v57 }
 0x1fc   :  { %4670 = vmatprep.mubr.bf16.mxu1 %v12722_v32  ;;  %20199 = vst [vmem:[#allocation26_spill] sm:$0xff] %v15328_v18  ;;  %4714 = vmatpush2.bf16.msra.mxu0 %v11564_v7  ;;  %v3989_v46 = vadd.f32 %v3988_v35, %v3876_v8  ;;  %v3878_v3 = vadd.f32 %v3877_v12, %v14935_v41  ;;  %v3990_v5 = vpop.f32.mrf.mxu1  ;;  %v5000_v42 = vmax.f32 %v3987_v45, 0.0  ;;  %v12726_v51 = vld [vmem:[%s20022_s0 + $0x194] ss:$28 sps:$4 sm:$0xff]   ;;  %v414_v20 = vld [vmem:[%s20021_s1 + $0xa18] sm:$0xff] }
 0x1fd   :  { %4715 = vmatprep.subr.bf16.mxu0 %v11557_v17  ;;  %v3881_v36 = vpop.f32.mrf.mxu0  ;;  %v418_v52 = vld [vmem:[%s20021_s1 + $0xa38] sm:$0xff] }
 0x1fe   :  { %v5007_v43 = vmax.f32 %v3989_v46, 0.0  ;;  %v3991_v7 = vadd.f32 %v3990_v5, %v3878_v3  ;;  %v3882_v41 = vadd.f32 %v3881_v36, %v14941_v61  ;;  %v3994_v14 = vpop.f32.mrf.mxu1  ;;  %v11533_v8 = vcombine.high %v414_v20, %v418_v52  ;;  %v15372_v46 = vld [vmem:[%s20024_s3 + $0x1e0] sm:$0xff] }
 0x1ff   :  { %v3883_v48 = vpop.f32.mrf.mxu0  ;;  %v12727_v3 = vld [vmem:[%s20022_s0 + $0x188] ss:$28 sps:$4 sm:$0xff]   ;;  %v11532_v5 = vcombine.low %v414_v20, %v418_v52 }
 0x200   :  { %4716 = vmatpush2.bf16.msra.mxu0 %v11556_v44  ;;  %v15348_v59 = vpack.c.bf16 %v5007_v43, %v4999_v21  ;;  %v5008_v53 = vmax.f32 %v3991_v7, 0.0  ;;  %v3995_v61 = vadd.f32 %v3994_v14, %v3882_v41  ;;  %v3884_v13 = vadd.f32 %v3883_v48, %v14960_v16  ;;  %v3996_v17 = vpop.f32.mrf.mxu1  ;;  %v12728_v21 = vld [vmem:[%s20022_s0 + $0x190] ss:$28 sps:$4 sm:$0xff]   ;;  %v5289_v20 = vld [vmem:[%s20024_s3 + $0x5a0] sm:$0xff] }
 0x201   :  { %4558 = vmatmul.mubr.bf16.gmra.mxu0 %v12723_v22  ;;  %4717 = vmatprep.subr.bf16.mxu0 %v11549_v6  ;;  %v3885_v28 = vpop.f32.mrf.mxu0  ;;  %v15367_v6 = vld [vmem:[%s20024_s3 + $0x1c0] sm:$0xff]  ;;  %v12729_v41 = vld [vmem:[%s20022_s0 + $0x14] ss:$28 sps:$4 sm:$0xff]  }
 0x202   :  { %4567 = vmatprep.mubr.bf16.mxu0 %v12725_v55  ;;  %20200 = vst [vmem:[#allocation27_spill] sm:$0xff] %v15348_v59  ;;  %v15360_v32 = vpack.c.bf16 %v5008_v53, %v5000_v42  ;;  %v3997_v37 = vadd.f32 %v3996_v17, %v3884_v13  ;;  %v3886_v16 = vadd.f32 %v3885_v28, %v14963_v54  ;;  %v3998_v10 = vpop.f32.mrf.mxu1  ;;  %v5015_v23 = vmax.f32 %v3995_v61, 0.0  ;;  %v15395_v53 = vld [vmem:[%s20024_s3 + $0x180] sm:$0xff] }
 0x203   :  { %4671 = vmatmul.mubr.bf16.gmra.mxu1 %v12724_v39  ;;  %v3887_v45 = vpop.f32.mrf.mxu0  ;;  %v11711_v14 = vcombine.high %v15367_v6, %v15372_v46  ;;  %v5161_v61 = vld [vmem:[%s20024_s3 + $0x1a0] sm:$0xff] }
 0x204   :  { %4680 = vmatprep.mubr.bf16.mxu1 %v12726_v51  ;;  %20201 = vst [vmem:[#allocation28_spill] sm:$0xff] %v15360_v32  ;;  %4718 = vmatpush2.bf16.msra.mxu0 %v11548_v60  ;;  %v3999_v35 = vadd.f32 %v3998_v10, %v3886_v16  ;;  %v3888_v44 = vadd.f32 %v3887_v45, %v14981_v40  ;;  %v4000_v12 = vpop.f32.mrf.mxu1  ;;  %v20051_v40 = vsub.s32 4, %v13844_v63  ;;  %v5016_v43 = vmax.f32 %v3997_v37, 0.0  ;;  %v12730_v17 = vld [vmem:[%s20023_s2] sm:$0xff] }
 0x205   :  { %4719 = vmatprep.subr.bf16.mxu0 %v11541_v31  ;;  %v3891_v54 = vpop.f32.mrf.mxu0  ;;  %v5285_v51 = vld [vmem:[%s20024_s3 + $0x580] sm:$0xff]  ;;  %v11710_v10 = vcombine.low %v15367_v6, %v15372_v46  ;;  %v11838_v45 = vcombine.low %v15235_v50, %v15240_v33 }
 0x206   :  { %v5023_v57 = vmax.f32 %v3999_v35, 0.0  ;;  %v4001_v36 = vadd.f32 %v4000_v12, %v3888_v44  ;;  %v3892_v22 = vadd.f32 %v3891_v54, %v14987_v11  ;;  %v4004_v60 = vpop.f32.mrf.mxu1  ;;  %v20050_v11 = vsub.s32 5, %v13844_v63  ;;  %v15424_v35 = vld [vmem:[%s20024_s3 + $0x140] sm:$0xff] }
 0x207   :  { %v3893_v7 = vpop.f32.mrf.mxu0  ;;  %v11831_v6 = vcombine.high %v5285_v51, %v5289_v20  ;;  %v15434_v50 = vld [vmem:[%s20024_s3 + $0x160] sm:$0xff] }
 0x208   :  { %4720 = vmatpush2.bf16.msra.mxu0 %v11540_v0  ;;  %v15388_v39 = vpack.c.bf16 %v5023_v57, %v5015_v23  ;;  %v5024_v42 = vmax.f32 %v4001_v36, 0.0  ;;  %v4005_v48 = vadd.f32 %v4004_v60, %v3892_v22  ;;  %v3894_v55 = vadd.f32 %v3893_v7, %v15002_v15  ;;  %v4006_v31 = vpop.f32.mrf.mxu1  ;;  %v15439_v33 = vld [vmem:[%s20024_s3 + $0x540] sm:$0xff] }
 0x209   :  { %4568 = vmatmul.mubr.bf16.gmra.mxu0 %v12727_v3  ;;  %4721 = vmatprep.subr.bf16.mxu0 %v11533_v8  ;;  %v3895_v13 = vpop.f32.mrf.mxu0  ;;  %v15405_v15 = vrot.slane %v12730_v17, %v20051_v40  ;;  %v11703_v8 = vcombine.high %v15395_v53, %v5161_v61  ;;  %v15429_v54 = vrot.slane %v12730_v17, %v20050_v11  ;;  %v12731_v3 = vld [vmem:[%s20022_s0 + $0x10] ss:$28 sps:$4 sm:$0xff]   ;;  %v5141_v17 = vld [vmem:[%s20024_s3 + $0x100] sm:$0xff] }
 0x20a   :  { %4723 = vmatprep.mubr.bf16.mxu0 %v12729_v41  ;;  %20202 = vst [vmem:[#allocation29_spill] sm:$0xff] %v15388_v39  ;;  %v15413_v52 = vpack.c.bf16 %v5024_v42, %v5016_v43  ;;  %v4007_v28 = vadd.f32 %v4006_v31, %v3894_v55  ;;  %v3896_v37 = vadd.f32 %v3895_v13, %v15011_v19  ;;  %v4008_v16 = vpop.f32.mrf.mxu1  ;;  %v5031_v23 = vmax.f32 %v4005_v48, 0.0  ;;  %v12733_v13 = vld [vmem:[%s20022_s0 + $0x4c] ss:$28 sps:$4 sm:$0xff]  }
 0x20b   :  { %4681 = vmatmul.mubr.bf16.gmra.mxu1 %v12728_v21  ;;  %v3897_v0 = vpop.f32.mrf.mxu0  ;;  %v12732_v21 = vld [vmem:[%s20022_s0 + $0x18] ss:$28 sps:$4 sm:$0xff]   ;;  %v11830_v41 = vcombine.low %v5285_v51, %v5289_v20  ;;  %v5145_v51 = vld [vmem:[%s20024_s3 + $0x120] sm:$0xff] }
 0x20c   :  { %4836 = vmatprep.mubr.bf16.mxu1 %v20167_v25  ;;  %20203 = vst [vmem:[#allocation30_spill] sm:$0xff] %v15413_v52  ;;  %4722 = vmatpush2.bf16.msra.mxu0 %v11532_v5  ;;  %v4009_v44 = vadd.f32 %v4008_v16, %v3896_v37  ;;  %v3898_v19 = vadd.f32 %v3897_v0, %v15033_v30  ;;  %v4010_v12 = vpop.f32.mrf.mxu1  ;;  %v15444_v30 = vld [vmem:[%s20024_s3 + $0x560] sm:$0xff]  ;;  %v5032_v43 = vmax.f32 %v4007_v28, 0.0 }
 0x20d   :  { %8223 = vmatprep.subr.bf16.mxu0 %v11711_v14  ;;  %v4047_v46 = vpop.f32.mrf.mxu0  ;;  %v11702_v5 = vcombine.low %v15395_v53, %v5161_v61  ;;  %v11695_v14 = vcombine.high %v15424_v35, %v15434_v50  ;;  %v11823_v42 = vcombine.high %v15439_v33, %v15444_v30  ;;  %v5269_v28 = vld [vmem:[%s20024_s3 + $0x500] sm:$0xff] }
 0x20e   :  { %v5039_v57 = vmax.f32 %v4009_v44, 0.0  ;;  %v4011_v36 = vadd.f32 %v4010_v12, %v3898_v19  ;;  %v4048_v22 = vadd.f32 %v4047_v46, %v15405_v15  ;;  %v4160_v60 = vpop.f32.mrf.mxu1  ;;  %v5273_v37 = vld [vmem:[%s20024_s3 + $0x520] sm:$0xff]  ;;  %v11822_v19 = vcombine.low %v15439_v33, %v15444_v30 }
 0x20f   :  { %v4049_v7 = vpop.f32.mrf.mxu0  ;;  %v11687_v12 = vcombine.high %v5141_v17, %v5145_v51  ;;  %v12734_v33 = vld [vmem:[%s20022_s0 + $0x48] ss:$28 sps:$4 sm:$0xff]  }
 0x210   :  { %v15458_v48 = vpack.c.bf16 %v5039_v57, %v5031_v23  ;;  %v5040_v55 = vmax.f32 %v4011_v36, 0.0  ;;  %v15460_v31 = vadd.f32 %v4160_v60, %v4048_v22  ;;  %v4050_v53 = vadd.f32 %v4049_v7, %v15429_v54  ;;  %v4162_v61 = vpop.f32.mrf.mxu1  ;;  %v5261_v30 = vld [vmem:[%s20024_s3 + $0x4c0] sm:$0xff] }
 0x211   :  { %4724 = vmatmul.mubr.bf16.vlgmr.msra.gmra.mxu0 %v12731_v3  ;;  %v4051_v20 = vpop.f32.mrf.mxu0  ;;  %v11815_v23 = vcombine.high %v5269_v28, %v5273_v37  ;;  %v5265_v57 = vld [vmem:[%s20024_s3 + $0x4e0] sm:$0xff] }
 0x212   :  { %8224 = vmatpush1.bf16.msra.mxu0 %v11710_v10  ;;  %20204 = vst [vmem:[#allocation31_spill] sm:$0xff] %v15458_v48  ;;  %4733 = vmatprep.mubr.bf16.mxu0 %v12733_v13  ;;  %v15479_v16 = vpack.c.bf16 %v5040_v55, %v5032_v43  ;;  %v15481_v10 = vadd.f32 %v4162_v61, %v4050_v53  ;;  %v12736_v61 = vld [vmem:[%s20022_s0 + $0x84] ss:$28 sps:$4 sm:$0xff]  }
 0x213   :  { %4837 = vmatmul.mubr.bf16.vlgmr.msra.gmra.mxu1 %v12732_v21  ;;  %8225 = vmatprep.subr.bf16.mxu0 %v11703_v8  ;;  %v4052_v0 = vadd.f32 %v4051_v20, %v15405_v15  ;;  %v11694_v8 = vcombine.low %v15424_v35, %v15434_v50  ;;  %v4053_v44 = vpop.f32.mrf.mxu0  ;;  %v5137_v35 = vld [vmem:[%s20024_s3 + $0xe0] sm:$0xff]  ;;  %v12735_v21 = vld [vmem:[%s20022_s0 + $0x50] ss:$28 sps:$4 sm:$0xff]   ;;  %v11686_v43 = vcombine.low %v5141_v17, %v5145_v51 }
 0x214   :  { %8337 = vmatpush1.bf16.msra.mxu1 %v11838_v45  ;;  %4846 = vmatprep.mubr.bf16.mxu1 %v20167_v25  ;;  %20205 = vst [vmem:[#allocation32_spill] sm:$0xff] %v15479_v16  ;;  %v4164_v45 = vpop.f32.mrf.mxu1  ;;  %v4054_v46 = vadd.f32 %v4053_v44, %v15429_v54  ;;  %v11807_v13 = vcombine.high %v5261_v30, %v5265_v57  ;;  %v5125_v17 = vld [vmem:[%s20024_s3 + $0x80] sm:$0xff] }
 0x215   :  { %8338 = vmatprep.subr.bf16.mxu1 %v11831_v6  ;;  %v15488_v6 = vadd.f32 %v4164_v45, %v4052_v0  ;;  %v4057_v50 = vpop.f32.mrf.mxu0  ;;  %v5129_v51 = vld [vmem:[%s20024_s3 + $0xa0] sm:$0xff] }
 0x216   :  { %8226 = vmatpush1.bf16.msra.mxu0 %v11702_v5  ;;  %v4166_v3 = vpop.f32.mrf.mxu1  ;;  %v5133_v5 = vld [vmem:[%s20024_s3 + $0xc0] sm:$0xff]  ;;  %v4058_v22 = vadd.f32 %v4057_v50, %v15405_v15 }
 0x217   :  { %8227 = vmatprep.subr.bf16.mxu0 %v11695_v14  ;;  %v15506_v36 = vadd.f32 %v4166_v3, %v4054_v46  ;;  %v4059_v7 = vpop.f32.mrf.mxu0  ;;  %v11679_v14 = vcombine.high %v5133_v5, %v5137_v35  ;;  %v11678_v44 = vcombine.low %v5133_v5, %v5137_v35  ;;  %v11671_v46 = vcombine.high %v5125_v17, %v5129_v51  ;;  %v5121_v5 = vld [vmem:[%s20024_s3 + $0x60] sm:$0xff] }
 0x218   :  { %8339 = vmatpush1.bf16.msra.mxu1 %v11830_v41  ;;  %v4170_v60 = vpop.f32.mrf.mxu1  ;;  %v11814_v41 = vcombine.low %v5269_v28, %v5273_v37  ;;  %v4060_v55 = vadd.f32 %v4059_v7, %v15429_v54  ;;  %v5253_v28 = vld [vmem:[%s20024_s3 + $0x480] sm:$0xff] }
 0x219   :  { %8340 = vmatprep.subr.bf16.mxu1 %v11823_v42  ;;  %4734 = vmatmul.mubr.bf16.gmra.mxu0 %v12734_v33  ;;  %v15512_v42 = vadd.f32 %v4170_v60, %v4058_v22  ;;  %v4061_v20 = vpop.f32.mrf.mxu0  ;;  %v5257_v37 = vld [vmem:[%s20024_s3 + $0x4a0] sm:$0xff] }
 0x21a   :  { %8228 = vmatpush1.bf16.msra.mxu0 %v11694_v8  ;;  %v4172_v53 = vpop.f32.mrf.mxu1  ;;  %4743 = vmatprep.mubr.bf16.mxu0 %v12736_v61  ;;  %v4062_v45 = vadd.f32 %v4061_v20, %v15405_v15  ;;  %v11799_v33 = vcombine.high %v5253_v28, %v5257_v37  ;;  %v5117_v22 = vld [vmem:[%s20024_s3 + $0x40] sm:$0xff] }
 0x21b   :  { %4847 = vmatmul.mubr.bf16.gmra.mxu1 %v12735_v21  ;;  %8229 = vmatprep.subr.bf16.mxu0 %v11687_v12  ;;  %v15531_v0 = vadd.f32 %v4172_v53, %v4060_v55  ;;  %v11806_v12 = vcombine.low %v5261_v30, %v5265_v57  ;;  %v12737_v30 = vld [vmem:[%s20022_s0 + $0x80] ss:$28 sps:$4 sm:$0xff]   ;;  %v11798_v53 = vcombine.low %v5253_v28, %v5257_v37 }
 0x21c   :  { %8341 = vmatpush1.bf16.msra.mxu1 %v11822_v19  ;;  %4856 = vmatprep.mubr.bf16.mxu1 %v20167_v25  ;;  %v4174_v8 = vpop.f32.mrf.mxu1  ;;  %v4063_v19 = vpop.f32.mrf.mxu0  ;;  %v5245_v57 = vld [vmem:[%s20024_s3 + $0x440] sm:$0xff]  ;;  %v11663_v61 = vcombine.high %v5117_v22, %v5121_v5 }
 0x21d   :  { %8342 = vmatprep.subr.bf16.mxu1 %v11815_v23  ;;  %v15534_v3 = vadd.f32 %v4174_v8, %v4062_v45  ;;  %v4064_v23 = vadd.f32 %v4063_v19, %v15429_v54  ;;  %v5249_v60 = vld [vmem:[%s20024_s3 + $0x460] sm:$0xff]  ;;  %v12739_v8 = vld [vmem:[%s20022_s0 + $0xbc] ss:$28 sps:$4 sm:$0xff]  }
 0x21e   :  { %8230 = vmatpush1.bf16.msra.mxu0 %v11686_v43  ;;  %v4176_v50 = vpop.f32.mrf.mxu1  ;;  %v4067_v35 = vpop.f32.mrf.mxu0  ;;  %v11791_v19 = vcombine.high %v5245_v57, %v5249_v60  ;;  %v5237_v37 = vld [vmem:[%s20024_s3 + $0x400] sm:$0xff] }
 0x21f   :  { %8231 = vmatprep.subr.bf16.mxu0 %v11679_v14  ;;  %v15552_v21 = vadd.f32 %v4176_v50, %v4064_v23  ;;  %v4068_v43 = vadd.f32 %v4067_v35, %v15405_v15  ;;  %v11670_v14 = vcombine.low %v5125_v17, %v5129_v51  ;;  %v5109_v17 = vld [vmem:[%s20024_s3] sm:$0xff]  ;;  %v11662_v50 = vcombine.low %v5117_v22, %v5121_v5 }
 0x220   :  { %8343 = vmatpush1.bf16.msra.mxu1 %v11814_v41  ;;  %v4180_v7 = vpop.f32.mrf.mxu1  ;;  %v12738_v41 = vld [vmem:[%s20022_s0 + $0x88] ss:$28 sps:$4 sm:$0xff]   ;;  %v4069_v55 = vpop.f32.mrf.mxu0  ;;  %v11790_v35 = vcombine.low %v5245_v57, %v5249_v60  ;;  %v12740_v57 = vld [vmem:[%s20022_s0 + $0xb8] ss:$28 sps:$4 sm:$0xff]  }
 0x221   :  { %8344 = vmatprep.subr.bf16.mxu1 %v11807_v13  ;;  %4744 = vmatmul.mubr.bf16.gmra.mxu0 %v12737_v30  ;;  %v15558_v13 = vadd.f32 %v4180_v7, %v4068_v43  ;;  %v4070_v20 = vadd.f32 %v4069_v55, %v15429_v54  ;;  %v5113_v51 = vld [vmem:[%s20024_s3 + $0x20] sm:$0xff] }
 0x222   :  { %8232 = vmatpush1.bf16.msra.mxu0 %v11678_v44  ;;  %v4182_v45 = vpop.f32.mrf.mxu1  ;;  %4753 = vmatprep.mubr.bf16.mxu0 %v12739_v8  ;;  %v4071_v28 = vpop.f32.mrf.mxu0  ;;  %v5241_v44 = vld [vmem:[%s20024_s3 + $0x420] sm:$0xff]  ;;  %v11655_v30 = vcombine.high %v5109_v17, %v5113_v51 }
 0x223   :  { %4857 = vmatmul.mubr.bf16.gmra.mxu1 %v12738_v41  ;;  %8233 = vmatprep.subr.bf16.mxu0 %v11671_v46  ;;  %v4072_v46 = vadd.f32 %v4071_v28, %v15405_v15  ;;  %v11783_v55 = vcombine.high %v5237_v37, %v5241_v44  ;;  %v5233_v22 = vld [vmem:[%s20024_s3 + $0x3e0] sm:$0xff] }
 0x224   :  { %8345 = vmatpush1.bf16.msra.mxu1 %v11806_v12  ;;  %4866 = vmatprep.mubr.bf16.mxu1 %v20167_v25  ;;  %v15577_v12 = vadd.f32 %v4182_v45, %v4070_v20  ;;  %v4184_v23 = vpop.f32.mrf.mxu1  ;;  %v5229_v20 = vld [vmem:[%s20024_s3 + $0x3c0] sm:$0xff] }
 0x225   :  { %8346 = vmatprep.subr.bf16.mxu1 %v11799_v33  ;;  %v4073_v33 = vpop.f32.mrf.mxu0  ;;  %v15580_v43 = vadd.f32 %v4184_v23, %v4072_v46  ;;  %v5357_v60 = vld [vmem:[%s20024_s3 + $0x7c0] sm:$0xff]  ;;  %v11782_v46 = vcombine.low %v5237_v37, %v5241_v44  ;;  %v11775_v23 = vcombine.high %v5229_v20, %v5233_v22 }
 0x226   :  { %8234 = vmatpush1.bf16.msra.mxu0 %v11670_v14  ;;  %v4074_v7 = vadd.f32 %v4073_v33, %v15429_v54  ;;  %v4186_v41 = vpop.f32.mrf.mxu1  ;;  %v5361_v14 = vld [vmem:[%s20024_s3 + $0x7e0] sm:$0xff] }
 0x227   :  { %8235 = vmatprep.subr.bf16.mxu0 %v11663_v61  ;;  %v4077_v5 = vpop.f32.mrf.mxu0  ;;  %v12741_v8 = vld [vmem:[%s20022_s0 + $0xc0] ss:$28 sps:$4 sm:$0xff]  }
 0x228   :  { %8347 = vmatpush1.bf16.msra.mxu1 %v11798_v53  ;;  %v15598_v53 = vadd.f32 %v4186_v41, %v4074_v7  ;;  %v4078_v61 = vadd.f32 %v4077_v5, %v15405_v15  ;;  %v4190_v45 = vpop.f32.mrf.mxu1  ;;  %v12742_v5 = vld [vmem:[%s20022_s0 + $0xf4] ss:$28 sps:$4 sm:$0xff]   ;;  %v5349_v44 = vld [vmem:[%s20024_s3 + $0x780] sm:$0xff] }
 0x229   :  { %8348 = vmatprep.subr.bf16.mxu1 %v11791_v19  ;;  %4754 = vmatmul.mubr.bf16.gmra.mxu0 %v12740_v57  ;;  %v11654_v19 = vcombine.low %v5109_v17, %v5113_v51  ;;  %v4079_v28 = vpop.f32.mrf.mxu0  ;;  %v11903_v57 = vcombine.high %v5357_v60, %v5361_v14  ;;  %v5221_v17 = vld [vmem:[%s20024_s3 + $0x380] sm:$0xff] }
 0x22a   :  { %8236 = vmatpush1.bf16.msra.mxu0 %v11662_v50  ;;  %v15604_v33 = vadd.f32 %v4190_v45, %v4078_v61  ;;  %v4080_v7 = vadd.f32 %v4079_v28, %v15429_v54  ;;  %v4192_v41 = vpop.f32.mrf.mxu1  ;;  %4763 = vmatprep.mubr.bf16.mxu0 %v12742_v5  ;;  %v5225_v51 = vld [vmem:[%s20024_s3 + $0x3a0] sm:$0xff]  ;;  %v11774_v61 = vcombine.low %v5229_v20, %v5233_v22 }
 0x22b   :  { %4867 = vmatmul.mubr.bf16.gmra.mxu1 %v12741_v8  ;;  %8237 = vmatprep.subr.bf16.mxu0 %v11655_v30  ;;  %v4081_v37 = vpop.f32.mrf.mxu0  ;;  %v5353_v50 = vld [vmem:[%s20024_s3 + $0x7a0] sm:$0xff]  ;;  %v11902_v8 = vcombine.low %v5357_v60, %v5361_v14  ;;  %v11767_v28 = vcombine.high %v5221_v17, %v5225_v51  ;;  %v12743_v60 = vld [vmem:[%s20022_s0 + $0xf0] ss:$28 sps:$4 sm:$0xff]  }
 0x22c   :  { %8349 = vmatpush1.bf16.msra.mxu1 %v11790_v35  ;;  %4876 = vmatprep.mubr.bf16.mxu1 %v20167_v25  ;;  %v15623_v35 = vadd.f32 %v4192_v41, %v4080_v7  ;;  %v4082_v30 = vadd.f32 %v4081_v37, %v15405_v15  ;;  %v11895_v48 = vcombine.high %v5349_v44, %v5353_v50  ;;  %v5213_v7 = vld [vmem:[%s20024_s3 + $0x340] sm:$0xff] }
 0x22d   :  { %8350 = vmatprep.subr.bf16.mxu1 %v11783_v55  ;;  %v4194_v55 = vpop.f32.mrf.mxu1  ;;  %v4083_v45 = vpop.f32.mrf.mxu0  ;;  %v5217_v20 = vld [vmem:[%s20024_s3 + $0x360] sm:$0xff]  ;;  %v11766_v37 = vcombine.low %v5221_v17, %v5225_v51 }
 0x22e   :  { %8238 = vmatpush1.bf16.msra.mxu0 %v11654_v19  ;;  %v15626_v5 = vadd.f32 %v4194_v55, %v4082_v30  ;;  %v4084_v11 = vadd.f32 %v4083_v45, %v15429_v54  ;;  %v5341_v14 = vld [vmem:[%s20024_s3 + $0x740] sm:$0xff]  ;;  %v11894_v55 = vcombine.low %v5349_v44, %v5353_v50  ;;  %v11759_v45 = vcombine.high %v5213_v7, %v5217_v20 }
 0x22f   :  { %8239 = vmatprep.subr.bf16.mxu0 %v11775_v23  ;;  %v4196_v40 = vpop.f32.mrf.mxu1  ;;  %v4087_v22 = vpop.f32.mrf.mxu0  ;;  %v5345_v19 = vld [vmem:[%s20024_s3 + $0x760] sm:$0xff] }
 0x230   :  { %8351 = vmatpush1.bf16.msra.mxu1 %v11782_v46  ;;  %v15644_v46 = vadd.f32 %v4196_v40, %v4084_v11  ;;  %v4088_v23 = vadd.f32 %v4087_v22, %v15405_v15  ;;  %v12745_v22 = vld [vmem:[%s20022_s0 + $0x12c] ss:$28 sps:$4 sm:$0xff]   ;;  %v11887_v63 = vcombine.high %v5341_v14, %v5345_v19  ;;  %v5205_v17 = vld [vmem:[%s20024_s3 + $0x300] sm:$0xff] }
 0x231   :  { %8352 = vmatprep.subr.bf16.mxu1 %v11903_v57  ;;  %4764 = vmatmul.mubr.bf16.gmra.mxu0 %v12743_v60  ;;  %v4200_v41 = vpop.f32.mrf.mxu1  ;;  %v12744_v57 = vld [vmem:[%s20022_s0 + $0xf8] ss:$28 sps:$4 sm:$0xff]   ;;  %v4089_v30 = vpop.f32.mrf.mxu0  ;;  %v5209_v51 = vld [vmem:[%s20024_s3 + $0x320] sm:$0xff] }
 0x232   :  { %8240 = vmatpush2.bf16.msra.mxu0 %v11774_v61  ;;  %v15650_v60 = vadd.f32 %v4200_v41, %v4088_v23  ;;  %v4090_v40 = vadd.f32 %v4089_v30, %v15429_v54  ;;  %4773 = vmatprep.mubr.bf16.mxu0 %v12745_v22  ;;  %v5337_v50 = vld [vmem:[%s20024_s3 + $0x720] sm:$0xff]  ;;  %v11758_v23 = vcombine.low %v5213_v7, %v5217_v20 }
 0x233   :  { %4877 = vmatmul.mubr.bf16.gmra.mxu1 %v12744_v57  ;;  %8241 = vmatprep.subr.bf16.mxu0 %v11767_v28  ;;  %v4202_v11 = vpop.f32.mrf.mxu1  ;;  %v4091_v44 = vpop.f32.mrf.mxu0  ;;  %v11886_v57 = vcombine.low %v5341_v14, %v5345_v19  ;;  %v11751_v30 = vcombine.high %v5205_v17, %v5209_v51  ;;  %v5201_v7 = vld [vmem:[%s20024_s3 + $0x2e0] sm:$0xff] }
 0x234   :  { %8353 = vmatpush2.bf16.msra.mxu1 %v11902_v8  ;;  %4886 = vmatprep.mubr.bf16.mxu1 %v20167_v25  ;;  %v15669_v61 = vadd.f32 %v4202_v11, %v4090_v40  ;;  %v4092_v8 = vadd.f32 %v4091_v44, %v15405_v15  ;;  %v5197_v40 = vld [vmem:[%s20024_s3 + $0x2c0] sm:$0xff]  ;;  %v12747_v11 = vld [vmem:[%s20022_s0 + $0x130] ss:$28 sps:$4 sm:$0xff]   ;;  %v11750_v44 = vcombine.low %v5205_v17, %v5209_v51 }
 0x235   :  { %8354 = vmatprep.subr.bf16.mxu1 %v11895_v48  ;;  %v5333_v48 = vld [vmem:[%s20024_s3 + $0x700] sm:$0xff]  ;;  %v4204_v28 = vpop.f32.mrf.mxu1  ;;  %v4093_v41 = vpop.f32.mrf.mxu0 }
 0x236   :  { %8242 = vmatpush2.bf16.msra.mxu0 %v11766_v37  ;;  %v15672_v22 = vadd.f32 %v4204_v28, %v4092_v8  ;;  %v4094_v16 = vadd.f32 %v4093_v41, %v15429_v54  ;;  %v11879_v52 = vcombine.high %v5333_v48, %v5337_v50  ;;  %v12746_v14 = vld [vmem:[%s20022_s0 + $0x128] ss:$28 sps:$4 sm:$0xff]   ;;  %v11878_v28 = vcombine.low %v5333_v48, %v5337_v50 }
 0x237   :  { %8243 = vmatprep.subr.bf16.mxu0 %v11759_v45  ;;  %v4206_v39 = vpop.f32.mrf.mxu1  ;;  %v4097_v20 = vpop.f32.mrf.mxu0  ;;  %v5325_v19 = vld [vmem:[%s20024_s3 + $0x6c0] sm:$0xff]  ;;  %v11743_v41 = vcombine.high %v5197_v40, %v5201_v7 }
 0x238   :  { %8355 = vmatpush2.bf16.msra.mxu1 %v11894_v55  ;;  %20206 = vst [vmem:[#allocation33_spill] sm:$0xff] %v15672_v22  ;;  %v15690_v37 = vadd.f32 %v4206_v39, %v4094_v16  ;;  %v4098_v55 = vadd.f32 %v4097_v20, %v15405_v15  ;;  %v12748_v20 = vld [vmem:[%s20022_s0 + $0x164] ss:$28 sps:$4 sm:$0xff]  }
 0x239   :  { %8356 = vmatprep.subr.bf16.mxu1 %v11887_v63  ;;  %4774 = vmatmul.mubr.bf16.gmra.mxu0 %v12746_v14  ;;  %v5329_v63 = vld [vmem:[%s20024_s3 + $0x6e0] sm:$0xff]  ;;  %v4210_v45 = vpop.f32.mrf.mxu1  ;;  %v4099_v8 = vpop.f32.mrf.mxu0 }
 0x23a   :  { %20207 = vst [vmem:[#allocation34_spill] sm:$0xff] %v15690_v37  ;;  %8244 = vmatpush2.bf16.msra.mxu0 %v11758_v23  ;;  %v15696_v14 = vadd.f32 %v4210_v45, %v4098_v55  ;;  %v4100_v39 = vadd.f32 %v4099_v8, %v15429_v54  ;;  %4783 = vmatprep.mubr.bf16.mxu0 %v12748_v20  ;;  %v5189_v17 = vld [vmem:[%s20024_s3 + $0x280] sm:$0xff] }
 0x23b   :  { %4887 = vmatmul.mubr.bf16.gmra.mxu1 %v12747_v11  ;;  %8245 = vmatprep.subr.bf16.mxu0 %v11751_v30  ;;  %v4212_v16 = vpop.f32.mrf.mxu1  ;;  %v11871_v59 = vcombine.high %v5325_v19, %v5329_v63  ;;  %v5193_v51 = vld [vmem:[%s20024_s3 + $0x2a0] sm:$0xff]  ;;  %v4101_v48 = vpop.f32.mrf.mxu0  ;;  %v11742_v55 = vcombine.low %v5197_v40, %v5201_v7  ;;  %v11870_v11 = vcombine.low %v5325_v19, %v5329_v63 }
 0x23c   :  { %8357 = vmatpush2.bf16.msra.mxu1 %v11886_v57  ;;  %20208 = vst [vmem:[#allocation35_spill] sm:$0xff] %v15696_v14  ;;  %4896 = vmatprep.mubr.bf16.mxu1 %v20167_v25  ;;  %v5321_v50 = vld [vmem:[%s20024_s3 + $0x6a0] sm:$0xff]  ;;  %v15715_v23 = vadd.f32 %v4212_v16, %v4100_v39  ;;  %v4102_v57 = vadd.f32 %v4101_v48, %v15405_v15 }
 0x23d   :  { %8358 = vmatprep.subr.bf16.mxu1 %v11879_v52  ;;  %v5317_v52 = vld [vmem:[%s20024_s3 + $0x680] sm:$0xff]  ;;  %v4214_v30 = vpop.f32.mrf.mxu1  ;;  %v4103_v45 = vpop.f32.mrf.mxu0  ;;  %v11735_v8 = vcombine.high %v5189_v17, %v5193_v51  ;;  %v11734_v48 = vcombine.low %v5189_v17, %v5193_v51 }
 0x23e   :  { %8246 = vmatpush2.bf16.msra.mxu0 %v11750_v44  ;;  %v15718_v20 = vadd.f32 %v4214_v30, %v4102_v57  ;;  %v4104_v14 = vadd.f32 %v4103_v45, %v15429_v54  ;;  %v11863_v22 = vcombine.high %v5317_v52, %v5321_v50  ;;  %v5181_v39 = vld [vmem:[%s20024_s3 + $0x240] sm:$0xff]  ;;  %v11862_v30 = vcombine.low %v5317_v52, %v5321_v50 }
 0x23f   :  { %8247 = vmatprep.subr.bf16.mxu0 %v11743_v41  ;;  %v4216_v37 = vpop.f32.mrf.mxu1  ;;  %v5185_v40 = vld [vmem:[%s20024_s3 + $0x260] sm:$0xff]  ;;  %v4107_v7 = vpop.f32.mrf.mxu0 }
 0x240   :  { %8359 = vmatpush2.bf16.msra.mxu1 %v11878_v28  ;;  %v12749_v19 = vld [vmem:[%s20022_s0 + $0x160] ss:$28 sps:$4 sm:$0xff]   ;;  %v15736_v44 = vadd.f32 %v4216_v37, %v4104_v14  ;;  %v4108_v28 = vadd.f32 %v4107_v7, %v15405_v15  ;;  %v12750_v16 = vld [vmem:[%s20022_s0 + $0x168] ss:$28 sps:$4 sm:$0xff]   ;;  %v11727_v45 = vcombine.high %v5181_v39, %v5185_v40 }
 0x241   :  { %8360 = vmatprep.subr.bf16.mxu1 %v11871_v59  ;;  %4784 = vmatmul.mubr.bf16.gmra.mxu0 %v12749_v19  ;;  %v5309_v63 = vld [vmem:[%s20024_s3 + $0x640] sm:$0xff]  ;;  %v4220_v41 = vpop.f32.mrf.mxu1  ;;  %v4109_v57 = vpop.f32.mrf.mxu0  ;;  %v12751_v7 = vld [vmem:[%s20022_s0 + $0x19c] ss:$28 sps:$4 sm:$0xff]  }
 0x242   :  { %v5313_v59 = vld [vmem:[%s20024_s3 + $0x660] sm:$0xff]  ;;  %20209 = vst [vmem:[#allocation36_spill] sm:$0xff] %v15736_v44  ;;  %8248 = vmatpush2.bf16.msra.mxu0 %v11742_v55  ;;  %v15742_v19 = vadd.f32 %v4220_v41, %v4108_v28  ;;  %v4110_v37 = vadd.f32 %v4109_v57, %v15429_v54  ;;  %4793 = vmatprep.mubr.bf16.mxu0 %v12751_v7 }
 0x243   :  { %4897 = vmatmul.mubr.bf16.gmra.mxu1 %v12750_v16  ;;  %8249 = vmatprep.subr.bf16.mxu0 %v11735_v8  ;;  %v4222_v14 = vpop.f32.mrf.mxu1  ;;  %v11855_v44 = vcombine.high %v5309_v63, %v5313_v59  ;;  %v4111_v16 = vpop.f32.mrf.mxu0  ;;  %v5173_v17 = vld [vmem:[%s20024_s3 + $0x200] sm:$0xff]  ;;  %v11726_v55 = vcombine.low %v5181_v39, %v5185_v40  ;;  %v11854_v28 = vcombine.low %v5309_v63, %v5313_v59  ;;  %v12752_v63 = vld [vmem:[%s20022_s0 + $0x198] ss:$28 sps:$4 sm:$0xff]  }
 0x244   :  { %8361 = vmatpush2.bf16.msra.mxu1 %v11870_v11  ;;  %4906 = vmatprep.mubr.bf16.mxu1 %v20167_v25  ;;  %v5177_v51 = vld [vmem:[%s20024_s3 + $0x220] sm:$0xff]  ;;  %v15755_v52 = vadd.f32 %v4222_v14, %v4110_v37 }
 0x245   :  { %8362 = vmatprep.subr.bf16.mxu1 %v11863_v22  ;;  %v4112_v22 = vadd.f32 %v4111_v16, %v15405_v15  ;;  %v4224_v50 = vpop.f32.mrf.mxu1  ;;  %v5301_v11 = vld [vmem:[%s20024_s3 + $0x600] sm:$0xff]  ;;  %v4113_v8 = vpop.f32.mrf.mxu0 }
 0x246   :  { %20210 = vst [vmem:[#allocation37_spill] sm:$0xff] %v15755_v52  ;;  %8250 = vmatpush2.bf16.msra.mxu0 %v11734_v48  ;;  %v5305_v25 = vld [vmem:[%s20024_s3 + $0x620] sm:$0xff]  ;;  %v4114_v57 = vadd.f32 %v4113_v8, %v15429_v54  ;;  %v11719_v48 = vcombine.high %v5173_v17, %v5177_v51 }
 0x247   :  { %8251 = vmatprep.subr.bf16.mxu0 %v11727_v45  ;;  %v15764_v41 = vadd.f32 %v4224_v50, %v4112_v22  ;;  %v4226_v37 = vpop.f32.mrf.mxu1  ;;  %v5421_v39 = vld [vmem:[%s20024_s3 + $0x9c0] sm:$0xff]  ;;  %v4117_v14 = vpop.f32.mrf.mxu0  ;;  %v11847_v59 = vcombine.high %v5301_v11, %v5305_v25  ;;  %v11718_v50 = vcombine.low %v5173_v17, %v5177_v51 }
 0x248   :  { %8363 = vmatpush2.bf16.msra.mxu1 %v11862_v30  ;;  %v5425_v40 = vld [vmem:[%s20024_s3 + $0x9e0] sm:$0xff]  ;;  %v15782_v45 = vadd.f32 %v4226_v37, %v4114_v57  ;;  %v4118_v7 = vadd.f32 %v4117_v14, %v15405_v15 }
 0x249   :  { %20211 = vst [vmem:[#allocation38_spill] sm:$0xff] %v15764_v41  ;;  %8364 = vmatprep.subr.bf16.mxu1 %v11855_v44  ;;  %4794 = vmatmul.mubr.bf16.gmra.mxu0 %v12752_v63  ;;  %v5549_v44 = vld [vmem:[%s20024_s3 + $0xdc0] sm:$0xff]  ;;  %v4230_v16 = vpop.f32.mrf.mxu1  ;;  %v4119_v8 = vpop.f32.mrf.mxu0  ;;  %v11846_v63 = vcombine.low %v5301_v11, %v5305_v25  ;;  %v11967_v41 = vcombine.high %v5421_v39, %v5425_v40 }
 0x24a   :  { %v5553_v30 = vld [vmem:[%s20024_s3 + $0xde0] sm:$0xff]  ;;  %20212 = vst [vmem:[#allocation39_spill] sm:$0xff] %v15782_v45  ;;  %8252 = vmatpush2.bf16.msra.mxu0 %v11726_v55  ;;  %8255 = vmatprep.mubr.bf16.mxu0 %v14323_v58  ;;  %v15789_v52 = vadd.f32 %v4230_v16, %v4118_v7  ;;  %v4120_v57 = vadd.f32 %v4119_v8, %v15429_v54 }
 0x24b   :  { %v12753_v22 = vld [vmem:[%s20022_s0 + $0x1a0] ss:$28 sps:$4 sm:$0xff]   ;;  %v4232_v37 = vpop.f32.mrf.mxu1  ;;  %8253 = vmatprep.subr.bf16.mxu0 %v11719_v48  ;;  %v12095_v14 = vcombine.high %v5549_v44, %v5553_v30  ;;  %v4121_v45 = vpop.f32.mrf.mxu0  ;;  %v11966_v7 = vcombine.low %v5421_v39, %v5425_v40 }
 0x24c   :  { %4907 = vmatmul.mubr.bf16.gmra.mxu1 %v12753_v22  ;;  %v5413_v17 = vld [vmem:[%s20024_s3 + $0x980] sm:$0xff]  ;;  %v15799_v55 = vadd.f32 %v4232_v37, %v4120_v57  ;;  %v4122_v11 = vadd.f32 %v4121_v45, %v15405_v15  ;;  %v12094_v45 = vcombine.low %v5549_v44, %v5553_v30 }
 0x24d   :  { %8365 = vmatpush2.bf16.msra.mxu1 %v11854_v28  ;;  %8368 = vmatprep.mubr.bf16.mxu1 %v15120_v1  ;;  %v5417_v51 = vld [vmem:[%s20024_s3 + $0x9a0] sm:$0xff]  ;;  %v4234_v25 = vpop.f32.mrf.mxu1 }
 0x24e   :  { %8366 = vmatprep.subr.bf16.mxu1 %v11847_v59  ;;  %8254 = vmatpush2.bf16.msra.mxu0 %v11718_v50  ;;  %v5541_v28 = vld [vmem:[%s20024_s3 + $0xd80] sm:$0xff]  ;;  %v4123_v59 = vpop.f32.mrf.mxu0  ;;  %v15808_v16 = vadd.f32 %v4234_v25, %v4122_v11  ;;  %v11959_v15 = vcombine.high %v5413_v17, %v5417_v51 }
 0x24f   :  { %v5545_v48 = vld [vmem:[%s20024_s3 + $0xda0] sm:$0xff]  ;;  %8449 = vmatprep.subr.bf16.mxu0 %v11967_v41  ;;  %v4124_v22 = vadd.f32 %v4123_v59, %v15429_v54  ;;  %v4236_v8 = vpop.f32.mrf.mxu1 }
 0x250   :  { %v4273_v50 = vpop.f32.mrf.mxu0  ;;  %v5405_v57 = vld [vmem:[%s20024_s3 + $0x940] sm:$0xff]  ;;  %v12087_v41 = vcombine.high %v5541_v28, %v5545_v48 }
 0x251   :  { %8367 = vmatpush2.bf16.msra.mxu1 %v11846_v63  ;;  %8256 = vmatmul.mubr.bf16.vlgmr.msra.gmra.mxu0 %v14307_v38  ;;  %v5409_v39 = vld [vmem:[%s20024_s3 + $0x960] sm:$0xff]  ;;  %v15818_v40 = vadd.f32 %v4236_v8, %v4124_v22  ;;  %v4274_v54 = vadd.f32 %v4273_v50, %v15460_v31  ;;  %v4386_v63 = vpop.f32.mrf.mxu1  ;;  %v12086_v8 = vcombine.low %v5541_v28, %v5545_v48 }
 0x252   :  { %8562 = vmatprep.subr.bf16.mxu1 %v12095_v14  ;;  %8265 = vmatprep.mubr.bf16.mxu0 %v14397_v2  ;;  %v5533_v44 = vld [vmem:[%s20024_s3 + $0xd40] sm:$0xff]  ;;  %v4275_v37 = vpop.f32.mrf.mxu0  ;;  %v11958_v14 = vcombine.low %v5413_v17, %v5417_v51  ;;  %v11951_v25 = vcombine.high %v5405_v57, %v5409_v39  ;;  %v11950_v28 = vcombine.low %v5405_v57, %v5409_v39 }
 0x253   :  { %v5537_v30 = vld [vmem:[%s20024_s3 + $0xd60] sm:$0xff]  ;;  %8450 = vmatpush1.bf16.msra.mxu0 %v11966_v7  ;;  %v4276_v31 = vadd.f32 %v4275_v37, %v15481_v10  ;;  %v4388_v11 = vpop.f32.mrf.mxu1 }
 0x254   :  { %8369 = vmatmul.mubr.bf16.vlgmr.msra.gmra.mxu1 %v15104_v24  ;;  %8451 = vmatprep.subr.bf16.mxu0 %v11959_v15  ;;  %v5397_v59 = vld [vmem:[%s20024_s3 + $0x900] sm:$0xff]  ;;  %v4277_v50 = vpop.f32.mrf.mxu0  ;;  %v12079_v7 = vcombine.high %v5533_v44, %v5537_v30 }
 0x255   :  { %8378 = vmatprep.mubr.bf16.mxu1 %v15194_v47  ;;  %v5401_v22 = vld [vmem:[%s20024_s3 + $0x920] sm:$0xff]  ;;  %8563 = vmatpush1.bf16.msra.mxu1 %v12094_v45  ;;  %v4387_v47 = vadd.f32 %v4386_v63, %v4274_v54  ;;  %v4278_v17 = vadd.f32 %v4277_v50, %v15488_v6  ;;  %v4390_v10 = vpop.f32.mrf.mxu1  ;;  %v4389_v37 = vadd.f32 %v4388_v11, %v4276_v31 }
 0x256   :  { %8564 = vmatprep.subr.bf16.mxu1 %v12087_v41  ;;  %v15841_v51 = vld [vmem:[%s20024_s3 + $0xd00] sm:$0xff]  ;;  %v4279_v45 = vpop.f32.mrf.mxu0  ;;  %v11943_v48 = vcombine.high %v5397_v59, %v5401_v22  ;;  %v12078_v41 = vcombine.low %v5533_v44, %v5537_v30 }
 0x257   :  { %v15846_v15 = vld [vmem:[%s20024_s3 + $0xd20] sm:$0xff]  ;;  %8452 = vmatpush1.bf16.msra.mxu0 %v11958_v14  ;;  %v4391_v54 = vadd.f32 %v4390_v10, %v4278_v17  ;;  %v4280_v6 = vadd.f32 %v4279_v45, %v15506_v36  ;;  %v4392_v63 = vpop.f32.mrf.mxu1  ;;  %v4921_v39 = vmax.f32 %v4387_v47, 0.0  ;;  %v4922_v17 = vmax.f32 %v4389_v37, 0.0 }
 0x258   :  { %8453 = vmatprep.subr.bf16.mxu0 %v11951_v25  ;;  %v15852_v50 = vld [vmem:[%s20024_s3 + $0x8c0] sm:$0xff]  ;;  %v4283_v57 = vpop.f32.mrf.mxu0  ;;  %v12071_v36 = vcombine.high %v15841_v51, %v15846_v15 }
 0x259   :  { %v15857_v24 = vld [vmem:[%s20024_s3 + $0x8e0] sm:$0xff]  ;;  %8565 = vmatpush1.bf16.msra.mxu1 %v12086_v8  ;;  %8266 = vmatmul.mubr.bf16.gmra.mxu0 %v14379_v49  ;;  %v4929_v44 = vmax.f32 %v4391_v54, 0.0  ;;  %v4393_v30 = vadd.f32 %v4392_v63, %v4280_v6  ;;  %v4284_v14 = vadd.f32 %v4283_v57, %v15512_v42  ;;  %v4396_v31 = vpop.f32.mrf.mxu1  ;;  %v11942_v42 = vcombine.low %v5397_v59, %v5401_v22 }
 0x25a   :  { %8566 = vmatprep.subr.bf16.mxu1 %v12079_v7  ;;  %8275 = vmatprep.mubr.bf16.mxu0 %v14461_v34  ;;  %v15868_v11 = vld [vmem:[%s20024_s3 + $0xcc0] sm:$0xff]  ;;  %v4285_v47 = vpop.f32.mrf.mxu0  ;;  %v11935_v8 = vcombine.high %v15852_v50, %v15857_v24  ;;  %v12070_v7 = vcombine.low %v15841_v51, %v15846_v15 }
 0x25b   :  { %v15873_v25 = vld [vmem:[%s20024_s3 + $0xce0] sm:$0xff]  ;;  %8454 = vmatpush1.bf16.msra.mxu0 %v11950_v28  ;;  %v15880_v10 = vpack.c.bf16 %v4929_v44, %v4921_v39  ;;  %v4930_v45 = vmax.f32 %v4393_v30, 0.0  ;;  %v4286_v54 = vadd.f32 %v4285_v47, %v15531_v0  ;;  %v4398_v6 = vpop.f32.mrf.mxu1  ;;  %v4397_v22 = vadd.f32 %v4396_v31, %v4284_v14 }
 0x25c   :  { %8379 = vmatmul.mubr.bf16.gmra.mxu1 %v15176_v9  ;;  %8455 = vmatprep.subr.bf16.mxu0 %v11943_v48  ;;  %v15886_v28 = vld [vmem:[%s20024_s3 + $0x880] sm:$0xff]  ;;  %v4287_v51 = vpop.f32.mrf.mxu0  ;;  %v12063_v15 = vcombine.high %v15868_v11, %v15873_v25  ;;  %v12062_v44 = vcombine.low %v15868_v11, %v15873_v25  ;;  %v15933_v11 = vld [vmem:[%s20024_s3 + $0x5e8] sm:$0xff] }
 0x25d   :  { %8388 = vmatprep.mubr.bf16.mxu1 %v15262_v26  ;;  %20213 = vst [vmem:[#allocation40_spill] sm:$0xff] %v15880_v10  ;;  %v15891_v59 = vld [vmem:[%s20024_s3 + $0x8a0] sm:$0xff]  ;;  %8567 = vmatpush1.bf16.msra.mxu1 %v12078_v41  ;;  %v15895_v0 = vpack.c.bf16 %v4930_v45, %v4922_v17  ;;  %v4288_v48 = vadd.f32 %v4287_v51, %v15534_v3  ;;  %v4400_v37 = vpop.f32.mrf.mxu1  ;;  %v4937_v25 = vmax.f32 %v4397_v22, 0.0 }
 0x25e   :  { %8568 = vmatprep.subr.bf16.mxu1 %v12071_v36  ;;  %v15901_v63 = vld [vmem:[%s20024_s3 + $0xc80] sm:$0xff]  ;;  %v4289_v57 = vpop.f32.mrf.mxu0  ;;  %v11934_v36 = vcombine.low %v15852_v50, %v15857_v24  ;;  %v11927_v39 = vcombine.high %v15886_v28, %v15891_v59  ;;  %v4399_v30 = vadd.f32 %v4398_v6, %v4286_v54  ;;  %v15928_v50 = vld [vmem:[%s20024_s3 + $0x5c8] sm:$0xff]  ;;  %v20215_v54 = vld [vmem:[#allocation8_spill] sm:$0xff] }
 0x25f   :  { %20214 = vst [vmem:[#allocation41_spill] sm:$0xff] %v15895_v0  ;;  %v15906_v41 = vld [vmem:[%s20024_s3 + $0xca0] sm:$0xff]  ;;  %8456 = vmatpush1.bf16.msra.mxu0 %v11942_v42  ;;  %v4401_v14 = vadd.f32 %v4400_v37, %v4288_v48  ;;  %v4290_v31 = vadd.f32 %v4289_v57, %v15552_v21  ;;  %v4402_v47 = vpop.f32.mrf.mxu1 }
 0x260   :  { %v15915_v3 = vld [vmem:[%s20024_s3 + $0x840] sm:$0xff]  ;;  %8457 = vmatprep.subr.bf16.mxu0 %v11935_v8  ;;  %v4293_v21 = vpop.f32.mrf.mxu0  ;;  %v12055_v42 = vcombine.high %v15901_v63, %v15906_v41  ;;  %v12054_v37 = vcombine.low %v15901_v63, %v15906_v41  ;;  %v4938_v57 = vmax.f32 %v4399_v30, 0.0 }
 0x261   :  { %v15923_v24 = vld [vmem:[%s20024_s3 + $0x860] sm:$0xff]  ;;  %8569 = vmatpush1.bf16.msra.mxu1 %v12070_v7  ;;  %8276 = vmatmul.mubr.bf16.gmra.mxu0 %v14447_v29  ;;  %v4945_v8 = vmax.f32 %v4401_v14, 0.0  ;;  %v4403_v7 = vadd.f32 %v4402_v47, %v4290_v31  ;;  %v4294_v17 = vadd.f32 %v4293_v21, %v15558_v13  ;;  %v4406_v45 = vpop.f32.mrf.mxu1 }
 0x262   :  { %8570 = vmatprep.subr.bf16.mxu1 %v12063_v15  ;;  %8285 = vmatprep.mubr.bf16.mxu0 %v20215_v54  ;;  %v15944_v6 = vld [vmem:[%s20024_s3 + $0xc40] sm:$0xff]  ;;  %v4295_v13 = vpop.f32.mrf.mxu0  ;;  %v11926_v15 = vcombine.low %v15886_v28, %v15891_v59  ;;  %v11919_v48 = vcombine.high %v15915_v3, %v15923_v24 }
 0x263   :  { %v15949_v22 = vld [vmem:[%s20024_s3 + $0xc60] sm:$0xff]  ;;  %8458 = vmatpush1.bf16.msra.mxu0 %v11934_v36  ;;  %v15960_v14 = vpack.c.bf16 %v4945_v8, %v4937_v25  ;;  %v4946_v31 = vmax.f32 %v4403_v7, 0.0  ;;  %v4296_v47 = vadd.f32 %v4295_v13, %v15577_v12  ;;  %v4408_v21 = vpop.f32.mrf.mxu1  ;;  %v4407_v30 = vadd.f32 %v4406_v45, %v4294_v17 }
 0x264   :  { %8389 = vmatmul.mubr.bf16.gmra.mxu1 %v15248_v4  ;;  %8459 = vmatprep.subr.bf16.mxu0 %v11927_v39  ;;  %v5365_v36 = vld [vmem:[%s20024_s3 + $0x800] sm:$0xff]  ;;  %v4297_v59 = vpop.f32.mrf.mxu0  ;;  %v12047_v63 = vcombine.high %v15944_v6, %v15949_v22  ;;  %v11918_v8 = vcombine.low %v15915_v3, %v15923_v24 }
 0x265   :  { %8398 = vmatprep.mubr.bf16.mxu1 %v15296_v62  ;;  %20216 = vst [vmem:[#allocation42_spill] sm:$0xff] %v15960_v14  ;;  %v5369_v28 = vld [vmem:[%s20024_s3 + $0x820] sm:$0xff]  ;;  %8571 = vmatpush1.bf16.msra.mxu1 %v12062_v44  ;;  %v15971_v41 = vpack.c.bf16 %v4946_v31, %v4938_v57  ;;  %v4298_v12 = vadd.f32 %v4297_v59, %v15580_v43  ;;  %v4410_v39 = vpop.f32.mrf.mxu1 }
 0x266   :  { %8572 = vmatprep.subr.bf16.mxu1 %v12055_v42  ;;  %v15977_v25 = vld [vmem:[%s20024_s3 + $0xc00] sm:$0xff]  ;;  %v4299_v42 = vpop.f32.mrf.mxu0  ;;  %v11911_v7 = vcombine.high %v5365_v36, %v5369_v28  ;;  %v12046_v43 = vcombine.low %v15944_v6, %v15949_v22  ;;  %v4409_v17 = vadd.f32 %v4408_v21, %v4296_v47  ;;  %v4953_v6 = vmax.f32 %v4407_v30, 0.0 }
 0x267   :  { %20217 = vst [vmem:[#allocation43_spill] sm:$0xff] %v15971_v41  ;;  %v15982_v44 = vld [vmem:[%s20024_s3 + $0xc20] sm:$0xff]  ;;  %8460 = vmatpush1.bf16.msra.mxu0 %v11926_v15  ;;  %v4411_v45 = vadd.f32 %v4410_v39, %v4298_v12  ;;  %v4300_v13 = vadd.f32 %v4299_v42, %v15598_v53  ;;  %v4412_v57 = vpop.f32.mrf.mxu1 }
 0x268   :  { %8461 = vmatprep.subr.bf16.mxu0 %v11919_v48  ;;  %v15992_v31 = vld [vmem:[%s20024_s3 + $0xbc0] sm:$0xff]  ;;  %v4303_v3 = vpop.f32.mrf.mxu0  ;;  %v12039_v53 = vcombine.high %v15977_v25, %v15982_v44  ;;  %v12038_v39 = vcombine.low %v15977_v25, %v15982_v44  ;;  %v4954_v42 = vmax.f32 %v4409_v17, 0.0 }
 0x269   :  { %v15997_v15 = vld [vmem:[%s20024_s3 + $0xbe0] sm:$0xff]  ;;  %8573 = vmatpush1.bf16.msra.mxu1 %v12054_v37  ;;  %v4961_v22 = vmax.f32 %v4411_v45, 0.0  ;;  %v4413_v48 = vadd.f32 %v4412_v57, %v4300_v13  ;;  %v4304_v47 = vadd.f32 %v4303_v3, %v15604_v33  ;;  %v4416_v21 = vpop.f32.mrf.mxu1  ;;  %v11910_v33 = vcombine.low %v5365_v36, %v5369_v28 }
 0x26a   :  { %v20218_v24 = vld [vmem:[#allocation6_spill] sm:$0xff]  ;;  %8574 = vmatprep.subr.bf16.mxu1 %v12047_v63  ;;  %v4305_v30 = vpop.f32.mrf.mxu0  ;;  %v12031_v12 = vcombine.high %v15992_v31, %v15997_v15 }
 0x26b   :  { %8286 = vmatmul.mubr.bf16.gmra.mxu0 %v20218_v24  ;;  %v20219_v59 = vld [vmem:[#allocation10_spill] sm:$0xff]  ;;  %v16020_v45 = vpack.c.bf16 %v4961_v22, %v4953_v6  ;;  %v4962_v13 = vmax.f32 %v4413_v48, 0.0  ;;  %v4306_v57 = vadd.f32 %v4305_v30, %v15623_v35  ;;  %v4418_v3 = vpop.f32.mrf.mxu1  ;;  %v4417_v17 = vadd.f32 %v4416_v21, %v4304_v47 }
 0x26c   :  { %8399 = vmatmul.mubr.bf16.gmra.mxu1 %v15284_v56  ;;  %8295 = vmatprep.mubr.bf16.mxu0 %v20219_v59  ;;  %v16008_v37 = vld [vmem:[%s20024_s3 + $0xfc0] sm:$0xff]  ;;  %v4307_v28 = vpop.f32.mrf.mxu0  ;;  %v12030_v22 = vcombine.low %v15992_v31, %v15997_v15  ;;  %v20222_v15 = vld [vmem:[#allocation9_spill] sm:$0xff] }
 0x26d   :  { %v16013_v63 = vld [vmem:[%s20024_s3 + $0xfe0] sm:$0xff]  ;;  %8408 = vmatprep.mubr.bf16.mxu1 %v15328_v18  ;;  %8462 = vmatpush1.bf16.msra.mxu0 %v11918_v8  ;;  %20220 = vst [vmem:[#allocation44_spill] sm:$0xff] %v16020_v45  ;;  %v16031_v44 = vpack.c.bf16 %v4962_v13, %v4954_v42  ;;  %v4308_v35 = vadd.f32 %v4307_v28, %v15626_v5  ;;  %v20223_v28 = vld [vmem:[#allocation12_spill] sm:$0xff] }
 0x26e   :  { %8463 = vmatprep.subr.bf16.mxu0 %v11911_v7  ;;  %v5477_v8 = vld [vmem:[%s20024_s3 + $0xb80] sm:$0xff]  ;;  %8575 = vmatpush1.bf16.msra.mxu1 %v12046_v43  ;;  %v12159_v25 = vcombine.high %v16008_v37, %v16013_v63  ;;  %v4420_v7 = vpop.f32.mrf.mxu1  ;;  %v12158_v5 = vcombine.low %v16008_v37, %v16013_v63  ;;  %v4419_v47 = vadd.f32 %v4418_v3, %v4306_v57  ;;  %v4969_v37 = vmax.f32 %v4417_v17, 0.0 }
 0x26f   :  { %v5481_v36 = vld [vmem:[%s20024_s3 + $0xba0] sm:$0xff]  ;;  %8576 = vmatprep.subr.bf16.mxu1 %v12039_v53  ;;  %20221 = vst [vmem:[#allocation45_spill] sm:$0xff] %v16031_v44  ;;  %v4309_v53 = vpop.f32.mrf.mxu0  ;;  %v4421_v21 = vadd.f32 %v4420_v7, %v4308_v35 }
 0x270   :  { %v16037_v6 = vld [vmem:[%s20024_s3 + $0xf80] sm:$0xff]  ;;  %v12023_v48 = vcombine.high %v5477_v8, %v5481_v36  ;;  %v4310_v30 = vadd.f32 %v4309_v53, %v15644_v46  ;;  %v4422_v42 = vpop.f32.mrf.mxu1  ;;  %v4970_v53 = vmax.f32 %v4419_v47, 0.0 }
 0x271   :  { %v16042_v43 = vld [vmem:[%s20024_s3 + $0xfa0] sm:$0xff]  ;;  %8464 = vmatpush1.bf16.msra.mxu0 %v11910_v33  ;;  %v4313_v31 = vpop.f32.mrf.mxu0  ;;  %v4977_v63 = vmax.f32 %v4421_v21, 0.0 }
 0x272   :  { %8465 = vmatprep.subr.bf16.mxu0 %v12031_v12  ;;  %v16052_v13 = vld [vmem:[%s20024_s3 + $0xb40] sm:$0xff]  ;;  %8577 = vmatpush1.bf16.msra.mxu1 %v12038_v39  ;;  %v12151_v46 = vcombine.high %v16037_v6, %v16042_v43  ;;  %v4423_v12 = vadd.f32 %v4422_v42, %v4310_v30  ;;  %v4314_v57 = vadd.f32 %v4313_v31, %v15650_v60  ;;  %v4426_v3 = vpop.f32.mrf.mxu1 }
 0x273   :  { %v16057_v33 = vld [vmem:[%s20024_s3 + $0xb60] sm:$0xff]  ;;  %8296 = vmatmul.mubr.bf16.gmra.mxu0 %v20222_v15  ;;  %8578 = vmatprep.subr.bf16.mxu1 %v12159_v25  ;;  %v4315_v17 = vpop.f32.mrf.mxu0  ;;  %v12022_v60 = vcombine.low %v5477_v8, %v5481_v36  ;;  %v12150_v7 = vcombine.low %v16037_v6, %v16042_v43  ;;  %v16080_v21 = vpack.c.bf16 %v4977_v63, %v4969_v37 }
 0x274   :  { %8409 = vmatmul.mubr.bf16.gmra.mxu1 %v15316_v27  ;;  %8305 = vmatprep.mubr.bf16.mxu0 %v20223_v28  ;;  %v16068_v39 = vld [vmem:[%s20024_s3 + $0xf40] sm:$0xff]  ;;  %v12015_v35 = vcombine.high %v16052_v13, %v16057_v33  ;;  %v4978_v30 = vmax.f32 %v4423_v12, 0.0  ;;  %v4316_v42 = vadd.f32 %v4315_v17, %v15669_v61  ;;  %v4428_v31 = vpop.f32.mrf.mxu1  ;;  %v4427_v47 = vadd.f32 %v4426_v3, %v4314_v57  ;;  %v20226_v61 = vld [vmem:[#allocation33_spill] sm:$0xff] }
 0x275   :  { %v16073_v25 = vld [vmem:[%s20024_s3 + $0xf60] sm:$0xff]  ;;  %8418 = vmatprep.mubr.bf16.mxu1 %v15360_v32  ;;  %8466 = vmatpush2.bf16.msra.mxu0 %v12030_v22  ;;  %20224 = vst [vmem:[#allocation46_spill] sm:$0xff] %v16080_v21  ;;  %v4317_v36 = vpop.f32.mrf.mxu0  ;;  %v12014_v12 = vcombine.low %v16052_v13, %v16057_v33  ;;  %v20228_v33 = vld [vmem:[#allocation11_spill] sm:$0xff] }
 0x276   :  { %8467 = vmatprep.subr.bf16.mxu0 %v12023_v48  ;;  %v5461_v22 = vld [vmem:[%s20024_s3 + $0xb00] sm:$0xff]  ;;  %8579 = vmatpush2.bf16.msra.mxu1 %v12158_v5  ;;  %v12143_v6 = vcombine.high %v16068_v39, %v16073_v25  ;;  %v16091_v43 = vpack.c.bf16 %v4978_v30, %v4970_v53  ;;  %v4318_v37 = vadd.f32 %v4317_v36, %v20226_v61  ;;  %v4430_v48 = vpop.f32.mrf.mxu1 }
 0x277   :  { %v5465_v8 = vld [vmem:[%s20024_s3 + $0xb20] sm:$0xff]  ;;  %8580 = vmatprep.subr.bf16.mxu1 %v12151_v46  ;;  %v4319_v46 = vpop.f32.mrf.mxu0  ;;  %v12142_v57 = vcombine.low %v16068_v39, %v16073_v25  ;;  %v4429_v3 = vadd.f32 %v4428_v31, %v4316_v42  ;;  %v4985_v25 = vmax.f32 %v4427_v47, 0.0  ;;  %v20229_v31 = vld [vmem:[#allocation35_spill] sm:$0xff] }
 0x278   :  { %20225 = vst [vmem:[#allocation47_spill] sm:$0xff] %v16091_v43  ;;  %v16097_v63 = vld [vmem:[%s20024_s3 + $0xf00] sm:$0xff]  ;;  %v12007_v17 = vcombine.high %v5461_v22, %v5465_v8  ;;  %v4431_v53 = vadd.f32 %v4430_v48, %v4318_v37  ;;  %v4432_v61 = vpop.f32.mrf.mxu1 }
 0x279   :  { %v16102_v5 = vld [vmem:[%s20024_s3 + $0xf20] sm:$0xff]  ;;  %8468 = vmatpush2.bf16.msra.mxu0 %v12022_v60  ;;  %v4323_v13 = vpop.f32.mrf.mxu0 }
 0x27a   :  { %v20227_v30 = vld [vmem:[#allocation34_spill] sm:$0xff]  ;;  %8469 = vmatprep.subr.bf16.mxu0 %v12015_v35  ;;  %8581 = vmatpush2.bf16.msra.mxu1 %v12150_v7  ;;  %v12135_v39 = vcombine.high %v16097_v63, %v16102_v5  ;;  %v4993_v35 = vmax.f32 %v4431_v53, 0.0  ;;  %v4324_v37 = vadd.f32 %v4323_v13, %v20229_v31  ;;  %v4436_v48 = vpop.f32.mrf.mxu1  ;;  %v12134_v13 = vcombine.low %v16097_v63, %v16102_v5 }
 0x27b   :  { %v4320_v36 = vadd.f32 %v4319_v46, %v20227_v30  ;;  %v16112_v51 = vld [vmem:[%s20024_s3 + $0xac0] sm:$0xff]  ;;  %8306 = vmatmul.mubr.bf16.gmra.mxu0 %v20228_v33  ;;  %8582 = vmatprep.subr.bf16.mxu1 %v12143_v6  ;;  %v20230_v46 = vld [vmem:[#allocation27_spill] sm:$0xff]  ;;  %v4325_v53 = vpop.f32.mrf.mxu0  ;;  %v4986_v31 = vmax.f32 %v4429_v3, 0.0 }
 0x27c   :  { %v16117_v60 = vld [vmem:[%s20024_s3 + $0xae0] sm:$0xff]  ;;  %8419 = vmatmul.mubr.bf16.gmra.mxu1 %v20230_v46  ;;  %v16140_v46 = vpack.c.bf16 %v4993_v35, %v4985_v25  ;;  %v4326_v27 = vadd.f32 %v4325_v53, %v15715_v23  ;;  %v4438_v18 = vpop.f32.mrf.mxu1  ;;  %v4437_v3 = vadd.f32 %v4436_v48, %v4324_v37  ;;  %v20235_v48 = vld [vmem:[#allocation36_spill] sm:$0xff] }
 0x27d   :  { %v4433_v42 = vadd.f32 %v4432_v61, %v4320_v36  ;;  %v20231_v30 = vld [vmem:[#allocation14_spill] sm:$0xff]  ;;  %8470 = vmatpush2.bf16.msra.mxu0 %v12014_v12  ;;  %v12006_v36 = vcombine.low %v5461_v22, %v5465_v8  ;;  %v11999_v61 = vcombine.high %v16112_v51, %v16117_v60  ;;  %v4327_v8 = vpop.f32.mrf.mxu0 }
 0x27e   :  { %8315 = vmatprep.mubr.bf16.mxu0 %v20231_v30  ;;  %v16128_v7 = vld [vmem:[%s20024_s3 + $0xec0] sm:$0xff]  ;;  %20233 = vst [vmem:[#allocation33_spill] sm:$0xff] %v16140_v46  ;;  %8471 = vmatprep.subr.bf16.mxu0 %v12007_v17  ;;  %v4328_v23 = vadd.f32 %v4327_v8, %v15718_v20  ;;  %v4440_v17 = vpop.f32.mrf.mxu1 }
 0x27f   :  { %v16133_v6 = vld [vmem:[%s20024_s3 + $0xee0] sm:$0xff]  ;;  %v4994_v32 = vmax.f32 %v4433_v42, 0.0  ;;  %8583 = vmatpush2.bf16.msra.mxu1 %v12142_v57  ;;  %v4439_v42 = vadd.f32 %v4438_v18, %v4326_v27  ;;  %v5001_v18 = vmax.f32 %v4437_v3, 0.0 }
 0x280   :  { %v20232_v47 = vld [vmem:[#allocation30_spill] sm:$0xff]  ;;  %8584 = vmatprep.subr.bf16.mxu1 %v12135_v39  ;;  %v12127_v63 = vcombine.high %v16128_v7, %v16133_v6  ;;  %v4329_v39 = vpop.f32.mrf.mxu0  ;;  %v12126_v20 = vcombine.low %v16128_v7, %v16133_v6  ;;  %v4441_v37 = vadd.f32 %v4440_v17, %v4328_v23  ;;  %v20237_v17 = vld [vmem:[#allocation29_spill] sm:$0xff] }
 0x281   :  { %8428 = vmatprep.mubr.bf16.mxu1 %v20232_v47  ;;  %v5445_v12 = vld [vmem:[%s20024_s3 + $0xa80] sm:$0xff]  ;;  %v16151_v5 = vpack.c.bf16 %v4994_v32, %v4986_v31  ;;  %8472 = vmatpush2.bf16.msra.mxu0 %v12006_v36  ;;  %v11998_v32 = vcombine.low %v16112_v51, %v16117_v60  ;;  %v4330_v53 = vadd.f32 %v4329_v39, %v20235_v48  ;;  %v4442_v31 = vpop.f32.mrf.mxu1  ;;  %v20236_v60 = vld [vmem:[#allocation13_spill] sm:$0xff]  ;;  %v20238_v39 = vld [vmem:[#allocation16_spill] sm:$0xff] }
 0x282   :  { %v5449_v22 = vld [vmem:[%s20024_s3 + $0xaa0] sm:$0xff]  ;;  %8473 = vmatprep.subr.bf16.mxu0 %v11999_v61  ;;  %v4333_v51 = vpop.f32.mrf.mxu0  ;;  %v5009_v7 = vmax.f32 %v4441_v37, 0.0  ;;  %v20239_v48 = vld [vmem:[#allocation32_spill] sm:$0xff]  ;;  %v20241_v47 = vld [vmem:[#allocation37_spill] sm:$0xff] }
 0x283   :  { %20234 = vst [vmem:[#allocation34_spill] sm:$0xff] %v16151_v5  ;;  %v16157_v25 = vld [vmem:[%s20024_s3 + $0xe80] sm:$0xff]  ;;  %v11991_v35 = vcombine.high %v5445_v12, %v5449_v22  ;;  %8585 = vmatpush2.bf16.msra.mxu1 %v12134_v13  ;;  %8316 = vmatmul.mubr.bf16.gmra.mxu0 %v20236_v60  ;;  %v4443_v6 = vadd.f32 %v4442_v31, %v4330_v53  ;;  %v4446_v23 = vpop.f32.mrf.mxu1  ;;  %v5002_v31 = vmax.f32 %v4439_v42, 0.0 }
 0x284   :  { %v16162_v57 = vld [vmem:[%s20024_s3 + $0xea0] sm:$0xff]  ;;  %8586 = vmatprep.subr.bf16.mxu1 %v12127_v63  ;;  %v4334_v61 = vadd.f32 %v4333_v51, %v15742_v19  ;;  %8429 = vmatmul.mubr.bf16.gmra.mxu1 %v20237_v17  ;;  %v4335_v3 = vpop.f32.mrf.mxu0  ;;  %v11990_v37 = vcombine.low %v5445_v12, %v5449_v22  ;;  %v16198_v51 = vpack.c.bf16 %v5009_v7, %v5001_v18 }
 0x285   :  { %v16172_v8 = vld [vmem:[%s20024_s3 + $0xa40] sm:$0xff]  ;;  %v12119_v27 = vcombine.high %v16157_v25, %v16162_v57  ;;  %8325 = vmatprep.mubr.bf16.mxu0 %v20238_v39  ;;  %8438 = vmatprep.mubr.bf16.mxu1 %v20239_v48  ;;  %v12118_v53 = vcombine.low %v16157_v25, %v16162_v57  ;;  %v5010_v17 = vmax.f32 %v4443_v6, 0.0  ;;  %v4336_v56 = vadd.f32 %v4335_v3, %v20241_v47  ;;  %v4448_v62 = vpop.f32.mrf.mxu1  ;;  %v5166_v48 = vld [vmem:[%s20024_s3 + $0x1c8] sm:$0xff] }
 0x286   :  { %v16177_v36 = vld [vmem:[%s20024_s3 + $0xa60] sm:$0xff]  ;;  %8474 = vmatpush2.bf16.msra.mxu0 %v11998_v32  ;;  %20240 = vst [vmem:[#allocation35_spill] sm:$0xff] %v16198_v51  ;;  %v4337_v22 = vpop.f32.mrf.mxu0  ;;  %v4447_v42 = vadd.f32 %v4446_v23, %v4334_v61 }
 0x287   :  { %v16188_v13 = vld [vmem:[%s20024_s3 + $0xe40] sm:$0xff]  ;;  %v11983_v19 = vcombine.high %v16172_v8, %v16177_v36  ;;  %8475 = vmatprep.subr.bf16.mxu0 %v11991_v35  ;;  %8587 = vmatpush2.bf16.msra.mxu1 %v12126_v20  ;;  %v16208_v57 = vpack.c.bf16 %v5010_v17, %v5002_v31  ;;  %v4450_v7 = vpop.f32.mrf.mxu1  ;;  %v4449_v23 = vadd.f32 %v4448_v62, %v4336_v56  ;;  %v20244_v31 = vld [vmem:[#allocation39_spill] sm:$0xff] }
 0x288   :  { %v5569_v63 = vld [vmem:[%s20024_s3 + $0xe60] sm:$0xff]  ;;  %8588 = vmatprep.subr.bf16.mxu1 %v12119_v27  ;;  %v4339_v20 = vpop.f32.mrf.mxu0  ;;  %v11982_v27 = vcombine.low %v16172_v8, %v16177_v36  ;;  %v20245_v8 = vld [vmem:[#allocation15_spill] sm:$0xff]  ;;  %v5017_v62 = vmax.f32 %v4447_v42, 0.0 }
 0x289   :  { %v5429_v32 = vld [vmem:[%s20024_s3 + $0xa00] sm:$0xff]  ;;  %v12111_v25 = vcombine.high %v16188_v13, %v5569_v63  ;;  %20242 = vst [vmem:[#allocation36_spill] sm:$0xff] %v16208_v57  ;;  %v12110_v61 = vcombine.low %v16188_v13, %v5569_v63  ;;  %v20246_v36 = vld [vmem:[#allocation7_spill] sm:$0xff]  ;;  %v5018_v13 = vmax.f32 %v4449_v23, 0.0 }
 0x28a   :  { %v5433_v12 = vld [vmem:[%s20024_s3 + $0xa20] sm:$0xff]  ;;  %8476 = vmatpush2.bf16.msra.mxu0 %v11990_v37  ;;  %v5170_v37 = vld [vmem:[%s20024_s3 + $0x1e8] sm:$0xff]  ;;  %v4343_v4 = vpop.f32.mrf.mxu0  ;;  %v20081_v9 = vsub.s32 7, %v20246_v36  ;;  %v20250_v23 = vsub.s32 6, %v20246_v36 }
 0x28b   :  { %v20243_v18 = vld [vmem:[#allocation38_spill] sm:$0xff]  ;;  %v11975_v17 = vcombine.high %v5429_v32, %v5433_v12  ;;  %8477 = vmatprep.subr.bf16.mxu0 %v11983_v19  ;;  %8589 = vmatpush2.bf16.msra.mxu1 %v12118_v53  ;;  %v11713_v26 = vcombine.high %v5166_v48, %v5170_v37 }
 0x28c   :  { %v4338_v47 = vadd.f32 %v4337_v22, %v20243_v18  ;;  %v16214_v35 = vld [vmem:[%s20024_s3 + $0xe00] sm:$0xff]  ;;  %v4340_v22 = vadd.f32 %v4339_v20, %v20244_v31  ;;  %v4452_v18 = vpop.f32.mrf.mxu1  ;;  %8326 = vmatmul.mubr.bf16.gmra.mxu0 %v20245_v8  ;;  %8590 = vmatprep.subr.bf16.mxu1 %v12111_v25  ;;  %v20247_v20 = vld [vmem:[#allocation31_spill] sm:$0xff]  ;;  %v4345_v53 = vpop.f32.mrf.mxu0  ;;  %v11974_v31 = vcombine.low %v5429_v32, %v5433_v12 }
 0x28d   :  { %v5561_v6 = vld [vmem:[%s20024_s3 + $0xe20] sm:$0xff]  ;;  %8439 = vmatmul.mubr.bf16.gmra.mxu1 %v20247_v20  ;;  %8481 = vmatprep.mubr.bf16.mxu0 %v15895_v0  ;;  %v5162_v32 = vld [vmem:[%s20024_s3 + $0x1a8] sm:$0xff]  ;;  %v11841_v12 = vcombine.high %v15928_v50, %v15933_v11 }
 0x28e   :  { %v4451_v3 = vadd.f32 %v4450_v7, %v4338_v47  ;;  %v12103_v56 = vcombine.high %v16214_v35, %v5561_v6  ;;  %v4453_v19 = vadd.f32 %v4452_v18, %v4340_v22  ;;  %v4344_v47 = vadd.f32 %v4343_v4, %v15789_v52  ;;  %v4456_v7 = vpop.f32.mrf.mxu1  ;;  %8478 = vmatpush2.bf16.msra.mxu0 %v11982_v27  ;;  %v4347_v52 = vpop.f32.mrf.mxu0  ;;  %v5158_v27 = vld [vmem:[%s20024_s3 + $0x188] sm:$0xff] }
 0x28f   :  { %v12102_v25 = vcombine.low %v16214_v35, %v5561_v6  ;;  %8479 = vmatprep.subr.bf16.mxu0 %v11975_v17  ;;  %8591 = vmatpush2.bf16.msra.mxu1 %v12110_v61  ;;  %v12754_v61 = vld [vmem:[%s20023_s2] sm:$0xff] }
 0x290   :  { %v5025_v63 = vmax.f32 %v4451_v3, 0.0  ;;  %v5026_v42 = vmax.f32 %v4453_v19, 0.0  ;;  %v4346_v3 = vadd.f32 %v4345_v53, %v15799_v55  ;;  %v4458_v4 = vpop.f32.mrf.mxu1  ;;  %8592 = vmatprep.subr.bf16.mxu1 %v12103_v56  ;;  %v4457_v6 = vadd.f32 %v4456_v7, %v4344_v47  ;;  %v4349_v56 = vpop.f32.mrf.mxu0  ;;  %v5150_v7 = vld [vmem:[%s20024_s3 + $0x148] sm:$0xff] }
 0x291   :  { %v4348_v55 = vadd.f32 %v4347_v52, %v15808_v16  ;;  %v16256_v22 = vrot.slane %v12754_v61, %v20250_v23  ;;  %v4350_v16 = vadd.f32 %v4349_v56, %v15818_v40  ;;  %v11705_v47 = vcombine.high %v5158_v27, %v5162_v32  ;;  %v5154_v53 = vld [vmem:[%s20024_s3 + $0x168] sm:$0xff] }
 0x292   :  { %v16237_v1 = vpack.c.bf16 %v5025_v63, %v5017_v62  ;;  %v16248_v35 = vpack.c.bf16 %v5026_v42, %v5018_v13  ;;  %v4460_v17 = vpop.f32.mrf.mxu1  ;;  %v4459_v18 = vadd.f32 %v4458_v4, %v4346_v3  ;;  %8480 = vmatpush2.bf16.msra.mxu0 %v11974_v31  ;;  %v11712_v62 = vcombine.low %v5166_v48, %v5170_v37  ;;  %v4499_v48 = vpop.f32.mrf.mxu0 }
 0x293   :  { %v16260_v13 = vrot.slane %v12754_v61, %v20081_v9  ;;  %v4461_v63 = vadd.f32 %v4460_v17, %v4348_v55  ;;  %8675 = vmatprep.subr.bf16.mxu0 %v11713_v26  ;;  %8593 = vmatpush2.bf16.msra.mxu1 %v12102_v25  ;;  %v5033_v37 = vmax.f32 %v4457_v6, 0.0  ;;  %v4500_v3 = vadd.f32 %v4499_v48, %v16256_v22 }
 0x294   :  { %20248 = vst [vmem:[#allocation37_spill] sm:$0xff] %v16237_v1  ;;  %20249 = vst [vmem:[#allocation38_spill] sm:$0xff] %v16248_v35  ;;  %v4462_v19 = vpop.f32.mrf.mxu1  ;;  %8788 = vmatprep.subr.bf16.mxu1 %v11841_v12  ;;  %v5034_v26 = vmax.f32 %v4459_v18, 0.0  ;;  %v4501_v4 = vpop.f32.mrf.mxu0  ;;  %v11704_v52 = vcombine.low %v5158_v27, %v5162_v32  ;;  %v11697_v55 = vcombine.high %v5150_v7, %v5154_v53  ;;  %v5142_v18 = vld [vmem:[%s20024_s3 + $0x108] sm:$0xff] }
 0x295   :  { %v5041_v31 = vmax.f32 %v4461_v63, 0.0  ;;  %v4463_v42 = vadd.f32 %v4462_v19, %v4350_v16  ;;  %8482 = vmatmul.mubr.bf16.vlgmr.msra.gmra.mxu0 %v15880_v10  ;;  %v4502_v12 = vadd.f32 %v4501_v4, %v16260_v13  ;;  %v5146_v27 = vld [vmem:[%s20024_s3 + $0x128] sm:$0xff]  ;;  %v11696_v16 = vcombine.low %v5150_v7, %v5154_v53 }
 0x296   :  { %v4612_v40 = vpop.f32.mrf.mxu1  ;;  %8491 = vmatprep.mubr.bf16.mxu0 %v15971_v41  ;;  %8676 = vmatpush1.bf16.msra.mxu0 %v11712_v62  ;;  %v16277_v23 = vpop.f32.mrf.mxu0  ;;  %v11688_v53 = vcombine.low %v5142_v18, %v5146_v27 }
 0x297   :  { %v16272_v17 = vpack.c.bf16 %v5041_v31, %v5033_v37  ;;  %v5042_v25 = vmax.f32 %v4463_v42, 0.0  ;;  %v16274_v61 = vadd.f32 %v4612_v40, %v4500_v3  ;;  %8677 = vmatprep.subr.bf16.mxu0 %v11705_v47  ;;  %v11689_v47 = vcombine.high %v5142_v18, %v5146_v27  ;;  %v5134_v37 = vld [vmem:[%s20024_s3 + $0xc8] sm:$0xff] }
 0x298   :  { %v4614_v6 = vpop.f32.mrf.mxu1  ;;  %v16291_v63 = vpop.f32.mrf.mxu0  ;;  %v5138_v31 = vld [vmem:[%s20024_s3 + $0xe8] sm:$0xff] }
 0x299   :  { %20251 = vst [vmem:[#allocation39_spill] sm:$0xff] %v16272_v17  ;;  %v16285_v32 = vpack.c.bf16 %v5042_v25, %v5034_v26  ;;  %v16287_v56 = vadd.f32 %v4614_v6, %v4502_v12  ;;  %v5126_v25 = vld [vmem:[%s20024_s3 + $0x88] sm:$0xff] }
 0x29a   :  { %v16289_v62 = vpop.f32.mrf.mxu1  ;;  %8678 = vmatpush1.bf16.msra.mxu0 %v11704_v52  ;;  %v4509_v48 = vpop.f32.mrf.mxu0  ;;  %v11681_v52 = vcombine.high %v5134_v37, %v5138_v31  ;;  %v5130_v12 = vld [vmem:[%s20024_s3 + $0xa8] sm:$0xff] }
 0x29b   :  { %20252 = vst [vmem:[#allocation48_spill] sm:$0xff] %v16285_v32  ;;  %8679 = vmatprep.subr.bf16.mxu0 %v11697_v55  ;;  %v4510_v42 = vadd.f32 %v4509_v48, %v16256_v22  ;;  %v11673_v48 = vcombine.high %v5126_v25, %v5130_v12 }
 0x29c   :  { %v16293_v19 = vpop.f32.mrf.mxu1  ;;  %v4511_v7 = vpop.f32.mrf.mxu0 }
 0x29d   :  { %8492 = vmatmul.mubr.bf16.gmra.mxu0 %v15960_v14  ;;  %v4512_v26 = vadd.f32 %v4511_v7, %v16260_v13  ;;  %v5122_v7 = vld [vmem:[%s20024_s3 + $0x68] sm:$0xff] }
 0x29e   :  { %v4622_v3 = vpop.f32.mrf.mxu1  ;;  %8501 = vmatprep.mubr.bf16.mxu0 %v16031_v44  ;;  %8680 = vmatpush1.bf16.msra.mxu0 %v11696_v16  ;;  %v16307_v55 = vpop.f32.mrf.mxu0  ;;  %v11680_v16 = vcombine.low %v5134_v37, %v5138_v31  ;;  %v11672_v31 = vcombine.low %v5126_v25, %v5130_v12 }
 0x29f   :  { %v16304_v40 = vadd.f32 %v4622_v3, %v4510_v42  ;;  %8681 = vmatprep.subr.bf16.mxu0 %v11689_v47  ;;  %v5118_v3 = vld [vmem:[%s20024_s3 + $0x48] sm:$0xff] }
 0x2a0   :  { %v4624_v4 = vpop.f32.mrf.mxu1  ;;  %v16319_v27 = vpop.f32.mrf.mxu0  ;;  %v11665_v20 = vcombine.high %v5118_v3, %v5122_v7 }
 0x2a1   :  { %v16315_v6 = vadd.f32 %v4624_v4, %v4512_v26 }
 0x2a2   :  { %v16317_v18 = vpop.f32.mrf.mxu1  ;;  %8682 = vmatpush1.bf16.msra.mxu0 %v11688_v53  ;;  %v4519_v42 = vpop.f32.mrf.mxu0 }
 0x2a3   :  { %8683 = vmatprep.subr.bf16.mxu0 %v11681_v52  ;;  %v4520_v26 = vadd.f32 %v4519_v42, %v16256_v22  ;;  %v5110_v42 = vld [vmem:[%s20024_s3 + $0x8] sm:$0xff] }
 0x2a4   :  { %v16321_v47 = vpop.f32.mrf.mxu1  ;;  %v4521_v37 = vpop.f32.mrf.mxu0 }
 0x2a5   :  { %8502 = vmatmul.mubr.bf16.gmra.mxu0 %v16020_v45  ;;  %v4522_v52 = vadd.f32 %v4521_v37, %v16260_v13  ;;  %v5230_v45 = vld [vmem:[%s20024_s3 + $0x3c8] sm:$0xff] }
 0x2a6   :  { %v4632_v4 = vpop.f32.mrf.mxu1  ;;  %8511 = vmatprep.mubr.bf16.mxu0 %v16091_v43  ;;  %8684 = vmatpush1.bf16.msra.mxu0 %v11680_v16  ;;  %v16335_v44 = vpop.f32.mrf.mxu0  ;;  %v5114_v43 = vld [vmem:[%s20024_s3 + $0x28] sm:$0xff] }
 0x2a7   :  { %v16332_v53 = vadd.f32 %v4632_v4, %v4520_v26  ;;  %8685 = vmatprep.subr.bf16.mxu0 %v11673_v48  ;;  %v11664_v26 = vcombine.low %v5118_v3, %v5122_v7  ;;  %v11657_v4 = vcombine.high %v5110_v42, %v5114_v43 }
 0x2a8   :  { %v4634_v9 = vpop.f32.mrf.mxu1  ;;  %v16347_v12 = vpop.f32.mrf.mxu0 }
 0x2a9   :  { %v16343_v16 = vadd.f32 %v4634_v9, %v4522_v52  ;;  %v5234_v9 = vld [vmem:[%s20024_s3 + $0x3e8] sm:$0xff] }
 0x2aa   :  { %v16345_v25 = vpop.f32.mrf.mxu1  ;;  %8686 = vmatpush1.bf16.msra.mxu0 %v11672_v31  ;;  %v4529_v37 = vpop.f32.mrf.mxu0  ;;  %v11777_v10 = vcombine.high %v5230_v45, %v5234_v9 }
 0x2ab   :  { %8687 = vmatprep.subr.bf16.mxu0 %v11665_v20  ;;  %v4530_v52 = vadd.f32 %v4529_v37, %v16256_v22  ;;  %v11656_v20 = vcombine.low %v5110_v42, %v5114_v43  ;;  %v5222_v37 = vld [vmem:[%s20024_s3 + $0x388] sm:$0xff]  ;;  %v11776_v42 = vcombine.low %v5230_v45, %v5234_v9 }
 0x2ac   :  { %v16349_v48 = vpop.f32.mrf.mxu1  ;;  %v4531_v3 = vpop.f32.mrf.mxu0 }
 0x2ad   :  { %8512 = vmatmul.mubr.bf16.gmra.mxu0 %v16080_v21  ;;  %v4532_v31 = vadd.f32 %v4531_v3, %v16260_v13  ;;  %v5214_v21 = vld [vmem:[%s20024_s3 + $0x348] sm:$0xff] }
 0x2ae   :  { %v4642_v14 = vpop.f32.mrf.mxu1  ;;  %8521 = vmatprep.mubr.bf16.mxu0 %v16151_v5  ;;  %8688 = vmatpush1.bf16.msra.mxu0 %v11664_v26  ;;  %v16363_v36 = vpop.f32.mrf.mxu0  ;;  %v5226_v5 = vld [vmem:[%s20024_s3 + $0x3a8] sm:$0xff] }
 0x2af   :  { %v16360_v7 = vadd.f32 %v4642_v14, %v4530_v52  ;;  %8689 = vmatprep.subr.bf16.mxu0 %v11657_v4  ;;  %v11769_v52 = vcombine.high %v5222_v37, %v5226_v5 }
 0x2b0   :  { %v4644_v41 = vpop.f32.mrf.mxu1  ;;  %v16375_v14 = vpop.f32.mrf.mxu0 }
 0x2b1   :  { %v16371_v26 = vadd.f32 %v4644_v41, %v4532_v31  ;;  %v5218_v41 = vld [vmem:[%s20024_s3 + $0x368] sm:$0xff] }
 0x2b2   :  { %v16373_v43 = vpop.f32.mrf.mxu1  ;;  %8690 = vmatpush1.bf16.msra.mxu0 %v11656_v20  ;;  %v4539_v3 = vpop.f32.mrf.mxu0  ;;  %v11761_v39 = vcombine.high %v5214_v21, %v5218_v41 }
 0x2b3   :  { %8691 = vmatprep.subr.bf16.mxu0 %v11777_v10  ;;  %v4540_v31 = vadd.f32 %v4539_v3, %v16256_v22  ;;  %v11768_v10 = vcombine.low %v5222_v37, %v5226_v5  ;;  %v5206_v3 = vld [vmem:[%s20024_s3 + $0x308] sm:$0xff]  ;;  %v11760_v37 = vcombine.low %v5214_v21, %v5218_v41 }
 0x2b4   :  { %v16377_v4 = vpop.f32.mrf.mxu1  ;;  %v4541_v45 = vpop.f32.mrf.mxu0 }
 0x2b5   :  { %8522 = vmatmul.mubr.bf16.gmra.mxu0 %v16140_v46  ;;  %v4542_v20 = vadd.f32 %v4541_v45, %v16260_v13  ;;  %v5198_v46 = vld [vmem:[%s20024_s3 + $0x2c8] sm:$0xff] }
 0x2b6   :  { %v4652_v0 = vpop.f32.mrf.mxu1  ;;  %8531 = vmatprep.mubr.bf16.mxu0 %v16208_v57  ;;  %8692 = vmatpush2.bf16.msra.mxu0 %v11776_v42  ;;  %v16391_v60 = vpop.f32.mrf.mxu0  ;;  %v5210_v57 = vld [vmem:[%s20024_s3 + $0x328] sm:$0xff] }
 0x2b7   :  { %v16388_v9 = vadd.f32 %v4652_v0, %v4540_v31  ;;  %8693 = vmatprep.subr.bf16.mxu0 %v11769_v52  ;;  %v11753_v31 = vcombine.high %v5206_v3, %v5210_v57 }
 0x2b8   :  { %v4654_v8 = vpop.f32.mrf.mxu1  ;;  %v16403_v0 = vpop.f32.mrf.mxu0 }
 0x2b9   :  { %20253 = vst [vmem:[#allocation49_spill] sm:$0xff] %v16388_v9  ;;  %v16399_v42 = vadd.f32 %v4654_v8, %v4542_v20  ;;  %v5202_v8 = vld [vmem:[%s20024_s3 + $0x2e8] sm:$0xff] }
 0x2ba   :  { %v16401_v5 = vpop.f32.mrf.mxu1  ;;  %8694 = vmatpush2.bf16.msra.mxu0 %v11768_v10  ;;  %v4549_v45 = vpop.f32.mrf.mxu0 }
 0x2bb   :  { %8695 = vmatprep.subr.bf16.mxu0 %v11761_v39  ;;  %v4550_v20 = vadd.f32 %v4549_v45, %v16256_v22  ;;  %v11752_v39 = vcombine.low %v5206_v3, %v5210_v57  ;;  %v5190_v45 = vld [vmem:[%s20024_s3 + $0x288] sm:$0xff]  ;;  %v11744_v3 = vcombine.low %v5198_v46, %v5202_v8 }
 0x2bc   :  { %v16405_v52 = vpop.f32.mrf.mxu1  ;;  %v4551_v21 = vpop.f32.mrf.mxu0 }
 0x2bd   :  { %20254 = vst [vmem:[#allocation50_spill] sm:$0xff] %v16405_v52  ;;  %8532 = vmatmul.mubr.bf16.gmra.mxu0 %v16198_v51  ;;  %v4552_v10 = vadd.f32 %v4551_v21, %v16260_v13  ;;  %v11745_v52 = vcombine.high %v5198_v46, %v5202_v8  ;;  %v5182_v51 = vld [vmem:[%s20024_s3 + $0x248] sm:$0xff] }
 0x2be   :  { %v4662_v30 = vpop.f32.mrf.mxu1  ;;  %8541 = vmatprep.mubr.bf16.mxu0 %v16248_v35  ;;  %8696 = vmatpush2.bf16.msra.mxu0 %v11760_v37  ;;  %v16419_v9 = vpop.f32.mrf.mxu0  ;;  %v5194_v35 = vld [vmem:[%s20024_s3 + $0x2a8] sm:$0xff] }
 0x2bf   :  { %v16416_v41 = vadd.f32 %v4662_v30, %v4550_v20  ;;  %8697 = vmatprep.subr.bf16.mxu0 %v11753_v31  ;;  %v11737_v20 = vcombine.high %v5190_v45, %v5194_v35 }
 0x2c0   :  { %v4664_v33 = vpop.f32.mrf.mxu1  ;;  %v16431_v30 = vpop.f32.mrf.mxu0 }
 0x2c1   :  { %20255 = vst [vmem:[#allocation51_spill] sm:$0xff] %v16416_v41  ;;  %v16427_v37 = vadd.f32 %v4664_v33, %v4552_v10  ;;  %v5186_v33 = vld [vmem:[%s20024_s3 + $0x268] sm:$0xff] }
 0x2c2   :  { %v16429_v57 = vpop.f32.mrf.mxu1  ;;  %8698 = vmatpush2.bf16.msra.mxu0 %v11752_v39  ;;  %v4559_v21 = vpop.f32.mrf.mxu0 }
 0x2c3   :  { %20256 = vst [vmem:[#allocation52_spill] sm:$0xff] %v16427_v37  ;;  %20257 = vst [vmem:[#allocation53_spill] sm:$0xff] %v16429_v57  ;;  %8699 = vmatprep.subr.bf16.mxu0 %v11745_v52  ;;  %v4560_v10 = vadd.f32 %v4559_v21, %v16256_v22  ;;  %v11736_v52 = vcombine.low %v5190_v45, %v5194_v35  ;;  %v11729_v37 = vcombine.high %v5182_v51, %v5186_v33  ;;  %v5174_v21 = vld [vmem:[%s20024_s3 + $0x208] sm:$0xff] }
 0x2c4   :  { %v16433_v31 = vpop.f32.mrf.mxu1  ;;  %v4561_v46 = vpop.f32.mrf.mxu0  ;;  %v11728_v45 = vcombine.low %v5182_v51, %v5186_v33 }
 0x2c5   :  { %20258 = vst [vmem:[#allocation54_spill] sm:$0xff] %v16433_v31  ;;  %8542 = vmatmul.mubr.bf16.gmra.mxu0 %v16237_v1  ;;  %v4562_v39 = vadd.f32 %v4561_v46, %v16260_v13  ;;  %v5422_v1 = vld [vmem:[%s20024_s3 + $0x9c8] sm:$0xff] }
 0x2c6   :  { %v4672_v41 = vpop.f32.mrf.mxu1  ;;  %8551 = vmatprep.mubr.bf16.mxu0 %v16285_v32  ;;  %8700 = vmatpush2.bf16.msra.mxu0 %v11744_v3  ;;  %v16447_v57 = vpop.f32.mrf.mxu0  ;;  %v5178_v32 = vld [vmem:[%s20024_s3 + $0x228] sm:$0xff] }
 0x2c7   :  { %v16444_v8 = vadd.f32 %v4672_v41, %v4560_v10  ;;  %8701 = vmatprep.subr.bf16.mxu0 %v11737_v20  ;;  %v11721_v10 = vcombine.high %v5174_v21, %v5178_v32 }
 0x2c8   :  { %v4674_v31 = vpop.f32.mrf.mxu1  ;;  %v16459_v41 = vpop.f32.mrf.mxu0 }
 0x2c9   :  { %20259 = vst [vmem:[#allocation55_spill] sm:$0xff] %v16444_v8  ;;  %v16455_v3 = vadd.f32 %v4674_v31, %v4562_v39  ;;  %20262 = vst [vmem:[#allocation58_spill] sm:$0xff] %v16459_v41  ;;  %v5426_v31 = vld [vmem:[%s20024_s3 + $0x9e8] sm:$0xff] }
 0x2ca   :  { %v16457_v35 = vpop.f32.mrf.mxu1  ;;  %8702 = vmatpush2.bf16.msra.mxu0 %v11736_v52  ;;  %v4569_v46 = vpop.f32.mrf.mxu0 }
 0x2cb   :  { %20260 = vst [vmem:[#allocation56_spill] sm:$0xff] %v16455_v3  ;;  %20261 = vst [vmem:[#allocation57_spill] sm:$0xff] %v16457_v35  ;;  %8703 = vmatprep.subr.bf16.mxu0 %v11729_v37  ;;  %v4570_v39 = vadd.f32 %v4569_v46, %v16256_v22  ;;  %v11720_v37 = vcombine.low %v5174_v21, %v5178_v32  ;;  %v11969_v3 = vcombine.high %v5422_v1, %v5426_v31  ;;  %v5414_v46 = vld [vmem:[%s20024_s3 + $0x988] sm:$0xff] }
 0x2cc   :  { %v16461_v20 = vpop.f32.mrf.mxu1  ;;  %v4571_v51 = vpop.f32.mrf.mxu0  ;;  %v11968_v21 = vcombine.low %v5422_v1, %v5426_v31 }
 0x2cd   :  { %20263 = vst [vmem:[#allocation59_spill] sm:$0xff] %v16461_v20  ;;  %8552 = vmatmul.mubr.bf16.gmra.mxu0 %v16272_v17  ;;  %v4572_v52 = vadd.f32 %v4571_v51, %v16260_v13 }
 0x2ce   :  { %v4682_v8 = vpop.f32.mrf.mxu1  ;;  %8704 = vmatpush2.bf16.msra.mxu0 %v11728_v45  ;;  %8707 = vmatprep.mubr.bf16.mxu0 %v14323_v58  ;;  %v16475_v35 = vpop.f32.mrf.mxu0  ;;  %v5418_v45 = vld [vmem:[%s20024_s3 + $0x9a8] sm:$0xff] }
 0x2cf   :  { %v16472_v33 = vadd.f32 %v4682_v8, %v4570_v39  ;;  %8705 = vmatprep.subr.bf16.mxu0 %v11721_v10  ;;  %20265 = vst [vmem:[#allocation61_spill] sm:$0xff] %v16475_v35  ;;  %v4504_v10 = vadd.f32 %v16277_v23, %v16256_v22  ;;  %v11961_v51 = vcombine.high %v5414_v46, %v5418_v45 }
 0x2d0   :  { %v4684_v20 = vpop.f32.mrf.mxu1  ;;  %v16487_v8 = vpop.f32.mrf.mxu0 }
 0x2d1   :  { %20264 = vst [vmem:[#allocation60_spill] sm:$0xff] %v16472_v33  ;;  %v16483_v58 = vadd.f32 %v4684_v20, %v4572_v52  ;;  %20268 = vst [vmem:[#allocation64_spill] sm:$0xff] %v16487_v8  ;;  %v5406_v33 = vld [vmem:[%s20024_s3 + $0x948] sm:$0xff]  ;;  %v4617_v31 = vadd.f32 %v16289_v62, %v4504_v10 }
 0x2d2   :  { %v16485_v32 = vpop.f32.mrf.mxu1  ;;  %8706 = vmatpush2.bf16.msra.mxu0 %v11720_v37  ;;  %v4725_v17 = vpop.f32.mrf.mxu0  ;;  %v5410_v20 = vld [vmem:[%s20024_s3 + $0x968] sm:$0xff]  ;;  %v4506_v37 = vadd.f32 %v16291_v63, %v16260_v13 }
 0x2d3   :  { %20266 = vst [vmem:[#allocation62_spill] sm:$0xff] %v16483_v58  ;;  %20267 = vst [vmem:[#allocation63_spill] sm:$0xff] %v16485_v32  ;;  %8901 = vmatprep.subr.bf16.mxu0 %v11969_v3  ;;  %v11960_v3 = vcombine.low %v5414_v46, %v5418_v45  ;;  %v11953_v58 = vcombine.high %v5406_v33, %v5410_v20  ;;  %v5398_v32 = vld [vmem:[%s20024_s3 + $0x908] sm:$0xff]  ;;  %v11952_v10 = vcombine.low %v5406_v33, %v5410_v20 }
 0x2d4   :  { %v16491_v39 = vpop.f32.mrf.mxu1  ;;  %v4727_v23 = vpop.f32.mrf.mxu0  ;;  %v5402_v63 = vld [vmem:[%s20024_s3 + $0x928] sm:$0xff]  ;;  %v4619_v46 = vadd.f32 %v16293_v19, %v4506_v37  ;;  %v4516_v33 = vadd.f32 %v16319_v27, %v16260_v13 }
 0x2d5   :  { %20269 = vst [vmem:[#allocation65_spill] sm:$0xff] %v16491_v39  ;;  %8708 = vmatmul.mubr.bf16.vlgmr.msra.gmra.mxu0 %v14307_v38  ;;  %v4728_v52 = vadd.f32 %v4727_v23, %v16287_v56  ;;  %v4514_v23 = vadd.f32 %v16307_v55, %v16256_v22 }
 0x2d6   :  { %v4838_v1 = vpop.f32.mrf.mxu1  ;;  %8717 = vmatprep.mubr.bf16.mxu0 %v14397_v2  ;;  %8902 = vmatpush1.bf16.msra.mxu0 %v11968_v21  ;;  %v4726_v2 = vadd.f32 %v4725_v17, %v16274_v61  ;;  %v4729_v21 = vpop.f32.mrf.mxu0  ;;  %v5390_v17 = vld [vmem:[%s20024_s3 + $0x8c8] sm:$0xff] }
 0x2d7   :  { %8903 = vmatprep.subr.bf16.mxu0 %v11961_v51  ;;  %v4730_v45 = vadd.f32 %v4729_v21, %v4617_v31  ;;  %v11945_v51 = vcombine.high %v5398_v32, %v5402_v63  ;;  %v5394_v61 = vld [vmem:[%s20024_s3 + $0x8e8] sm:$0xff]  ;;  %v4629_v21 = vadd.f32 %v16321_v47, %v4516_v33 }
 0x2d8   :  { %v4840_v39 = vpop.f32.mrf.mxu1  ;;  %v4731_v56 = vpop.f32.mrf.mxu0  ;;  %v4839_v19 = vadd.f32 %v4838_v1, %v4726_v2  ;;  %v11937_v31 = vcombine.high %v5390_v17, %v5394_v61  ;;  %v4627_v2 = vadd.f32 %v16317_v18, %v4514_v23  ;;  %v16545_v18 = vld [vmem:[%s20024_s3 + $0x8a8] sm:$0xff] }
 0x2d9   :  { %v4841_v38 = vadd.f32 %v4840_v39, %v4728_v52  ;;  %v4732_v35 = vadd.f32 %v4731_v56, %v4619_v46  ;;  %v16528_v52 = vld [vmem:[%s20024_s3 + $0x588] sm:$0xff]  ;;  %v11936_v56 = vcombine.low %v5390_v17, %v5394_v61 }
 0x2da   :  { %v4842_v62 = vpop.f32.mrf.mxu1  ;;  %8904 = vmatpush1.bf16.msra.mxu0 %v11960_v3  ;;  %v4735_v37 = vpop.f32.mrf.mxu0  ;;  %v11944_v3 = vcombine.low %v5398_v32, %v5402_v63  ;;  %v16540_v32 = vld [vmem:[%s20024_s3 + $0x888] sm:$0xff] }
 0x2db   :  { %v4843_v8 = vadd.f32 %v4842_v62, %v4730_v45  ;;  %8905 = vmatprep.subr.bf16.mxu0 %v11953_v58  ;;  %v4924_v1 = vmax.f32 %v4841_v38, 0.0  ;;  %v4923_v38 = vmax.f32 %v4839_v19, 0.0  ;;  %v16562_v47 = vld [vmem:[%s20024_s3 + $0x548] sm:$0xff] }
 0x2dc   :  { %v4844_v41 = vpop.f32.mrf.mxu1  ;;  %v4737_v58 = vpop.f32.mrf.mxu0 }
 0x2dd   :  { %v4845_v20 = vadd.f32 %v4844_v41, %v4732_v35  ;;  %8718 = vmatmul.mubr.bf16.gmra.mxu0 %v14379_v49  ;;  %v4931_v39 = vmax.f32 %v4843_v8, 0.0  ;;  %v4738_v35 = vadd.f32 %v4737_v58, %v16315_v6  ;;  %v16535_v8 = vld [vmem:[%s20024_s3 + $0x5a8] sm:$0xff]  ;;  %v4736_v6 = vadd.f32 %v4735_v37, %v16304_v40 }
 0x2de   :  { %v4848_v55 = vpop.f32.mrf.mxu1  ;;  %8727 = vmatprep.mubr.bf16.mxu0 %v14461_v34  ;;  %8906 = vmatpush1.bf16.msra.mxu0 %v11952_v10  ;;  %v4739_v63 = vpop.f32.mrf.mxu0  ;;  %v4524_v10 = vadd.f32 %v16335_v44, %v16256_v22  ;;  %v11833_v19 = vcombine.high %v16528_v52, %v16535_v8  ;;  %v11929_v40 = vcombine.high %v16540_v32, %v16545_v18  ;;  %v16568_v44 = vld [vmem:[%s20024_s3 + $0x568] sm:$0xff] }
 0x2df   :  { %v4932_v27 = vmax.f32 %v4845_v20, 0.0  ;;  %8907 = vmatprep.subr.bf16.mxu0 %v11945_v51  ;;  %v4740_v45 = vadd.f32 %v4739_v63, %v4627_v2  ;;  %v16553_v51 = vpack.c.bf16 %v4931_v39, %v4923_v38  ;;  %v16573_v20 = vld [vmem:[%s20024_s3 + $0x848] sm:$0xff]  ;;  %v4849_v58 = vadd.f32 %v4848_v55, %v4736_v6 }
 0x2e0   :  { %v4850_v41 = vpop.f32.mrf.mxu1  ;;  %v4741_v23 = vpop.f32.mrf.mxu0  ;;  %v16578_v39 = vld [vmem:[%s20024_s3 + $0x868] sm:$0xff]  ;;  %v11928_v38 = vcombine.low %v16540_v32, %v16545_v18 }
 0x2e1   :  { %v16549_v46 = vpack.c.bf16 %v4932_v27, %v4924_v1  ;;  %20271 = vst [vmem:[#allocation67_spill] sm:$0xff] %v16553_v51  ;;  %v4851_v37 = vadd.f32 %v4850_v41, %v4738_v35  ;;  %v4742_v61 = vadd.f32 %v4741_v23, %v4629_v21  ;;  %v20272_v27 = vcombine.low %v15928_v50, %v15933_v11  ;;  %v16599_v50 = vld [vmem:[%s20024_s3 + $0x508] sm:$0xff] }
 0x2e2   :  { %v4852_v62 = vpop.f32.mrf.mxu1  ;;  %8908 = vmatpush1.bf16.msra.mxu0 %v11944_v3  ;;  %v4745_v3 = vpop.f32.mrf.mxu0  ;;  %v11832_v35 = vcombine.low %v16528_v52, %v16535_v8  ;;  %v11921_v6 = vcombine.high %v16573_v20, %v16578_v39  ;;  %v16604_v11 = vld [vmem:[%s20024_s3 + $0x528] sm:$0xff]  ;;  %v4637_v52 = vadd.f32 %v16345_v25, %v4524_v10  ;;  %v11920_v10 = vcombine.low %v16573_v20, %v16578_v39 }
 0x2e3   :  { %20270 = vst [vmem:[#allocation66_spill] sm:$0xff] %v16549_v46  ;;  %v4853_v17 = vadd.f32 %v4852_v62, %v4740_v45  ;;  %8594 = vmatprep.mubr.bf16.mxu1 %v16549_v46  ;;  %8909 = vmatprep.subr.bf16.mxu0 %v11937_v31  ;;  %v4526_v31 = vadd.f32 %v16347_v12, %v16260_v13  ;;  %v4940_v8 = vmax.f32 %v4851_v37, 0.0  ;;  %v16611_v21 = vld [vmem:[%s20024_s3 + $0x808] sm:$0xff]  ;;  %v4939_v62 = vmax.f32 %v4849_v58, 0.0 }
 0x2e4   :  { %v4854_v33 = vpop.f32.mrf.mxu1  ;;  %8595 = vmatmul.mubr.bf16.vlgmr.msra.gmra.mxu1 %v16553_v51  ;;  %v4747_v55 = vpop.f32.mrf.mxu0  ;;  %v11825_v12 = vcombine.high %v16562_v47, %v16568_v44  ;;  %v16616_v45 = vld [vmem:[%s20024_s3 + $0x828] sm:$0xff]  ;;  %v4746_v25 = vadd.f32 %v4745_v3, %v16332_v53  ;;  %v4534_v53 = vadd.f32 %v16363_v36, %v16256_v22 }
 0x2e5   :  { %v4855_v2 = vadd.f32 %v4854_v33, %v4742_v61  ;;  %8728 = vmatmul.mubr.bf16.gmra.mxu0 %v14447_v29  ;;  %8789 = vmatpush1.bf16.msra.mxu1 %v20272_v27  ;;  %v4947_v41 = vmax.f32 %v4853_v17, 0.0  ;;  %v4748_v18 = vadd.f32 %v4747_v55, %v16343_v16  ;;  %v11824_v16 = vcombine.low %v16562_v47, %v16568_v44  ;;  %v16643_v36 = vld [vmem:[%s20024_s3 + $0x4e8] sm:$0xff] }
 0x2e6   :  { %v4858_v1 = vpop.f32.mrf.mxu1  ;;  %8737 = vmatprep.mubr.bf16.mxu0 %v20215_v54  ;;  %8910 = vmatpush1.bf16.msra.mxu0 %v11936_v56  ;;  %v4749_v56 = vpop.f32.mrf.mxu0  ;;  %v4639_v23 = vadd.f32 %v16349_v48, %v4526_v31  ;;  %v11817_v17 = vcombine.high %v16599_v50, %v16604_v11  ;;  %v11913_v33 = vcombine.high %v16611_v21, %v16616_v45  ;;  %v16637_v48 = vld [vmem:[%s20024_s3 + $0x4c8] sm:$0xff] }
 0x2e7   :  { %v4948_v32 = vmax.f32 %v4855_v2, 0.0  ;;  %8790 = vmatprep.subr.bf16.mxu1 %v11833_v19  ;;  %8911 = vmatprep.subr.bf16.mxu0 %v11929_v40  ;;  %v4750_v40 = vadd.f32 %v4749_v56, %v4637_v52  ;;  %v16630_v61 = vpack.c.bf16 %v4947_v41, %v4939_v62  ;;  %v16648_v3 = vld [vmem:[%s20024_s3 + $0xbc8] sm:$0xff]  ;;  %v4859_v2 = vadd.f32 %v4858_v1, %v4746_v25 }
 0x2e8   :  { %v4860_v63 = vpop.f32.mrf.mxu1  ;;  %v4751_v47 = vpop.f32.mrf.mxu0  ;;  %v16653_v31 = vld [vmem:[%s20024_s3 + $0xbe8] sm:$0xff]  ;;  %v11912_v1 = vcombine.low %v16611_v21, %v16616_v45  ;;  %v11809_v52 = vcombine.high %v16637_v48, %v16643_v36 }
 0x2e9   :  { %v16624_v19 = vpack.c.bf16 %v4948_v32, %v4940_v8  ;;  %8791 = vmatpush1.bf16.msra.mxu1 %v11832_v35  ;;  %20274 = vst [vmem:[#allocation69_spill] sm:$0xff] %v16630_v61  ;;  %v4861_v44 = vadd.f32 %v4860_v63, %v4748_v18  ;;  %v4752_v39 = vadd.f32 %v4751_v47, %v4639_v23  ;;  %v16671_v8 = vld [vmem:[%s20024_s3 + $0x488] sm:$0xff]  ;;  %v4955_v25 = vmax.f32 %v4859_v2, 0.0 }
 0x2ea   :  { %v4862_v37 = vpop.f32.mrf.mxu1  ;;  %8912 = vmatpush1.bf16.msra.mxu0 %v11928_v38  ;;  %8792 = vmatprep.subr.bf16.mxu1 %v11825_v12  ;;  %v4755_v27 = vpop.f32.mrf.mxu0  ;;  %v4536_v35 = vadd.f32 %v16375_v14, %v16260_v13  ;;  %v11816_v38 = vcombine.low %v16599_v50, %v16604_v11  ;;  %v12033_v14 = vcombine.high %v16648_v3, %v16653_v31  ;;  %v16676_v50 = vld [vmem:[%s20024_s3 + $0x4a8] sm:$0xff] }
 0x2eb   :  { %20273 = vst [vmem:[#allocation68_spill] sm:$0xff] %v16624_v19  ;;  %v4863_v20 = vadd.f32 %v4862_v37, %v4750_v40  ;;  %8604 = vmatprep.mubr.bf16.mxu1 %v16624_v19  ;;  %8913 = vmatprep.subr.bf16.mxu0 %v11921_v6  ;;  %v4647_v11 = vadd.f32 %v16373_v43, %v4534_v53  ;;  %v4956_v32 = vmax.f32 %v4861_v44, 0.0  ;;  %v16683_v45 = vld [vmem:[%s20024_s3 + $0xb88] sm:$0xff] }
 0x2ec   :  { %v4864_v58 = vpop.f32.mrf.mxu1  ;;  %8605 = vmatmul.mubr.bf16.gmra.mxu1 %v16630_v61  ;;  %v4757_v6 = vpop.f32.mrf.mxu0  ;;  %v16688_v62 = vld [vmem:[%s20024_s3 + $0xba8] sm:$0xff]  ;;  %v4756_v43 = vadd.f32 %v4755_v27, %v16360_v7  ;;  %v4544_v7 = vadd.f32 %v16391_v60, %v16256_v22  ;;  %v4546_v2 = vadd.f32 %v16403_v0, %v16260_v13 }
 0x2ed   :  { %v4865_v41 = vadd.f32 %v4864_v58, %v4752_v39  ;;  %8738 = vmatmul.mubr.bf16.gmra.mxu0 %v20218_v24  ;;  %8793 = vmatpush1.bf16.msra.mxu1 %v11824_v16  ;;  %v4963_v12 = vmax.f32 %v4863_v20, 0.0  ;;  %v4758_v63 = vadd.f32 %v4757_v6, %v16371_v26  ;;  %v11808_v26 = vcombine.low %v16637_v48, %v16643_v36  ;;  %v16715_v60 = vld [vmem:[%s20024_s3 + $0x468] sm:$0xff] }
 0x2ee   :  { %v4868_v55 = vpop.f32.mrf.mxu1  ;;  %8747 = vmatprep.mubr.bf16.mxu0 %v20219_v59  ;;  %8914 = vmatpush1.bf16.msra.mxu0 %v11920_v10  ;;  %v4759_v56 = vpop.f32.mrf.mxu0  ;;  %v12032_v16 = vcombine.low %v16648_v3, %v16653_v31  ;;  %v4649_v10 = vadd.f32 %v16377_v4, %v4536_v35  ;;  %v16709_v4 = vld [vmem:[%s20024_s3 + $0x448] sm:$0xff] }
 0x2ef   :  { %v4964_v18 = vmax.f32 %v4865_v41, 0.0  ;;  %8794 = vmatprep.subr.bf16.mxu1 %v11817_v17  ;;  %8915 = vmatprep.subr.bf16.mxu0 %v11913_v33  ;;  %v4760_v40 = vadd.f32 %v4759_v56, %v4647_v11  ;;  %v11801_v17 = vcombine.high %v16671_v8, %v16676_v50  ;;  %v16702_v53 = vpack.c.bf16 %v4963_v12, %v4955_v25  ;;  %v16720_v58 = vld [vmem:[%s20024_s3 + $0xb48] sm:$0xff] }
 0x2f0   :  { %v4870_v21 = vpop.f32.mrf.mxu1  ;;  %v4761_v47 = vpop.f32.mrf.mxu0  ;;  %v12025_v33 = vcombine.high %v16683_v45, %v16688_v62  ;;  %v16725_v36 = vld [vmem:[%s20024_s3 + $0xb68] sm:$0xff]  ;;  %v4869_v3 = vadd.f32 %v4868_v55, %v4756_v43  ;;  %v11800_v41 = vcombine.low %v16671_v8, %v16676_v50  ;;  %v12024_v55 = vcombine.low %v16683_v45, %v16688_v62  ;;  %v20277_v45 = vld [vmem:[#allocation49_spill] sm:$0xff]  ;;  %v20278_v43 = vld [vmem:[#allocation50_spill] sm:$0xff] }
 0x2f1   :  { %v16696_v23 = vpack.c.bf16 %v4964_v18, %v4956_v32  ;;  %8795 = vmatpush1.bf16.msra.mxu1 %v11816_v38  ;;  %20276 = vst [vmem:[#allocation71_spill] sm:$0xff] %v16702_v53  ;;  %v4871_v48 = vadd.f32 %v4870_v21, %v4758_v63  ;;  %v4762_v20 = vadd.f32 %v4761_v47, %v4649_v10  ;;  %v16755_v18 = vld [vmem:[%s20024_s3 + $0xb08] sm:$0xff] }
 0x2f2   :  { %v4872_v37 = vpop.f32.mrf.mxu1  ;;  %8916 = vmatpush1.bf16.msra.mxu0 %v11912_v1  ;;  %8796 = vmatprep.subr.bf16.mxu1 %v11809_v52  ;;  %v4765_v31 = vpop.f32.mrf.mxu0  ;;  %v11793_v6 = vcombine.high %v16709_v4, %v16715_v60  ;;  %v12017_v0 = vcombine.high %v16720_v58, %v16725_v36  ;;  %v16743_v1 = vld [vmem:[%s20024_s3 + $0x408] sm:$0xff]  ;;  %v4971_v21 = vmax.f32 %v4869_v3, 0.0  ;;  %v12016_v25 = vcombine.low %v16720_v58, %v16725_v36 }
 0x2f3   :  { %20275 = vst [vmem:[#allocation70_spill] sm:$0xff] %v16696_v23  ;;  %v4873_v44 = vadd.f32 %v4872_v37, %v4760_v40  ;;  %8614 = vmatprep.mubr.bf16.mxu1 %v16696_v23  ;;  %8917 = vmatprep.subr.bf16.mxu0 %v12033_v14  ;;  %v16748_v52 = vld [vmem:[%s20024_s3 + $0x428] sm:$0xff]  ;;  %v4657_v14 = vadd.f32 %v16401_v5, %v4544_v7  ;;  %v4972_v8 = vmax.f32 %v4871_v48, 0.0 }
 0x2f4   :  { %v4874_v39 = vpop.f32.mrf.mxu1  ;;  %8615 = vmatmul.mubr.bf16.gmra.mxu1 %v16702_v53  ;;  %v4767_v12 = vpop.f32.mrf.mxu0  ;;  %v16760_v63 = vld [vmem:[%s20024_s3 + $0xb28] sm:$0xff]  ;;  %v4766_v5 = vadd.f32 %v4765_v31, %v20277_v45  ;;  %v4659_v56 = vadd.f32 %v20278_v43, %v4546_v2  ;;  %v11785_v40 = vcombine.high %v16743_v1, %v16748_v52  ;;  %v4554_v37 = vadd.f32 %v16419_v9, %v16256_v22 }
 0x2f5   :  { %v4875_v27 = vadd.f32 %v4874_v39, %v4762_v20  ;;  %8748 = vmatmul.mubr.bf16.gmra.mxu0 %v20222_v15  ;;  %8797 = vmatpush1.bf16.msra.mxu1 %v11808_v26  ;;  %v4979_v38 = vmax.f32 %v4873_v44, 0.0  ;;  %v4768_v11 = vadd.f32 %v4767_v12, %v16399_v42  ;;  %v11792_v42 = vcombine.low %v16709_v4, %v16715_v60  ;;  %v16787_v9 = vld [vmem:[%s20024_s3 + $0x7e8] sm:$0xff]  ;;  %v20282_v12 = vld [vmem:[#allocation14_spill] sm:$0xff] }
 0x2f6   :  { %v4878_v35 = vpop.f32.mrf.mxu1  ;;  %8757 = vmatprep.mubr.bf16.mxu0 %v20223_v28  ;;  %8918 = vmatpush2.bf16.msra.mxu0 %v12032_v16  ;;  %v4769_v62 = vpop.f32.mrf.mxu0  ;;  %v12009_v47 = vcombine.high %v16755_v18, %v16760_v63  ;;  %v16792_v39 = vld [vmem:[%s20024_s3 + $0xac8] sm:$0xff]  ;;  %v4556_v3 = vadd.f32 %v16431_v30, %v16260_v13 }
 0x2f7   :  { %v4980_v50 = vmax.f32 %v4875_v27, 0.0  ;;  %8798 = vmatprep.subr.bf16.mxu1 %v11801_v17  ;;  %8919 = vmatprep.subr.bf16.mxu0 %v12025_v33  ;;  %v4770_v16 = vadd.f32 %v4769_v62, %v4657_v14  ;;  %v16774_v17 = vpack.c.bf16 %v4979_v38, %v4971_v21  ;;  %v16781_v33 = vld [vmem:[%s20024_s3 + $0x7c8] sm:$0xff]  ;;  %v4879_v58 = vadd.f32 %v4878_v35, %v4766_v5 }
 0x2f8   :  { %v4880_v32 = vpop.f32.mrf.mxu1  ;;  %v4771_v7 = vpop.f32.mrf.mxu0  ;;  %v16797_v60 = vld [vmem:[%s20024_s3 + $0xae8] sm:$0xff]  ;;  %v12008_v35 = vcombine.low %v16755_v18, %v16760_v63 }
 0x2f9   :  { %v16768_v26 = vpack.c.bf16 %v4980_v50, %v4972_v8  ;;  %8799 = vmatpush1.bf16.msra.mxu1 %v11800_v41  ;;  %20280 = vst [vmem:[#allocation50_spill] sm:$0xff] %v16774_v17  ;;  %v4881_v4 = vadd.f32 %v4880_v32, %v4768_v11  ;;  %v4772_v44 = vadd.f32 %v4771_v7, %v4659_v56  ;;  %v20281_v27 = vld [vmem:[#allocation11_spill] sm:$0xff]  ;;  %v20284_v11 = vld [vmem:[#allocation52_spill] sm:$0xff]  ;;  %v4987_v45 = vmax.f32 %v4879_v58, 0.0  ;;  %v20286_v56 = vld [vmem:[#allocation54_spill] sm:$0xff] }
 0x2fa   :  { %v4882_v10 = vpop.f32.mrf.mxu1  ;;  %8920 = vmatpush2.bf16.msra.mxu0 %v12024_v55  ;;  %8800 = vmatprep.subr.bf16.mxu1 %v11793_v6  ;;  %v4775_v36 = vpop.f32.mrf.mxu0  ;;  %v11784_v41 = vcombine.low %v16743_v1, %v16748_v52  ;;  %v11905_v6 = vcombine.high %v16781_v33, %v16787_v9  ;;  %v12001_v30 = vcombine.high %v16792_v39, %v16797_v60  ;;  %v16820_v1 = vld [vmem:[%s20024_s3 + $0x7a8] sm:$0xff]  ;;  %v20283_v52 = vld [vmem:[#allocation53_spill] sm:$0xff] }
 0x2fb   :  { %20279 = vst [vmem:[#allocation49_spill] sm:$0xff] %v16768_v26  ;;  %v4883_v48 = vadd.f32 %v4882_v10, %v4770_v16  ;;  %8624 = vmatprep.mubr.bf16.mxu1 %v16768_v26  ;;  %8921 = vmatprep.subr.bf16.mxu0 %v12017_v0  ;;  %v16815_v0 = vld [vmem:[%s20024_s3 + $0x788] sm:$0xff]  ;;  %v4667_v14 = vadd.f32 %v20283_v52, %v4554_v37  ;;  %v4988_v8 = vmax.f32 %v4881_v4, 0.0 }
 0x2fc   :  { %v4884_v20 = vpop.f32.mrf.mxu1  ;;  %8625 = vmatmul.mubr.bf16.gmra.mxu1 %v16774_v17  ;;  %v4777_v55 = vpop.f32.mrf.mxu0  ;;  %v16827_v63 = vld [vmem:[%s20024_s3 + $0xa88] sm:$0xff]  ;;  %v12000_v43 = vcombine.low %v16792_v39, %v16797_v60  ;;  %v4669_v16 = vadd.f32 %v20286_v56, %v4556_v3  ;;  %v11897_v7 = vcombine.high %v16815_v0, %v16820_v1 }
 0x2fd   :  { %v4885_v31 = vadd.f32 %v4884_v20, %v4772_v44  ;;  %8758 = vmatmul.mubr.bf16.gmra.mxu0 %v20281_v27  ;;  %8801 = vmatpush1.bf16.msra.mxu1 %v11792_v42  ;;  %v4995_v38 = vmax.f32 %v4883_v48, 0.0  ;;  %v4778_v32 = vadd.f32 %v4777_v55, %v20284_v11  ;;  %v16832_v21 = vld [vmem:[%s20024_s3 + $0xaa8] sm:$0xff] }
 0x2fe   :  { %v4888_v2 = vpop.f32.mrf.mxu1  ;;  %8767 = vmatprep.mubr.bf16.mxu0 %v20282_v12  ;;  %8922 = vmatpush2.bf16.msra.mxu0 %v12016_v25  ;;  %v20285_v5 = vld [vmem:[#allocation51_spill] sm:$0xff]  ;;  %v4779_v42 = vpop.f32.mrf.mxu0  ;;  %v11904_v25 = vcombine.low %v16781_v33, %v16787_v9  ;;  %v11993_v48 = vcombine.high %v16827_v63, %v16832_v21 }
 0x2ff   :  { %v4996_v50 = vmax.f32 %v4885_v31, 0.0  ;;  %8802 = vmatprep.subr.bf16.mxu1 %v11785_v40  ;;  %8923 = vmatprep.subr.bf16.mxu0 %v12009_v47  ;;  %v4776_v62 = vadd.f32 %v4775_v36, %v20285_v5  ;;  %v4780_v40 = vadd.f32 %v4779_v42, %v4667_v14  ;;  %v4564_v47 = vadd.f32 %v16447_v57, %v16256_v22  ;;  %v16853_v44 = vld [vmem:[%s20024_s3 + $0x748] sm:$0xff]  ;;  %v20291_v14 = vld [vmem:[#allocation16_spill] sm:$0xff] }
 0x300   :  { %v4890_v18 = vpop.f32.mrf.mxu1  ;;  %v16846_v4 = vpack.c.bf16 %v4995_v38, %v4987_v45  ;;  %v4781_v33 = vpop.f32.mrf.mxu0  ;;  %v16859_v57 = vld [vmem:[%s20024_s3 + $0x768] sm:$0xff] }
 0x301   :  { %v16840_v10 = vpack.c.bf16 %v4996_v50, %v4988_v8  ;;  %8803 = vmatpush1.bf16.msra.mxu1 %v11784_v41  ;;  %v4891_v20 = vadd.f32 %v4890_v18, %v4778_v32  ;;  %v4782_v39 = vadd.f32 %v4781_v33, %v4669_v16  ;;  %v16864_v58 = vld [vmem:[%s20024_s3 + $0xa48] sm:$0xff]  ;;  %v4889_v3 = vadd.f32 %v4888_v2, %v4776_v62  ;;  %v20289_v41 = vld [vmem:[#allocation58_spill] sm:$0xff] }
 0x302   :  { %v4892_v37 = vpop.f32.mrf.mxu1  ;;  %20288 = vst [vmem:[#allocation52_spill] sm:$0xff] %v16846_v4  ;;  %8924 = vmatpush2.bf16.msra.mxu0 %v12008_v35  ;;  %8804 = vmatprep.subr.bf16.mxu1 %v11905_v6  ;;  %v16869_v36 = vld [vmem:[%s20024_s3 + $0xa68] sm:$0xff]  ;;  %v4785_v31 = vpop.f32.mrf.mxu0  ;;  %v4566_v38 = vadd.f32 %v20289_v41, %v16260_v13  ;;  %v20290_v6 = vld [vmem:[#allocation13_spill] sm:$0xff]  ;;  %v11992_v2 = vcombine.low %v16827_v63, %v16832_v21  ;;  %v20293_v21 = vld [vmem:[#allocation56_spill] sm:$0xff] }
 0x303   :  { %20287 = vst [vmem:[#allocation53_spill] sm:$0xff] %v16840_v10  ;;  %v4893_v9 = vadd.f32 %v4892_v37, %v4780_v40  ;;  %8634 = vmatprep.mubr.bf16.mxu1 %v16840_v10  ;;  %8925 = vmatprep.subr.bf16.mxu0 %v12001_v30  ;;  %v11896_v30 = vcombine.low %v16815_v0, %v16820_v1  ;;  %v16887_v32 = vld [vmem:[%s20024_s3 + $0x708] sm:$0xff]  ;;  %v20292_v1 = vld [vmem:[#allocation57_spill] sm:$0xff]  ;;  %v5004_v45 = vmax.f32 %v4891_v20, 0.0 }
 0x304   :  { %v4894_v60 = vpop.f32.mrf.mxu1  ;;  %8635 = vmatmul.mubr.bf16.gmra.mxu1 %v16846_v4  ;;  %v4787_v8 = vpop.f32.mrf.mxu0  ;;  %v11889_v50 = vcombine.high %v16853_v44, %v16859_v57  ;;  %v11985_v11 = vcombine.high %v16864_v58, %v16869_v36  ;;  %v16892_v0 = vld [vmem:[%s20024_s3 + $0x728] sm:$0xff]  ;;  %v4677_v18 = vadd.f32 %v20292_v1, %v4564_v47  ;;  %v11888_v37 = vcombine.low %v16853_v44, %v16859_v57  ;;  %v20299_v1 = vld [vmem:[#allocation64_spill] sm:$0xff] }
 0x305   :  { %v4895_v55 = vadd.f32 %v4894_v60, %v4782_v39  ;;  %8768 = vmatmul.mubr.bf16.gmra.mxu0 %v20290_v6  ;;  %8805 = vmatpush2.bf16.msra.mxu1 %v11904_v25  ;;  %v5011_v52 = vmax.f32 %v4893_v9, 0.0  ;;  %v4788_v5 = vadd.f32 %v4787_v8, %v20293_v21  ;;  %v16899_v42 = vld [vmem:[%s20024_s3 + $0xa08] sm:$0xff]  ;;  %v11881_v39 = vcombine.high %v16887_v32, %v16892_v0  ;;  %v20297_v60 = vld [vmem:[#allocation61_spill] sm:$0xff]  ;;  %v16944_v8 = vld [vmem:[%s20024_s3 + $0x1f0] sm:$0xff] }
 0x306   :  { %v4898_v35 = vpop.f32.mrf.mxu1  ;;  %8777 = vmatprep.mubr.bf16.mxu0 %v20291_v14  ;;  %8926 = vmatpush2.bf16.msra.mxu0 %v12000_v43  ;;  %v16904_v25 = vld [vmem:[%s20024_s3 + $0xa28] sm:$0xff]  ;;  %v5003_v43 = vmax.f32 %v4889_v3, 0.0  ;;  %v4789_v40 = vpop.f32.mrf.mxu0  ;;  %v4574_v3 = vadd.f32 %v20297_v60, %v16256_v22  ;;  %v16976_v60 = vld [vmem:[%s20024_s3 + $0x190] sm:$0xff] }
 0x307   :  { %v5012_v63 = vmax.f32 %v4895_v55, 0.0  ;;  %8806 = vmatprep.subr.bf16.mxu1 %v11897_v7  ;;  %8927 = vmatprep.subr.bf16.mxu0 %v11993_v48  ;;  %v20294_v56 = vld [vmem:[#allocation55_spill] sm:$0xff]  ;;  %v11984_v7 = vcombine.low %v16864_v58, %v16869_v36  ;;  %v4790_v20 = vadd.f32 %v4789_v40, %v4677_v18  ;;  %v11977_v57 = vcombine.high %v16899_v42, %v16904_v25 }
 0x308   :  { %v4900_v62 = vpop.f32.mrf.mxu1  ;;  %v4786_v16 = vadd.f32 %v4785_v31, %v20294_v56  ;;  %v20295_v47 = vld [vmem:[#allocation59_spill] sm:$0xff]  ;;  %v16918_v31 = vpack.c.bf16 %v5011_v52, %v5003_v43  ;;  %v4791_v44 = vpop.f32.mrf.mxu0  ;;  %v16939_v52 = vld [vmem:[%s20024_s3 + $0x1d0] sm:$0xff]  ;;  %v4576_v18 = vadd.f32 %v20299_v1, %v16260_v13 }
 0x309   :  { %v4679_v33 = vadd.f32 %v20295_v47, %v4566_v38  ;;  %v16912_v48 = vpack.c.bf16 %v5012_v63, %v5004_v45  ;;  %8807 = vmatpush2.bf16.msra.mxu1 %v11896_v30  ;;  %v16925_v58 = vld [vmem:[%s20024_s3 + $0x6c8] sm:$0xff]  ;;  %v4901_v41 = vadd.f32 %v4900_v62, %v4788_v5  ;;  %v5621_v30 = vld [vmem:[%s20025_s4] sm:$0xff]  ;;  %v11976_v5 = vcombine.low %v16899_v42, %v16904_v25 }
 0x30a   :  { %v4902_v9 = vpop.f32.mrf.mxu1  ;;  %20298 = vst [vmem:[#allocation54_spill] sm:$0xff] %v16918_v31  ;;  %8928 = vmatpush2.bf16.msra.mxu0 %v11992_v2  ;;  %8808 = vmatprep.subr.bf16.mxu1 %v11889_v50  ;;  %v16930_v36 = vld [vmem:[%s20024_s3 + $0x6e8] sm:$0xff]  ;;  %v4899_v2 = vadd.f32 %v4898_v35, %v4786_v16  ;;  %v4795_v50 = vpop.f32.mrf.mxu0  ;;  %v20301_v35 = vld [vmem:[#allocation41_spill] sm:$0xff]  ;;  %v20305_v47 = vld [vmem:[#allocation62_spill] sm:$0xff] }
 0x30b   :  { %20296 = vst [vmem:[#allocation51_spill] sm:$0xff] %v16912_v48  ;;  %v4903_v22 = vadd.f32 %v4902_v9, %v4790_v20  ;;  %v4792_v38 = vadd.f32 %v4791_v44, %v4679_v33  ;;  %8644 = vmatprep.mubr.bf16.mxu1 %v16912_v48  ;;  %8929 = vmatprep.subr.bf16.mxu0 %v11985_v11  ;;  %v20300_v21 = vld [vmem:[#allocation15_spill] sm:$0xff] }
 0x30c   :  { %v4904_v55 = vpop.f32.mrf.mxu1  ;;  %8645 = vmatmul.mubr.bf16.gmra.mxu1 %v16918_v31  ;;  %v11880_v11 = vcombine.low %v16887_v32, %v16892_v0  ;;  %v4797_v43 = vpop.f32.mrf.mxu0  ;;  %v20302_v56 = vld [vmem:[#allocation7_spill] sm:$0xff]  ;;  %v11873_v13 = vcombine.high %v16925_v58, %v16930_v36  ;;  %v11715_v32 = vcombine.high %v16939_v52, %v16944_v8  ;;  %v5019_v44 = vmax.f32 %v4899_v2, 0.0 }
 0x30d   :  { %v4905_v45 = vadd.f32 %v4904_v55, %v4792_v38  ;;  %8778 = vmatmul.mubr.bf16.gmra.mxu0 %v20300_v21  ;;  %8809 = vmatpush2.bf16.msra.mxu1 %v11888_v37  ;;  %v5027_v62 = vmax.f32 %v4903_v22, 0.0  ;;  %v20303_v16 = vsub.s32 0, %v20302_v56  ;;  %v16966_v0 = vld [vmem:[%s20024_s3 + $0x688] sm:$0xff]  ;;  %v5020_v37 = vmax.f32 %v4901_v41, 0.0  ;;  %v20306_v41 = vld [vmem:[#allocation60_spill] sm:$0xff]  ;;  %v20307_v55 = vld [vmem:[#allocation65_spill] sm:$0xff] }
 0x30e   :  { %v4908_v63 = vpop.f32.mrf.mxu1  ;;  %8930 = vmatpush2.bf16.msra.mxu0 %v11984_v7  ;;  %8933 = vmatprep.mubr.bf16.mxu0 %v20301_v35  ;;  %v20304_v42 = vld [vmem:[#allocation63_spill] sm:$0xff]  ;;  %v4798_v33 = vadd.f32 %v4797_v43, %v20305_v47  ;;  %v4796_v22 = vadd.f32 %v4795_v50, %v20306_v41  ;;  %v4799_v38 = vpop.f32.mrf.mxu0  ;;  %v4689_v1 = vadd.f32 %v20307_v55, %v4576_v18 }
 0x30f   :  { %v16957_v40 = vrot.slane %v5621_v30, %v20303_v16  ;;  %v4687_v25 = vadd.f32 %v20304_v42, %v4574_v3  ;;  %v5028_v7 = vmax.f32 %v4905_v45, 0.0  ;;  %8810 = vmatprep.subr.bf16.mxu1 %v11881_v39  ;;  %8931 = vmatprep.subr.bf16.mxu0 %v11977_v57  ;;  %v5322_v9 = vld [vmem:[%s20024_s3 + $0x6a8] sm:$0xff]  ;;  %v16981_v3 = vld [vmem:[%s20024_s3 + $0x1b0] sm:$0xff]  ;;  %v11872_v39 = vcombine.low %v16925_v58, %v16930_v36 }
 0x310   :  { %v4910_v20 = vpop.f32.mrf.mxu1  ;;  %v11714_v57 = vcombine.low %v16939_v52, %v16944_v8  ;;  %v20309_v42 = vsub.s32 1, %v20302_v56  ;;  %v16995_v2 = vpack.c.bf16 %v5027_v62, %v5019_v44  ;;  %v4801_v50 = vpop.f32.mrf.mxu0  ;;  %v11865_v58 = vcombine.high %v16966_v0, %v5322_v9  ;;  %v17003_v52 = vld [vmem:[%s20024_s3 + $0x648] sm:$0xff]  ;;  %v17012_v62 = vld [vmem:[%s20024_s3 + $0x150] sm:$0xff] }
 0x311   :  { %v16989_v45 = vpack.c.bf16 %v5028_v7, %v5020_v37  ;;  %v4800_v43 = vadd.f32 %v4799_v38, %v4687_v25  ;;  %8811 = vmatpush2.bf16.msra.mxu1 %v11880_v11  ;;  %v11707_v36 = vcombine.high %v16976_v60, %v16981_v3  ;;  %v4911_v8 = vadd.f32 %v4910_v20, %v4798_v33  ;;  %v20311_v20 = vld [vmem:[#allocation40_spill] sm:$0xff]  ;;  %v20312_v38 = vld [vmem:[#allocation43_spill] sm:$0xff] }
 0x312   :  { %v4912_v16 = vpop.f32.mrf.mxu1  ;;  %v16993_v47 = vrot.slane %v5621_v30, %v20309_v42  ;;  %20310 = vst [vmem:[#allocation57_spill] sm:$0xff] %v16995_v2  ;;  %8932 = vmatpush2.bf16.msra.mxu0 %v11976_v5  ;;  %8812 = vmatprep.subr.bf16.mxu1 %v11873_v13  ;;  %v4802_v18 = vadd.f32 %v4801_v50, %v4689_v1  ;;  %v5314_v5 = vld [vmem:[%s20024_s3 + $0x668] sm:$0xff]  ;;  %v17017_v13 = vld [vmem:[%s20024_s3 + $0x170] sm:$0xff]  ;;  %v8257_v37 = vpop.f32.mrf.mxu0 }
 0x313   :  { %20308 = vst [vmem:[#allocation58_spill] sm:$0xff] %v16989_v45  ;;  %v4913_v11 = vadd.f32 %v4912_v16, %v4800_v43  ;;  %8654 = vmatprep.mubr.bf16.mxu1 %v16989_v45  ;;  %9127 = vmatprep.subr.bf16.mxu0 %v11715_v32  ;;  %v4909_v25 = vadd.f32 %v4908_v63, %v4796_v22  ;;  %v5036_v43 = vmax.f32 %v4911_v8, 0.0  ;;  %v5546_v56 = vld [vmem:[%s20024_s3 + $0xda8] sm:$0xff] }
 0x314   :  { %v4914_v30 = vpop.f32.mrf.mxu1  ;;  %8655 = vmatmul.mubr.bf16.gmra.mxu1 %v16995_v2  ;;  %v8258_v32 = vadd.f32 %v8257_v37, %v16957_v40  ;;  %v11864_v44 = vcombine.low %v16966_v0, %v5322_v9  ;;  %v8259_v55 = vpop.f32.mrf.mxu0  ;;  %v11706_v63 = vcombine.low %v16976_v60, %v16981_v3  ;;  %v11857_v22 = vcombine.high %v17003_v52, %v5314_v5  ;;  %v5302_v60 = vld [vmem:[%s20024_s3 + $0x608] sm:$0xff] }
 0x315   :  { %v4915_v7 = vadd.f32 %v4914_v30, %v4802_v18  ;;  %8934 = vmatmul.mubr.bf16.vlgmr.msra.gmra.mxu0 %v20311_v20  ;;  %8813 = vmatpush2.bf16.msra.mxu1 %v11872_v39  ;;  %v5043_v41 = vmax.f32 %v4913_v11, 0.0  ;;  %v11699_v1 = vcombine.high %v17012_v62, %v17017_v13  ;;  %v8260_v39 = vadd.f32 %v8259_v55, %v16993_v47  ;;  %v5306_v3 = vld [vmem:[%s20024_s3 + $0x628] sm:$0xff]  ;;  %v5147_v30 = vld [vmem:[%s20024_s3 + $0x130] sm:$0xff] }
 0x316   :  { %v8370_v33 = vpop.f32.mrf.mxu1  ;;  %8943 = vmatprep.mubr.bf16.mxu0 %v20312_v38  ;;  %9128 = vmatpush1.bf16.msra.mxu0 %v11714_v57  ;;  %v5035_v9 = vmax.f32 %v4909_v25, 0.0  ;;  %v8261_v57 = vpop.f32.mrf.mxu0  ;;  %v5526_v2 = vld [vmem:[%s20024_s3 + $0xd08] sm:$0xff] }
 0x317   :  { %v5044_v16 = vmax.f32 %v4915_v7, 0.0  ;;  %v17029_v42 = vadd.f32 %v8370_v33, %v8258_v32  ;;  %8814 = vmatprep.subr.bf16.mxu1 %v11865_v58  ;;  %9129 = vmatprep.subr.bf16.mxu0 %v11707_v36  ;;  %v8262_v11 = vadd.f32 %v8261_v57, %v16957_v40  ;;  %v11856_v58 = vcombine.low %v17003_v52, %v5314_v5  ;;  %v5143_v36 = vld [vmem:[%s20024_s3 + $0x110] sm:$0xff]  ;;  %v5550_v33 = vld [vmem:[%s20024_s3 + $0xdc8] sm:$0xff] }
 0x318   :  { %v8372_v0 = vpop.f32.mrf.mxu1  ;;  %v17050_v25 = vpack.c.bf16 %v5043_v41, %v5035_v9  ;;  %v17052_v37 = vpop.f32.mrf.mxu0  ;;  %v11698_v52 = vcombine.low %v17012_v62, %v17017_v13  ;;  %v11849_v5 = vcombine.high %v5302_v60, %v5306_v3  ;;  %v11691_v55 = vcombine.high %v5143_v36, %v5147_v30  ;;  %v5135_v13 = vld [vmem:[%s20024_s3 + $0xd0] sm:$0xff]  ;;  %v5510_v14 = vld [vmem:[%s20024_s3 + $0xc88] sm:$0xff] }
 0x319   :  { %v17038_v50 = vpack.c.bf16 %v5044_v16, %v5036_v43  ;;  %v17040_v8 = vadd.f32 %v8372_v0, %v8260_v39  ;;  %8815 = vmatpush2.bf16.msra.mxu1 %v11864_v44  ;;  %v5554_v44 = vld [vmem:[%s20024_s3 + $0xde8] sm:$0xff]  ;;  %v20315_v43 = vld [vmem:[#allocation42_spill] sm:$0xff]  ;;  %v11848_v62 = vcombine.low %v5302_v60, %v5306_v3  ;;  %v20317_v39 = vld [vmem:[#allocation45_spill] sm:$0xff]  ;;  %v11690_v3 = vcombine.low %v5143_v36, %v5147_v30 }
 0x31a   :  { %v8374_v18 = vpop.f32.mrf.mxu1  ;;  %20314 = vst [vmem:[#allocation55_spill] sm:$0xff] %v17050_v25  ;;  %9130 = vmatpush1.bf16.msra.mxu0 %v11706_v63  ;;  %8816 = vmatprep.subr.bf16.mxu1 %v11857_v22  ;;  %v8267_v41 = vpop.f32.mrf.mxu0  ;;  %v20316_v16 = vld [vmem:[#allocation18_spill] sm:$0xff]  ;;  %v12097_v9 = vcombine.high %v5550_v33, %v5554_v44  ;;  %v5127_v36 = vld [vmem:[%s20024_s3 + $0x90] sm:$0xff]  ;;  %v5494_v10 = vld [vmem:[%s20024_s3 + $0xc08] sm:$0xff] }
 0x31b   :  { %20313 = vst [vmem:[#allocation56_spill] sm:$0xff] %v17038_v50  ;;  %v17054_v7 = vadd.f32 %v8374_v18, %v8262_v11  ;;  %8664 = vmatprep.mubr.bf16.mxu1 %v17038_v50  ;;  %9131 = vmatprep.subr.bf16.mxu0 %v11699_v1  ;;  %v8268_v63 = vadd.f32 %v8267_v41, %v16957_v40  ;;  %v5139_v1 = vld [vmem:[%s20024_s3 + $0xf0] sm:$0xff]  ;;  %v5542_v41 = vld [vmem:[%s20024_s3 + $0xd88] sm:$0xff] }
 0x31c   :  { %v17056_v32 = vpop.f32.mrf.mxu1  ;;  %8665 = vmatmul.mubr.bf16.gmra.mxu1 %v17050_v25  ;;  %v8269_v0 = vpop.f32.mrf.mxu0  ;;  %v5131_v30 = vld [vmem:[%s20024_s3 + $0xb0] sm:$0xff] }
 0x31d   :  { %8944 = vmatmul.mubr.bf16.gmra.mxu0 %v20315_v43  ;;  %8817 = vmatpush2.bf16.msra.mxu1 %v11856_v58  ;;  %v8270_v11 = vadd.f32 %v8269_v0, %v16993_v47  ;;  %v11683_v58 = vcombine.high %v5135_v13, %v5139_v1  ;;  %v11675_v43 = vcombine.high %v5127_v36, %v5131_v30 }
 0x31e   :  { %v8380_v22 = vpop.f32.mrf.mxu1  ;;  %8820 = vmatprep.mubr.bf16.mxu1 %v20316_v16  ;;  %8953 = vmatprep.mubr.bf16.mxu0 %v20317_v39  ;;  %v8271_v18 = vpop.f32.mrf.mxu0  ;;  %v5534_v16 = vld [vmem:[%s20024_s3 + $0xd48] sm:$0xff]  ;;  %v11674_v25 = vcombine.low %v5127_v36, %v5131_v30 }
 0x31f   :  { %v17078_v57 = vadd.f32 %v8380_v22, %v8268_v63  ;;  %9132 = vmatpush1.bf16.msra.mxu0 %v11698_v52  ;;  %8818 = vmatprep.subr.bf16.mxu1 %v11849_v5  ;;  %v8272_v52 = vadd.f32 %v8271_v18, %v16957_v40  ;;  %v20318_v18 = vld [vmem:[#allocation17_spill] sm:$0xff] }
 0x320   :  { %v8382_v60 = vpop.f32.mrf.mxu1  ;;  %9133 = vmatprep.subr.bf16.mxu0 %v11691_v55  ;;  %v17096_v5 = vpop.f32.mrf.mxu0  ;;  %v12096_v55 = vcombine.low %v5550_v33, %v5554_v44  ;;  %v5538_v33 = vld [vmem:[%s20024_s3 + $0xd68] sm:$0xff] }
 0x321   :  { %v17087_v39 = vadd.f32 %v8382_v60, %v8270_v11  ;;  %8819 = vmatpush2.bf16.msra.mxu1 %v11848_v62  ;;  %v11682_v11 = vcombine.low %v5135_v13, %v5139_v1  ;;  %v12089_v60 = vcombine.high %v5542_v41, %v5546_v56  ;;  %v20320_v13 = vld [vmem:[#allocation20_spill] sm:$0xff]  ;;  %v12081_v38 = vcombine.high %v5534_v16, %v5538_v33 }
 0x322   :  { %v8384_v63 = vpop.f32.mrf.mxu1  ;;  %9014 = vmatprep.subr.bf16.mxu1 %v12097_v9  ;;  %v8277_v62 = vpop.f32.mrf.mxu0  ;;  %v5119_v1 = vld [vmem:[%s20024_s3 + $0x50] sm:$0xff] }
 0x323   :  { %v17098_v22 = vadd.f32 %v8384_v63, %v8272_v52  ;;  %9134 = vmatpush1.bf16.msra.mxu0 %v11690_v3  ;;  %v8278_v44 = vadd.f32 %v8277_v62, %v16957_v40  ;;  %v20319_v3 = vld [vmem:[#allocation44_spill] sm:$0xff]  ;;  %v20321_v52 = vld [vmem:[#allocation47_spill] sm:$0xff] }
 0x324   :  { %v17100_v0 = vpop.f32.mrf.mxu1  ;;  %8821 = vmatmul.mubr.bf16.vlgmr.msra.gmra.mxu1 %v20318_v18  ;;  %9135 = vmatprep.subr.bf16.mxu0 %v11683_v58  ;;  %v5123_v58 = vld [vmem:[%s20024_s3 + $0x70] sm:$0xff]  ;;  %v8279_v63 = vpop.f32.mrf.mxu0  ;;  %v12088_v18 = vcombine.low %v5542_v41, %v5546_v56  ;;  %v5530_v56 = vld [vmem:[%s20024_s3 + $0xd28] sm:$0xff] }
 0x325   :  { %8954 = vmatmul.mubr.bf16.gmra.mxu0 %v20319_v3  ;;  %8830 = vmatprep.mubr.bf16.mxu1 %v20320_v13  ;;  %v8280_v3 = vadd.f32 %v8279_v63, %v16993_v47  ;;  %v11667_v50 = vcombine.high %v5119_v1, %v5123_v58  ;;  %v20322_v63 = vld [vmem:[#allocation19_spill] sm:$0xff] }
 0x326   :  { %v8390_v9 = vpop.f32.mrf.mxu1  ;;  %8963 = vmatprep.mubr.bf16.mxu0 %v20321_v52  ;;  %9015 = vmatpush1.bf16.msra.mxu1 %v12096_v55  ;;  %v8281_v20 = vpop.f32.mrf.mxu0  ;;  %v5111_v55 = vld [vmem:[%s20024_s3 + $0x10] sm:$0xff] }
 0x327   :  { %v17119_v62 = vadd.f32 %v8390_v9, %v8278_v44  ;;  %9136 = vmatpush1.bf16.msra.mxu0 %v11682_v11  ;;  %9016 = vmatprep.subr.bf16.mxu1 %v12089_v60  ;;  %v8282_v36 = vadd.f32 %v8281_v20, %v16957_v40  ;;  %v12080_v60 = vcombine.low %v5534_v16, %v5538_v33  ;;  %v5522_v16 = vld [vmem:[%s20024_s3 + $0xce8] sm:$0xff] }
 0x328   :  { %v8392_v13 = vpop.f32.mrf.mxu1  ;;  %9137 = vmatprep.subr.bf16.mxu0 %v11675_v43  ;;  %v5115_v43 = vld [vmem:[%s20024_s3 + $0x30] sm:$0xff]  ;;  %v17137_v11 = vpop.f32.mrf.mxu0  ;;  %v11666_v20 = vcombine.low %v5119_v1, %v5123_v58  ;;  %v20325_v58 = vld [vmem:[#allocation34_spill] sm:$0xff] }
 0x329   :  { %v17128_v41 = vadd.f32 %v8392_v13, %v8280_v3  ;;  %v12073_v3 = vcombine.high %v5526_v2, %v5530_v56  ;;  %v11659_v52 = vcombine.high %v5111_v55, %v5115_v43  ;;  %v5235_v1 = vld [vmem:[%s20024_s3 + $0x3f0] sm:$0xff]  ;;  %v11658_v35 = vcombine.low %v5111_v55, %v5115_v43 }
 0x32a   :  { %v8394_v30 = vpop.f32.mrf.mxu1  ;;  %9017 = vmatpush1.bf16.msra.mxu1 %v12088_v18  ;;  %v5518_v18 = vld [vmem:[%s20024_s3 + $0xcc8] sm:$0xff] }
 0x32b   :  { %v17139_v44 = vadd.f32 %v8394_v30, %v8282_v36  ;;  %9138 = vmatpush1.bf16.msra.mxu0 %v11674_v25  ;;  %9018 = vmatprep.subr.bf16.mxu1 %v12081_v38  ;;  %v8287_v13 = vpop.f32.mrf.mxu0  ;;  %v20323_v36 = vld [vmem:[#allocation46_spill] sm:$0xff]  ;;  %v12065_v45 = vcombine.high %v5518_v18, %v5522_v16 }
 0x32c   :  { %v17141_v9 = vpop.f32.mrf.mxu1  ;;  %8831 = vmatmul.mubr.bf16.gmra.mxu1 %v20322_v63  ;;  %9139 = vmatprep.subr.bf16.mxu0 %v11667_v50  ;;  %v8288_v25 = vadd.f32 %v8287_v13, %v16957_v40  ;;  %v20324_v38 = vld [vmem:[#allocation22_spill] sm:$0xff]  ;;  %v5231_v50 = vld [vmem:[%s20024_s3 + $0x3d0] sm:$0xff]  ;;  %v12072_v63 = vcombine.low %v5526_v2, %v5530_v56  ;;  %v5514_v2 = vld [vmem:[%s20024_s3 + $0xca8] sm:$0xff] }
 0x32d   :  { %8964 = vmatmul.mubr.bf16.gmra.mxu0 %v20323_v36  ;;  %8840 = vmatprep.mubr.bf16.mxu1 %v20324_v38  ;;  %v8289_v30 = vpop.f32.mrf.mxu0  ;;  %v11779_v31 = vcombine.high %v5231_v50, %v5235_v1 }
 0x32e   :  { %v8400_v33 = vpop.f32.mrf.mxu1  ;;  %8973 = vmatprep.mubr.bf16.mxu0 %v20325_v58  ;;  %9019 = vmatpush1.bf16.msra.mxu1 %v12080_v60  ;;  %v8290_v36 = vadd.f32 %v8289_v30, %v16993_v47  ;;  %v5223_v60 = vld [vmem:[%s20024_s3 + $0x390] sm:$0xff]  ;;  %v20326_v30 = vld [vmem:[#allocation21_spill] sm:$0xff] }
 0x32f   :  { %v17160_v13 = vadd.f32 %v8400_v33, %v8288_v25  ;;  %9140 = vmatpush1.bf16.msra.mxu0 %v11666_v20  ;;  %9020 = vmatprep.subr.bf16.mxu1 %v12073_v3  ;;  %v8291_v21 = vpop.f32.mrf.mxu0  ;;  %v12064_v3 = vcombine.low %v5518_v18, %v5522_v16  ;;  %v5506_v18 = vld [vmem:[%s20024_s3 + $0xc68] sm:$0xff] }
 0x330   :  { %v8402_v38 = vpop.f32.mrf.mxu1  ;;  %9141 = vmatprep.subr.bf16.mxu0 %v11659_v52  ;;  %v8292_v55 = vadd.f32 %v8291_v21, %v16957_v40  ;;  %v5227_v52 = vld [vmem:[%s20024_s3 + $0x3b0] sm:$0xff]  ;;  %v11778_v21 = vcombine.low %v5231_v50, %v5235_v1 }
 0x331   :  { %v17169_v56 = vadd.f32 %v8402_v38, %v8290_v36  ;;  %v17178_v20 = vpop.f32.mrf.mxu0  ;;  %v12057_v36 = vcombine.high %v5510_v14, %v5514_v2  ;;  %v11771_v58 = vcombine.high %v5223_v60, %v5227_v52  ;;  %v5219_v50 = vld [vmem:[%s20024_s3 + $0x370] sm:$0xff]  ;;  %v11770_v48 = vcombine.low %v5223_v60, %v5227_v52 }
 0x332   :  { %v8404_v43 = vpop.f32.mrf.mxu1  ;;  %9021 = vmatpush1.bf16.msra.mxu1 %v12072_v63  ;;  %v5502_v63 = vld [vmem:[%s20024_s3 + $0xc48] sm:$0xff]  ;;  %v20329_v1 = vld [vmem:[#allocation36_spill] sm:$0xff] }
 0x333   :  { %v17180_v25 = vadd.f32 %v8404_v43, %v8292_v55  ;;  %9142 = vmatpush1.bf16.msra.mxu0 %v11658_v35  ;;  %9022 = vmatprep.subr.bf16.mxu1 %v12065_v45  ;;  %v8297_v38 = vpop.f32.mrf.mxu0  ;;  %v20327_v55 = vld [vmem:[#allocation33_spill] sm:$0xff]  ;;  %v20328_v45 = vld [vmem:[#allocation24_spill] sm:$0xff]  ;;  %v12049_v6 = vcombine.high %v5502_v63, %v5506_v18 }
 0x334   :  { %v17182_v33 = vpop.f32.mrf.mxu1  ;;  %8841 = vmatmul.mubr.bf16.gmra.mxu1 %v20326_v30  ;;  %9143 = vmatprep.subr.bf16.mxu0 %v11779_v31  ;;  %v8298_v35 = vadd.f32 %v8297_v38, %v16957_v40  ;;  %v5215_v31 = vld [vmem:[%s20024_s3 + $0x350] sm:$0xff]  ;;  %v12056_v30 = vcombine.low %v5510_v14, %v5514_v2  ;;  %v5498_v14 = vld [vmem:[%s20024_s3 + $0xc28] sm:$0xff] }
 0x335   :  { %8974 = vmatmul.mubr.bf16.gmra.mxu0 %v20327_v55  ;;  %8850 = vmatprep.mubr.bf16.mxu1 %v20328_v45  ;;  %v8299_v43 = vpop.f32.mrf.mxu0  ;;  %v11763_v12 = vcombine.high %v5215_v31, %v5219_v50 }
 0x336   :  { %v8410_v16 = vpop.f32.mrf.mxu1  ;;  %8983 = vmatprep.mubr.bf16.mxu0 %v20329_v1  ;;  %9023 = vmatpush1.bf16.msra.mxu1 %v12064_v3  ;;  %v8300_v55 = vadd.f32 %v8299_v43, %v16993_v47  ;;  %v5207_v3 = vld [vmem:[%s20024_s3 + $0x310] sm:$0xff]  ;;  %v20333_v43 = vld [vmem:[#allocation23_spill] sm:$0xff] }
 0x337   :  { %v17201_v38 = vadd.f32 %v8410_v16, %v8298_v35  ;;  %9144 = vmatpush2.bf16.msra.mxu0 %v11778_v21  ;;  %9024 = vmatprep.subr.bf16.mxu1 %v12057_v36  ;;  %v8301_v4 = vpop.f32.mrf.mxu0  ;;  %v12048_v36 = vcombine.low %v5502_v63, %v5506_v18  ;;  %v5618_v63 = vld [vmem:[%s20024_s3 + $0xfe8] sm:$0xff] }
 0x338   :  { %v8412_v45 = vpop.f32.mrf.mxu1  ;;  %9145 = vmatprep.subr.bf16.mxu0 %v11771_v58  ;;  %v8302_v60 = vadd.f32 %v8301_v4, %v16957_v40  ;;  %v5211_v58 = vld [vmem:[%s20024_s3 + $0x330] sm:$0xff]  ;;  %v11762_v4 = vcombine.low %v5215_v31, %v5219_v50  ;;  %v20336_v50 = vld [vmem:[#allocation38_spill] sm:$0xff] }
 0x339   :  { %v17210_v2 = vadd.f32 %v8412_v45, %v8300_v55  ;;  %v17219_v21 = vpop.f32.mrf.mxu0  ;;  %v12041_v55 = vcombine.high %v5494_v10, %v5498_v14  ;;  %v11755_v1 = vcombine.high %v5207_v3, %v5211_v58  ;;  %v5203_v31 = vld [vmem:[%s20024_s3 + $0x2f0] sm:$0xff]  ;;  %v11754_v27 = vcombine.low %v5207_v3, %v5211_v58 }
 0x33a   :  { %v8414_v52 = vpop.f32.mrf.mxu1  ;;  %9025 = vmatpush1.bf16.msra.mxu1 %v12056_v30  ;;  %v5614_v30 = vld [vmem:[%s20024_s3 + $0xfc8] sm:$0xff] }
 0x33b   :  { %20330 = vst [vmem:[#allocation59_spill] sm:$0xff] %v17210_v2  ;;  %v17221_v35 = vadd.f32 %v8414_v52, %v8302_v60  ;;  %9146 = vmatpush2.bf16.msra.mxu0 %v11770_v48  ;;  %9026 = vmatprep.subr.bf16.mxu1 %v12049_v6  ;;  %v8307_v45 = vpop.f32.mrf.mxu0  ;;  %v20334_v60 = vld [vmem:[#allocation35_spill] sm:$0xff]  ;;  %v20335_v6 = vld [vmem:[#allocation26_spill] sm:$0xff]  ;;  %v12161_v17 = vcombine.high %v5614_v30, %v5618_v63 }
 0x33c   :  { %v17223_v16 = vpop.f32.mrf.mxu1  ;;  %8851 = vmatmul.mubr.bf16.gmra.mxu1 %v20333_v43  ;;  %9147 = vmatprep.subr.bf16.mxu0 %v11763_v12  ;;  %v8308_v48 = vadd.f32 %v8307_v45, %v16957_v40  ;;  %v5199_v12 = vld [vmem:[%s20024_s3 + $0x2d0] sm:$0xff]  ;;  %v12040_v43 = vcombine.low %v5494_v10, %v5498_v14  ;;  %v5606_v2 = vld [vmem:[%s20024_s3 + $0xf88] sm:$0xff] }
 0x33d   :  { %20331 = vst [vmem:[#allocation61_spill] sm:$0xff] %v17221_v35  ;;  %20332 = vst [vmem:[#allocation64_spill] sm:$0xff] %v17223_v16  ;;  %8984 = vmatmul.mubr.bf16.gmra.mxu0 %v20334_v60  ;;  %8860 = vmatprep.mubr.bf16.mxu1 %v20335_v6  ;;  %v8309_v52 = vpop.f32.mrf.mxu0  ;;  %v11747_v16 = vcombine.high %v5199_v12, %v5203_v31  ;;  %v5610_v10 = vld [vmem:[%s20024_s3 + $0xfa8] sm:$0xff] }
 0x33e   :  { %v8420_v18 = vpop.f32.mrf.mxu1  ;;  %8993 = vmatprep.mubr.bf16.mxu0 %v20336_v50  ;;  %9027 = vmatpush1.bf16.msra.mxu1 %v12048_v36  ;;  %v8310_v60 = vadd.f32 %v8309_v52, %v16993_v47  ;;  %v5191_v36 = vld [vmem:[%s20024_s3 + $0x290] sm:$0xff]  ;;  %v20342_v52 = vld [vmem:[#allocation25_spill] sm:$0xff] }
 0x33f   :  { %v17242_v45 = vadd.f32 %v8420_v18, %v8308_v48  ;;  %9148 = vmatpush2.bf16.msra.mxu0 %v11762_v4  ;;  %9028 = vmatprep.subr.bf16.mxu1 %v12041_v55  ;;  %v8311_v35 = vpop.f32.mrf.mxu0  ;;  %v12160_v55 = vcombine.low %v5614_v30, %v5618_v63  ;;  %v5602_v30 = vld [vmem:[%s20024_s3 + $0xf68] sm:$0xff] }
 0x340   :  { %v8422_v6 = vpop.f32.mrf.mxu1  ;;  %9149 = vmatprep.subr.bf16.mxu0 %v11755_v1  ;;  %v8312_v3 = vadd.f32 %v8311_v35, %v16957_v40  ;;  %v5195_v1 = vld [vmem:[%s20024_s3 + $0x2b0] sm:$0xff]  ;;  %v11746_v35 = vcombine.low %v5199_v12, %v5203_v31 }
 0x341   :  { %20337 = vst [vmem:[#allocation63_spill] sm:$0xff] %v17242_v45  ;;  %v17251_v14 = vadd.f32 %v8422_v6, %v8310_v60  ;;  %v17260_v4 = vpop.f32.mrf.mxu0  ;;  %v12153_v60 = vcombine.high %v5606_v2, %v5610_v10  ;;  %v11739_v50 = vcombine.high %v5191_v36, %v5195_v1  ;;  %v5187_v12 = vld [vmem:[%s20024_s3 + $0x270] sm:$0xff] }
 0x342   :  { %v8424_v58 = vpop.f32.mrf.mxu1  ;;  %9029 = vmatpush1.bf16.msra.mxu1 %v12040_v43  ;;  %20339 = vst [vmem:[#allocation60_spill] sm:$0xff] %v17260_v4  ;;  %v5598_v43 = vld [vmem:[%s20024_s3 + $0xf48] sm:$0xff]  ;;  %v20345_v31 = vld [vmem:[#allocation48_spill] sm:$0xff] }
 0x343   :  { %20338 = vst [vmem:[#allocation62_spill] sm:$0xff] %v17251_v14  ;;  %v17262_v48 = vadd.f32 %v8424_v58, %v8312_v3  ;;  %9150 = vmatpush2.bf16.msra.mxu0 %v11754_v27  ;;  %9030 = vmatprep.subr.bf16.mxu1 %v12161_v17  ;;  %v8317_v6 = vpop.f32.mrf.mxu0  ;;  %v20343_v3 = vld [vmem:[#allocation37_spill] sm:$0xff]  ;;  %v20344_v17 = vld [vmem:[#allocation28_spill] sm:$0xff]  ;;  %v5590_v4 = vld [vmem:[%s20024_s3 + $0xf08] sm:$0xff] }
 0x344   :  { %v17264_v18 = vpop.f32.mrf.mxu1  ;;  %8861 = vmatmul.mubr.bf16.gmra.mxu1 %v20342_v52  ;;  %9151 = vmatprep.subr.bf16.mxu0 %v11747_v16  ;;  %v8318_v27 = vadd.f32 %v8317_v6, %v16957_v40  ;;  %v5183_v16 = vld [vmem:[%s20024_s3 + $0x250] sm:$0xff]  ;;  %v12152_v52 = vcombine.low %v5606_v2, %v5610_v10  ;;  %v5594_v2 = vld [vmem:[%s20024_s3 + $0xf28] sm:$0xff] }
 0x345   :  { %20340 = vst [vmem:[#allocation65_spill] sm:$0xff] %v17262_v48  ;;  %20341 = vst [vmem:[#allocation72_spill] sm:$0xff] %v17264_v18  ;;  %8994 = vmatmul.mubr.bf16.gmra.mxu0 %v20343_v3  ;;  %8870 = vmatprep.mubr.bf16.mxu1 %v20344_v17  ;;  %v8319_v58 = vpop.f32.mrf.mxu0  ;;  %v11738_v48 = vcombine.low %v5191_v36, %v5195_v1  ;;  %v12145_v18 = vcombine.high %v5598_v43, %v5602_v30 }
 0x346   :  { %v8430_v63 = vpop.f32.mrf.mxu1  ;;  %9003 = vmatprep.mubr.bf16.mxu0 %v20345_v31  ;;  %9031 = vmatpush2.bf16.msra.mxu1 %v12160_v55  ;;  %v8320_v3 = vadd.f32 %v8319_v58, %v16993_v47  ;;  %v11731_v45 = vcombine.high %v5183_v16, %v5187_v12  ;;  %v5175_v55 = vld [vmem:[%s20024_s3 + $0x210] sm:$0xff]  ;;  %v20351_v58 = vld [vmem:[#allocation27_spill] sm:$0xff] }
 0x347   :  { %v17283_v6 = vadd.f32 %v8430_v63, %v8318_v27  ;;  %9152 = vmatpush2.bf16.msra.mxu0 %v11746_v35  ;;  %9032 = vmatprep.subr.bf16.mxu1 %v12153_v60  ;;  %v8321_v14 = vpop.f32.mrf.mxu0  ;;  %v12144_v60 = vcombine.low %v5598_v43, %v5602_v30  ;;  %v5586_v43 = vld [vmem:[%s20024_s3 + $0xee8] sm:$0xff] }
 0x348   :  { %v8432_v17 = vpop.f32.mrf.mxu1  ;;  %9153 = vmatprep.subr.bf16.mxu0 %v11739_v50  ;;  %v8322_v36 = vadd.f32 %v8321_v14, %v16957_v40  ;;  %v5179_v50 = vld [vmem:[%s20024_s3 + $0x230] sm:$0xff]  ;;  %v11730_v14 = vcombine.low %v5183_v16, %v5187_v12  ;;  %v20354_v12 = vld [vmem:[#allocation3_spill] sm:$0xff] }
 0x349   :  { %20346 = vst [vmem:[#allocation73_spill] sm:$0xff] %v17283_v6  ;;  %v17292_v10 = vadd.f32 %v8432_v17, %v8320_v3  ;;  %v17301_v35 = vpop.f32.mrf.mxu0  ;;  %v12137_v3 = vcombine.high %v5590_v4, %v5594_v2  ;;  %v11723_v31 = vcombine.high %v5175_v55, %v5179_v50  ;;  %v5427_v16 = vld [vmem:[%s20024_s3 + $0x9f0] sm:$0xff] }
 0x34a   :  { %v8434_v1 = vpop.f32.mrf.mxu1  ;;  %9033 = vmatpush2.bf16.msra.mxu1 %v12152_v52  ;;  %20348 = vst [vmem:[#allocation75_spill] sm:$0xff] %v17301_v35  ;;  %v5582_v52 = vld [vmem:[%s20024_s3 + $0xec8] sm:$0xff] }
 0x34b   :  { %20347 = vst [vmem:[#allocation74_spill] sm:$0xff] %v17292_v10  ;;  %v17303_v27 = vadd.f32 %v8434_v1, %v8322_v36  ;;  %9154 = vmatpush2.bf16.msra.mxu0 %v11738_v48  ;;  %9034 = vmatprep.subr.bf16.mxu1 %v12145_v18  ;;  %v20352_v36 = vld [vmem:[#allocation39_spill] sm:$0xff]  ;;  %v20353_v18 = vld [vmem:[#allocation30_spill] sm:$0xff] }
 0x34c   :  { %v17305_v63 = vpop.f32.mrf.mxu1  ;;  %v8327_v17 = vpop.f32.mrf.mxu0  ;;  %8871 = vmatmul.mubr.bf16.gmra.mxu1 %v20351_v58  ;;  %9155 = vmatprep.subr.bf16.mxu0 %v11731_v45  ;;  %v5423_v45 = vld [vmem:[%s20024_s3 + $0x9d0] sm:$0xff]  ;;  %v12136_v58 = vcombine.low %v5590_v4, %v5594_v2  ;;  %v5578_v2 = vld [vmem:[%s20024_s3 + $0xea8] sm:$0xff] }
 0x34d   :  { %20349 = vst [vmem:[#allocation76_spill] sm:$0xff] %v17303_v27  ;;  %20350 = vst [vmem:[#allocation77_spill] sm:$0xff] %v17305_v63  ;;  %v8328_v48 = vadd.f32 %v8327_v17, %v16957_v40  ;;  %9004 = vmatmul.mubr.bf16.gmra.mxu0 %v20352_v36  ;;  %8880 = vmatprep.mubr.bf16.mxu1 %v20353_v18  ;;  %v11722_v27 = vcombine.low %v5175_v55, %v5179_v50  ;;  %v5415_v55 = vld [vmem:[%s20024_s3 + $0x990] sm:$0xff] }
 0x34e   :  { %v8440_v30 = vpop.f32.mrf.mxu1  ;;  %9035 = vmatpush2.bf16.msra.mxu1 %v12144_v60  ;;  %9159 = vmatprep.mubr.bf16.mxu0 %v20354_v12  ;;  %v8329_v1 = vpop.f32.mrf.mxu0  ;;  %v12129_v63 = vcombine.high %v5582_v52, %v5586_v43  ;;  %v11971_v6 = vcombine.high %v5423_v45, %v5427_v16  ;;  %v5574_v60 = vld [vmem:[%s20024_s3 + $0xe88] sm:$0xff] }
 0x34f   :  { %v17324_v17 = vadd.f32 %v8440_v30, %v8328_v48  ;;  %9156 = vmatpush2.bf16.msra.mxu0 %v11730_v14  ;;  %v8330_v36 = vadd.f32 %v8329_v1, %v16993_v47  ;;  %9036 = vmatprep.subr.bf16.mxu1 %v12137_v3  ;;  %v12128_v3 = vcombine.low %v5582_v52, %v5586_v43  ;;  %v20357_v52 = vld [vmem:[#allocation32_spill] sm:$0xff] }
 0x350   :  { %v8442_v18 = vpop.f32.mrf.mxu1  ;;  %v8331_v10 = vpop.f32.mrf.mxu0  ;;  %9157 = vmatprep.subr.bf16.mxu0 %v11723_v31  ;;  %v5419_v31 = vld [vmem:[%s20024_s3 + $0x9b0] sm:$0xff]  ;;  %v12121_v30 = vcombine.high %v5574_v60, %v5578_v2 }
 0x351   :  { %v17330_v35 = vadd.f32 %v8442_v18, %v8330_v36  ;;  %v8332_v4 = vadd.f32 %v8331_v10, %v16957_v40  ;;  %v11970_v40 = vcombine.low %v5423_v45, %v5427_v16  ;;  %v20356_v10 = vld [vmem:[#allocation29_spill] sm:$0xff]  ;;  %v11963_v36 = vcombine.high %v5415_v55, %v5419_v31  ;;  %v5566_v18 = vld [vmem:[%s20024_s3 + $0xe48] sm:$0xff]  ;;  %v20358_v45 = vld [vmem:[#allocation2_spill] sm:$0xff] }
 0x352   :  { %v8444_v50 = vpop.f32.mrf.mxu1  ;;  %9037 = vmatpush2.bf16.msra.mxu1 %v12136_v58  ;;  %v17342_v14 = vpop.f32.mrf.mxu0  ;;  %v5570_v58 = vld [vmem:[%s20024_s3 + $0xe68] sm:$0xff]  ;;  %v12120_v16 = vcombine.low %v5574_v60, %v5578_v2  ;;  %v5399_v2 = vld [vmem:[%s20024_s3 + $0x910] sm:$0xff] }
 0x353   :  { %v17344_v48 = vadd.f32 %v8444_v50, %v8332_v4  ;;  %9158 = vmatpush2.bf16.msra.mxu0 %v11722_v27  ;;  %9038 = vmatprep.subr.bf16.mxu1 %v12129_v63  ;;  %v5407_v27 = vld [vmem:[%s20024_s3 + $0x950] sm:$0xff]  ;;  %v8264_v63 = vadd.f32 %v17052_v37, %v16993_v47  ;;  %v5562_v60 = vld [vmem:[%s20024_s3 + $0xe28] sm:$0xff] }
 0x354   :  { %8881 = vmatmul.mubr.bf16.gmra.mxu1 %v20356_v10  ;;  %9353 = vmatprep.subr.bf16.mxu0 %v11971_v6  ;;  %v5411_v6 = vld [vmem:[%s20024_s3 + $0x970] sm:$0xff]  ;;  %v12113_v10 = vcombine.high %v5566_v18, %v5570_v58 }
 0x355   :  { %20355 = vst [vmem:[#allocation78_spill] sm:$0xff] %v17344_v48  ;;  %v8483_v1 = vpop.f32.mrf.mxu0  ;;  %8890 = vmatprep.mubr.bf16.mxu1 %v20357_v52  ;;  %v20359_v4 = vld [vmem:[#allocation4_spill] sm:$0xff]  ;;  %v11962_v52 = vcombine.low %v5415_v55, %v5419_v31  ;;  %v11955_v48 = vcombine.high %v5407_v27, %v5411_v6  ;;  %v8377_v55 = vadd.f32 %v17056_v32, %v8264_v63 }
 0x356   :  { %v17363_v43 = vadd.f32 %v8483_v1, %v17029_v42  ;;  %9160 = vmatmul.mubr.bf16.vlgmr.msra.gmra.mxu0 %v20358_v45  ;;  %9039 = vmatpush2.bf16.msra.mxu1 %v12128_v3  ;;  %v5558_v42 = vld [vmem:[%s20024_s3 + $0xe08] sm:$0xff]  ;;  %v12112_v3 = vcombine.low %v5566_v18, %v5570_v58  ;;  %v5295_v32 = vld [vmem:[%s20024_s3 + $0x5d0] sm:$0xff]  ;;  %v8274_v58 = vadd.f32 %v17096_v5, %v16993_v47 }
 0x357   :  { %9169 = vmatprep.mubr.bf16.mxu0 %v20359_v4  ;;  %9354 = vmatpush1.bf16.msra.mxu0 %v11970_v40  ;;  %v8485_v50 = vpop.f32.mrf.mxu0  ;;  %v20360_v1 = vld [vmem:[#allocation31_spill] sm:$0xff] }
 0x358   :  { %v17368_v12 = vadd.f32 %v8485_v50, %v17040_v8  ;;  %9040 = vmatprep.subr.bf16.mxu1 %v12121_v30  ;;  %9355 = vmatprep.subr.bf16.mxu0 %v11963_v36  ;;  %v5403_v8 = vld [vmem:[%s20024_s3 + $0x930] sm:$0xff]  ;;  %v11954_v30 = vcombine.low %v5407_v27, %v5411_v6  ;;  %v12105_v50 = vcombine.high %v5558_v42, %v5562_v60 }
 0x359   :  { %v8487_v37 = vpop.f32.mrf.mxu0  ;;  %v11947_v4 = vcombine.high %v5399_v2, %v5403_v8  ;;  %v12104_v27 = vcombine.low %v5558_v42, %v5562_v60  ;;  %v11946_v63 = vcombine.low %v5399_v2, %v5403_v8  ;;  %v5291_v42 = vld [vmem:[%s20024_s3 + $0x5b0] sm:$0xff]  ;;  %v8387_v60 = vadd.f32 %v17100_v0, %v8274_v58 }
 0x35a   :  { %v17384_v31 = vadd.f32 %v8487_v37, %v17054_v7  ;;  %9041 = vmatpush2.bf16.msra.mxu1 %v12120_v16  ;;  %v5299_v7 = vld [vmem:[%s20024_s3 + $0x5f0] sm:$0xff] }
 0x35b   :  { %9356 = vmatpush1.bf16.msra.mxu0 %v11962_v52  ;;  %v8489_v40 = vpop.f32.mrf.mxu0  ;;  %9042 = vmatprep.subr.bf16.mxu1 %v12113_v10  ;;  %v5391_v10 = vld [vmem:[%s20024_s3 + $0x8d0] sm:$0xff]  ;;  %v11843_v16 = vcombine.high %v5295_v32, %v5299_v7 }
 0x35c   :  { %v17386_v36 = vadd.f32 %v8489_v40, %v8377_v55  ;;  %8891 = vmatmul.mubr.bf16.gmra.mxu1 %v20360_v1  ;;  %9357 = vmatprep.subr.bf16.mxu0 %v11955_v48  ;;  %v5395_v48 = vld [vmem:[%s20024_s3 + $0x8f0] sm:$0xff] }
 0x35d   :  { %v8493_v18 = vpop.f32.mrf.mxu0  ;;  %9046 = vmatprep.mubr.bf16.mxu1 %v16549_v46  ;;  %v11939_v55 = vcombine.high %v5391_v10, %v5395_v48  ;;  %v5283_v58 = vld [vmem:[%s20024_s3 + $0x570] sm:$0xff] }
 0x35e   :  { %v17405_v52 = vadd.f32 %v8493_v18, %v17078_v57  ;;  %9170 = vmatmul.mubr.bf16.gmra.mxu0 %v14379_v49  ;;  %9043 = vmatpush2.bf16.msra.mxu1 %v12112_v3  ;;  %v5287_v57 = vld [vmem:[%s20024_s3 + $0x590] sm:$0xff]  ;;  %v11842_v3 = vcombine.low %v5295_v32, %v5299_v7  ;;  %v8284_v32 = vadd.f32 %v17137_v11, %v16993_v47 }
 0x35f   :  { %9179 = vmatprep.mubr.bf16.mxu0 %v14461_v34  ;;  %9358 = vmatpush1.bf16.msra.mxu0 %v11954_v30  ;;  %v8495_v6 = vpop.f32.mrf.mxu0  ;;  %v11938_v30 = vcombine.low %v5391_v10, %v5395_v48  ;;  %v11835_v0 = vcombine.high %v5287_v57, %v5291_v42  ;;  %v5279_v18 = vld [vmem:[%s20024_s3 + $0x550] sm:$0xff]  ;;  %v11834_v11 = vcombine.low %v5287_v57, %v5291_v42 }
 0x360   :  { %v17410_v37 = vadd.f32 %v8495_v6, %v17087_v39  ;;  %9044 = vmatprep.subr.bf16.mxu1 %v12105_v50  ;;  %9359 = vmatprep.subr.bf16.mxu0 %v11947_v4  ;;  %v5383_v39 = vld [vmem:[%s20024_s3 + $0x890] sm:$0xff]  ;;  %v8397_v57 = vadd.f32 %v17141_v9, %v8284_v32 }
 0x361   :  { %v8497_v5 = vpop.f32.mrf.mxu0  ;;  %v5387_v4 = vld [vmem:[%s20024_s3 + $0x8b0] sm:$0xff] }
 0x362   :  { %v17420_v2 = vadd.f32 %v8497_v5, %v17098_v22  ;;  %9045 = vmatpush2.bf16.msra.mxu1 %v12104_v27  ;;  %v11931_v50 = vcombine.high %v5383_v39, %v5387_v4  ;;  %v5375_v10 = vld [vmem:[%s20024_s3 + $0x850] sm:$0xff]  ;;  %v11930_v6 = vcombine.low %v5383_v39, %v5387_v4 }
 0x363   :  { %9360 = vmatpush1.bf16.msra.mxu0 %v11946_v63  ;;  %v8499_v8 = vpop.f32.mrf.mxu0  ;;  %9240 = vmatprep.subr.bf16.mxu1 %v11843_v16  ;;  %v5379_v48 = vld [vmem:[%s20024_s3 + $0x870] sm:$0xff]  ;;  %v11827_v63 = vcombine.high %v5279_v18, %v5283_v58 }
 0x364   :  { %v17428_v40 = vadd.f32 %v8499_v8, %v8387_v60  ;;  %9361 = vmatprep.subr.bf16.mxu0 %v11939_v55  ;;  %v11923_v55 = vcombine.high %v5375_v10, %v5379_v48  ;;  %v5271_v5 = vld [vmem:[%s20024_s3 + $0x510] sm:$0xff]  ;;  %v11826_v8 = vcombine.low %v5279_v18, %v5283_v58  ;;  %v8294_v18 = vadd.f32 %v17178_v20, %v16993_v47 }
 0x365   :  { %v8503_v22 = vpop.f32.mrf.mxu0  ;;  %9047 = vmatmul.mubr.bf16.vlgmr.msra.gmra.mxu1 %v16553_v51  ;;  %v5275_v60 = vld [vmem:[%s20024_s3 + $0x530] sm:$0xff] }
 0x366   :  { %v17440_v7 = vadd.f32 %v8503_v22, %v17119_v62  ;;  %9180 = vmatmul.mubr.bf16.gmra.mxu0 %v14447_v29  ;;  %9056 = vmatprep.mubr.bf16.mxu1 %v16624_v19  ;;  %v5371_v39 = vld [vmem:[%s20024_s3 + $0x830] sm:$0xff]  ;;  %v11819_v9 = vcombine.high %v5271_v5, %v5275_v60  ;;  %v11818_v20 = vcombine.low %v5271_v5, %v5275_v60 }
 0x367   :  { %9189 = vmatprep.mubr.bf16.mxu0 %v20215_v54  ;;  %9241 = vmatpush1.bf16.msra.mxu1 %v11842_v3  ;;  %v8505_v27 = vpop.f32.mrf.mxu0  ;;  %v5263_v22 = vld [vmem:[%s20024_s3 + $0x4d0] sm:$0xff]  ;;  %v8407_v5 = vadd.f32 %v17182_v33, %v8294_v18  ;;  %v20394_v54 = vld [vmem:[#allocation18_spill] sm:$0xff] }
 0x368   :  { %9362 = vmatpush1.bf16.msra.mxu0 %v11938_v30  ;;  %v17452_v62 = vadd.f32 %v8505_v27, %v17128_v41  ;;  %9242 = vmatprep.subr.bf16.mxu1 %v11835_v0  ;;  %v5367_v41 = vld [vmem:[%s20024_s3 + $0x810] sm:$0xff]  ;;  %v11922_v30 = vcombine.low %v5375_v10, %v5379_v48 }
 0x369   :  { %v8507_v16 = vpop.f32.mrf.mxu0  ;;  %9363 = vmatprep.subr.bf16.mxu0 %v11931_v50  ;;  %v5267_v50 = vld [vmem:[%s20024_s3 + $0x4f0] sm:$0xff]  ;;  %v11914_v27 = vcombine.low %v5367_v41, %v5371_v39 }
 0x36a   :  { %v17462_v42 = vadd.f32 %v8507_v16, %v17139_v44  ;;  %v11915_v44 = vcombine.high %v5367_v41, %v5371_v39  ;;  %v5487_v32 = vld [vmem:[%s20024_s3 + $0xbd0] sm:$0xff]  ;;  %v11810_v39 = vcombine.low %v5263_v22, %v5267_v50 }
 0x36b   :  { %9243 = vmatpush1.bf16.msra.mxu1 %v11834_v11  ;;  %v8509_v4 = vpop.f32.mrf.mxu0  ;;  %v5491_v10 = vld [vmem:[%s20024_s3 + $0xbf0] sm:$0xff]  ;;  %v11811_v11 = vcombine.high %v5263_v22, %v5267_v50 }
 0x36c   :  { %9364 = vmatpush1.bf16.msra.mxu0 %v11930_v6  ;;  %v17470_v3 = vadd.f32 %v8509_v4, %v8397_v57  ;;  %9244 = vmatprep.subr.bf16.mxu1 %v11827_v63  ;;  %v12035_v63 = vcombine.high %v5487_v32, %v5491_v10  ;;  %v5255_v16 = vld [vmem:[%s20024_s3 + $0x490] sm:$0xff] }
 0x36d   :  { %v8513_v0 = vpop.f32.mrf.mxu0  ;;  %9057 = vmatmul.mubr.bf16.gmra.mxu1 %v16630_v61  ;;  %9365 = vmatprep.subr.bf16.mxu0 %v11923_v55  ;;  %v5259_v55 = vld [vmem:[%s20024_s3 + $0x4b0] sm:$0xff] }
 0x36e   :  { %v17482_v58 = vadd.f32 %v8513_v0, %v17160_v13  ;;  %9190 = vmatmul.mubr.bf16.gmra.mxu0 %v20218_v24  ;;  %9066 = vmatprep.mubr.bf16.mxu1 %v16696_v23  ;;  %v5483_v57 = vld [vmem:[%s20024_s3 + $0xbb0] sm:$0xff]  ;;  %v11803_v33 = vcombine.high %v5255_v16, %v5259_v55  ;;  %v20386_v24 = vld [vmem:[#allocation78_spill] sm:$0xff] }
 0x36f   :  { %9199 = vmatprep.mubr.bf16.mxu0 %v20219_v59  ;;  %9245 = vmatpush1.bf16.msra.mxu1 %v11826_v8  ;;  %v8515_v48 = vpop.f32.mrf.mxu0  ;;  %v12034_v8 = vcombine.low %v5487_v32, %v5491_v10  ;;  %v5251_v0 = vld [vmem:[%s20024_s3 + $0x470] sm:$0xff] }
 0x370   :  { %9366 = vmatpush1.bf16.msra.mxu0 %v11922_v30  ;;  %v17494_v13 = vadd.f32 %v8515_v48, %v17169_v56  ;;  %9246 = vmatprep.subr.bf16.mxu1 %v11819_v9  ;;  %v5479_v56 = vld [vmem:[%s20024_s3 + $0xb90] sm:$0xff] }
 0x371   :  { %v8517_v6 = vpop.f32.mrf.mxu0  ;;  %9367 = vmatprep.subr.bf16.mxu0 %v11915_v44  ;;  %v5247_v9 = vld [vmem:[%s20024_s3 + $0x450] sm:$0xff]  ;;  %v8304_v44 = vadd.f32 %v17219_v21, %v16993_v47  ;;  %v11802_v21 = vcombine.low %v5255_v16, %v5259_v55  ;;  %v12026_v48 = vcombine.low %v5479_v56, %v5483_v57  ;;  %v20363_v55 = vld [vmem:[#allocation61_spill] sm:$0xff] }
 0x372   :  { %v17504_v60 = vadd.f32 %v8517_v6, %v17180_v25  ;;  %v12027_v25 = vcombine.high %v5479_v56, %v5483_v57  ;;  %v5471_v50 = vld [vmem:[%s20024_s3 + $0xb50] sm:$0xff] }
 0x373   :  { %9247 = vmatpush1.bf16.msra.mxu1 %v11818_v20  ;;  %v8519_v41 = vpop.f32.mrf.mxu0  ;;  %v5475_v18 = vld [vmem:[%s20024_s3 + $0xb70] sm:$0xff]  ;;  %v11795_v20 = vcombine.high %v5247_v9, %v5251_v0 }
 0x374   :  { %9368 = vmatpush1.bf16.msra.mxu0 %v11914_v27  ;;  %v17512_v4 = vadd.f32 %v8519_v41, %v8407_v5  ;;  %9248 = vmatprep.subr.bf16.mxu1 %v11811_v11  ;;  %v12019_v11 = vcombine.high %v5471_v50, %v5475_v18  ;;  %v5239_v6 = vld [vmem:[%s20024_s3 + $0x410] sm:$0xff] }
 0x375   :  { %v8523_v30 = vpop.f32.mrf.mxu0  ;;  %9067 = vmatmul.mubr.bf16.gmra.mxu1 %v16702_v53  ;;  %9369 = vmatprep.subr.bf16.mxu0 %v12035_v63  ;;  %v5243_v63 = vld [vmem:[%s20024_s3 + $0x430] sm:$0xff] }
 0x376   :  { %v17524_v22 = vadd.f32 %v8523_v30, %v17201_v38  ;;  %9200 = vmatmul.mubr.bf16.gmra.mxu0 %v20222_v15  ;;  %9076 = vmatprep.mubr.bf16.mxu1 %v16768_v26  ;;  %v20361_v38 = vld [vmem:[#allocation59_spill] sm:$0xff]  ;;  %v20362_v5 = vld [vmem:[#allocation64_spill] sm:$0xff]  ;;  %v12018_v30 = vcombine.low %v5471_v50, %v5475_v18  ;;  %v20368_v18 = vld [vmem:[#allocation53_spill] sm:$0xff] }
 0x377   :  { %9209 = vmatprep.mubr.bf16.mxu0 %v20223_v28  ;;  %9249 = vmatpush1.bf16.msra.mxu1 %v11810_v39  ;;  %v8525_v32 = vpop.f32.mrf.mxu0  ;;  %v8417_v16 = vadd.f32 %v20362_v5, %v8304_v44  ;;  %v5463_v56 = vld [vmem:[%s20024_s3 + $0xb10] sm:$0xff]  ;;  %v20367_v50 = vld [vmem:[#allocation11_spill] sm:$0xff] }
 0x378   :  { %9370 = vmatpush2.bf16.msra.mxu0 %v12034_v8  ;;  %v17536_v10 = vadd.f32 %v8525_v32, %v20361_v38  ;;  %9250 = vmatprep.subr.bf16.mxu1 %v11803_v33  ;;  %v5467_v57 = vld [vmem:[%s20024_s3 + $0xb30] sm:$0xff]  ;;  %v11794_v8 = vcombine.low %v5247_v9, %v5251_v0  ;;  %v20364_v32 = vld [vmem:[#allocation50_spill] sm:$0xff] }
 0x379   :  { %v8527_v27 = vpop.f32.mrf.mxu0  ;;  %9371 = vmatprep.subr.bf16.mxu0 %v12027_v25  ;;  %v11787_v25 = vcombine.high %v5239_v6, %v5243_v63  ;;  %v12011_v38 = vcombine.high %v5463_v56, %v5467_v57  ;;  %v20365_v9 = vld [vmem:[#allocation60_spill] sm:$0xff] }
 0x37a   :  { %v17546_v41 = vadd.f32 %v8527_v27, %v20363_v55  ;;  %v5359_v27 = vld [vmem:[%s20024_s3 + $0x7d0] sm:$0xff]  ;;  %v8314_v0 = vadd.f32 %v20365_v9, %v16993_v47 }
 0x37b   :  { %9251 = vmatpush1.bf16.msra.mxu1 %v11802_v21  ;;  %v8529_v39 = vpop.f32.mrf.mxu0  ;;  %v5363_v21 = vld [vmem:[%s20024_s3 + $0x7f0] sm:$0xff] }
 0x37c   :  { %9372 = vmatpush2.bf16.msra.mxu0 %v12026_v48  ;;  %v17554_v33 = vadd.f32 %v8529_v39, %v8417_v16  ;;  %9252 = vmatprep.subr.bf16.mxu1 %v11795_v20  ;;  %v20366_v48 = vld [vmem:[#allocation63_spill] sm:$0xff]  ;;  %v5459_v5 = vld [vmem:[%s20024_s3 + $0xaf0] sm:$0xff]  ;;  %v20369_v16 = vld [vmem:[#allocation14_spill] sm:$0xff]  ;;  %v11786_v39 = vcombine.low %v5239_v6, %v5243_v63 }
 0x37d   :  { %v8533_v44 = vpop.f32.mrf.mxu0  ;;  %9077 = vmatmul.mubr.bf16.gmra.mxu1 %v20364_v32  ;;  %9373 = vmatprep.subr.bf16.mxu0 %v12019_v11  ;;  %v5455_v11 = vld [vmem:[%s20024_s3 + $0xad0] sm:$0xff]  ;;  %v20372_v63 = vld [vmem:[#allocation65_spill] sm:$0xff] }
 0x37e   :  { %v17566_v20 = vadd.f32 %v8533_v44, %v20366_v48  ;;  %9210 = vmatmul.mubr.bf16.gmra.mxu0 %v20367_v50  ;;  %9086 = vmatprep.mubr.bf16.mxu1 %v20368_v18  ;;  %v20370_v44 = vld [vmem:[#allocation62_spill] sm:$0xff]  ;;  %v12010_v48 = vcombine.low %v5463_v56, %v5467_v57  ;;  %v11907_v18 = vcombine.high %v5359_v27, %v5363_v21  ;;  %v5351_v28 = vld [vmem:[%s20024_s3 + $0x790] sm:$0xff] }
 0x37f   :  { %9219 = vmatprep.mubr.bf16.mxu0 %v20369_v16  ;;  %9253 = vmatpush1.bf16.msra.mxu1 %v11794_v8  ;;  %v8535_v55 = vpop.f32.mrf.mxu0  ;;  %v12003_v32 = vcombine.high %v5455_v11, %v5459_v5  ;;  %v5355_v8 = vld [vmem:[%s20024_s3 + $0x7b0] sm:$0xff] }
 0x380   :  { %9374 = vmatpush2.bf16.msra.mxu0 %v12018_v30  ;;  %v17578_v9 = vadd.f32 %v8535_v55, %v20370_v44  ;;  %9254 = vmatprep.subr.bf16.mxu1 %v11787_v25  ;;  %v20371_v16 = vld [vmem:[#allocation72_spill] sm:$0xff]  ;;  %v12002_v44 = vcombine.low %v5455_v11, %v5459_v5  ;;  %v20376_v11 = vld [vmem:[#allocation13_spill] sm:$0xff]  ;;  %v20377_v5 = vld [vmem:[#allocation51_spill] sm:$0xff] }
 0x381   :  { %v8537_v50 = vpop.f32.mrf.mxu0  ;;  %9375 = vmatprep.subr.bf16.mxu0 %v12011_v38  ;;  %v8427_v6 = vadd.f32 %v20371_v16, %v8314_v0  ;;  %v5447_v56 = vld [vmem:[%s20024_s3 + $0xa90] sm:$0xff]  ;;  %v11906_v38 = vcombine.low %v5359_v27, %v5363_v21  ;;  %v11899_v0 = vcombine.high %v5351_v28, %v5355_v8  ;;  %v20374_v27 = vld [vmem:[#allocation75_spill] sm:$0xff] }
 0x382   :  { %v17588_v30 = vadd.f32 %v8537_v50, %v20372_v63  ;;  %v5451_v57 = vld [vmem:[%s20024_s3 + $0xab0] sm:$0xff]  ;;  %v8324_v21 = vadd.f32 %v20374_v27, %v16993_v47  ;;  %v11898_v27 = vcombine.low %v5351_v28, %v5355_v8 }
 0x383   :  { %9255 = vmatpush1.bf16.msra.mxu1 %v11786_v39  ;;  %v8539_v25 = vpop.f32.mrf.mxu0  ;;  %v20373_v50 = vld [vmem:[#allocation52_spill] sm:$0xff]  ;;  %v11995_v63 = vcombine.high %v5447_v56, %v5451_v57 }
 0x384   :  { %9376 = vmatpush2.bf16.msra.mxu0 %v12010_v48  ;;  %v17596_v55 = vadd.f32 %v8539_v25, %v8427_v6  ;;  %9256 = vmatprep.subr.bf16.mxu1 %v11907_v18  ;;  %v5343_v26 = vld [vmem:[%s20024_s3 + $0x750] sm:$0xff]  ;;  %v20375_v48 = vld [vmem:[#allocation73_spill] sm:$0xff] }
 0x385   :  { %v8543_v16 = vpop.f32.mrf.mxu0  ;;  %9087 = vmatmul.mubr.bf16.gmra.mxu1 %v20373_v50  ;;  %9377 = vmatprep.subr.bf16.mxu0 %v12003_v32  ;;  %v5347_v39 = vld [vmem:[%s20024_s3 + $0x770] sm:$0xff] }
 0x386   :  { %v17608_v18 = vadd.f32 %v8543_v16, %v20375_v48  ;;  %9220 = vmatmul.mubr.bf16.gmra.mxu0 %v20376_v11  ;;  %9096 = vmatprep.mubr.bf16.mxu1 %v20377_v5  ;;  %v5439_v32 = vld [vmem:[%s20024_s3 + $0xa50] sm:$0xff]  ;;  %v20379_v16 = vld [vmem:[#allocation74_spill] sm:$0xff]  ;;  %v11994_v11 = vcombine.low %v5447_v56, %v5451_v57  ;;  %v11891_v5 = vcombine.high %v5343_v26, %v5347_v39 }
 0x387   :  { %v5443_v6 = vld [vmem:[%s20024_s3 + $0xa70] sm:$0xff]  ;;  %9257 = vmatpush2.bf16.msra.mxu1 %v11906_v38  ;;  %v8545_v50 = vpop.f32.mrf.mxu0 }
 0x388   :  { %v20378_v25 = vld [vmem:[#allocation16_spill] sm:$0xff]  ;;  %9378 = vmatpush2.bf16.msra.mxu0 %v12002_v44  ;;  %v17620_v48 = vadd.f32 %v8545_v50, %v20379_v16  ;;  %9258 = vmatprep.subr.bf16.mxu1 %v11899_v0  ;;  %v11987_v53 = vcombine.high %v5439_v32, %v5443_v6  ;;  %v11890_v50 = vcombine.low %v5343_v26, %v5347_v39 }
 0x389   :  { %9229 = vmatprep.mubr.bf16.mxu0 %v20378_v25  ;;  %v8547_v15 = vpop.f32.mrf.mxu0  ;;  %9379 = vmatprep.subr.bf16.mxu0 %v11995_v63  ;;  %v5335_v59 = vld [vmem:[%s20024_s3 + $0x710] sm:$0xff]  ;;  %v20380_v25 = vld [vmem:[#allocation77_spill] sm:$0xff]  ;;  %v11986_v16 = vcombine.low %v5439_v32, %v5443_v6  ;;  %v8334_v26 = vadd.f32 %v17342_v14, %v16993_v47 }
 0x38a   :  { %v5339_v38 = vld [vmem:[%s20024_s3 + $0x730] sm:$0xff]  ;;  %v8437_v28 = vadd.f32 %v20380_v25, %v8324_v21  ;;  %v5172_v32 = vld [vmem:[%s20024_s3 + $0x1f8] sm:$0xff] }
 0x38b   :  { %v20381_v8 = vld [vmem:[#allocation76_spill] sm:$0xff]  ;;  %9259 = vmatpush2.bf16.msra.mxu1 %v11898_v27  ;;  %v8549_v0 = vpop.f32.mrf.mxu0  ;;  %v11883_v21 = vcombine.high %v5335_v59, %v5339_v38  ;;  %v20385_v6 = vld [vmem:[#allocation41_spill] sm:$0xff]  ;;  %v11882_v47 = vcombine.low %v5335_v59, %v5339_v38 }
 0x38c   :  { %v17630_v44 = vadd.f32 %v8547_v15, %v20381_v8  ;;  %v5431_v56 = vld [vmem:[%s20024_s3 + $0xa10] sm:$0xff]  ;;  %9380 = vmatpush2.bf16.msra.mxu0 %v11994_v11  ;;  %v17638_v63 = vadd.f32 %v8549_v0, %v8437_v28  ;;  %9260 = vmatprep.subr.bf16.mxu1 %v11891_v5  ;;  %v20382_v15 = vld [vmem:[#allocation54_spill] sm:$0xff]  ;;  %v20383_v11 = vld [vmem:[#allocation15_spill] sm:$0xff] }
 0x38d   :  { %v5435_v57 = vld [vmem:[%s20024_s3 + $0xa30] sm:$0xff]  ;;  %v8553_v25 = vpop.f32.mrf.mxu0  ;;  %9097 = vmatmul.mubr.bf16.gmra.mxu1 %v20382_v15  ;;  %9381 = vmatprep.subr.bf16.mxu0 %v11987_v53  ;;  %v20384_v5 = vld [vmem:[#allocation58_spill] sm:$0xff]  ;;  %v5168_v53 = vld [vmem:[%s20024_s3 + $0x1d8] sm:$0xff] }
 0x38e   :  { %v11979_v8 = vcombine.high %v5431_v56, %v5435_v57  ;;  %v5327_v23 = vld [vmem:[%s20024_s3 + $0x6d0] sm:$0xff]  ;;  %v17650_v39 = vadd.f32 %v8553_v25, %v17324_v17  ;;  %9230 = vmatmul.mubr.bf16.gmra.mxu0 %v20383_v11  ;;  %9106 = vmatprep.mubr.bf16.mxu1 %v20384_v5  ;;  %v11978_v14 = vcombine.low %v5431_v56, %v5435_v57  ;;  %v8446_v25 = vpop.f32.mrf.mxu1  ;;  %v5164_v38 = vld [vmem:[%s20024_s3 + $0x1b8] sm:$0xff] }
 0x38f   :  { %v5331_v27 = vld [vmem:[%s20024_s3 + $0x6f0] sm:$0xff]  ;;  %9261 = vmatpush2.bf16.msra.mxu1 %v11890_v50  ;;  %9385 = vmatprep.mubr.bf16.mxu0 %v20385_v6  ;;  %v8555_v28 = vpop.f32.mrf.mxu0  ;;  %v11717_v11 = vcombine.high %v5168_v53, %v5172_v32  ;;  %v8447_v50 = vadd.f32 %v8446_v25, %v8334_v26 }
 0x390   :  { %9382 = vmatpush2.bf16.msra.mxu0 %v11986_v16  ;;  %v17662_v17 = vadd.f32 %v8555_v28, %v17330_v35  ;;  %9262 = vmatprep.subr.bf16.mxu1 %v11883_v21  ;;  %v11875_v0 = vcombine.high %v5327_v23, %v5331_v27  ;;  %v5319_v15 = vld [vmem:[%s20024_s3 + $0x690] sm:$0xff]  ;;  %v5160_v35 = vld [vmem:[%s20024_s3 + $0x198] sm:$0xff]  ;;  %v11874_v57 = vcombine.low %v5327_v23, %v5331_v27 }
 0x391   :  { %v8557_v5 = vpop.f32.mrf.mxu0  ;;  %9383 = vmatprep.subr.bf16.mxu0 %v11979_v8  ;;  %v5323_v59 = vld [vmem:[%s20024_s3 + $0x6b0] sm:$0xff]  ;;  %v20387_v8 = vld [vmem:[#allocation57_spill] sm:$0xff]  ;;  %v11708_v25 = vcombine.low %v5160_v35, %v5164_v38 }
 0x392   :  { %v17668_v6 = vadd.f32 %v8557_v5, %v20386_v24  ;;  %v11716_v24 = vcombine.low %v5168_v53, %v5172_v32  ;;  %v11867_v26 = vcombine.high %v5319_v15, %v5323_v59  ;;  %v11709_v5 = vcombine.high %v5160_v35, %v5164_v38  ;;  %v5311_v28 = vld [vmem:[%s20024_s3 + $0x650] sm:$0xff]  ;;  %v5152_v53 = vld [vmem:[%s20024_s3 + $0x158] sm:$0xff] }
 0x393   :  { %9263 = vmatpush2.bf16.msra.mxu1 %v11882_v47  ;;  %v8559_v56 = vpop.f32.mrf.mxu0  ;;  %v5315_v23 = vld [vmem:[%s20024_s3 + $0x670] sm:$0xff] }
 0x394   :  { %9384 = vmatpush2.bf16.msra.mxu0 %v11978_v14  ;;  %v17679_v16 = vadd.f32 %v8559_v56, %v8447_v50  ;;  %9264 = vmatprep.subr.bf16.mxu1 %v11875_v0  ;;  %v20388_v27 = vld [vmem:[#allocation56_spill] sm:$0xff]  ;;  %v11866_v14 = vcombine.low %v5319_v15, %v5323_v59  ;;  %v20390_v0 = vld [vmem:[#allocation43_spill] sm:$0xff]  ;;  %v11859_v50 = vcombine.high %v5311_v28, %v5315_v23  ;;  %v5144_v15 = vld [vmem:[%s20024_s3 + $0x118] sm:$0xff] }
 0x395   :  { %v17681_v21 = vpop.f32.mrf.mxu0  ;;  %9107 = vmatmul.mubr.bf16.gmra.mxu1 %v20387_v8  ;;  %9579 = vmatprep.subr.bf16.mxu0 %v11717_v11  ;;  %v5156_v11 = vld [vmem:[%s20024_s3 + $0x178] sm:$0xff]  ;;  %v20389_v32 = vld [vmem:[#allocation40_spill] sm:$0xff]  ;;  %v11858_v38 = vcombine.low %v5311_v28, %v5315_v23 }
 0x396   :  { %9116 = vmatprep.mubr.bf16.mxu1 %v20388_v27  ;;  %v11701_v27 = vcombine.high %v5152_v53, %v5156_v11  ;;  %v5303_v8 = vld [vmem:[%s20024_s3 + $0x610] sm:$0xff]  ;;  %v5148_v59 = vld [vmem:[%s20024_s3 + $0x138] sm:$0xff] }
 0x397   :  { %9386 = vmatmul.mubr.bf16.vlgmr.msra.gmra.mxu0 %v20389_v32  ;;  %9265 = vmatpush2.bf16.msra.mxu1 %v11874_v57  ;;  %v17698_v47 = vpop.f32.mrf.mxu0  ;;  %v5307_v57 = vld [vmem:[%s20024_s3 + $0x630] sm:$0xff]  ;;  %v11693_v32 = vcombine.high %v5144_v15, %v5148_v59  ;;  %v5136_v28 = vld [vmem:[%s20024_s3 + $0xd8] sm:$0xff] }
 0x398   :  { %9395 = vmatprep.mubr.bf16.mxu0 %v20390_v0  ;;  %9580 = vmatpush1.bf16.msra.mxu0 %v11716_v24  ;;  %v11700_v24 = vcombine.low %v5152_v53, %v5156_v11  ;;  %v11851_v0 = vcombine.high %v5303_v8, %v5307_v57  ;;  %v5551_v61 = vld [vmem:[%s20024_s3 + $0xdd0] sm:$0xff]  ;;  %v5140_v23 = vld [vmem:[%s20024_s3 + $0xf8] sm:$0xff]  ;;  %v11850_v11 = vcombine.low %v5303_v8, %v5307_v57 }
 0x399   :  { %v17701_v56 = vpop.f32.mrf.mxu0  ;;  %9266 = vmatprep.subr.bf16.mxu1 %v11867_v26  ;;  %9581 = vmatprep.subr.bf16.mxu0 %v11709_v5  ;;  %v20393_v5 = vld [vmem:[#allocation55_spill] sm:$0xff]  ;;  %v5128_v57 = vld [vmem:[%s20024_s3 + $0x98] sm:$0xff] }
 0x39b   :  { %9267 = vmatpush2.bf16.msra.mxu1 %v11866_v14  ;;  %v17715_v35 = vpop.f32.mrf.mxu0  ;;  %v5555_v14 = vld [vmem:[%s20024_s3 + $0xdf0] sm:$0xff] }
 0x39c   :  { %20391 = vst [vmem:[#allocation2_spill] sm:$0xff] %v17715_v35  ;;  %9582 = vmatpush1.bf16.msra.mxu0 %v11708_v25  ;;  %9268 = vmatprep.subr.bf16.mxu1 %v11859_v50  ;;  %v20397_v25 = vld [vmem:[#allocation45_spill] sm:$0xff]  ;;  %v11692_v50 = vcombine.low %v5144_v15, %v5148_v59  ;;  %v5543_v35 = vld [vmem:[%s20024_s3 + $0xd90] sm:$0xff]  ;;  %v12098_v15 = vcombine.low %v5551_v61, %v5555_v14 }
 0x39d   :  { %v17717_v26 = vpop.f32.mrf.mxu0  ;;  %9117 = vmatmul.mubr.bf16.gmra.mxu1 %v20393_v5  ;;  %9583 = vmatprep.subr.bf16.mxu0 %v11701_v27  ;;  %v20395_v27 = vld [vmem:[#allocation42_spill] sm:$0xff]  ;;  %v12099_v5 = vcombine.high %v5551_v61, %v5555_v14  ;;  %v5539_v61 = vld [vmem:[%s20024_s3 + $0xd70] sm:$0xff] }
 0x39e   :  { %20392 = vst [vmem:[#allocation59_spill] sm:$0xff] %v17717_v26  ;;  %9272 = vmatprep.mubr.bf16.mxu1 %v20394_v54  ;;  %v11685_v26 = vcombine.high %v5136_v28, %v5140_v23 }
 0x39f   :  { %9396 = vmatmul.mubr.bf16.gmra.mxu0 %v20395_v27  ;;  %9269 = vmatpush2.bf16.msra.mxu1 %v11858_v38  ;;  %v17734_v53 = vpop.f32.mrf.mxu0  ;;  %v5547_v38 = vld [vmem:[%s20024_s3 + $0xdb0] sm:$0xff]  ;;  %v20401_v27 = vld [vmem:[#allocation17_spill] sm:$0xff] }
 0x3a0   :  { %20396 = vst [vmem:[#allocation64_spill] sm:$0xff] %v17734_v53  ;;  %9405 = vmatprep.mubr.bf16.mxu0 %v20397_v25  ;;  %9584 = vmatpush1.bf16.msra.mxu0 %v11700_v24  ;;  %v11684_v25 = vcombine.low %v5136_v28, %v5140_v23  ;;  %v5535_v53 = vld [vmem:[%s20024_s3 + $0xd50] sm:$0xff]  ;;  %v5120_v28 = vld [vmem:[%s20024_s3 + $0x58] sm:$0xff] }
 0x3a1   :  { %v17737_v54 = vpop.f32.mrf.mxu0  ;;  %9270 = vmatprep.subr.bf16.mxu1 %v11851_v0  ;;  %9585 = vmatprep.subr.bf16.mxu0 %v11693_v32  ;;  %v5132_v32 = vld [vmem:[%s20024_s3 + $0xb8] sm:$0xff] }
 0x3a2   :  { %20398 = vst [vmem:[#allocation61_spill] sm:$0xff] %v17737_v54  ;;  %v11677_v54 = vcombine.high %v5128_v57, %v5132_v32  ;;  %v5124_v23 = vld [vmem:[%s20024_s3 + $0x78] sm:$0xff] }
 0x3a3   :  { %9271 = vmatpush2.bf16.msra.mxu1 %v11850_v11  ;;  %v17745_v8 = vpop.f32.mrf.mxu0  ;;  %v12091_v11 = vcombine.high %v5543_v35, %v5547_v38 }
 0x3a4   :  { %20399 = vst [vmem:[#allocation60_spill] sm:$0xff] %v17745_v8  ;;  %9586 = vmatpush1.bf16.msra.mxu0 %v11692_v50  ;;  %v8596_v0 = vpop.f32.mrf.mxu1  ;;  %9466 = vmatprep.subr.bf16.mxu1 %v12099_v5  ;;  %v20402_v5 = vld [vmem:[#allocation44_spill] sm:$0xff]  ;;  %v20405_v50 = vld [vmem:[#allocation47_spill] sm:$0xff] }
 0x3a5   :  { %v8597_v59 = vadd.f32 %v8596_v0, %v17363_v43  ;;  %v17754_v24 = vpop.f32.mrf.mxu0  ;;  %9587 = vmatprep.subr.bf16.mxu0 %v11685_v26  ;;  %v20403_v43 = vld [vmem:[#allocation20_spill] sm:$0xff] }
 0x3a6   :  { %20400 = vst [vmem:[#allocation63_spill] sm:$0xff] %v17754_v24  ;;  %9273 = vmatmul.mubr.bf16.vlgmr.msra.gmra.mxu1 %v20401_v27  ;;  %v8598_v8 = vpop.f32.mrf.mxu1  ;;  %v12090_v27 = vcombine.low %v5543_v35, %v5547_v38  ;;  %v5531_v24 = vld [vmem:[%s20024_s3 + $0xd30] sm:$0xff] }
 0x3a7   :  { %9406 = vmatmul.mubr.bf16.gmra.mxu0 %v20402_v5  ;;  %9282 = vmatprep.mubr.bf16.mxu1 %v20403_v43  ;;  %v8599_v14 = vadd.f32 %v8598_v8, %v17368_v12  ;;  %v17766_v26 = vpop.f32.mrf.mxu0  ;;  %v11676_v12 = vcombine.low %v5128_v57, %v5132_v32  ;;  %v12083_v8 = vcombine.high %v5535_v53, %v5539_v61  ;;  %v10031_v35 = vmax.f32 %v8597_v59, 0.0  ;;  %v5112_v57 = vld [vmem:[%s20024_s3 + $0x18] sm:$0xff] }
 0x3a8   :  { %20404 = vst [vmem:[#allocation62_spill] sm:$0xff] %v17766_v26  ;;  %9415 = vmatprep.mubr.bf16.mxu0 %v20405_v50  ;;  %9467 = vmatpush1.bf16.msra.mxu1 %v12098_v15  ;;  %v8600_v0 = vpop.f32.mrf.mxu1  ;;  %v5527_v26 = vld [vmem:[%s20024_s3 + $0xd10] sm:$0xff]  ;;  %v11669_v50 = vcombine.high %v5120_v28, %v5124_v23  ;;  %v5116_v32 = vld [vmem:[%s20024_s3 + $0x38] sm:$0xff] }
 0x3a9   :  { %9588 = vmatpush1.bf16.msra.mxu0 %v11684_v25  ;;  %v8601_v43 = vadd.f32 %v8600_v0, %v17384_v31  ;;  %v17776_v5 = vpop.f32.mrf.mxu0  ;;  %9468 = vmatprep.subr.bf16.mxu1 %v12091_v11  ;;  %v12082_v0 = vcombine.low %v5535_v53, %v5539_v61  ;;  %v10032_v19 = vmax.f32 %v8599_v14, 0.0  ;;  %v11661_v51 = vcombine.high %v5112_v57, %v5116_v32  ;;  %v5523_v53 = vld [vmem:[%s20024_s3 + $0xcf0] sm:$0xff]  ;;  %v20410_v61 = vld [vmem:[#allocation46_spill] sm:$0xff] }
 0x3aa   :  { %20406 = vst [vmem:[#allocation72_spill] sm:$0xff] %v17776_v5  ;;  %9589 = vmatprep.subr.bf16.mxu0 %v11677_v54  ;;  %v8602_v15 = vpop.f32.mrf.mxu1  ;;  %v11668_v54 = vcombine.low %v5120_v28, %v5124_v23  ;;  %v12075_v5 = vcombine.high %v5527_v26, %v5531_v24  ;;  %v20411_v14 = vld [vmem:[#allocation22_spill] sm:$0xff]  ;;  %v5232_v23 = vld [vmem:[%s20024_s3 + $0x3d8] sm:$0xff] }
 0x3ab   :  { %v10039_v25 = vmax.f32 %v8601_v43, 0.0  ;;  %v8603_v31 = vadd.f32 %v8602_v15, %v17386_v36  ;;  %v17785_v38 = vpop.f32.mrf.mxu0 }
 0x3ac   :  { %20407 = vst [vmem:[#allocation65_spill] sm:$0xff] %v17785_v38  ;;  %9469 = vmatpush1.bf16.msra.mxu1 %v12090_v27  ;;  %v8606_v11 = vpop.f32.mrf.mxu1  ;;  %v20409_v38 = vld [vmem:[#allocation19_spill] sm:$0xff]  ;;  %v5519_v27 = vld [vmem:[%s20024_s3 + $0xcd0] sm:$0xff] }
 0x3ad   :  { %v17793_v59 = vpack.c.bf16 %v10039_v25, %v10031_v35  ;;  %9590 = vmatpush1.bf16.msra.mxu0 %v11676_v12  ;;  %v10040_v36 = vmax.f32 %v8603_v31, 0.0  ;;  %v8607_v43 = vadd.f32 %v8606_v11, %v17405_v52  ;;  %v17796_v15 = vpop.f32.mrf.mxu0  ;;  %9470 = vmatprep.subr.bf16.mxu1 %v12083_v8  ;;  %v20413_v8 = vld [vmem:[#allocation34_spill] sm:$0xff]  ;;  %v12074_v25 = vcombine.low %v5527_v26, %v5531_v24 }
 0x3ae   :  { %9283 = vmatmul.mubr.bf16.gmra.mxu1 %v20409_v38  ;;  %9591 = vmatprep.subr.bf16.mxu0 %v11669_v50  ;;  %v8608_v29 = vpop.f32.mrf.mxu1  ;;  %v5236_v50 = vld [vmem:[%s20024_s3 + $0x3f8] sm:$0xff]  ;;  %v11660_v31 = vcombine.low %v5112_v57, %v5116_v32  ;;  %v12067_v11 = vcombine.high %v5519_v27, %v5523_v53 }
 0x3af   :  { %20408 = vst [vmem:[#allocation75_spill] sm:$0xff] %v17793_v59  ;;  %9416 = vmatmul.mubr.bf16.gmra.mxu0 %v20410_v61  ;;  %9292 = vmatprep.mubr.bf16.mxu1 %v20411_v14  ;;  %v8609_v52 = vadd.f32 %v8608_v29, %v17410_v37  ;;  %v17808_v28 = vpop.f32.mrf.mxu0  ;;  %v17816_v12 = vpack.c.bf16 %v10040_v36, %v10032_v19  ;;  %v5511_v59 = vld [vmem:[%s20024_s3 + $0xc90] sm:$0xff]  ;;  %v10047_v24 = vmax.f32 %v8607_v43, 0.0  ;;  %v5228_v57 = vld [vmem:[%s20024_s3 + $0x3b8] sm:$0xff] }
 0x3b0   :  { %9425 = vmatprep.mubr.bf16.mxu0 %v20413_v8  ;;  %9471 = vmatpush1.bf16.msra.mxu1 %v12082_v0  ;;  %v8610_v35 = vpop.f32.mrf.mxu1  ;;  %v5515_v19 = vld [vmem:[%s20024_s3 + $0xcb0] sm:$0xff]  ;;  %v11781_v36 = vcombine.high %v5232_v23, %v5236_v50  ;;  %v20415_v14 = vld [vmem:[#allocation21_spill] sm:$0xff] }
 0x3b1   :  { %20412 = vst [vmem:[#allocation73_spill] sm:$0xff] %v17816_v12  ;;  %9592 = vmatpush1.bf16.msra.mxu0 %v11668_v54  ;;  %v8611_v29 = vadd.f32 %v8610_v35, %v17420_v2  ;;  %v17820_v37 = vpop.f32.mrf.mxu0  ;;  %9472 = vmatprep.subr.bf16.mxu1 %v12075_v5  ;;  %v5224_v5 = vld [vmem:[%s20024_s3 + $0x398] sm:$0xff]  ;;  %v12066_v35 = vcombine.low %v5519_v27, %v5523_v53  ;;  %v10048_v8 = vmax.f32 %v8609_v52, 0.0  ;;  %v5503_v27 = vld [vmem:[%s20024_s3 + $0xc50] sm:$0xff] }
 0x3b2   :  { %9593 = vmatprep.subr.bf16.mxu0 %v11661_v51  ;;  %v8612_v0 = vpop.f32.mrf.mxu1  ;;  %v11780_v51 = vcombine.low %v5232_v23, %v5236_v50  ;;  %v12059_v12 = vcombine.high %v5511_v59, %v5515_v19  ;;  %v11773_v38 = vcombine.high %v5224_v5, %v5228_v57  ;;  %v5507_v53 = vld [vmem:[%s20024_s3 + $0xc70] sm:$0xff]  ;;  %v20416_v52 = vld [vmem:[#allocation33_spill] sm:$0xff] }
 0x3b3   :  { %v10055_v26 = vmax.f32 %v8611_v29, 0.0  ;;  %v8613_v2 = vadd.f32 %v8612_v0, %v17428_v40  ;;  %v17829_v54 = vpop.f32.mrf.mxu0  ;;  %v20417_v23 = vld [vmem:[#allocation24_spill] sm:$0xff] }
 0x3b4   :  { %9473 = vmatpush1.bf16.msra.mxu1 %v12074_v25  ;;  %v8616_v32 = vpop.f32.mrf.mxu1 }
 0x3b5   :  { %v17837_v43 = vpack.c.bf16 %v10055_v26, %v10047_v24  ;;  %9594 = vmatpush1.bf16.msra.mxu0 %v11660_v31  ;;  %v10056_v40 = vmax.f32 %v8613_v2, 0.0  ;;  %v8617_v29 = vadd.f32 %v8616_v32, %v17440_v7  ;;  %v17840_v0 = vpop.f32.mrf.mxu0  ;;  %9474 = vmatprep.subr.bf16.mxu1 %v12067_v11  ;;  %v5216_v7 = vld [vmem:[%s20024_s3 + $0x358] sm:$0xff]  ;;  %v12058_v26 = vcombine.low %v5511_v59, %v5515_v19  ;;  %v17866_v2 = vld [vmem:[%s20024_s3 + $0xc10] sm:$0xff] }
 0x3b6   :  { %9293 = vmatmul.mubr.bf16.gmra.mxu1 %v20415_v14  ;;  %9595 = vmatprep.subr.bf16.mxu0 %v11781_v36  ;;  %v8618_v61 = vpop.f32.mrf.mxu1  ;;  %v5220_v31 = vld [vmem:[%s20024_s3 + $0x378] sm:$0xff]  ;;  %v20419_v36 = vld [vmem:[#allocation36_spill] sm:$0xff]  ;;  %v11772_v32 = vcombine.low %v5224_v5, %v5228_v57 }
 0x3b7   :  { %20414 = vst [vmem:[#allocation74_spill] sm:$0xff] %v17837_v43  ;;  %9426 = vmatmul.mubr.bf16.gmra.mxu0 %v20416_v52  ;;  %9302 = vmatprep.mubr.bf16.mxu1 %v20417_v23  ;;  %v8619_v50 = vadd.f32 %v8618_v61, %v17452_v62  ;;  %v17855_v25 = vpop.f32.mrf.mxu0  ;;  %v17860_v11 = vpack.c.bf16 %v10056_v40, %v10048_v8  ;;  %v5499_v8 = vld [vmem:[%s20024_s3 + $0xc30] sm:$0xff]  ;;  %v5208_v19 = vld [vmem:[%s20024_s3 + $0x318] sm:$0xff] }
 0x3b8   :  { %9435 = vmatprep.mubr.bf16.mxu0 %v20419_v36  ;;  %9475 = vmatpush1.bf16.msra.mxu1 %v12066_v35  ;;  %v8620_v24 = vpop.f32.mrf.mxu1  ;;  %v12051_v43 = vcombine.high %v5503_v27, %v5507_v53  ;;  %v11765_v59 = vcombine.high %v5216_v7, %v5220_v31  ;;  %v17887_v36 = vld [vmem:[%s20024_s3 + $0xfd0] sm:$0xff]  ;;  %v5240_v14 = vld [vmem:[%s20024_s3 + $0x418] sm:$0xff] }
 0x3b9   :  { %20418 = vst [vmem:[#allocation77_spill] sm:$0xff] %v17860_v11  ;;  %9596 = vmatpush2.bf16.msra.mxu0 %v11780_v51  ;;  %v8621_v62 = vadd.f32 %v8620_v24, %v17462_v42  ;;  %v17869_v61 = vpop.f32.mrf.mxu0  ;;  %9476 = vmatprep.subr.bf16.mxu1 %v12059_v12  ;;  %v5212_v42 = vld [vmem:[%s20024_s3 + $0x338] sm:$0xff]  ;;  %v10063_v51 = vmax.f32 %v8617_v29, 0.0  ;;  %v12050_v24 = vcombine.low %v5503_v27, %v5507_v53  ;;  %v10064_v23 = vmax.f32 %v8619_v50, 0.0 }
 0x3ba   :  { %9597 = vmatprep.subr.bf16.mxu0 %v11773_v38  ;;  %v8622_v35 = vpop.f32.mrf.mxu1  ;;  %v11764_v38 = vcombine.low %v5216_v7, %v5220_v31  ;;  %v12043_v11 = vcombine.high %v17866_v2, %v5499_v8  ;;  %v11757_v53 = vcombine.high %v5208_v19, %v5212_v42  ;;  %v5619_v7 = vld [vmem:[%s20024_s3 + $0xff0] sm:$0xff]  ;;  %v5200_v50 = vld [vmem:[%s20024_s3 + $0x2d8] sm:$0xff]  ;;  %v20422_v31 = vld [vmem:[#allocation35_spill] sm:$0xff] }
 0x3bb   :  { %v10071_v40 = vmax.f32 %v8621_v62, 0.0  ;;  %v8623_v12 = vadd.f32 %v8622_v35, %v17470_v3  ;;  %v17881_v5 = vpop.f32.mrf.mxu0  ;;  %v5204_v35 = vld [vmem:[%s20024_s3 + $0x2f8] sm:$0xff] }
 0x3bc   :  { %9477 = vmatpush1.bf16.msra.mxu1 %v12058_v26  ;;  %v8626_v57 = vpop.f32.mrf.mxu1  ;;  %v20421_v26 = vld [vmem:[#allocation23_spill] sm:$0xff] }
 0x3bd   :  { %v17889_v52 = vpack.c.bf16 %v10071_v40, %v10063_v51  ;;  %9598 = vmatpush2.bf16.msra.mxu0 %v11772_v32  ;;  %v10072_v29 = vmax.f32 %v8623_v12, 0.0  ;;  %v8627_v3 = vadd.f32 %v8626_v57, %v17482_v58  ;;  %v17892_v62 = vpop.f32.mrf.mxu0  ;;  %9478 = vmatprep.subr.bf16.mxu1 %v12051_v43  ;;  %v20423_v32 = vld [vmem:[#allocation26_spill] sm:$0xff]  ;;  %v12042_v12 = vcombine.low %v17866_v2, %v5499_v8  ;;  %v17916_v57 = vld [vmem:[%s20024_s3 + $0xf90] sm:$0xff] }
 0x3be   :  { %9303 = vmatmul.mubr.bf16.gmra.mxu1 %v20421_v26  ;;  %9599 = vmatprep.subr.bf16.mxu0 %v11765_v59  ;;  %v8628_v27 = vpop.f32.mrf.mxu1  ;;  %v20425_v51 = vld [vmem:[#allocation38_spill] sm:$0xff]  ;;  %v11749_v8 = vcombine.high %v5200_v50, %v5204_v35 }
 0x3bf   :  { %20420 = vst [vmem:[#allocation76_spill] sm:$0xff] %v17889_v52  ;;  %9436 = vmatmul.mubr.bf16.gmra.mxu0 %v20422_v31  ;;  %9312 = vmatprep.mubr.bf16.mxu1 %v20423_v32  ;;  %v8629_v58 = vadd.f32 %v8628_v27, %v17494_v13  ;;  %v17904_v43 = vpop.f32.mrf.mxu0  ;;  %v17909_v59 = vpack.c.bf16 %v10072_v29, %v10064_v23  ;;  %v5192_v29 = vld [vmem:[%s20024_s3 + $0x298] sm:$0xff]  ;;  %v17939_v32 = vld [vmem:[%s20024_s3 + $0xf50] sm:$0xff] }
 0x3c0   :  { %9445 = vmatprep.mubr.bf16.mxu0 %v20425_v51  ;;  %9479 = vmatpush1.bf16.msra.mxu1 %v12050_v24  ;;  %v8630_v40 = vpop.f32.mrf.mxu1  ;;  %v11756_v52 = vcombine.low %v5208_v19, %v5212_v42  ;;  %v12163_v23 = vcombine.high %v17887_v36, %v5619_v7  ;;  %v5611_v24 = vld [vmem:[%s20024_s3 + $0xfb0] sm:$0xff] }
 0x3c1   :  { %20424 = vst [vmem:[#allocation78_spill] sm:$0xff] %v17909_v59  ;;  %9600 = vmatpush2.bf16.msra.mxu0 %v11764_v38  ;;  %v8631_v13 = vadd.f32 %v8630_v40, %v17504_v60  ;;  %v17919_v27 = vpop.f32.mrf.mxu0  ;;  %9480 = vmatprep.subr.bf16.mxu1 %v12043_v11  ;;  %v5196_v60 = vld [vmem:[%s20024_s3 + $0x2b8] sm:$0xff]  ;;  %v10079_v38 = vmax.f32 %v8627_v3, 0.0  ;;  %v11748_v59 = vcombine.low %v5200_v50, %v5204_v35  ;;  %v10080_v31 = vmax.f32 %v8629_v58, 0.0  ;;  %v5603_v50 = vld [vmem:[%s20024_s3 + $0xf70] sm:$0xff] }
 0x3c2   :  { %9601 = vmatprep.subr.bf16.mxu0 %v11757_v53  ;;  %v8632_v2 = vpop.f32.mrf.mxu1  ;;  %v12162_v53 = vcombine.low %v17887_v36, %v5619_v7  ;;  %v12155_v51 = vcombine.high %v17916_v57, %v5611_v24  ;;  %v11741_v7 = vcombine.high %v5192_v29, %v5196_v60  ;;  %v5184_v58 = vld [vmem:[%s20024_s3 + $0x258] sm:$0xff]  ;;  %v20429_v35 = vld [vmem:[#allocation28_spill] sm:$0xff] }
 0x3c3   :  { %v10087_v11 = vmax.f32 %v8631_v13, 0.0  ;;  %v8633_v19 = vadd.f32 %v8632_v2, %v17512_v4  ;;  %v17932_v42 = vpop.f32.mrf.mxu0  ;;  %v5188_v2 = vld [vmem:[%s20024_s3 + $0x278] sm:$0xff] }
 0x3c4   :  { %9481 = vmatpush1.bf16.msra.mxu1 %v12042_v12  ;;  %v8636_v40 = vpop.f32.mrf.mxu1  ;;  %v20427_v12 = vld [vmem:[#allocation25_spill] sm:$0xff] }
 0x3c5   :  { %v17941_v26 = vpack.c.bf16 %v10087_v11, %v10079_v38  ;;  %9602 = vmatpush2.bf16.msra.mxu0 %v11756_v52  ;;  %v10088_v3 = vmax.f32 %v8633_v19, 0.0  ;;  %v8637_v4 = vadd.f32 %v8636_v40, %v17524_v22  ;;  %v17944_v13 = vpop.f32.mrf.mxu0  ;;  %9482 = vmatprep.subr.bf16.mxu1 %v12163_v23  ;;  %v20428_v52 = vld [vmem:[#allocation37_spill] sm:$0xff]  ;;  %v20431_v38 = vld [vmem:[#allocation48_spill] sm:$0xff]  ;;  %v12154_v19 = vcombine.low %v17916_v57, %v5611_v24 }
 0x3c6   :  { %9313 = vmatmul.mubr.bf16.gmra.mxu1 %v20427_v12  ;;  %9603 = vmatprep.subr.bf16.mxu0 %v11749_v8  ;;  %v8638_v36 = vpop.f32.mrf.mxu1  ;;  %v17968_v40 = vld [vmem:[%s20024_s3 + $0xf10] sm:$0xff]  ;;  %v11733_v24 = vcombine.high %v5184_v58, %v5188_v2 }
 0x3c7   :  { %20426 = vst [vmem:[#allocation79_spill] sm:$0xff] %v17941_v26  ;;  %9446 = vmatmul.mubr.bf16.gmra.mxu0 %v20428_v52  ;;  %9322 = vmatprep.mubr.bf16.mxu1 %v20429_v35  ;;  %v8639_v22 = vadd.f32 %v8638_v36, %v17536_v10  ;;  %v17956_v23 = vpop.f32.mrf.mxu0  ;;  %v17961_v8 = vpack.c.bf16 %v10088_v3, %v10080_v31  ;;  %v5176_v3 = vld [vmem:[%s20024_s3 + $0x218] sm:$0xff]  ;;  %v17991_v35 = vld [vmem:[%s20024_s3 + $0xed0] sm:$0xff] }
 0x3c8   :  { %9455 = vmatprep.mubr.bf16.mxu0 %v20431_v38  ;;  %9483 = vmatpush2.bf16.msra.mxu1 %v12162_v53  ;;  %v8640_v11 = vpop.f32.mrf.mxu1  ;;  %v11740_v26 = vcombine.low %v5192_v29, %v5196_v60  ;;  %v12147_v31 = vcombine.high %v17939_v32, %v5603_v50  ;;  %v5595_v53 = vld [vmem:[%s20024_s3 + $0xf30] sm:$0xff] }
 0x3c9   :  { %20430 = vst [vmem:[#allocation80_spill] sm:$0xff] %v17961_v8  ;;  %9604 = vmatpush2.bf16.msra.mxu0 %v11748_v59  ;;  %v8641_v10 = vadd.f32 %v8640_v11, %v17546_v41  ;;  %v17971_v36 = vpop.f32.mrf.mxu0  ;;  %9484 = vmatprep.subr.bf16.mxu1 %v12155_v51  ;;  %v5180_v41 = vld [vmem:[%s20024_s3 + $0x238] sm:$0xff]  ;;  %v10095_v59 = vmax.f32 %v8637_v4, 0.0  ;;  %v11732_v8 = vcombine.low %v5184_v58, %v5188_v2  ;;  %v10096_v52 = vmax.f32 %v8639_v22, 0.0  ;;  %v5587_v58 = vld [vmem:[%s20024_s3 + $0xef0] sm:$0xff]  ;;  %v20435_v2 = vld [vmem:[#allocation30_spill] sm:$0xff] }
 0x3ca   :  { %9605 = vmatprep.subr.bf16.mxu0 %v11741_v7  ;;  %v8642_v57 = vpop.f32.mrf.mxu1  ;;  %v12146_v7 = vcombine.low %v17939_v32, %v5603_v50  ;;  %v12139_v38 = vcombine.high %v17968_v40, %v5595_v53  ;;  %v11725_v50 = vcombine.high %v5176_v3, %v5180_v41  ;;  %v5424_v22 = vld [vmem:[%s20024_s3 + $0x9d8] sm:$0xff] }
 0x3cb   :  { %v10103_v51 = vmax.f32 %v8641_v10, 0.0  ;;  %v8643_v29 = vadd.f32 %v8642_v57, %v17554_v33  ;;  %v17984_v60 = vpop.f32.mrf.mxu0  ;;  %v5428_v57 = vld [vmem:[%s20024_s3 + $0x9f8] sm:$0xff] }
 0x3cc   :  { %9485 = vmatpush2.bf16.msra.mxu1 %v12154_v19  ;;  %v8646_v11 = vpop.f32.mrf.mxu1  ;;  %v20433_v19 = vld [vmem:[#allocation27_spill] sm:$0xff] }
 0x3cd   :  { %v17993_v12 = vpack.c.bf16 %v10103_v51, %v10095_v59  ;;  %9606 = vmatpush2.bf16.msra.mxu0 %v11740_v26  ;;  %v10104_v4 = vmax.f32 %v8643_v29, 0.0  ;;  %v8647_v33 = vadd.f32 %v8646_v11, %v17566_v20  ;;  %v17996_v10 = vpop.f32.mrf.mxu0  ;;  %9486 = vmatprep.subr.bf16.mxu1 %v12147_v31  ;;  %v20434_v26 = vld [vmem:[#allocation39_spill] sm:$0xff]  ;;  %v12138_v29 = vcombine.low %v17968_v40, %v5595_v53 }
 0x3ce   :  { %9323 = vmatmul.mubr.bf16.gmra.mxu1 %v20433_v19  ;;  %9607 = vmatprep.subr.bf16.mxu0 %v11733_v24  ;;  %v8648_v32 = vpop.f32.mrf.mxu1  ;;  %v20437_v59 = vld [vmem:[#allocation3_spill] sm:$0xff]  ;;  %v11973_v40 = vcombine.high %v5424_v22, %v5428_v57  ;;  %v20462_v19 = vld [vmem:[#allocation10_spill] sm:$0xff] }
 0x3cf   :  { %20432 = vst [vmem:[#allocation81_spill] sm:$0xff] %v17993_v12  ;;  %9456 = vmatmul.mubr.bf16.gmra.mxu0 %v20434_v26  ;;  %9332 = vmatprep.mubr.bf16.mxu1 %v20435_v2  ;;  %v8649_v20 = vadd.f32 %v8648_v32, %v17578_v9  ;;  %v18008_v31 = vpop.f32.mrf.mxu0  ;;  %v18013_v24 = vpack.c.bf16 %v10104_v4, %v10096_v52  ;;  %v5575_v52 = vld [vmem:[%s20024_s3 + $0xe90] sm:$0xff] }
 0x3d0   :  { %9487 = vmatpush2.bf16.msra.mxu1 %v12146_v7  ;;  %9611 = vmatprep.mubr.bf16.mxu0 %v20437_v59  ;;  %v8650_v51 = vpop.f32.mrf.mxu1  ;;  %v11724_v9 = vcombine.low %v5176_v3, %v5180_v41  ;;  %v12131_v32 = vcombine.high %v17991_v35, %v5587_v58  ;;  %v5579_v7 = vld [vmem:[%s20024_s3 + $0xeb0] sm:$0xff] }
 0x3d1   :  { %20436 = vst [vmem:[#allocation82_spill] sm:$0xff] %v18013_v24  ;;  %9608 = vmatpush2.bf16.msra.mxu0 %v11732_v8  ;;  %v8651_v11 = vadd.f32 %v8650_v51, %v17588_v30  ;;  %v18018_v12 = vpop.f32.mrf.mxu0  ;;  %9488 = vmatprep.subr.bf16.mxu1 %v12139_v38  ;;  %v5416_v30 = vld [vmem:[%s20024_s3 + $0x998] sm:$0xff]  ;;  %v10111_v38 = vmax.f32 %v8647_v33, 0.0  ;;  %v11972_v51 = vcombine.low %v5424_v22, %v5428_v57  ;;  %v18040_v24 = vld [vmem:[%s20024_s3 + $0xe50] sm:$0xff]  ;;  %v10112_v2 = vmax.f32 %v8649_v20, 0.0 }
 0x3d2   :  { %9609 = vmatprep.subr.bf16.mxu0 %v11725_v50  ;;  %v8652_v4 = vpop.f32.mrf.mxu1  ;;  %v5420_v8 = vld [vmem:[%s20024_s3 + $0x9b8] sm:$0xff]  ;;  %v12130_v50 = vcombine.low %v17991_v35, %v5587_v58  ;;  %v12123_v58 = vcombine.high %v5575_v52, %v5579_v7  ;;  %v5571_v57 = vld [vmem:[%s20024_s3 + $0xe70] sm:$0xff] }
 0x3d3   :  { %v10119_v53 = vmax.f32 %v8651_v11, 0.0  ;;  %v8653_v3 = vadd.f32 %v8652_v4, %v17596_v55  ;;  %v18034_v41 = vpop.f32.mrf.mxu0  ;;  %v11965_v22 = vcombine.high %v5416_v30, %v5420_v8  ;;  %v5408_v20 = vld [vmem:[%s20024_s3 + $0x958] sm:$0xff] }
 0x3d4   :  { %9489 = vmatpush2.bf16.msra.mxu1 %v12138_v29  ;;  %v8656_v59 = vpop.f32.mrf.mxu1  ;;  %v20439_v29 = vld [vmem:[#allocation29_spill] sm:$0xff] }
 0x3d5   :  { %v18042_v26 = vpack.c.bf16 %v10119_v53, %v10111_v38  ;;  %9610 = vmatpush2.bf16.msra.mxu0 %v11724_v9  ;;  %v10120_v33 = vmax.f32 %v8653_v3, 0.0  ;;  %v8657_v11 = vadd.f32 %v8656_v59, %v17608_v18  ;;  %v18045_v55 = vpop.f32.mrf.mxu0  ;;  %9490 = vmatprep.subr.bf16.mxu1 %v12131_v32  ;;  %v20440_v9 = vld [vmem:[#allocation32_spill] sm:$0xff]  ;;  %v5412_v32 = vld [vmem:[%s20024_s3 + $0x978] sm:$0xff]  ;;  %v12122_v53 = vcombine.low %v5575_v52, %v5579_v7 }
 0x3d6   :  { %9333 = vmatmul.mubr.bf16.gmra.mxu1 %v20439_v29  ;;  %9805 = vmatprep.subr.bf16.mxu0 %v11973_v40  ;;  %v8658_v35 = vpop.f32.mrf.mxu1  ;;  %v20442_v3 = vld [vmem:[#allocation4_spill] sm:$0xff]  ;;  %v11957_v7 = vcombine.high %v5408_v20, %v5412_v32 }
 0x3d7   :  { %20438 = vst [vmem:[#allocation3_spill] sm:$0xff] %v18042_v26  ;;  %9342 = vmatprep.mubr.bf16.mxu1 %v20440_v9  ;;  %v8659_v18 = vadd.f32 %v8658_v35, %v17620_v48  ;;  %v18056_v4 = vpop.f32.mrf.mxu0  ;;  %v18061_v40 = vpack.c.bf16 %v10120_v33, %v10112_v2  ;;  %v11964_v48 = vcombine.low %v5416_v30, %v5420_v8  ;;  %v18072_v2 = vld [vmem:[%s20024_s3 + $0xe10] sm:$0xff]  ;;  %v5404_v30 = vld [vmem:[%s20024_s3 + $0x938] sm:$0xff]  ;;  %v10127_v8 = vmax.f32 %v8657_v11, 0.0 }
 0x3d8   :  { %9612 = vmatmul.mubr.bf16.vlgmr.msra.gmra.mxu0 %v20358_v45  ;;  %9491 = vmatpush2.bf16.msra.mxu1 %v12130_v50  ;;  %v8660_v38 = vpop.f32.mrf.mxu1  ;;  %v12115_v35 = vcombine.high %v18040_v24, %v5571_v57  ;;  %v5563_v45 = vld [vmem:[%s20024_s3 + $0xe30] sm:$0xff] }
 0x3d9   :  { %20441 = vst [vmem:[#allocation83_spill] sm:$0xff] %v18061_v40  ;;  %9621 = vmatprep.mubr.bf16.mxu0 %v20442_v3  ;;  %9806 = vmatpush1.bf16.msra.mxu0 %v11972_v51  ;;  %v8661_v59 = vadd.f32 %v8660_v38, %v17630_v44  ;;  %v18066_v26 = vpop.f32.mrf.mxu0  ;;  %v5400_v44 = vld [vmem:[%s20024_s3 + $0x918] sm:$0xff]  ;;  %v10128_v40 = vmax.f32 %v8659_v18, 0.0  ;;  %v20461_v29 = vld [vmem:[#allocation60_spill] sm:$0xff] }
 0x3da   :  { %9492 = vmatprep.subr.bf16.mxu1 %v12123_v58  ;;  %9807 = vmatprep.subr.bf16.mxu0 %v11965_v22  ;;  %v8662_v52 = vpop.f32.mrf.mxu1  ;;  %v12114_v58 = vcombine.low %v18040_v24, %v5571_v57  ;;  %v11956_v22 = vcombine.low %v5408_v20, %v5412_v32  ;;  %v18090_v3 = vld [vmem:[%s20024_s3 + $0x5d8] sm:$0xff]  ;;  %v12107_v57 = vcombine.high %v18072_v2, %v5563_v45 }
 0x3db   :  { %v10135_v50 = vmax.f32 %v8661_v59, 0.0  ;;  %v8663_v51 = vadd.f32 %v8662_v52, %v17638_v63  ;;  %v18084_v33 = vpop.f32.mrf.mxu0  ;;  %v11949_v20 = vcombine.high %v5400_v44, %v5404_v30  ;;  %v18102_v18 = vld [vmem:[%s20024_s3 + $0x5f8] sm:$0xff] }
 0x3dc   :  { %9493 = vmatpush2.bf16.msra.mxu1 %v12122_v53  ;;  %v8666_v38 = vpop.f32.mrf.mxu1  ;;  %v18107_v32 = vld [vmem:[%s20024_s3 + $0x8d8] sm:$0xff]  ;;  %v20444_v53 = vld [vmem:[#allocation7_spill] sm:$0xff] }
 0x3dd   :  { %v18092_v9 = vpack.c.bf16 %v10135_v50, %v10127_v8  ;;  %9808 = vmatpush1.bf16.msra.mxu0 %v11964_v48  ;;  %v10136_v11 = vmax.f32 %v8663_v51, 0.0  ;;  %v8667_v59 = vadd.f32 %v8666_v38, %v17650_v39  ;;  %v18095_v63 = vpop.f32.mrf.mxu0  ;;  %9494 = vmatprep.subr.bf16.mxu1 %v12115_v35  ;;  %v12755_v39 = vld [vmem:[%s20025_s4] sm:$0xff]  ;;  %v20445_v48 = vsub.s32 2, %v20444_v53  ;;  %v18123_v8 = vld [vmem:[%s20024_s3 + $0x8f8] sm:$0xff] }
 0x3de   :  { %9343 = vmatmul.mubr.bf16.gmra.mxu1 %v20360_v1  ;;  %9809 = vmatprep.subr.bf16.mxu0 %v11957_v7  ;;  %v8668_v24 = vpop.f32.mrf.mxu1  ;;  %v20447_v51 = vsub.s32 3, %v20444_v53 }
 0x3df   :  { %20443 = vst [vmem:[#allocation4_spill] sm:$0xff] %v18092_v9  ;;  %v18114_v35 = vrot.slane %v12755_v39, %v20445_v48  ;;  %9498 = vmatprep.mubr.bf16.mxu1 %v16549_v46  ;;  %v8669_v52 = vadd.f32 %v8668_v24, %v17662_v17  ;;  %v18118_v7 = vpop.f32.mrf.mxu0  ;;  %v18125_v50 = vpack.c.bf16 %v10136_v11, %v10128_v40  ;;  %v18142_v11 = vld [vmem:[%s20024_s3 + $0x598] sm:$0xff] }
 0x3e0   :  { %v18129_v38 = vrot.slane %v12755_v39, %v20447_v51  ;;  %9622 = vmatmul.mubr.bf16.gmra.mxu0 %v14379_v49  ;;  %9495 = vmatpush2.bf16.msra.mxu1 %v12114_v58  ;;  %v8670_v48 = vpop.f32.mrf.mxu1  ;;  %v12106_v9 = vcombine.low %v18072_v2, %v5563_v45  ;;  %v11948_v46 = vcombine.low %v5400_v44, %v5404_v30  ;;  %v18147_v49 = vld [vmem:[%s20024_s3 + $0x5b8] sm:$0xff]  ;;  %v10143_v30 = vmax.f32 %v8667_v59, 0.0 }
 0x3e1   :  { %20446 = vst [vmem:[#allocation84_spill] sm:$0xff] %v18125_v50  ;;  %9631 = vmatprep.mubr.bf16.mxu0 %v14461_v34  ;;  %9810 = vmatpush1.bf16.msra.mxu0 %v11956_v22  ;;  %v8671_v17 = vadd.f32 %v8670_v48, %v17668_v6  ;;  %v18135_v24 = vpop.f32.mrf.mxu0  ;;  %v11845_v40 = vcombine.high %v18090_v3, %v18102_v18  ;;  %v18154_v2 = vld [vmem:[%s20024_s3 + $0x898] sm:$0xff]  ;;  %v10144_v48 = vmax.f32 %v8669_v52, 0.0 }
 0x3e2   :  { %9496 = vmatprep.subr.bf16.mxu1 %v12107_v57  ;;  %9811 = vmatprep.subr.bf16.mxu0 %v11949_v20  ;;  %v8672_v34 = vpop.f32.mrf.mxu1  ;;  %v11941_v6 = vcombine.high %v18107_v32, %v18123_v8  ;;  %v18159_v45 = vld [vmem:[%s20024_s3 + $0x8b8] sm:$0xff]  ;;  %v8710_v44 = vadd.f32 %v17681_v21, %v18114_v35  ;;  %v8712_v20 = vadd.f32 %v17698_v47, %v18129_v38 }
 0x3e3   :  { %v10151_v58 = vmax.f32 %v8671_v17, 0.0  ;;  %v8673_v22 = vadd.f32 %v8672_v34, %v17679_v16  ;;  %v18164_v57 = vpop.f32.mrf.mxu0  ;;  %v11844_v51 = vcombine.low %v18090_v3, %v18102_v18  ;;  %v18177_v16 = vld [vmem:[%s20024_s3 + $0x558] sm:$0xff]  ;;  %v11837_v3 = vcombine.high %v18142_v11, %v18147_v49 }
 0x3e4   :  { %9497 = vmatpush2.bf16.msra.mxu1 %v12106_v9  ;;  %v8822_v39 = vpop.f32.mrf.mxu1  ;;  %v18182_v47 = vld [vmem:[%s20024_s3 + $0x578] sm:$0xff]  ;;  %v11940_v9 = vcombine.low %v18107_v32, %v18123_v8  ;;  %v11933_v18 = vcombine.high %v18154_v2, %v18159_v45  ;;  %v8714_v32 = vadd.f32 %v17701_v56, %v18114_v35  ;;  %v20449_v8 = vld [vmem:[#allocation67_spill] sm:$0xff]  ;;  %v20453_v56 = vld [vmem:[#allocation2_spill] sm:$0xff] }
 0x3e5   :  { %v18170_v50 = vpack.c.bf16 %v10151_v58, %v10143_v30  ;;  %9812 = vmatpush1.bf16.msra.mxu0 %v11948_v46  ;;  %v10152_v53 = vmax.f32 %v8673_v22, 0.0  ;;  %v8823_v21 = vadd.f32 %v8822_v39, %v8710_v44  ;;  %v18172_v59 = vpop.f32.mrf.mxu0  ;;  %9692 = vmatprep.subr.bf16.mxu1 %v11845_v40  ;;  %v18193_v52 = vld [vmem:[%s20024_s3 + $0x858] sm:$0xff]  ;;  %v20452_v58 = vld [vmem:[#allocation68_spill] sm:$0xff]  ;;  %v11836_v39 = vcombine.low %v18142_v11, %v18147_v49 }
 0x3e6   :  { %9813 = vmatprep.subr.bf16.mxu0 %v11941_v6  ;;  %v8824_v46 = vpop.f32.mrf.mxu1  ;;  %v18198_v17 = vld [vmem:[%s20024_s3 + $0x878] sm:$0xff] }
 0x3e7   :  { %20448 = vst [vmem:[#allocation85_spill] sm:$0xff] %v18170_v50  ;;  %9499 = vmatmul.mubr.bf16.vlgmr.msra.gmra.mxu1 %v20449_v8  ;;  %v8825_v40 = vadd.f32 %v8824_v46, %v8712_v20  ;;  %v18203_v34 = vpop.f32.mrf.mxu0  ;;  %v18206_v6 = vadd.f32 %v18045_v55, %v8823_v21  ;;  %v18208_v44 = vpack.c.bf16 %v10152_v53, %v10144_v48  ;;  %v20451_v30 = vld [vmem:[#allocation5_spill] sm:$0xff]  ;;  %v20454_v8 = vld [vmem:[#allocation8_spill] sm:$0xff] }
 0x3e8   :  { %9632 = vmatmul.mubr.bf16.gmra.mxu0 %v20451_v30  ;;  %9508 = vmatprep.mubr.bf16.mxu1 %v20452_v58  ;;  %v8826_v22 = vpop.f32.mrf.mxu1  ;;  %v8716_v50 = vadd.f32 %v20453_v56, %v18129_v38  ;;  %v18222_v55 = vld [vmem:[%s20024_s3 + $0x518] sm:$0xff]  ;;  %v11932_v48 = vcombine.low %v18154_v2, %v18159_v45  ;;  %v20456_v2 = vld [vmem:[#allocation64_spill] sm:$0xff] }
 0x3e9   :  { %20450 = vst [vmem:[#allocation86_spill] sm:$0xff] %v18208_v44  ;;  %9641 = vmatprep.mubr.bf16.mxu0 %v20454_v8  ;;  %9693 = vmatpush1.bf16.msra.mxu1 %v11844_v51  ;;  %v8827_v20 = vadd.f32 %v8826_v22, %v8714_v32  ;;  %v18217_v46 = vpop.f32.mrf.mxu0  ;;  %v18227_v53 = vld [vmem:[%s20024_s3 + $0x538] sm:$0xff]  ;;  %v18240_v51 = vadd.f32 %v18056_v4, %v8825_v40  ;;  %v20455_v8 = vld [vmem:[#allocation59_spill] sm:$0xff] }
 0x3ea   :  { %v18232_v11 = vld [vmem:[%s20024_s3 + $0x818] sm:$0xff]  ;;  %9814 = vmatpush1.bf16.msra.mxu0 %v11940_v9  ;;  %9694 = vmatprep.subr.bf16.mxu1 %v11837_v3  ;;  %v8828_v21 = vpop.f32.mrf.mxu1  ;;  %v11829_v32 = vcombine.high %v18177_v16, %v18182_v47  ;;  %v8720_v30 = vadd.f32 %v20455_v8, %v18114_v35  ;;  %v11925_v4 = vcombine.high %v18193_v52, %v18198_v17 }
 0x3eb   :  { %v18237_v49 = vld [vmem:[%s20024_s3 + $0x838] sm:$0xff]  ;;  %9815 = vmatprep.subr.bf16.mxu0 %v11933_v18  ;;  %v8829_v22 = vadd.f32 %v8828_v21, %v8716_v50  ;;  %v18248_v56 = vpop.f32.mrf.mxu0  ;;  %v18253_v9 = vadd.f32 %v18066_v26, %v8827_v20  ;;  %v8722_v45 = vadd.f32 %v20456_v2, %v18129_v38  ;;  %v11828_v18 = vcombine.low %v18177_v16, %v18182_v47  ;;  %v20460_v2 = vld [vmem:[#allocation70_spill] sm:$0xff] }
 0x3ec   :  { %v8832_v3 = vpop.f32.mrf.mxu1  ;;  %v18264_v50 = vld [vmem:[%s20024_s3 + $0x4d8] sm:$0xff]  ;;  %v11821_v16 = vcombine.high %v18222_v55, %v18227_v53  ;;  %v11917_v47 = vcombine.high %v18232_v11, %v18237_v49  ;;  %v11820_v1 = vcombine.low %v18222_v55, %v18227_v53 }
 0x3ed   :  { %9695 = vmatpush1.bf16.msra.mxu1 %v11836_v39  ;;  %v8833_v40 = vadd.f32 %v8832_v3, %v8720_v30  ;;  %v18257_v44 = vpop.f32.mrf.mxu0  ;;  %v18269_v26 = vld [vmem:[%s20024_s3 + $0x4f8] sm:$0xff]  ;;  %v18272_v20 = vadd.f32 %v18084_v33, %v8829_v22  ;;  %v11924_v39 = vcombine.low %v18193_v52, %v18198_v17  ;;  %v20459_v3 = vld [vmem:[#allocation6_spill] sm:$0xff] }
 0x3ee   :  { %9816 = vmatpush1.bf16.msra.mxu0 %v11932_v48  ;;  %9696 = vmatprep.subr.bf16.mxu1 %v11829_v32  ;;  %v8834_v21 = vpop.f32.mrf.mxu1  ;;  %v18283_v8 = vld [vmem:[%s20024_s3 + $0xbd8] sm:$0xff]  ;;  %v11813_v53 = vcombine.high %v18264_v50, %v18269_v26 }
 0x3ef   :  { %v18288_v33 = vld [vmem:[%s20024_s3 + $0xbf8] sm:$0xff]  ;;  %9817 = vmatprep.subr.bf16.mxu0 %v11925_v4  ;;  %v8835_v32 = vadd.f32 %v8834_v21, %v8722_v45  ;;  %v18293_v30 = vpop.f32.mrf.mxu0  ;;  %v18296_v22 = vadd.f32 %v18095_v63, %v8833_v40 }
 0x3f0   :  { %v20457_v48 = vld [vmem:[#allocation61_spill] sm:$0xff]  ;;  %9642 = vmatmul.mubr.bf16.gmra.mxu0 %v20459_v3  ;;  %v8836_v58 = vpop.f32.mrf.mxu1 }
 0x3f1   :  { %v8724_v52 = vadd.f32 %v20457_v48, %v18114_v35  ;;  %v20458_v17 = vld [vmem:[#allocation69_spill] sm:$0xff]  ;;  %v8726_v48 = vadd.f32 %v20461_v29, %v18129_v38  ;;  %9651 = vmatprep.mubr.bf16.mxu0 %v20462_v19  ;;  %9697 = vmatpush1.bf16.msra.mxu1 %v11828_v18  ;;  %v18305_v45 = vpop.f32.mrf.mxu0  ;;  %v18323_v19 = vadd.f32 %v18118_v7, %v8835_v32  ;;  %v20463_v18 = vld [vmem:[#allocation63_spill] sm:$0xff] }
 0x3f2   :  { %9509 = vmatmul.mubr.bf16.gmra.mxu1 %v20458_v17  ;;  %v18310_v63 = vld [vmem:[%s20024_s3 + $0x498] sm:$0xff]  ;;  %9818 = vmatpush1.bf16.msra.mxu0 %v11924_v39  ;;  %v8838_v55 = vpop.f32.mrf.mxu1  ;;  %v8730_v21 = vadd.f32 %v20463_v18, %v18114_v35  ;;  %v12037_v7 = vcombine.high %v18283_v8, %v18288_v33 }
 0x3f3   :  { %9518 = vmatprep.mubr.bf16.mxu1 %v20460_v2  ;;  %v8837_v4 = vadd.f32 %v8836_v58, %v8724_v52  ;;  %v18315_v40 = vld [vmem:[%s20024_s3 + $0x4b8] sm:$0xff]  ;;  %9698 = vmatprep.subr.bf16.mxu1 %v11821_v16  ;;  %v11916_v58 = vcombine.low %v18232_v11, %v18237_v49  ;;  %v8839_v52 = vadd.f32 %v8838_v55, %v8726_v48  ;;  %v18331_v3 = vpop.f32.mrf.mxu0  ;;  %v20464_v16 = vld [vmem:[#allocation62_spill] sm:$0xff] }
 0x3f4   :  { %v18320_v29 = vld [vmem:[%s20024_s3 + $0xb98] sm:$0xff]  ;;  %9819 = vmatprep.subr.bf16.mxu0 %v11917_v47  ;;  %v8842_v49 = vpop.f32.mrf.mxu1  ;;  %v8732_v32 = vadd.f32 %v20464_v16, %v18129_v38  ;;  %v11812_v48 = vcombine.low %v18264_v50, %v18269_v26  ;;  %v11805_v2 = vcombine.high %v18310_v63, %v18315_v40  ;;  %v20467_v16 = vld [vmem:[#allocation71_spill] sm:$0xff] }
 0x3f5   :  { %v5484_v39 = vld [vmem:[%s20024_s3 + $0xbb8] sm:$0xff]  ;;  %v18339_v11 = vadd.f32 %v18135_v24, %v8837_v4  ;;  %9699 = vmatpush1.bf16.msra.mxu1 %v11820_v1  ;;  %v8843_v18 = vadd.f32 %v8842_v49, %v8730_v21  ;;  %v18343_v47 = vpop.f32.mrf.mxu0  ;;  %v18348_v55 = vadd.f32 %v18164_v57, %v8839_v52  ;;  %v12036_v24 = vcombine.low %v18283_v8, %v18288_v33  ;;  %v20466_v21 = vld [vmem:[#allocation72_spill] sm:$0xff] }
 0x3f6   :  { %9820 = vmatpush1.bf16.msra.mxu0 %v11916_v58  ;;  %9700 = vmatprep.subr.bf16.mxu1 %v11813_v53  ;;  %v8844_v4 = vpop.f32.mrf.mxu1  ;;  %v12029_v1 = vcombine.high %v18320_v29, %v5484_v39  ;;  %v8734_v49 = vadd.f32 %v20466_v21, %v18114_v35  ;;  %v5248_v26 = vld [vmem:[%s20024_s3 + $0x458] sm:$0xff] }
 0x3f7   :  { %20465 = vst [vmem:[#allocation5_spill] sm:$0xff] %v18348_v55  ;;  %9821 = vmatprep.subr.bf16.mxu0 %v12037_v7  ;;  %v8845_v50 = vadd.f32 %v8844_v4, %v8732_v32  ;;  %v18358_v57 = vpop.f32.mrf.mxu0  ;;  %v5252_v8 = vld [vmem:[%s20024_s3 + $0x478] sm:$0xff]  ;;  %v18367_v33 = vadd.f32 %v18172_v59, %v8843_v18  ;;  %v11804_v7 = vcombine.low %v18310_v63, %v18315_v40  ;;  %v20472_v18 = vld [vmem:[#allocation12_spill] sm:$0xff] }
 0x3f8   :  { %v20469_v58 = vld [vmem:[#allocation9_spill] sm:$0xff]  ;;  %v8846_v52 = vpop.f32.mrf.mxu1  ;;  %v12028_v63 = vcombine.low %v18320_v29, %v5484_v39  ;;  %v11797_v17 = vcombine.high %v5248_v26, %v5252_v8 }
 0x3f9   :  { %20468 = vst [vmem:[#allocation2_spill] sm:$0xff] %v18367_v33  ;;  %9652 = vmatmul.mubr.bf16.gmra.mxu0 %v20469_v58  ;;  %v20470_v53 = vld [vmem:[#allocation49_spill] sm:$0xff]  ;;  %9701 = vmatpush1.bf16.msra.mxu1 %v11812_v48  ;;  %v8847_v58 = vadd.f32 %v8846_v52, %v8734_v49 }
 0x3fa   :  { %9519 = vmatmul.mubr.bf16.gmra.mxu1 %v20467_v16  ;;  %v5472_v32 = vld [vmem:[%s20024_s3 + $0xb58] sm:$0xff]  ;;  %9661 = vmatprep.mubr.bf16.mxu0 %v20472_v18  ;;  %v18385_v16 = vadd.f32 %v18203_v34, %v8845_v50  ;;  %v8848_v40 = vpop.f32.mrf.mxu1 }
 0x3fb   :  { %9528 = vmatprep.mubr.bf16.mxu1 %v20470_v53  ;;  %v5476_v4 = vld [vmem:[%s20024_s3 + $0xb78] sm:$0xff]  ;;  %v18382_v53 = vpop.f32.mrf.mxu0  ;;  %9822 = vmatpush2.bf16.msra.mxu0 %v12036_v24  ;;  %v18405_v39 = vadd.f32 %v18217_v46, %v8847_v58  ;;  %v8742_v24 = vadd.f32 %v17808_v28, %v18129_v38  ;;  %v8744_v46 = vadd.f32 %v17820_v37, %v18114_v35  ;;  %v20474_v58 = vld [vmem:[#allocation50_spill] sm:$0xff] }
 0x3fc   :  { %v20471_v21 = vld [vmem:[#allocation65_spill] sm:$0xff]  ;;  %20473 = vst [vmem:[#allocation8_spill] sm:$0xff] %v18385_v16  ;;  %9702 = vmatprep.subr.bf16.mxu1 %v11805_v2  ;;  %9823 = vmatprep.subr.bf16.mxu0 %v12029_v1  ;;  %v12021_v52 = vcombine.high %v5472_v32, %v5476_v4 }
 0x3fd   :  { %v8736_v59 = vadd.f32 %v20471_v21, %v18129_v38  ;;  %v8740_v21 = vadd.f32 %v17796_v15, %v18114_v35  ;;  %v18393_v49 = vpop.f32.mrf.mxu0  ;;  %v5244_v34 = vld [vmem:[%s20024_s3 + $0x438] sm:$0xff]  ;;  %v8852_v15 = vpop.f32.mrf.mxu1  ;;  %9703 = vmatpush1.bf16.msra.mxu1 %v11804_v7 }
 0x3fe   :  { %v5464_v2 = vld [vmem:[%s20024_s3 + $0xb18] sm:$0xff]  ;;  %9704 = vmatprep.subr.bf16.mxu1 %v11797_v17  ;;  %v11789_v33 = vcombine.high %v5240_v14, %v5244_v34 }
 0x3ff   :  { %v8849_v48 = vadd.f32 %v8848_v40, %v8736_v59  ;;  %v5468_v29 = vld [vmem:[%s20024_s3 + $0xb38] sm:$0xff]  ;;  %v8853_v1 = vadd.f32 %v8852_v15, %v8740_v21  ;;  %v18409_v50 = vpop.f32.mrf.mxu0  ;;  %v11796_v59 = vcombine.low %v5248_v26, %v5252_v8  ;;  %9824 = vmatpush2.bf16.msra.mxu0 %v12028_v63  ;;  %v12020_v40 = vcombine.low %v5472_v32, %v5476_v4  ;;  %v8854_v16 = vpop.f32.mrf.mxu1  ;;  %v20475_v8 = vld [vmem:[#allocation11_spill] sm:$0xff] }
 0x400   :  { %v12013_v55 = vcombine.high %v5464_v2, %v5468_v29  ;;  %9825 = vmatprep.subr.bf16.mxu0 %v12021_v52  ;;  %v8855_v28 = vadd.f32 %v8854_v16, %v8742_v24  ;;  %v5364_v17 = vld [vmem:[%s20024_s3 + $0x7f8] sm:$0xff]  ;;  %v11788_v4 = vcombine.low %v5240_v14, %v5244_v34  ;;  %v8746_v21 = vadd.f32 %v17829_v54, %v18129_v38 }
 0x401   :  { %v18412_v18 = vadd.f32 %v18248_v56, %v8849_v48  ;;  %v18417_v7 = vpop.f32.mrf.mxu0  ;;  %v5360_v56 = vld [vmem:[%s20024_s3 + $0x7d8] sm:$0xff]  ;;  %v18426_v26 = vadd.f32 %v18257_v44, %v8853_v1  ;;  %9662 = vmatmul.mubr.bf16.gmra.mxu0 %v20475_v8  ;;  %v8856_v32 = vpop.f32.mrf.mxu1  ;;  %v20477_v48 = vld [vmem:[#allocation14_spill] sm:$0xff]  ;;  %9705 = vmatpush1.bf16.msra.mxu1 %v11796_v59  ;;  %v12012_v14 = vcombine.low %v5464_v2, %v5468_v29 }
 0x402   :  { %9529 = vmatmul.mubr.bf16.gmra.mxu1 %v20474_v58  ;;  %v20476_v37 = vld [vmem:[#allocation53_spill] sm:$0xff]  ;;  %9671 = vmatprep.mubr.bf16.mxu0 %v20477_v48  ;;  %v8857_v44 = vadd.f32 %v8856_v32, %v8744_v46  ;;  %v18442_v15 = vadd.f32 %v18293_v30, %v8855_v28  ;;  %v11909_v24 = vcombine.high %v5360_v56, %v5364_v17 }
 0x403   :  { %9538 = vmatprep.mubr.bf16.mxu1 %v20476_v37  ;;  %v5456_v16 = vld [vmem:[%s20024_s3 + $0xad8] sm:$0xff]  ;;  %v18439_v52 = vpop.f32.mrf.mxu0  ;;  %9826 = vmatpush2.bf16.msra.mxu0 %v12020_v40  ;;  %v8858_v34 = vpop.f32.mrf.mxu1  ;;  %v8750_v54 = vadd.f32 %v17840_v0, %v18114_v35  ;;  %v11908_v32 = vcombine.low %v5360_v56, %v5364_v17 }
 0x404   :  { %v5460_v63 = vld [vmem:[%s20024_s3 + $0xaf8] sm:$0xff]  ;;  %9706 = vmatprep.subr.bf16.mxu1 %v11789_v33  ;;  %9827 = vmatprep.subr.bf16.mxu0 %v12013_v55  ;;  %v8859_v59 = vadd.f32 %v8858_v34, %v8746_v21  ;;  %v18461_v29 = vadd.f32 %v18305_v45, %v8857_v44  ;;  %v8752_v55 = vadd.f32 %v17855_v25, %v18129_v38  ;;  %v20478_v44 = vld [vmem:[#allocation52_spill] sm:$0xff] }
 0x405   :  { %v5352_v1 = vld [vmem:[%s20024_s3 + $0x798] sm:$0xff]  ;;  %v18449_v46 = vpop.f32.mrf.mxu0  ;;  %v12005_v8 = vcombine.high %v5456_v16, %v5460_v63  ;;  %v8862_v0 = vpop.f32.mrf.mxu1  ;;  %9707 = vmatpush1.bf16.msra.mxu1 %v11788_v4  ;;  %v12004_v48 = vcombine.low %v5456_v16, %v5460_v63  ;;  %v8754_v45 = vadd.f32 %v17869_v61, %v18114_v35  ;;  %v20480_v61 = vld [vmem:[#allocation51_spill] sm:$0xff] }
 0x406   :  { %v5356_v30 = vld [vmem:[%s20024_s3 + $0x7b8] sm:$0xff]  ;;  %v8863_v40 = vadd.f32 %v8862_v0, %v8750_v54  ;;  %v18468_v21 = vadd.f32 %v18331_v3, %v8859_v59  ;;  %9708 = vmatprep.subr.bf16.mxu1 %v11909_v24  ;;  %v8756_v59 = vadd.f32 %v17881_v5, %v18129_v38  ;;  %v8760_v5 = vadd.f32 %v17892_v62, %v18114_v35 }
 0x407   :  { %v5448_v33 = vld [vmem:[%s20024_s3 + $0xa98] sm:$0xff]  ;;  %v18465_v28 = vpop.f32.mrf.mxu0  ;;  %9828 = vmatpush2.bf16.msra.mxu0 %v12012_v14  ;;  %v8864_v34 = vpop.f32.mrf.mxu1  ;;  %v11901_v37 = vcombine.high %v5352_v1, %v5356_v30  ;;  %v11900_v14 = vcombine.low %v5352_v1, %v5356_v30 }
 0x408   :  { %v5452_v2 = vld [vmem:[%s20024_s3 + $0xab8] sm:$0xff]  ;;  %9829 = vmatprep.subr.bf16.mxu0 %v12005_v8  ;;  %v8865_v25 = vadd.f32 %v8864_v34, %v8752_v55  ;;  %v18482_v17 = vadd.f32 %v18343_v47, %v8863_v40  ;;  %v20481_v8 = vld [vmem:[#allocation16_spill] sm:$0xff] }
 0x409   :  { %v11997_v58 = vcombine.high %v5448_v33, %v5452_v2  ;;  %v18473_v4 = vpop.f32.mrf.mxu0  ;;  %v5344_v3 = vld [vmem:[%s20024_s3 + $0x758] sm:$0xff]  ;;  %v8866_v63 = vpop.f32.mrf.mxu1  ;;  %9709 = vmatpush2.bf16.msra.mxu1 %v11908_v32  ;;  %v11996_v1 = vcombine.low %v5448_v33, %v5452_v2 }
 0x40a   :  { %9539 = vmatmul.mubr.bf16.gmra.mxu1 %v20478_v44  ;;  %v5348_v56 = vld [vmem:[%s20024_s3 + $0x778] sm:$0xff]  ;;  %v8867_v47 = vadd.f32 %v8866_v63, %v8754_v45  ;;  %v18498_v55 = vadd.f32 %v18358_v57, %v8865_v25  ;;  %9710 = vmatprep.subr.bf16.mxu1 %v11901_v37 }
 0x40b   :  { %v20479_v16 = vld [vmem:[#allocation13_spill] sm:$0xff]  ;;  %9548 = vmatprep.mubr.bf16.mxu1 %v20480_v61  ;;  %v18495_v0 = vpop.f32.mrf.mxu0  ;;  %9830 = vmatpush2.bf16.msra.mxu0 %v12004_v48  ;;  %v8868_v30 = vpop.f32.mrf.mxu1  ;;  %v11893_v40 = vcombine.high %v5344_v3, %v5348_v56  ;;  %v11892_v63 = vcombine.low %v5344_v3, %v5348_v56 }
 0x40c   :  { %9672 = vmatmul.mubr.bf16.gmra.mxu0 %v20479_v16  ;;  %v5440_v24 = vld [vmem:[%s20024_s3 + $0xa58] sm:$0xff]  ;;  %9831 = vmatprep.subr.bf16.mxu0 %v11997_v58  ;;  %v8869_v32 = vadd.f32 %v8868_v30, %v8756_v59  ;;  %v18517_v2 = vadd.f32 %v18382_v53, %v8867_v47  ;;  %v8762_v58 = vadd.f32 %v17904_v43, %v18129_v38  ;;  %v20482_v47 = vld [vmem:[#allocation54_spill] sm:$0xff] }
 0x40d   :  { %v5444_v54 = vld [vmem:[%s20024_s3 + $0xa78] sm:$0xff]  ;;  %9681 = vmatprep.mubr.bf16.mxu0 %v20481_v8  ;;  %v18505_v45 = vpop.f32.mrf.mxu0  ;;  %v8872_v62 = vpop.f32.mrf.mxu1  ;;  %9711 = vmatpush2.bf16.msra.mxu1 %v11900_v14  ;;  %v8764_v53 = vadd.f32 %v17919_v27, %v18114_v35  ;;  %v20484_v27 = vld [vmem:[#allocation58_spill] sm:$0xff] }
 0x40e   :  { %v5336_v34 = vld [vmem:[%s20024_s3 + $0x718] sm:$0xff]  ;;  %v11989_v16 = vcombine.high %v5440_v24, %v5444_v54  ;;  %v8873_v48 = vadd.f32 %v8872_v62, %v8760_v5  ;;  %v18524_v59 = vadd.f32 %v18393_v49, %v8869_v32  ;;  %9712 = vmatprep.subr.bf16.mxu1 %v11893_v40  ;;  %v11988_v8 = vcombine.low %v5440_v24, %v5444_v54  ;;  %v20483_v24 = vld [vmem:[#allocation15_spill] sm:$0xff] }
 0x40f   :  { %v5340_v57 = vld [vmem:[%s20024_s3 + $0x738] sm:$0xff]  ;;  %v18521_v25 = vpop.f32.mrf.mxu0  ;;  %9832 = vmatpush2.bf16.msra.mxu0 %v11996_v1  ;;  %v8874_v30 = vpop.f32.mrf.mxu1  ;;  %v8766_v40 = vadd.f32 %v17932_v42, %v18129_v38 }
 0x410   :  { %v5432_v37 = vld [vmem:[%s20024_s3 + $0xa18] sm:$0xff]  ;;  %v11885_v61 = vcombine.high %v5336_v34, %v5340_v57  ;;  %9833 = vmatprep.subr.bf16.mxu0 %v11989_v16  ;;  %v8875_v43 = vadd.f32 %v8874_v30, %v8762_v58  ;;  %v18538_v56 = vadd.f32 %v18409_v50, %v8873_v48  ;;  %v11884_v1 = vcombine.low %v5336_v34, %v5340_v57 }
 0x411   :  { %v5436_v33 = vld [vmem:[%s20024_s3 + $0xa38] sm:$0xff]  ;;  %v18529_v14 = vpop.f32.mrf.mxu0  ;;  %v8876_v54 = vpop.f32.mrf.mxu1  ;;  %9713 = vmatpush2.bf16.msra.mxu1 %v11892_v63  ;;  %v8770_v34 = vadd.f32 %v17944_v13, %v18114_v35 }
 0x412   :  { %v11981_v44 = vcombine.high %v5432_v37, %v5436_v33  ;;  %9549 = vmatmul.mubr.bf16.gmra.mxu1 %v20482_v47  ;;  %v5328_v49 = vld [vmem:[%s20024_s3 + $0x6d8] sm:$0xff]  ;;  %v8877_v32 = vadd.f32 %v8876_v54, %v8764_v53  ;;  %v18548_v62 = vadd.f32 %v18417_v7, %v8875_v43  ;;  %9714 = vmatprep.subr.bf16.mxu1 %v11885_v61 }
 0x413   :  { %v5332_v3 = vld [vmem:[%s20024_s3 + $0x6f8] sm:$0xff]  ;;  %9558 = vmatprep.mubr.bf16.mxu1 %v20484_v27  ;;  %v18545_v16 = vpop.f32.mrf.mxu0  ;;  %9834 = vmatpush2.bf16.msra.mxu0 %v11988_v8  ;;  %v11980_v50 = vcombine.low %v5432_v37, %v5436_v33  ;;  %v8878_v58 = vpop.f32.mrf.mxu1 }
 0x414   :  { %9682 = vmatmul.mubr.bf16.gmra.mxu0 %v20483_v24  ;;  %v20485_v5 = vld [vmem:[#allocation41_spill] sm:$0xff]  ;;  %v11877_v48 = vcombine.high %v5328_v49, %v5332_v3  ;;  %9835 = vmatprep.subr.bf16.mxu0 %v11981_v44  ;;  %v8879_v57 = vadd.f32 %v8878_v58, %v8766_v40  ;;  %v18564_v37 = vadd.f32 %v18439_v52, %v8877_v32 }
 0x415   :  { %9837 = vmatprep.mubr.bf16.mxu0 %v20485_v5  ;;  %v18552_v42 = vpop.f32.mrf.mxu0  ;;  %v5320_v63 = vld [vmem:[%s20024_s3 + $0x698] sm:$0xff]  ;;  %v8882_v13 = vpop.f32.mrf.mxu1  ;;  %v8772_v44 = vadd.f32 %v17956_v23, %v18129_v38  ;;  %9715 = vmatpush2.bf16.msra.mxu1 %v11884_v1  ;;  %v11876_v8 = vcombine.low %v5328_v49, %v5332_v3  ;;  %v8774_v52 = vadd.f32 %v17971_v36, %v18114_v35  ;;  %v20487_v36 = vld [vmem:[#allocation56_spill] sm:$0xff] }
 0x416   :  { %v5324_v7 = vld [vmem:[%s20024_s3 + $0x6b8] sm:$0xff]  ;;  %v8883_v33 = vadd.f32 %v8882_v13, %v8770_v34  ;;  %v18569_v30 = vadd.f32 %v18449_v46, %v8879_v57  ;;  %9716 = vmatprep.subr.bf16.mxu1 %v11877_v48  ;;  %v8776_v58 = vadd.f32 %v17984_v60, %v18129_v38  ;;  %v20488_v48 = vld [vmem:[#allocation40_spill] sm:$0xff]  ;;  %v20489_v57 = vld [vmem:[#allocation43_spill] sm:$0xff]  ;;  %v8780_v13 = vadd.f32 %v17996_v10, %v18114_v35 }
 0x417   :  { %v12568_v61 = vld [vmem:[%s20026_s5 + $0x78] sm:$0xff]   ;;  %9836 = vmatpush2.bf16.msra.mxu0 %v11980_v50  ;;  %v18571_v53 = vpop.f32.mrf.mxu0  ;;  %v8884_v43 = vpop.f32.mrf.mxu1  ;;  %v11869_v24 = vcombine.high %v5320_v63, %v5324_v7  ;;  %v11868_v32 = vcombine.low %v5320_v63, %v5324_v7  ;;  %v12570_v50 = vld [vmem:[%s20026_s5 + $0x70] sm:$0xff]  }
 0x418   :  { %v20486_v54 = vld [vmem:[#allocation57_spill] sm:$0xff]  ;;  %v8885_v40 = vadd.f32 %v8884_v43, %v8772_v44  ;;  %12231 = vmatprep.subr.bf16.mxu0 %v12568_v61  ;;  %v18586_v3 = vadd.f32 %v18465_v28, %v8883_v33  ;;  %v12571_v33 = vld [vmem:[%s20026_s5 + $0x30] sm:$0xff]  }
 0x419   :  { %v5312_v23 = vld [vmem:[%s20024_s3 + $0x658] sm:$0xff]  ;;  %v18589_v1 = vpop.f32.mrf.mxu0  ;;  %v8886_v5 = vpop.f32.mrf.mxu1  ;;  %9717 = vmatpush2.bf16.msra.mxu1 %v11876_v8 }
 0x41a   :  { %9559 = vmatmul.mubr.bf16.gmra.mxu1 %v20486_v54  ;;  %v5316_v46 = vld [vmem:[%s20024_s3 + $0x678] sm:$0xff]  ;;  %v8887_v34 = vadd.f32 %v8886_v5, %v8774_v52  ;;  %v18598_v28 = vadd.f32 %v18473_v4, %v8885_v40  ;;  %9718 = vmatprep.subr.bf16.mxu1 %v11869_v24  ;;  %v12572_v24 = vld [vmem:[%s20026_s5 + $0x68] sm:$0xff]   ;;  %v8782_v52 = vadd.f32 %v18008_v31, %v18129_v38 }
 0x41b   :  { %v12569_v49 = vld [vmem:[%s20026_s5 + $0x38] sm:$0xff]   ;;  %9568 = vmatprep.mubr.bf16.mxu1 %v20487_v36  ;;  %v18601_v61 = vpop.f32.mrf.mxu0  ;;  %v8888_v63 = vpop.f32.mrf.mxu1  ;;  %v11861_v7 = vcombine.high %v5312_v23, %v5316_v46 }
 0x41c   :  { %9838 = vmatmul.mubr.bf16.vlgmr.msra.gmra.mxu0 %v20488_v48  ;;  %v8889_v44 = vadd.f32 %v8888_v63, %v8776_v58  ;;  %v5304_v60 = vld [vmem:[%s20024_s3 + $0x618] sm:$0xff]  ;;  %v18615_v8 = vadd.f32 %v18495_v0, %v8887_v34  ;;  %v20490_v34 = vld [vmem:[#allocation55_spill] sm:$0xff] }
 0x41d   :  { %9847 = vmatprep.mubr.bf16.mxu0 %v20489_v57  ;;  %v5308_v4 = vld [vmem:[%s20024_s3 + $0x638] sm:$0xff]  ;;  %12232 = vmatpush3.bf16.msra.mxu0 %v12569_v49  ;;  %v18617_v43 = vpop.f32.mrf.mxu0  ;;  %v8892_v10 = vpop.f32.mrf.mxu1  ;;  %v11860_v49 = vcombine.low %v5312_v23, %v5316_v46  ;;  %v12573_v23 = vld [vmem:[%s20026_s5 + $0x28] sm:$0xff]  }
 0x41e   :  { %12233 = vmatprep.subr.bf16.mxu0 %v12570_v50  ;;  %9719 = vmatpush2.bf16.msra.mxu1 %v11868_v32  ;;  %v8893_v40 = vadd.f32 %v8892_v10, %v8780_v13  ;;  %v18625_v5 = vadd.f32 %v18505_v45, %v8889_v44  ;;  %v11853_v48 = vcombine.high %v5304_v60, %v5308_v4  ;;  %v5552_v31 = vld [vmem:[%s20024_s3 + $0xdd8] sm:$0xff]  ;;  %v20492_v44 = vld [vmem:[#allocation42_spill] sm:$0xff] }
 0x41f   :  { %v18627_v58 = vpop.f32.mrf.mxu0  ;;  %9720 = vmatprep.subr.bf16.mxu1 %v11861_v7  ;;  %v8894_v0 = vpop.f32.mrf.mxu1  ;;  %v8784_v50 = vadd.f32 %v18018_v12, %v18114_v35  ;;  %v5556_v45 = vld [vmem:[%s20024_s3 + $0xdf8] sm:$0xff]  ;;  %v20491_v12 = vld [vmem:[#allocation18_spill] sm:$0xff]  ;;  %v11852_v63 = vcombine.low %v5304_v60, %v5308_v4  ;;  %v8786_v13 = vadd.f32 %v18034_v41, %v18129_v38 }
 0x420   :  { %v8895_v57 = vadd.f32 %v8894_v0, %v8782_v52  ;;  %v18642_v46 = vadd.f32 %v18521_v25, %v8893_v40  ;;  %v12574_v7 = vld [vmem:[%s20026_s5 + $0x60] sm:$0xff]   ;;  %v20493_v10 = vld [vmem:[#allocation45_spill] sm:$0xff]  ;;  %v12101_v4 = vcombine.high %v5552_v31, %v5556_v45 }
 0x421   :  { %12234 = vmatpush3.bf16.msra.mxu0 %v12571_v33  ;;  %v18645_v35 = vpop.f32.mrf.mxu0  ;;  %v8896_v32 = vpop.f32.mrf.mxu1  ;;  %v12575_v41 = vld [vmem:[%s20026_s5 + $0x20] sm:$0xff]   ;;  %v12576_v0 = vld [vmem:[%s20026_s5 + $0x58] sm:$0xff]  }
 0x422   :  { %9569 = vmatmul.mubr.bf16.gmra.mxu1 %v20490_v34  ;;  %12235 = vmatprep.subr.bf16.mxu0 %v12572_v24  ;;  %v8897_v33 = vadd.f32 %v8896_v32, %v8784_v50  ;;  %v18654_v25 = vadd.f32 %v18529_v14, %v8895_v57  ;;  %v5544_v14 = vld [vmem:[%s20024_s3 + $0xd98] sm:$0xff] }
 0x423   :  { %9724 = vmatprep.mubr.bf16.mxu1 %v20491_v12  ;;  %9721 = vmatpush2.bf16.msra.mxu1 %v11860_v49  ;;  %v18657_v52 = vpop.f32.mrf.mxu0  ;;  %v8898_v60 = vpop.f32.mrf.mxu1  ;;  %v5548_v49 = vld [vmem:[%s20024_s3 + $0xdb8] sm:$0xff] }
 0x424   :  { %9848 = vmatmul.mubr.bf16.gmra.mxu0 %v20492_v44  ;;  %20494 = vst [vmem:[#allocation59_spill] sm:$0xff] %v18657_v52  ;;  %9722 = vmatprep.subr.bf16.mxu1 %v11853_v48  ;;  %v8899_v24 = vadd.f32 %v8898_v60, %v8786_v13  ;;  %v18663_v38 = vadd.f32 %v18545_v16, %v8897_v33  ;;  %v20496_v13 = vld [vmem:[#allocation17_spill] sm:$0xff]  ;;  %v20498_v33 = vld [vmem:[#allocation20_spill] sm:$0xff] }
 0x425   :  { %9857 = vmatprep.mubr.bf16.mxu0 %v20493_v10  ;;  %12236 = vmatpush3.bf16.msra.mxu0 %v12573_v23  ;;  %v18665_v40 = vpop.f32.mrf.mxu0  ;;  %v9048_v48 = vpop.f32.mrf.mxu1  ;;  %v12100_v23 = vcombine.low %v5552_v31, %v5556_v45  ;;  %v12093_v32 = vcombine.high %v5544_v14, %v5548_v49  ;;  %v12578_v31 = vld [vmem:[%s20026_s5 + $0x50] sm:$0xff]   ;;  %v20499_v10 = vld [vmem:[#allocation47_spill] sm:$0xff] }
 0x426   :  { %20495 = vst [vmem:[#allocation64_spill] sm:$0xff] %v18665_v40  ;;  %12237 = vmatprep.subr.bf16.mxu0 %v12574_v7  ;;  %v18677_v16 = vadd.f32 %v18552_v42, %v8899_v24  ;;  %v9049_v50 = vadd.f32 %v9048_v48, %v18206_v6  ;;  %v12577_v7 = vld [vmem:[%s20026_s5 + $0x18] sm:$0xff]   ;;  %v20497_v45 = vld [vmem:[#allocation44_spill] sm:$0xff]  ;;  %v12092_v24 = vcombine.low %v5544_v14, %v5548_v49  ;;  %v12580_v49 = vld [vmem:[%s20026_s5 + $0x48] sm:$0xff]  }
 0x427   :  { %9723 = vmatpush2.bf16.msra.mxu1 %v11852_v63  ;;  %v18680_v57 = vpop.f32.mrf.mxu0  ;;  %v9050_v12 = vpop.f32.mrf.mxu1  ;;  %v5536_v6 = vld [vmem:[%s20024_s3 + $0xd58] sm:$0xff]  ;;  %v12579_v48 = vld [vmem:[%s20026_s5 + $0x10] sm:$0xff]  }
 0x428   :  { %9918 = vmatprep.subr.bf16.mxu1 %v12101_v4  ;;  %v9051_v63 = vadd.f32 %v9050_v12, %v18240_v51  ;;  %v5540_v42 = vld [vmem:[%s20024_s3 + $0xd78] sm:$0xff]  ;;  %v10033_v12 = vmax.f32 %v9049_v50, 0.0 }
 0x429   :  { %12238 = vmatpush3.bf16.msra.mxu0 %v12575_v41  ;;  %v18687_v44 = vpop.f32.mrf.mxu0  ;;  %v9052_v51 = vpop.f32.mrf.mxu1  ;;  %v5532_v14 = vld [vmem:[%s20024_s3 + $0xd38] sm:$0xff]  ;;  %v12084_v50 = vcombine.low %v5536_v6, %v5540_v42 }
 0x42a   :  { %9725 = vmatmul.mubr.bf16.vlgmr.msra.gmra.mxu1 %v20496_v13  ;;  %12239 = vmatprep.subr.bf16.mxu0 %v12576_v0  ;;  %v9053_v60 = vadd.f32 %v9052_v51, %v18253_v9  ;;  %v12085_v0 = vcombine.high %v5536_v6, %v5540_v42  ;;  %v5528_v9 = vld [vmem:[%s20024_s3 + $0xd18] sm:$0xff] }
 0x42b   :  { %9734 = vmatprep.mubr.bf16.mxu1 %v20498_v33  ;;  %9919 = vmatpush1.bf16.msra.mxu1 %v12100_v23  ;;  %v18702_v4 = vpop.f32.mrf.mxu0  ;;  %v9054_v41 = vpop.f32.mrf.mxu1  ;;  %v5524_v42 = vld [vmem:[%s20024_s3 + $0xcf8] sm:$0xff] }
 0x42c   :  { %9858 = vmatmul.mubr.bf16.gmra.mxu0 %v20497_v45  ;;  %20500 = vst [vmem:[#allocation61_spill] sm:$0xff] %v18702_v4  ;;  %9920 = vmatprep.subr.bf16.mxu1 %v12093_v32  ;;  %v10041_v13 = vmax.f32 %v9053_v60, 0.0  ;;  %v9055_v45 = vadd.f32 %v9054_v41, %v18272_v20  ;;  %v10034_v32 = vmax.f32 %v9051_v63, 0.0  ;;  %v12077_v41 = vcombine.high %v5528_v9, %v5532_v14 }
 0x42d   :  { %9867 = vmatprep.mubr.bf16.mxu0 %v20499_v10  ;;  %12240 = vmatpush3.bf16.msra.mxu0 %v12577_v7  ;;  %v18708_v33 = vpop.f32.mrf.mxu0  ;;  %v9058_v23 = vpop.f32.mrf.mxu1 }
 0x42e   :  { %20501 = vst [vmem:[#allocation6_spill] sm:$0xff] %v18708_v33  ;;  %12241 = vmatprep.subr.bf16.mxu0 %v12578_v31  ;;  %v18719_v7 = vpack.c.bf16 %v10041_v13, %v10033_v12  ;;  %v10042_v20 = vmax.f32 %v9055_v45, 0.0  ;;  %v9059_v51 = vadd.f32 %v9058_v23, %v18296_v22  ;;  %v12581_v31 = vld [vmem:[%s20026_s5 + $0x8] sm:$0xff]   ;;  %v5520_v22 = vld [vmem:[%s20024_s3 + $0xcd8] sm:$0xff]  ;;  %v20506_v13 = vld [vmem:[#allocation34_spill] sm:$0xff]  ;;  %v12076_v23 = vcombine.low %v5528_v9, %v5532_v14 }
 0x42f   :  { %9921 = vmatpush1.bf16.msra.mxu1 %v12092_v24  ;;  %v18722_v10 = vpop.f32.mrf.mxu0  ;;  %v9060_v60 = vpop.f32.mrf.mxu1  ;;  %v20503_v33 = vld [vmem:[#allocation19_spill] sm:$0xff]  ;;  %v12582_v24 = vld [vmem:[%s20026_s5 + $0x40] sm:$0xff]   ;;  %v5516_v9 = vld [vmem:[%s20024_s3 + $0xcb8] sm:$0xff] }
 0x430   :  { %20502 = vst [vmem:[#allocation60_spill] sm:$0xff] %v18719_v7  ;;  %9922 = vmatprep.subr.bf16.mxu1 %v12085_v0  ;;  %v9061_v63 = vadd.f32 %v9060_v60, %v18323_v19  ;;  %v18740_v0 = vpack.c.bf16 %v10042_v20, %v10034_v32  ;;  %v20505_v19 = vld [vmem:[#allocation22_spill] sm:$0xff]  ;;  %v12069_v60 = vcombine.high %v5520_v22, %v5524_v42  ;;  %v10049_v20 = vmax.f32 %v9059_v51, 0.0  ;;  %v12592_v14 = vld [vmem:[%s20026_s5 + $0x178] sm:$0xff]  }
 0x431   :  { %12242 = vmatpush3.bf16.msra.mxu0 %v12579_v48  ;;  %v18729_v6 = vpop.f32.mrf.mxu0  ;;  %v20504_v48 = vld [vmem:[#allocation46_spill] sm:$0xff]  ;;  %v9062_v12 = vpop.f32.mrf.mxu1  ;;  %v12068_v51 = vcombine.low %v5520_v22, %v5524_v42  ;;  %v20513_v42 = vld [vmem:[#allocation33_spill] sm:$0xff] }
 0x432   :  { %9735 = vmatmul.mubr.bf16.gmra.mxu1 %v20503_v33  ;;  %12243 = vmatprep.subr.bf16.mxu0 %v12580_v49  ;;  %v9063_v45 = vadd.f32 %v9062_v12, %v18339_v11  ;;  %v12583_v32 = vld [vmem:[%s20026_s5] sm:$0xff]   ;;  %v5512_v11 = vld [vmem:[%s20024_s3 + $0xc98] sm:$0xff] }
 0x433   :  { %9744 = vmatprep.mubr.bf16.mxu1 %v20505_v19  ;;  %9923 = vmatpush1.bf16.msra.mxu1 %v12084_v50  ;;  %v18746_v33 = vpop.f32.mrf.mxu0  ;;  %v9064_v49 = vpop.f32.mrf.mxu1  ;;  %v20508_v19 = vld [vmem:[#allocation5_spill] sm:$0xff] }
 0x434   :  { %9868 = vmatmul.mubr.bf16.gmra.mxu0 %v20504_v48  ;;  %20507 = vst [vmem:[#allocation10_spill] sm:$0xff] %v18746_v33  ;;  %9924 = vmatprep.subr.bf16.mxu1 %v12077_v41  ;;  %v10057_v48 = vmax.f32 %v9063_v45, 0.0  ;;  %v9065_v4 = vadd.f32 %v9064_v49, %v20508_v19  ;;  %v10050_v41 = vmax.f32 %v9061_v63, 0.0  ;;  %v20512_v33 = vld [vmem:[#allocation8_spill] sm:$0xff]  ;;  %v5504_v63 = vld [vmem:[%s20024_s3 + $0xc58] sm:$0xff] }
 0x435   :  { %9877 = vmatprep.mubr.bf16.mxu0 %v20506_v13  ;;  %12244 = vmatpush3.bf16.msra.mxu0 %v12581_v31  ;;  %v18752_v40 = vpop.f32.mrf.mxu0  ;;  %v9068_v50 = vpop.f32.mrf.mxu1  ;;  %v20510_v13 = vld [vmem:[#allocation2_spill] sm:$0xff] }
 0x436   :  { %20509 = vst [vmem:[#allocation63_spill] sm:$0xff] %v18752_v40  ;;  %12245 = vmatprep.subr.bf16.mxu0 %v12582_v24  ;;  %v18763_v31 = vpack.c.bf16 %v10057_v48, %v10049_v20  ;;  %v10058_v12 = vmax.f32 %v9065_v4, 0.0  ;;  %v9069_v45 = vadd.f32 %v9068_v50, %v20510_v13  ;;  %v12061_v40 = vcombine.high %v5512_v11, %v5516_v9  ;;  %v20511_v24 = vld [vmem:[#allocation21_spill] sm:$0xff] }
 0x437   :  { %9925 = vmatpush1.bf16.msra.mxu1 %v12076_v23  ;;  %v18766_v49 = vpop.f32.mrf.mxu0  ;;  %v9070_v19 = vpop.f32.mrf.mxu1  ;;  %v5508_v4 = vld [vmem:[%s20024_s3 + $0xc78] sm:$0xff]  ;;  %v20514_v23 = vld [vmem:[#allocation24_spill] sm:$0xff]  ;;  %v12060_v48 = vcombine.low %v5512_v11, %v5516_v9 }
 0x438   :  { %9926 = vmatprep.subr.bf16.mxu1 %v12069_v60  ;;  %v9071_v52 = vadd.f32 %v9070_v19, %v20512_v33  ;;  %v18778_v22 = vpack.c.bf16 %v10058_v12, %v10050_v41  ;;  %v12053_v13 = vcombine.high %v5504_v63, %v5508_v4  ;;  %v10065_v19 = vmax.f32 %v9069_v45, 0.0 }
 0x439   :  { %12246 = vmatpush3.bf16.msra.mxu0 %v12583_v32  ;;  %v18770_v7 = vpop.f32.mrf.mxu0  ;;  %v9072_v60 = vpop.f32.mrf.mxu1  ;;  %v20515_v32 = vld [vmem:[#allocation36_spill] sm:$0xff] }
 0x43a   :  { %9745 = vmatmul.mubr.bf16.gmra.mxu1 %v20511_v24  ;;  %12359 = vmatprep.subr.bf16.mxu0 %v12592_v14  ;;  %v9073_v33 = vadd.f32 %v9072_v60, %v18405_v39  ;;  %v5496_v24 = vld [vmem:[%s20024_s3 + $0xc18] sm:$0xff]  ;;  %v10066_v11 = vmax.f32 %v9071_v52, 0.0 }
 0x43b   :  { %9754 = vmatprep.mubr.bf16.mxu1 %v20514_v23  ;;  %9927 = vmatpush1.bf16.msra.mxu1 %v12068_v51  ;;  %v18784_v20 = vpop.f32.mrf.mxu0  ;;  %v9074_v50 = vpop.f32.mrf.mxu1  ;;  %v5500_v39 = vld [vmem:[%s20024_s3 + $0xc38] sm:$0xff] }
 0x43c   :  { %9878 = vmatmul.mubr.bf16.gmra.mxu0 %v20513_v42  ;;  %20516 = vst [vmem:[#allocation62_spill] sm:$0xff] %v18784_v20  ;;  %9928 = vmatprep.subr.bf16.mxu1 %v12061_v40  ;;  %v10073_v14 = vmax.f32 %v9073_v33, 0.0  ;;  %v9075_v41 = vadd.f32 %v9074_v50, %v18412_v18  ;;  %v12052_v42 = vcombine.low %v5504_v63, %v5508_v4  ;;  %v5616_v52 = vld [vmem:[%s20024_s3 + $0xfd8] sm:$0xff]  ;;  %v20519_v4 = vld [vmem:[#allocation35_spill] sm:$0xff] }
 0x43d   :  { %9887 = vmatprep.mubr.bf16.mxu0 %v20515_v32  ;;  %v18787_v12 = vpop.f32.mrf.mxu0  ;;  %v9078_v51 = vpop.f32.mrf.mxu1  ;;  %v12045_v60 = vcombine.high %v5496_v24, %v5500_v39  ;;  %v20518_v32 = vld [vmem:[#allocation23_spill] sm:$0xff]  ;;  %v5620_v63 = vld [vmem:[%s20024_s3 + $0xff8] sm:$0xff] }
 0x43e   :  { %20517 = vst [vmem:[#allocation72_spill] sm:$0xff] %v18787_v12  ;;  %v18795_v40 = vpack.c.bf16 %v10073_v14, %v10065_v19  ;;  %v10074_v9 = vmax.f32 %v9075_v41, 0.0  ;;  %v9079_v45 = vadd.f32 %v9078_v51, %v18426_v26  ;;  %v20521_v19 = vld [vmem:[#allocation38_spill] sm:$0xff]  ;;  %v12044_v41 = vcombine.low %v5496_v24, %v5500_v39  ;;  %v20570_v20 = vld [vmem:[#allocation81_spill] sm:$0xff] }
 0x43f   :  { %9929 = vmatpush1.bf16.msra.mxu1 %v12060_v48  ;;  %v18798_v18 = vpop.f32.mrf.mxu0  ;;  %v9080_v23 = vpop.f32.mrf.mxu1  ;;  %v20520_v48 = vld [vmem:[#allocation26_spill] sm:$0xff] }
 0x440   :  { %9930 = vmatprep.subr.bf16.mxu1 %v12053_v13  ;;  %v9081_v33 = vadd.f32 %v9080_v23, %v18442_v15  ;;  %v18810_v26 = vpack.c.bf16 %v10074_v9, %v10066_v11  ;;  %v12165_v23 = vcombine.high %v5616_v52, %v5620_v63 }
 0x441   :  { %v18802_v50 = vpop.f32.mrf.mxu0  ;;  %v9082_v13 = vpop.f32.mrf.mxu1 }
 0x442   :  { %9755 = vmatmul.mubr.bf16.gmra.mxu1 %v20518_v32  ;;  %v9083_v15 = vadd.f32 %v9082_v13, %v18461_v29  ;;  %v10081_v32 = vmax.f32 %v9079_v45, 0.0  ;;  %v5612_v29 = vld [vmem:[%s20024_s3 + $0xfb8] sm:$0xff]  ;;  %v10082_v24 = vmax.f32 %v9081_v33, 0.0 }
 0x443   :  { %9764 = vmatprep.mubr.bf16.mxu1 %v20520_v48  ;;  %9931 = vmatpush1.bf16.msra.mxu1 %v12052_v42  ;;  %v18816_v14 = vpop.f32.mrf.mxu0  ;;  %v9084_v51 = vpop.f32.mrf.mxu1  ;;  %v12164_v48 = vcombine.low %v5616_v52, %v5620_v63  ;;  %v5604_v33 = vld [vmem:[%s20024_s3 + $0xf78] sm:$0xff]  ;;  %v20527_v63 = vld [vmem:[#allocation28_spill] sm:$0xff] }
 0x444   :  { %9888 = vmatmul.mubr.bf16.gmra.mxu0 %v20519_v4  ;;  %20522 = vst [vmem:[#allocation9_spill] sm:$0xff] %v18816_v14  ;;  %9932 = vmatprep.subr.bf16.mxu1 %v12045_v60  ;;  %v10089_v12 = vmax.f32 %v9083_v15, 0.0  ;;  %v9085_v11 = vadd.f32 %v9084_v51, %v18468_v21  ;;  %v5608_v4 = vld [vmem:[%s20024_s3 + $0xf98] sm:$0xff] }
 0x445   :  { %9897 = vmatprep.mubr.bf16.mxu0 %v20521_v19  ;;  %v18819_v9 = vpop.f32.mrf.mxu0  ;;  %v9088_v42 = vpop.f32.mrf.mxu1  ;;  %v12157_v19 = vcombine.high %v5608_v4, %v5612_v29  ;;  %v20525_v15 = vld [vmem:[#allocation25_spill] sm:$0xff] }
 0x446   :  { %20523 = vst [vmem:[#allocation65_spill] sm:$0xff] %v18819_v9  ;;  %v18827_v39 = vpack.c.bf16 %v10089_v12, %v10081_v32  ;;  %v10090_v45 = vmax.f32 %v9085_v11, 0.0  ;;  %v9089_v60 = vadd.f32 %v9088_v42, %v18482_v17  ;;  %v5600_v12 = vld [vmem:[%s20024_s3 + $0xf58] sm:$0xff]  ;;  %v12156_v11 = vcombine.low %v5608_v4, %v5612_v29 }
 0x447   :  { %9933 = vmatpush1.bf16.msra.mxu1 %v12044_v41  ;;  %v18830_v21 = vpop.f32.mrf.mxu0  ;;  %v9090_v13 = vpop.f32.mrf.mxu1  ;;  %v20526_v52 = vld [vmem:[#allocation37_spill] sm:$0xff] }
 0x448   :  { %20524 = vst [vmem:[#allocation12_spill] sm:$0xff] %v18827_v39  ;;  %9934 = vmatprep.subr.bf16.mxu1 %v12165_v23  ;;  %v9091_v51 = vadd.f32 %v9090_v13, %v18498_v55  ;;  %v18842_v17 = vpack.c.bf16 %v10090_v45, %v10082_v24  ;;  %v20528_v23 = vld [vmem:[#allocation48_spill] sm:$0xff]  ;;  %v12149_v13 = vcombine.high %v5600_v12, %v5604_v33  ;;  %v20589_v39 = vld [vmem:[#allocation86_spill] sm:$0xff] }
 0x449   :  { %v18834_v9 = vpop.f32.mrf.mxu0  ;;  %v9092_v41 = vpop.f32.mrf.mxu1 }
 0x44a   :  { %9765 = vmatmul.mubr.bf16.gmra.mxu1 %v20525_v15  ;;  %v9093_v55 = vadd.f32 %v9092_v41, %v18517_v2  ;;  %v10097_v15 = vmax.f32 %v9089_v60, 0.0  ;;  %v5596_v2 = vld [vmem:[%s20024_s3 + $0xf38] sm:$0xff]  ;;  %v10098_v4 = vmax.f32 %v9091_v51, 0.0 }
 0x44b   :  { %9774 = vmatprep.mubr.bf16.mxu1 %v20527_v63  ;;  %9935 = vmatpush2.bf16.msra.mxu1 %v12164_v48  ;;  %v18848_v32 = vpop.f32.mrf.mxu0  ;;  %v9094_v42 = vpop.f32.mrf.mxu1  ;;  %v12148_v63 = vcombine.low %v5600_v12, %v5604_v33  ;;  %v5588_v51 = vld [vmem:[%s20024_s3 + $0xef8] sm:$0xff]  ;;  %v20534_v12 = vld [vmem:[#allocation39_spill] sm:$0xff]  ;;  %v20535_v33 = vld [vmem:[#allocation30_spill] sm:$0xff] }
 0x44c   :  { %9898 = vmatmul.mubr.bf16.gmra.mxu0 %v20526_v52  ;;  %20529 = vst [vmem:[#allocation11_spill] sm:$0xff] %v18848_v32  ;;  %9936 = vmatprep.subr.bf16.mxu1 %v12157_v19  ;;  %v10105_v14 = vmax.f32 %v9093_v55, 0.0  ;;  %v9095_v24 = vadd.f32 %v9094_v42, %v18524_v59  ;;  %v5592_v52 = vld [vmem:[%s20024_s3 + $0xf18] sm:$0xff]  ;;  %v20532_v55 = vld [vmem:[#allocation27_spill] sm:$0xff] }
 0x44d   :  { %9907 = vmatprep.mubr.bf16.mxu0 %v20528_v23  ;;  %v18851_v45 = vpop.f32.mrf.mxu0  ;;  %v9098_v48 = vpop.f32.mrf.mxu1  ;;  %v12141_v23 = vcombine.high %v5592_v52, %v5596_v2 }
 0x44e   :  { %20530 = vst [vmem:[#allocation14_spill] sm:$0xff] %v18851_v45  ;;  %v18859_v29 = vpack.c.bf16 %v10105_v14, %v10097_v15  ;;  %v10106_v60 = vmax.f32 %v9095_v24, 0.0  ;;  %v9099_v19 = vadd.f32 %v9098_v48, %v18538_v56  ;;  %v5584_v14 = vld [vmem:[%s20024_s3 + $0xed8] sm:$0xff]  ;;  %v12140_v24 = vcombine.low %v5592_v52, %v5596_v2 }
 0x44f   :  { %9937 = vmatpush2.bf16.msra.mxu1 %v12156_v11  ;;  %v18862_v59 = vpop.f32.mrf.mxu0  ;;  %v9100_v41 = vpop.f32.mrf.mxu1 }
 0x450   :  { %20531 = vst [vmem:[#allocation13_spill] sm:$0xff] %v18859_v29  ;;  %9938 = vmatprep.subr.bf16.mxu1 %v12149_v13  ;;  %v9101_v42 = vadd.f32 %v9100_v41, %v18548_v62  ;;  %v18874_v56 = vpack.c.bf16 %v10106_v60, %v10098_v4  ;;  %v20536_v13 = vld [vmem:[#allocation73_spill] sm:$0xff]  ;;  %v12133_v41 = vcombine.high %v5584_v14, %v5588_v51 }
 0x451   :  { %v18866_v45 = vpop.f32.mrf.mxu0  ;;  %v9102_v11 = vpop.f32.mrf.mxu1 }
 0x452   :  { %9775 = vmatmul.mubr.bf16.gmra.mxu1 %v20532_v55  ;;  %20533 = vst [vmem:[#allocation16_spill] sm:$0xff] %v18874_v56  ;;  %v9103_v62 = vadd.f32 %v9102_v11, %v18564_v37  ;;  %v10113_v55 = vmax.f32 %v9099_v19, 0.0  ;;  %v5580_v37 = vld [vmem:[%s20024_s3 + $0xeb8] sm:$0xff]  ;;  %v10114_v52 = vmax.f32 %v9101_v42, 0.0  ;;  %v12596_v42 = vld [vmem:[%s20026_s5 + $0x170] sm:$0xff]  }
 0x453   :  { %9784 = vmatprep.mubr.bf16.mxu1 %v20535_v33  ;;  %9939 = vmatpush2.bf16.msra.mxu1 %v12148_v63  ;;  %v18880_v15 = vpop.f32.mrf.mxu0  ;;  %v9104_v48 = vpop.f32.mrf.mxu1  ;;  %v5576_v63 = vld [vmem:[%s20024_s3 + $0xe98] sm:$0xff]  ;;  %v12132_v33 = vcombine.low %v5584_v14, %v5588_v51 }
 0x454   :  { %9908 = vmatmul.mubr.bf16.gmra.mxu0 %v20534_v12  ;;  %20537 = vst [vmem:[#allocation54_spill] sm:$0xff] %v18880_v15  ;;  %9940 = vmatprep.subr.bf16.mxu1 %v12141_v23  ;;  %v10121_v32 = vmax.f32 %v9103_v62, 0.0  ;;  %v9105_v4 = vadd.f32 %v9104_v48, %v18569_v30  ;;  %v12593_v62 = vld [vmem:[%s20026_s5 + $0x138] sm:$0xff]  }
 0x455   :  { %10774 = vmatprep.mubr.bf16.mxu0 %v20536_v13  ;;  %v18883_v60 = vpop.f32.mrf.mxu0  ;;  %v9108_v12 = vpop.f32.mrf.mxu1  ;;  %v12125_v13 = vcombine.high %v5576_v63, %v5580_v37  ;;  %v20540_v48 = vld [vmem:[#allocation29_spill] sm:$0xff] }
 0x456   :  { %20538 = vst [vmem:[#allocation15_spill] sm:$0xff] %v18883_v60  ;;  %v18891_v2 = vpack.c.bf16 %v10121_v32, %v10113_v55  ;;  %v10122_v19 = vmax.f32 %v9105_v4, 0.0  ;;  %v9109_v23 = vadd.f32 %v9108_v12, %v18586_v3  ;;  %v5568_v32 = vld [vmem:[%s20024_s3 + $0xe58] sm:$0xff] }
 0x457   :  { %9941 = vmatpush2.bf16.msra.mxu1 %v12140_v24  ;;  %v18894_v30 = vpop.f32.mrf.mxu0  ;;  %v9110_v11 = vpop.f32.mrf.mxu1  ;;  %v5572_v3 = vld [vmem:[%s20024_s3 + $0xe78] sm:$0xff]  ;;  %v20542_v24 = vld [vmem:[#allocation75_spill] sm:$0xff] }
 0x458   :  { %20539 = vst [vmem:[#allocation58_spill] sm:$0xff] %v18891_v2  ;;  %9942 = vmatprep.subr.bf16.mxu1 %v12133_v41  ;;  %v9111_v14 = vadd.f32 %v9110_v11, %v18598_v28  ;;  %v18910_v51 = vpack.c.bf16 %v10122_v19, %v10114_v52  ;;  %v20543_v41 = vld [vmem:[#allocation32_spill] sm:$0xff]  ;;  %v20544_v4 = vld [vmem:[#allocation77_spill] sm:$0xff]  ;;  %v12124_v11 = vcombine.low %v5576_v63, %v5580_v37  ;;  %v10129_v19 = vmax.f32 %v9109_v23, 0.0  ;;  %v12600_v63 = vld [vmem:[%s20026_s5 + $0x168] sm:$0xff]  }
 0x459   :  { %v18914_v55 = vpop.f32.mrf.mxu0  ;;  %v9112_v28 = vpop.f32.mrf.mxu1  ;;  %v12117_v15 = vcombine.high %v5568_v32, %v5572_v3  ;;  %v12597_v52 = vld [vmem:[%s20026_s5 + $0x130] sm:$0xff]   ;;  %v12116_v23 = vcombine.low %v5568_v32, %v5572_v3  ;;  %v12601_v2 = vld [vmem:[%s20026_s5 + $0x128] sm:$0xff]   ;;  %v12604_v32 = vld [vmem:[%s20026_s5 + $0x160] sm:$0xff]  }
 0x45a   :  { %9785 = vmatmul.mubr.bf16.gmra.mxu1 %v20540_v48  ;;  %20541 = vst [vmem:[#allocation41_spill] sm:$0xff] %v18910_v51  ;;  %v9113_v12 = vadd.f32 %v9112_v28, %v18615_v8  ;;  %v5564_v8 = vld [vmem:[%s20024_s3 + $0xe38] sm:$0xff]  ;;  %v20546_v51 = vld [vmem:[#allocation31_spill] sm:$0xff] }
 0x45b   :  { %9794 = vmatprep.mubr.bf16.mxu1 %v20543_v41  ;;  %9943 = vmatpush2.bf16.msra.mxu1 %v12132_v33  ;;  %v18918_v48 = vpop.f32.mrf.mxu0  ;;  %v9114_v60 = vpop.f32.mrf.mxu1  ;;  %v5560_v33 = vld [vmem:[%s20024_s3 + $0xe18] sm:$0xff]  ;;  %v20549_v3 = vld [vmem:[#allocation7_spill] sm:$0xff] }
 0x45c   :  { %10775 = vmatmul.mubr.bf16.vlgmr.msra.gmra.mxu0 %v20542_v24  ;;  %9944 = vmatprep.subr.bf16.mxu1 %v12125_v13  ;;  %v10137_v24 = vmax.f32 %v9113_v12, 0.0  ;;  %v9115_v41 = vadd.f32 %v9114_v60, %v18625_v5 }
 0x45d   :  { %10782 = vmatprep.mubr.bf16.mxu0 %v20544_v4  ;;  %12360 = vmatpush3.bf16.msra.mxu0 %v12593_v62  ;;  %v18933_v37 = vpop.f32.mrf.mxu0  ;;  %v9118_v13 = vpop.f32.mrf.mxu1  ;;  %v10130_v62 = vmax.f32 %v9111_v14, 0.0 }
 0x45e   :  { %12361 = vmatprep.subr.bf16.mxu0 %v12596_v42  ;;  %v18935_v28 = vpack.c.bf16 %v10137_v24, %v10129_v19  ;;  %v10138_v5 = vmax.f32 %v9115_v41, 0.0  ;;  %v9119_v60 = vadd.f32 %v9118_v13, %v18642_v46  ;;  %v12109_v42 = vcombine.high %v5560_v33, %v5564_v8  ;;  %v20553_v41 = vld [vmem:[#allocation78_spill] sm:$0xff] }
 0x45f   :  { %9945 = vmatpush2.bf16.msra.mxu1 %v12124_v11  ;;  %v18938_v4 = vpop.f32.mrf.mxu0  ;;  %v9120_v12 = vpop.f32.mrf.mxu1  ;;  %v20550_v11 = vsub.s32 4, %v20549_v3  ;;  %v12108_v13 = vcombine.low %v5560_v33, %v5564_v8 }
 0x460   :  { %20545 = vst [vmem:[#allocation57_spill] sm:$0xff] %v18935_v28  ;;  %9946 = vmatprep.subr.bf16.mxu1 %v12117_v15  ;;  %v9121_v14 = vadd.f32 %v9120_v12, %v18654_v25  ;;  %v18948_v46 = vpack.c.bf16 %v10138_v5, %v10130_v62  ;;  %v18953_v15 = vld [vmem:[%s20025_s4] sm:$0xff]  ;;  %v20554_v62 = vsub.s32 5, %v20549_v3 }
 0x461   :  { %12362 = vmatpush3.bf16.msra.mxu0 %v12597_v52  ;;  %20548 = vst [vmem:[#allocation40_spill] sm:$0xff] %v18953_v15  ;;  %v18958_v52 = vrot.slane %v18953_v15, %v20550_v11  ;;  %v20552_v25 = vld [vmem:[#allocation66_spill] sm:$0xff]  ;;  %v18962_v19 = vpop.f32.mrf.mxu0  ;;  %v9122_v24 = vpop.f32.mrf.mxu1 }
 0x462   :  { %9795 = vmatmul.mubr.bf16.gmra.mxu1 %v20546_v51  ;;  %12363 = vmatprep.subr.bf16.mxu0 %v12600_v63  ;;  %20547 = vst [vmem:[#allocation56_spill] sm:$0xff] %v18948_v46  ;;  %v20551_v51 = vld [vmem:[#allocation74_spill] sm:$0xff]  ;;  %v9123_v63 = vadd.f32 %v9122_v24, %v18663_v38  ;;  %v18969_v5 = vrot.slane %v18953_v15, %v20554_v62  ;;  %v10145_v38 = vmax.f32 %v9119_v60, 0.0 }
 0x463   :  { %9950 = vmatprep.mubr.bf16.mxu1 %v20552_v25  ;;  %9947 = vmatpush2.bf16.msra.mxu1 %v12116_v23  ;;  %v18971_v12 = vpop.f32.mrf.mxu0  ;;  %v9124_v11 = vpop.f32.mrf.mxu1  ;;  %v12605_v23 = vld [vmem:[%s20026_s5 + $0x120] sm:$0xff]   ;;  %v12608_v25 = vld [vmem:[%s20026_s5 + $0x158] sm:$0xff]  }
 0x464   :  { %10783 = vmatmul.mubr.bf16.gmra.mxu0 %v20551_v51  ;;  %9948 = vmatprep.subr.bf16.mxu1 %v12109_v42  ;;  %v12584_v51 = vld [vmem:[%s20026_s5 + $0xf8] sm:$0xff]   ;;  %v10153_v33 = vmax.f32 %v9123_v63, 0.0  ;;  %v9125_v8 = vadd.f32 %v9124_v11, %v18677_v16  ;;  %v9162_v42 = vadd.f32 %v18571_v53, %v18958_v52  ;;  %v9164_v60 = vadd.f32 %v18589_v1, %v18969_v5  ;;  %v12610_v1 = vld [vmem:[%s20026_s5 + $0x150] sm:$0xff]   ;;  %v20557_v11 = vld [vmem:[#allocation67_spill] sm:$0xff] }
 0x465   :  { %10790 = vmatprep.mubr.bf16.mxu0 %v20553_v41  ;;  %12364 = vmatpush3.bf16.msra.mxu0 %v12601_v2  ;;  %v18985_v24 = vpop.f32.mrf.mxu0  ;;  %v10146_v41 = vmax.f32 %v9121_v14, 0.0  ;;  %v12585_v53 = vld [vmem:[%s20026_s5 + $0xb8] sm:$0xff]  }
 0x466   :  { %12365 = vmatprep.subr.bf16.mxu0 %v12604_v32  ;;  %v18987_v2 = vpack.c.bf16 %v10153_v33, %v10145_v38  ;;  %v10154_v62 = vmax.f32 %v9125_v8, 0.0  ;;  %v9274_v15 = vpop.f32.mrf.mxu1  ;;  %v12609_v14 = vld [vmem:[%s20026_s5 + $0x118] sm:$0xff]   ;;  %v20559_v33 = vld [vmem:[#allocation68_spill] sm:$0xff] }
 0x467   :  { %9949 = vmatpush2.bf16.msra.mxu1 %v12108_v13  ;;  %v18991_v16 = vadd.f32 %v9274_v15, %v9162_v42  ;;  %v18993_v32 = vpop.f32.mrf.mxu0  ;;  %v12586_v13 = vld [vmem:[%s20026_s5 + $0xf0] sm:$0xff]  }
 0x468   :  { %20555 = vst [vmem:[#allocation43_spill] sm:$0xff] %v18987_v2  ;;  %12295 = vmatprep.subr.bf16.mxu1 %v12584_v51  ;;  %v9276_v63 = vpop.f32.mrf.mxu1  ;;  %v19007_v15 = vpack.c.bf16 %v10154_v62, %v10146_v41  ;;  %v20558_v51 = vld [vmem:[#allocation76_spill] sm:$0xff] }
 0x469   :  { %12366 = vmatpush3.bf16.msra.mxu0 %v12605_v23  ;;  %v19011_v23 = vadd.f32 %v9276_v63, %v9164_v60  ;;  %v19013_v38 = vpop.f32.mrf.mxu0  ;;  %v20560_v8 = vld [vmem:[#allocation80_spill] sm:$0xff]  ;;  %v12588_v63 = vld [vmem:[%s20026_s5 + $0xe8] sm:$0xff]  }
 0x46a   :  { %12367 = vmatprep.subr.bf16.mxu0 %v12608_v25  ;;  %20556 = vst [vmem:[#allocation55_spill] sm:$0xff] %v19007_v15  ;;  %9951 = vmatmul.mubr.bf16.vlgmr.msra.gmra.mxu1 %v20557_v11  ;;  %v19017_v42 = vpop.f32.mrf.mxu1  ;;  %v12587_v41 = vld [vmem:[%s20026_s5 + $0xb0] sm:$0xff]   ;;  %v9172_v11 = vadd.f32 %v18627_v58, %v18958_v52  ;;  %v12613_v58 = vld [vmem:[%s20026_s5 + $0x108] sm:$0xff]   ;;  %v20564_v15 = vld [vmem:[#allocation70_spill] sm:$0xff] }
 0x46b   :  { %9960 = vmatprep.mubr.bf16.mxu1 %v20559_v33  ;;  %v19019_v25 = vpop.f32.mrf.mxu0  ;;  %12296 = vmatpush3.bf16.msra.mxu1 %v12585_v53  ;;  %v12611_v62 = vld [vmem:[%s20026_s5 + $0x110] sm:$0xff]   ;;  %v12612_v53 = vld [vmem:[%s20026_s5 + $0x148] sm:$0xff]   ;;  %v9174_v33 = vadd.f32 %v18645_v35, %v18969_v5  ;;  %v12590_v35 = vld [vmem:[%s20026_s5 + $0xe0] sm:$0xff]  }
 0x46c   :  { %10791 = vmatmul.mubr.bf16.gmra.mxu0 %v20558_v51  ;;  %v19027_v60 = vpop.f32.mrf.mxu1  ;;  %12297 = vmatprep.subr.bf16.mxu1 %v12586_v13 }
 0x46d   :  { %10798 = vmatprep.mubr.bf16.mxu0 %v20560_v8  ;;  %12368 = vmatpush3.bf16.msra.mxu0 %v12609_v14  ;;  %v19037_v14 = vpop.f32.mrf.mxu0 }
 0x46e   :  { %12369 = vmatprep.subr.bf16.mxu0 %v12610_v1  ;;  %v9284_v51 = vpop.f32.mrf.mxu1  ;;  %v12589_v1 = vld [vmem:[%s20026_s5 + $0xa8] sm:$0xff]  }
 0x46f   :  { %v19041_v8 = vadd.f32 %v9284_v51, %v9172_v11  ;;  %v19043_v13 = vpop.f32.mrf.mxu0  ;;  %12298 = vmatpush3.bf16.msra.mxu1 %v12587_v41  ;;  %v12614_v41 = vld [vmem:[%s20026_s5 + $0x140] sm:$0xff]   ;;  %v20561_v11 = vld [vmem:[#allocation69_spill] sm:$0xff]  ;;  %v20562_v51 = vld [vmem:[#allocation79_spill] sm:$0xff] }
 0x470   :  { %v9286_v3 = vpop.f32.mrf.mxu1  ;;  %12299 = vmatprep.subr.bf16.mxu1 %v12588_v63  ;;  %v20565_v63 = vld [vmem:[#allocation82_spill] sm:$0xff] }
 0x471   :  { %12370 = vmatpush3.bf16.msra.mxu0 %v12611_v62  ;;  %v19059_v62 = vadd.f32 %v9286_v3, %v9174_v33  ;;  %v19061_v2 = vpop.f32.mrf.mxu0  ;;  %v12615_v3 = vld [vmem:[%s20026_s5 + $0x100] sm:$0xff]  }
 0x472   :  { %12371 = vmatprep.subr.bf16.mxu0 %v12612_v53  ;;  %9961 = vmatmul.mubr.bf16.gmra.mxu1 %v20561_v11  ;;  %20563 = vst [vmem:[#allocation18_spill] sm:$0xff] %v19061_v2  ;;  %v19065_v28 = vpop.f32.mrf.mxu1  ;;  %v12591_v53 = vld [vmem:[%s20026_s5 + $0xa0] sm:$0xff]   ;;  %v20586_v2 = vld [vmem:[#allocation4_spill] sm:$0xff] }
 0x473   :  { %9970 = vmatprep.mubr.bf16.mxu1 %v20564_v15  ;;  %v19067_v46 = vpop.f32.mrf.mxu0  ;;  %12300 = vmatpush3.bf16.msra.mxu1 %v12589_v1  ;;  %v12594_v15 = vld [vmem:[%s20026_s5 + $0xd8] sm:$0xff]   ;;  %v9182_v1 = vadd.f32 %v18680_v57, %v18958_v52  ;;  %v12598_v57 = vld [vmem:[%s20026_s5 + $0xd0] sm:$0xff]  }
 0x474   :  { %10799 = vmatmul.mubr.bf16.gmra.mxu0 %v20562_v51  ;;  %20566 = vst [vmem:[#allocation42_spill] sm:$0xff] %v19067_v46  ;;  %v19075_v33 = vpop.f32.mrf.mxu1  ;;  %12301 = vmatprep.subr.bf16.mxu1 %v12590_v35  ;;  %v12595_v35 = vld [vmem:[%s20026_s5 + $0x98] sm:$0xff]   ;;  %v20578_v46 = vld [vmem:[#allocation3_spill] sm:$0xff] }
 0x475   :  { %10806 = vmatprep.mubr.bf16.mxu0 %v20565_v63  ;;  %12372 = vmatpush3.bf16.msra.mxu0 %v12613_v58  ;;  %v19082_v11 = vpop.f32.mrf.mxu0  ;;  %v9184_v58 = vadd.f32 %v18687_v44, %v18969_v5 }
 0x476   :  { %12373 = vmatprep.subr.bf16.mxu0 %v12614_v41  ;;  %20567 = vst [vmem:[#allocation45_spill] sm:$0xff] %v19082_v11  ;;  %v9294_v51 = vpop.f32.mrf.mxu1  ;;  %v20569_v11 = vld [vmem:[#allocation71_spill] sm:$0xff] }
 0x477   :  { %v19086_v63 = vadd.f32 %v9294_v51, %v9182_v1  ;;  %v19088_v29 = vpop.f32.mrf.mxu0  ;;  %12302 = vmatpush3.bf16.msra.mxu1 %v12591_v53  ;;  %v20572_v53 = vld [vmem:[#allocation49_spill] sm:$0xff]  ;;  %v20573_v51 = vld [vmem:[#allocation83_spill] sm:$0xff] }
 0x478   :  { %20568 = vst [vmem:[#allocation17_spill] sm:$0xff] %v19088_v29  ;;  %v9296_v41 = vpop.f32.mrf.mxu1  ;;  %12303 = vmatprep.subr.bf16.mxu1 %v12594_v15  ;;  %v12599_v15 = vld [vmem:[%s20026_s5 + $0x90] sm:$0xff]  }
 0x479   :  { %12374 = vmatpush3.bf16.msra.mxu0 %v12615_v3  ;;  %v19098_v44 = vadd.f32 %v9296_v41, %v9184_v58  ;;  %v19100_v1 = vpop.f32.mrf.mxu0  ;;  %v9192_v58 = vadd.f32 %v18722_v10, %v18958_v52  ;;  %v12606_v10 = vld [vmem:[%s20026_s5 + $0xc0] sm:$0xff]  }
 0x47a   :  { %9971 = vmatmul.mubr.bf16.gmra.mxu1 %v20569_v11  ;;  %20571 = vst [vmem:[#allocation44_spill] sm:$0xff] %v19100_v1  ;;  %v19104_v29 = vpop.f32.mrf.mxu1 }
 0x47b   :  { %9980 = vmatprep.mubr.bf16.mxu1 %v20572_v53  ;;  %v19106_v3 = vpop.f32.mrf.mxu0  ;;  %12304 = vmatpush3.bf16.msra.mxu1 %v12595_v35  ;;  %v9194_v35 = vadd.f32 %v18729_v6, %v18969_v5 }
 0x47c   :  { %10807 = vmatmul.mubr.bf16.gmra.mxu0 %v20570_v20  ;;  %20574 = vst [vmem:[#allocation20_spill] sm:$0xff] %v19106_v3  ;;  %v19111_v11 = vpop.f32.mrf.mxu1  ;;  %12305 = vmatprep.subr.bf16.mxu1 %v12598_v57  ;;  %v12602_v20 = vld [vmem:[%s20026_s5 + $0xc8] sm:$0xff]  }
 0x47d   :  { %10814 = vmatprep.mubr.bf16.mxu0 %v20573_v51  ;;  %v19118_v41 = vpop.f32.mrf.mxu0  ;;  %v12603_v57 = vld [vmem:[%s20026_s5 + $0x88] sm:$0xff]  }
 0x47e   :  { %20575 = vst [vmem:[#allocation47_spill] sm:$0xff] %v19118_v41  ;;  %v9304_v53 = vpop.f32.mrf.mxu1  ;;  %v20577_v41 = vld [vmem:[#allocation50_spill] sm:$0xff] }
 0x47f   :  { %v19122_v51 = vadd.f32 %v9304_v53, %v9192_v58  ;;  %v19124_v3 = vpop.f32.mrf.mxu0  ;;  %12306 = vmatpush3.bf16.msra.mxu1 %v12599_v15  ;;  %v20581_v53 = vld [vmem:[#allocation53_spill] sm:$0xff]  ;;  %v20582_v15 = vld [vmem:[#allocation84_spill] sm:$0xff] }
 0x480   :  { %20576 = vst [vmem:[#allocation19_spill] sm:$0xff] %v19124_v3  ;;  %v9306_v1 = vpop.f32.mrf.mxu1  ;;  %12307 = vmatprep.subr.bf16.mxu1 %v12602_v20  ;;  %v12607_v20 = vld [vmem:[%s20026_s5 + $0x80] sm:$0xff]  }
 0x481   :  { %v19134_v6 = vadd.f32 %v9306_v1, %v9194_v35  ;;  %v19136_v58 = vpop.f32.mrf.mxu0  ;;  %v9202_v1 = vadd.f32 %v18766_v49, %v18958_v52 }
 0x482   :  { %9981 = vmatmul.mubr.bf16.gmra.mxu1 %v20577_v41  ;;  %20580 = vst [vmem:[#allocation22_spill] sm:$0xff] %v19136_v58  ;;  %v19140_v3 = vpop.f32.mrf.mxu1 }
 0x483   :  { %20579 = vst [vmem:[#allocation46_spill] sm:$0xff] %v19134_v6  ;;  %9990 = vmatprep.mubr.bf16.mxu1 %v20581_v53  ;;  %v19142_v56 = vpop.f32.mrf.mxu0  ;;  %12308 = vmatpush3.bf16.msra.mxu1 %v12603_v57  ;;  %v9204_v57 = vadd.f32 %v18770_v7, %v18969_v5 }
 0x484   :  { %10815 = vmatmul.mubr.bf16.gmra.mxu0 %v20578_v46  ;;  %20583 = vst [vmem:[#allocation34_spill] sm:$0xff] %v19142_v56  ;;  %v19147_v41 = vpop.f32.mrf.mxu1  ;;  %12309 = vmatprep.subr.bf16.mxu1 %v12606_v10  ;;  %v12616_v46 = vld [vmem:[%s20026_s5 + $0x1f8] sm:$0xff]   ;;  %v20585_v10 = vld [vmem:[#allocation52_spill] sm:$0xff] }
 0x485   :  { %10822 = vmatprep.mubr.bf16.mxu0 %v20582_v15  ;;  %v19154_v35 = vpop.f32.mrf.mxu0 }
 0x486   :  { %20584 = vst [vmem:[#allocation5_spill] sm:$0xff] %v19154_v35  ;;  %v9314_v53 = vpop.f32.mrf.mxu1  ;;  %v20588_v35 = vld [vmem:[#allocation51_spill] sm:$0xff] }
 0x487   :  { %v19158_v15 = vadd.f32 %v9314_v53, %v9202_v1  ;;  %v19160_v56 = vpop.f32.mrf.mxu0  ;;  %12310 = vmatpush3.bf16.msra.mxu1 %v12607_v20  ;;  %v9212_v20 = vadd.f32 %v18798_v18, %v18958_v52 }
 0x488   :  { %v9316_v58 = vpop.f32.mrf.mxu1  ;;  %12423 = vmatprep.subr.bf16.mxu1 %v12616_v46 }
 0x489   :  { %v19164_v6 = vadd.f32 %v9316_v58, %v9204_v57  ;;  %v19166_v49 = vpop.f32.mrf.mxu0  ;;  %v9214_v58 = vadd.f32 %v18802_v50, %v18969_v5 }
 0x48a   :  { %9991 = vmatmul.mubr.bf16.gmra.mxu1 %v20585_v10  ;;  %20587 = vst [vmem:[#allocation2_spill] sm:$0xff] %v19166_v49  ;;  %v19170_v7 = vpop.f32.mrf.mxu1  ;;  %v20593_v10 = vld [vmem:[#allocation85_spill] sm:$0xff] }
 0x48b   :  { %10000 = vmatprep.mubr.bf16.mxu1 %v20588_v35  ;;  %v19172_v1 = vpop.f32.mrf.mxu0 }
 0x48c   :  { %10823 = vmatmul.mubr.bf16.gmra.mxu0 %v20586_v2  ;;  %20590 = vst [vmem:[#allocation21_spill] sm:$0xff] %v19172_v1  ;;  %v19174_v53 = vpop.f32.mrf.mxu1 }
 0x48d   :  { %10830 = vmatprep.mubr.bf16.mxu0 %v20589_v39  ;;  %v19178_v46 = vpop.f32.mrf.mxu0 }
 0x48e   :  { %20591 = vst [vmem:[#allocation8_spill] sm:$0xff] %v19178_v46  ;;  %v9324_v2 = vpop.f32.mrf.mxu1 }
 0x48f   :  { %v19182_v57 = vadd.f32 %v9324_v2, %v9212_v20  ;;  %v19184_v35 = vpop.f32.mrf.mxu0  ;;  %v9222_v20 = vadd.f32 %v18830_v21, %v18958_v52 }
 0x490   :  { %20592 = vst [vmem:[#allocation33_spill] sm:$0xff] %v19184_v35  ;;  %v9326_v39 = vpop.f32.mrf.mxu1 }
 0x491   :  { %v19188_v1 = vadd.f32 %v9326_v39, %v9214_v58  ;;  %v19190_v49 = vpop.f32.mrf.mxu0  ;;  %v9224_v58 = vadd.f32 %v18834_v9, %v18969_v5  ;;  %v9232_v9 = vadd.f32 %v18862_v59, %v18958_v52 }
 0x492   :  { %10001 = vmatmul.mubr.bf16.gmra.mxu1 %v20482_v47  ;;  %20594 = vst [vmem:[#allocation24_spill] sm:$0xff] %v19190_v49  ;;  %v19193_v18 = vpop.f32.mrf.mxu1 }
 0x493   :  { %10010 = vmatprep.mubr.bf16.mxu1 %v20484_v27  ;;  %v19195_v46 = vpop.f32.mrf.mxu0 }
 0x494   :  { %10831 = vmatmul.mubr.bf16.gmra.mxu0 %v20593_v10  ;;  %20595 = vst [vmem:[#allocation36_spill] sm:$0xff] %v19195_v46  ;;  %v19197_v50 = vpop.f32.mrf.mxu1 }
 0x495   :  { %v19201_v2 = vpop.f32.mrf.mxu0 }
 0x496   :  { %20596 = vst [vmem:[#allocation23_spill] sm:$0xff] %v19201_v2  ;;  %v9334_v47 = vpop.f32.mrf.mxu1 }
 0x497   :  { %v19205_v39 = vadd.f32 %v9334_v47, %v9222_v20 }
 0x498   :  { %v19207_v10 = vpop.f32.mrf.mxu0  ;;  %v9336_v27 = vpop.f32.mrf.mxu1 }
 0x499   :  { %20597 = vst [vmem:[#allocation35_spill] sm:$0xff] %v19207_v10  ;;  %v19210_v49 = vadd.f32 %v9336_v27, %v9224_v58 }
 0x49a   :  { %10011 = vmatmul.mubr.bf16.gmra.mxu1 %v20486_v54  ;;  %v19213_v46 = vpop.f32.mrf.mxu0  ;;  %v19215_v21 = vpop.f32.mrf.mxu1  ;;  %v9234_v54 = vadd.f32 %v18866_v45, %v18969_v5 }
 0x49b   :  { %10020 = vmatprep.mubr.bf16.mxu1 %v20487_v36  ;;  %20598 = vst [vmem:[#allocation26_spill] sm:$0xff] %v19213_v46 }
 0x49c   :  { %v19217_v2 = vpop.f32.mrf.mxu0  ;;  %v19219_v35 = vpop.f32.mrf.mxu1 }
 0x49d   :  { %20599 = vst [vmem:[#allocation38_spill] sm:$0xff] %v19217_v2 }
 0x49e   :  { %v19223_v20 = vpop.f32.mrf.mxu0  ;;  %v9344_v47 = vpop.f32.mrf.mxu1 }
 0x49f   :  { %20600 = vst [vmem:[#allocation25_spill] sm:$0xff] %v19223_v20  ;;  %v19227_v58 = vadd.f32 %v9344_v47, %v9232_v9  ;;  %v9166_v20 = vadd.f32 %v18601_v61, %v18958_v52  ;;  %v9168_v9 = vadd.f32 %v18617_v43, %v18969_v5  ;;  %v12618_v61 = vld [vmem:[%s20026_s5 + $0x1f0] sm:$0xff]  }
 0x4a0   :  { %v19229_v36 = vpop.f32.mrf.mxu0  ;;  %v9346_v27 = vpop.f32.mrf.mxu1  ;;  %v20608_v43 = vld [vmem:[#allocation60_spill] sm:$0xff] }
 0x4a1   :  { %20601 = vst [vmem:[#allocation37_spill] sm:$0xff] %v19229_v36  ;;  %v19232_v46 = vadd.f32 %v9346_v27, %v9234_v54  ;;  %v9281_v27 = vadd.f32 %v19027_v60, %v9168_v9  ;;  %v12620_v60 = vld [vmem:[%s20026_s5 + $0x1e8] sm:$0xff]  }
 0x4a2   :  { %10021 = vmatmul.mubr.bf16.gmra.mxu1 %v20490_v34  ;;  %v19235_v2 = vpop.f32.mrf.mxu0  ;;  %v19237_v59 = vpop.f32.mrf.mxu1  ;;  %v9279_v34 = vadd.f32 %v19017_v42, %v9166_v20 }
 0x4a3   :  { %20602 = vst [vmem:[#allocation28_spill] sm:$0xff] %v19232_v46  ;;  %10871 = vmatprep.mubr.bf16.mxu1 %v18740_v0  ;;  %20603 = vst [vmem:[#allocation48_spill] sm:$0xff] %v19235_v2  ;;  %v12617_v0 = vld [vmem:[%s20026_s5 + $0x1b8] sm:$0xff]  }
 0x4a4   :  { %v19241_v10 = vpop.f32.mrf.mxu0  ;;  %v19243_v45 = vpop.f32.mrf.mxu1  ;;  %v9392_v46 = vadd.f32 %v18918_v48, %v9279_v34  ;;  %v9394_v48 = vadd.f32 %v18933_v37, %v9281_v27  ;;  %v20611_v34 = vld [vmem:[#allocation64_spill] sm:$0xff]  ;;  %v12622_v27 = vld [vmem:[%s20026_s5 + $0x1e0] sm:$0xff]  }
 0x4a5   :  { %20604 = vst [vmem:[#allocation27_spill] sm:$0xff] %v19241_v10  ;;  %20605 = vst [vmem:[#allocation39_spill] sm:$0xff] %v19243_v45  ;;  %v9388_v10 = vadd.f32 %v18894_v30, %v18991_v16  ;;  %v12619_v30 = vld [vmem:[%s20026_s5 + $0x1b0] sm:$0xff]  }
 0x4a6   :  { %v19248_v47 = vpop.f32.mrf.mxu0 }
 0x4a7   :  { %20606 = vst [vmem:[#allocation30_spill] sm:$0xff] %v19248_v47  ;;  %v9500_v54 = vpop.f32.mrf.mxu1  ;;  %v9390_v47 = vadd.f32 %v18914_v55, %v19011_v23 }
 0x4a8   :  { %v19259_v2 = vpop.f32.mrf.mxu0  ;;  %v9501_v20 = vadd.f32 %v9500_v54, %v9388_v10 }
 0x4a9   :  { %20607 = vst [vmem:[#allocation73_spill] sm:$0xff] %v19259_v2  ;;  %v9502_v42 = vpop.f32.mrf.mxu1 }
 0x4aa   :  { %10872 = vmatmul.mubr.bf16.vlgmr.msra.gmra.mxu1 %v20608_v43  ;;  %v19265_v36 = vpop.f32.mrf.mxu0  ;;  %v9503_v9 = vadd.f32 %v9502_v42, %v9390_v47  ;;  %v9398_v47 = vadd.f32 %v18938_v4, %v19041_v8 }
 0x4ab   :  { %10879 = vmatprep.mubr.bf16.mxu1 %v18778_v22  ;;  %20609 = vst [vmem:[#allocation29_spill] sm:$0xff] %v19265_v36  ;;  %12424 = vmatpush3.bf16.msra.mxu1 %v12617_v0  ;;  %v9504_v16 = vpop.f32.mrf.mxu1  ;;  %v20610_v22 = vld [vmem:[#allocation59_spill] sm:$0xff]  ;;  %v9178_v0 = vadd.f32 %v20611_v34, %v18969_v5 }
 0x4ac   :  { %12425 = vmatprep.subr.bf16.mxu1 %v12618_v61  ;;  %v9176_v10 = vadd.f32 %v20610_v22, %v18958_v52  ;;  %v9505_v55 = vadd.f32 %v9504_v16, %v9392_v46  ;;  %v19276_v23 = vpop.f32.mrf.mxu0  ;;  %v10035_v61 = vmax.f32 %v9501_v20, 0.0  ;;  %v12621_v46 = vld [vmem:[%s20026_s5 + $0x1a8] sm:$0xff]   ;;  %v10036_v42 = vmax.f32 %v9503_v9, 0.0 }
 0x4ad   :  { %v9506_v54 = vpop.f32.mrf.mxu1 }
 0x4ae   :  { %v9289_v43 = vadd.f32 %v19065_v28, %v9176_v10  ;;  %v10043_v36 = vmax.f32 %v9505_v55, 0.0  ;;  %v9507_v2 = vadd.f32 %v9506_v54, %v9394_v48  ;;  %v19282_v45 = vpop.f32.mrf.mxu0  ;;  %v9291_v28 = vadd.f32 %v19075_v33, %v9178_v0  ;;  %v12623_v33 = vld [vmem:[%s20026_s5 + $0x1a0] sm:$0xff]  }
 0x4af   :  { %12426 = vmatpush3.bf16.msra.mxu1 %v12619_v30  ;;  %v9400_v30 = vadd.f32 %v18962_v19, %v19059_v62  ;;  %v20612_v19 = vld [vmem:[#allocation61_spill] sm:$0xff]  ;;  %v20613_v48 = vld [vmem:[#allocation6_spill] sm:$0xff] }
 0x4b0   :  { %12427 = vmatprep.subr.bf16.mxu1 %v12620_v60  ;;  %v10163_v20 = vpack.c.bf16 %v10043_v36, %v10035_v61  ;;  %v10044_v16 = vmax.f32 %v9507_v2, 0.0  ;;  %v19293_v22 = vpop.f32.mrf.mxu0  ;;  %v9402_v60 = vadd.f32 %v18971_v12, %v9289_v43  ;;  %v9186_v62 = vadd.f32 %v20612_v19, %v18958_v52  ;;  %v20615_v19 = vld [vmem:[#allocation63_spill] sm:$0xff] }
 0x4b1   :  { %v9404_v12 = vadd.f32 %v18985_v24, %v9291_v28  ;;  %v9188_v34 = vadd.f32 %v20613_v48, %v18969_v5  ;;  %v9408_v24 = vadd.f32 %v18993_v32, %v19086_v63  ;;  %v12626_v28 = vld [vmem:[%s20026_s5 + $0x1d0] sm:$0xff]  }
 0x4b2   :  { %v9510_v37 = vpop.f32.mrf.mxu1  ;;  %10880 = vmatmul.mubr.bf16.gmra.mxu1 %v18763_v31  ;;  %v19299_v8 = vpop.f32.mrf.mxu0  ;;  %v10164_v55 = vpack.c.bf16 %v10044_v16, %v10036_v42  ;;  %v12624_v31 = vld [vmem:[%s20026_s5 + $0x1d8] sm:$0xff]   ;;  %v9299_v54 = vadd.f32 %v19104_v29, %v9186_v62  ;;  %v9198_v62 = vadd.f32 %v20615_v19, %v18969_v5 }
 0x4b3   :  { %v9511_v4 = vadd.f32 %v9510_v37, %v9398_v47  ;;  %10887 = vmatprep.mubr.bf16.mxu1 %v18810_v26  ;;  %12428 = vmatpush3.bf16.msra.mxu1 %v12621_v46  ;;  %v12625_v37 = vld [vmem:[%s20026_s5 + $0x198] sm:$0xff]   ;;  %v9301_v29 = vadd.f32 %v19111_v11, %v9188_v34  ;;  %v12627_v11 = vld [vmem:[%s20026_s5 + $0x190] sm:$0xff]  }
 0x4b4   :  { %v9512_v10 = vpop.f32.mrf.mxu1  ;;  %12429 = vmatprep.subr.bf16.mxu1 %v12622_v27  ;;  %v19310_v9 = vpop.f32.mrf.mxu0  ;;  %10968 = vmatprep.mubr.bf16.mxu0 %v10164_v55 }
 0x4b5   :  { %v9513_v26 = vadd.f32 %v9512_v10, %v9400_v30  ;;  %10969 = vmatmul.mubr.bf16.vlgmr.msra.gmra.mxu0 %v10163_v20  ;;  %v10051_v43 = vmax.f32 %v9511_v4, 0.0  ;;  %v9410_v10 = vadd.f32 %v19013_v38, %v19098_v44  ;;  %v20614_v38 = vld [vmem:[#allocation10_spill] sm:$0xff] }
 0x4b6   :  { %v9514_v2 = vpop.f32.mrf.mxu1  ;;  %v19316_v47 = vpop.f32.mrf.mxu0  ;;  %v9196_v44 = vadd.f32 %v20614_v38, %v18958_v52 }
 0x4b7   :  { %v9515_v36 = vadd.f32 %v9514_v2, %v9402_v60  ;;  %12430 = vmatpush3.bf16.msra.mxu1 %v12623_v33  ;;  %v10052_v42 = vmax.f32 %v9513_v26, 0.0  ;;  %v9412_v60 = vadd.f32 %v19019_v25, %v9299_v54  ;;  %v9414_v25 = vadd.f32 %v19037_v14, %v9301_v29  ;;  %v12629_v54 = vld [vmem:[%s20026_s5 + $0x188] sm:$0xff]   ;;  %v20617_v29 = vld [vmem:[#allocation46_spill] sm:$0xff] }
 0x4b8   :  { %v9516_v0 = vpop.f32.mrf.mxu1  ;;  %12431 = vmatprep.subr.bf16.mxu1 %v12624_v31  ;;  %v9418_v14 = vadd.f32 %v19043_v13, %v19122_v51  ;;  %v20619_v51 = vld [vmem:[#allocation16_spill] sm:$0xff] }
 0x4b9   :  { %v10059_v61 = vmax.f32 %v9515_v36, 0.0  ;;  %v9517_v46 = vadd.f32 %v9516_v0, %v9404_v12  ;;  %v19327_v30 = vpop.f32.mrf.mxu0  ;;  %v9309_v36 = vadd.f32 %v19140_v3, %v9196_v44  ;;  %v9311_v3 = vadd.f32 %v19147_v41, %v9198_v62  ;;  %v12631_v41 = vld [vmem:[%s20026_s5 + $0x180] sm:$0xff]  }
 0x4ba   :  { %v9520_v27 = vpop.f32.mrf.mxu1  ;;  %10888 = vmatmul.mubr.bf16.gmra.mxu1 %v18795_v40  ;;  %v12628_v40 = vld [vmem:[%s20026_s5 + $0x1c8] sm:$0xff]  }
 0x4bb   :  { %v10171_v20 = vpack.c.bf16 %v10059_v61, %v10051_v43  ;;  %v10060_v16 = vmax.f32 %v9517_v46, 0.0  ;;  %v9521_v32 = vadd.f32 %v9520_v27, %v9408_v24  ;;  %10895 = vmatprep.mubr.bf16.mxu1 %v18842_v17  ;;  %v19333_v63 = vpop.f32.mrf.mxu0  ;;  %12432 = vmatpush3.bf16.msra.mxu1 %v12625_v37  ;;  %v12630_v61 = vld [vmem:[%s20026_s5 + $0x1c0] sm:$0xff]  }
 0x4bc   :  { %v9522_v4 = vpop.f32.mrf.mxu1  ;;  %12433 = vmatprep.subr.bf16.mxu1 %v12626_v28  ;;  %v20616_v28 = vld [vmem:[#allocation12_spill] sm:$0xff] }
 0x4bd   :  { %v10172_v55 = vpack.c.bf16 %v10060_v16, %v10052_v42  ;;  %v9523_v17 = vadd.f32 %v9522_v4, %v9410_v10  ;;  %v19344_v31 = vpop.f32.mrf.mxu0  ;;  %v10067_v12 = vmax.f32 %v9521_v32, 0.0  ;;  %v20618_v42 = vld [vmem:[#allocation18_spill] sm:$0xff] }
 0x4be   :  { %v9524_v33 = vpop.f32.mrf.mxu1  ;;  %v20620_v4 = vld [vmem:[#allocation42_spill] sm:$0xff] }
 0x4bf   :  { %v9525_v2 = vadd.f32 %v9524_v33, %v9412_v60  ;;  %10976 = vmatprep.mubr.bf16.mxu0 %v10172_v55  ;;  %v19350_v0 = vpop.f32.mrf.mxu0  ;;  %12434 = vmatpush3.bf16.msra.mxu1 %v12627_v11  ;;  %v10068_v46 = vmax.f32 %v9523_v17, 0.0  ;;  %v9422_v32 = vadd.f32 %v20620_v4, %v9309_v36  ;;  %v20621_v11 = vld [vmem:[#allocation62_spill] sm:$0xff]  ;;  %v20623_v17 = vld [vmem:[#allocation45_spill] sm:$0xff] }
 0x4c0   :  { %v9526_v26 = vpop.f32.mrf.mxu1  ;;  %10977 = vmatmul.mubr.bf16.gmra.mxu0 %v10171_v20  ;;  %12435 = vmatprep.subr.bf16.mxu1 %v12628_v40  ;;  %v9420_v20 = vadd.f32 %v20618_v42, %v20617_v29  ;;  %v9206_v33 = vadd.f32 %v20621_v11, %v18958_v52  ;;  %v20628_v42 = vld [vmem:[#allocation41_spill] sm:$0xff] }
 0x4c1   :  { %v10075_v48 = vmax.f32 %v9525_v2, 0.0  ;;  %v9527_v34 = vadd.f32 %v9526_v26, %v9414_v25  ;;  %v19361_v27 = vpop.f32.mrf.mxu0  ;;  %v9424_v2 = vadd.f32 %v20623_v17, %v9311_v3  ;;  %v20624_v25 = vld [vmem:[#allocation72_spill] sm:$0xff] }
 0x4c2   :  { %v9530_v43 = vpop.f32.mrf.mxu1  ;;  %10896 = vmatmul.mubr.bf16.gmra.mxu1 %v20616_v28  ;;  %v9208_v19 = vadd.f32 %v20624_v25, %v18969_v5  ;;  %v9319_v26 = vadd.f32 %v19170_v7, %v9206_v33  ;;  %v20633_v33 = vld [vmem:[#allocation47_spill] sm:$0xff] }
 0x4c3   :  { %v10179_v37 = vpack.c.bf16 %v10075_v48, %v10067_v12  ;;  %v10076_v24 = vmax.f32 %v9527_v34, 0.0  ;;  %v9531_v13 = vadd.f32 %v9530_v43, %v9418_v14  ;;  %10903 = vmatprep.mubr.bf16.mxu1 %v20619_v51  ;;  %v19367_v10 = vpop.f32.mrf.mxu0  ;;  %12436 = vmatpush3.bf16.msra.mxu1 %v12629_v54  ;;  %v20626_v54 = vld [vmem:[#allocation17_spill] sm:$0xff] }
 0x4c4   :  { %v9532_v16 = vpop.f32.mrf.mxu1  ;;  %12437 = vmatprep.subr.bf16.mxu1 %v12630_v61  ;;  %v9428_v14 = vadd.f32 %v20626_v54, %v19158_v15  ;;  %v9321_v61 = vadd.f32 %v19174_v53, %v9208_v19  ;;  %v20630_v15 = vld [vmem:[#allocation20_spill] sm:$0xff] }
 0x4c5   :  { %v10180_v60 = vpack.c.bf16 %v10076_v24, %v10068_v46  ;;  %v9533_v40 = vadd.f32 %v9532_v16, %v9420_v20  ;;  %v19375_v44 = vpop.f32.mrf.mxu0  ;;  %v10083_v36 = vmax.f32 %v9531_v13, 0.0  ;;  %v20629_v20 = vld [vmem:[#allocation44_spill] sm:$0xff]  ;;  %v9432_v51 = vadd.f32 %v20630_v15, %v9319_v26  ;;  %v20641_v15 = vld [vmem:[#allocation11_spill] sm:$0xff] }
 0x4c6   :  { %v9534_v55 = vpop.f32.mrf.mxu1  ;;  %20622 = vst [vmem:[#allocation75_spill] sm:$0xff] %v19375_v44  ;;  %v9430_v16 = vadd.f32 %v20629_v20, %v19164_v6 }
 0x4c7   :  { %v9535_v38 = vadd.f32 %v9534_v55, %v9422_v32  ;;  %10984 = vmatprep.mubr.bf16.mxu0 %v10180_v60  ;;  %v19381_v34 = vpop.f32.mrf.mxu0  ;;  %12438 = vmatpush3.bf16.msra.mxu1 %v12631_v41  ;;  %v10084_v3 = vmax.f32 %v9533_v40, 0.0  ;;  %v20631_v32 = vld [vmem:[#allocation9_spill] sm:$0xff]  ;;  %v9434_v40 = vadd.f32 %v20633_v33, %v9321_v61 }
 0x4c8   :  { %v9536_v62 = vpop.f32.mrf.mxu1  ;;  %10985 = vmatmul.mubr.bf16.gmra.mxu0 %v10179_v37  ;;  %20625 = vst [vmem:[#allocation32_spill] sm:$0xff] %v19381_v34  ;;  %v20627_v37 = vld [vmem:[#allocation13_spill] sm:$0xff]  ;;  %v9216_v60 = vadd.f32 %v20631_v32, %v18958_v52 }
 0x4c9   :  { %v10091_v12 = vmax.f32 %v9535_v38, 0.0  ;;  %v9537_v48 = vadd.f32 %v9536_v62, %v9424_v2  ;;  %v20634_v38 = vld [vmem:[#allocation65_spill] sm:$0xff] }
 0x4ca   :  { %v9540_v43 = vpop.f32.mrf.mxu1  ;;  %10904 = vmatmul.mubr.bf16.gmra.mxu1 %v20627_v37  ;;  %v9218_v17 = vadd.f32 %v20634_v38, %v18969_v5  ;;  %v9329_v2 = vadd.f32 %v19193_v18, %v9216_v60  ;;  %v20638_v37 = vld [vmem:[#allocation56_spill] sm:$0xff]  ;;  %v20643_v60 = vld [vmem:[#allocation5_spill] sm:$0xff] }
 0x4cb   :  { %v10187_v46 = vpack.c.bf16 %v10091_v12, %v10083_v36  ;;  %v10092_v24 = vmax.f32 %v9537_v48, 0.0  ;;  %v9541_v29 = vadd.f32 %v9540_v43, %v9428_v14  ;;  %10911 = vmatprep.mubr.bf16.mxu1 %v20628_v42  ;;  %v20636_v36 = vld [vmem:[#allocation19_spill] sm:$0xff] }
 0x4cc   :  { %v19386_v28 = vpop.f32.mrf.mxu0  ;;  %v9542_v7 = vpop.f32.mrf.mxu1  ;;  %v9438_v12 = vadd.f32 %v20636_v36, %v19182_v57  ;;  %v9331_v54 = vadd.f32 %v19197_v50, %v9218_v17  ;;  %v20640_v57 = vld [vmem:[#allocation34_spill] sm:$0xff] }
 0x4cd   :  { %v10188_v4 = vpack.c.bf16 %v10092_v24, %v10084_v3  ;;  %v9543_v41 = vadd.f32 %v9542_v7, %v9430_v16  ;;  %v10099_v25 = vmax.f32 %v9541_v29, 0.0  ;;  %v20637_v24 = vld [vmem:[#allocation58_spill] sm:$0xff]  ;;  %v9442_v20 = vadd.f32 %v20640_v57, %v9329_v2 }
 0x4ce   :  { %v19392_v13 = vpop.f32.mrf.mxu0  ;;  %v9544_v53 = vpop.f32.mrf.mxu1  ;;  %v20639_v7 = vld [vmem:[#allocation22_spill] sm:$0xff] }
 0x4cf   :  { %v9545_v55 = vadd.f32 %v9544_v53, %v9432_v51  ;;  %10992 = vmatprep.mubr.bf16.mxu0 %v10188_v4  ;;  %v10100_v14 = vmax.f32 %v9543_v41, 0.0  ;;  %v9440_v29 = vadd.f32 %v20639_v7, %v19188_v1  ;;  %v9226_v51 = vadd.f32 %v20641_v15, %v18958_v52  ;;  %v20650_v7 = vld [vmem:[#allocation54_spill] sm:$0xff]  ;;  %v20652_v15 = vld [vmem:[#allocation15_spill] sm:$0xff] }
 0x4d0   :  { %v19397_v11 = vpop.f32.mrf.mxu0  ;;  %v9546_v6 = vpop.f32.mrf.mxu1  ;;  %10993 = vmatmul.mubr.bf16.gmra.mxu0 %v10187_v46  ;;  %v9444_v41 = vadd.f32 %v20643_v60, %v9331_v54 }
 0x4d1   :  { %20632 = vst [vmem:[#allocation77_spill] sm:$0xff] %v19397_v11  ;;  %v10107_v19 = vmax.f32 %v9545_v55, 0.0  ;;  %v9547_v62 = vadd.f32 %v9546_v6, %v9434_v40  ;;  %v20644_v55 = vld [vmem:[#allocation14_spill] sm:$0xff]  ;;  %v9339_v40 = vadd.f32 %v19215_v21, %v9226_v51  ;;  %v9238_v51 = vadd.f32 %v20652_v15, %v18969_v5 }
 0x4d2   :  { %v19403_v26 = vpop.f32.mrf.mxu0  ;;  %v9550_v48 = vpop.f32.mrf.mxu1  ;;  %10912 = vmatmul.mubr.bf16.gmra.mxu1 %v20637_v24  ;;  %v9228_v33 = vadd.f32 %v20644_v55, %v18969_v5  ;;  %v20648_v24 = vld [vmem:[#allocation2_spill] sm:$0xff] }
 0x4d3   :  { %20635 = vst [vmem:[#allocation31_spill] sm:$0xff] %v19403_v26  ;;  %v10195_v43 = vpack.c.bf16 %v10107_v19, %v10099_v25  ;;  %v10108_v61 = vmax.f32 %v9547_v62, 0.0  ;;  %v9551_v18 = vadd.f32 %v9550_v48, %v9438_v12  ;;  %10919 = vmatprep.mubr.bf16.mxu1 %v20638_v37  ;;  %v9448_v25 = vadd.f32 %v19160_v56, %v19205_v39 }
 0x4d4   :  { %v19408_v3 = vpop.f32.mrf.mxu0  ;;  %v9552_v46 = vpop.f32.mrf.mxu1  ;;  %v9341_v62 = vadd.f32 %v19219_v35, %v9228_v33 }
 0x4d5   :  { %v10196_v16 = vpack.c.bf16 %v10108_v61, %v10100_v14  ;;  %v9553_v4 = vadd.f32 %v9552_v46, %v9440_v29  ;;  %v10115_v38 = vmax.f32 %v9551_v18, 0.0  ;;  %v20646_v14 = vld [vmem:[#allocation57_spill] sm:$0xff]  ;;  %v20647_v61 = vld [vmem:[#allocation55_spill] sm:$0xff]  ;;  %v9450_v46 = vadd.f32 %v20648_v24, %v19210_v49 }
 0x4d6   :  { %v19414_v42 = vpop.f32.mrf.mxu0  ;;  %v9554_v50 = vpop.f32.mrf.mxu1  ;;  %v20649_v18 = vld [vmem:[#allocation21_spill] sm:$0xff]  ;;  %v9236_v29 = vadd.f32 %v20650_v7, %v18958_v52  ;;  %v20659_v24 = vld [vmem:[#allocation7_spill] sm:$0xff] }
 0x4d7   :  { %v9555_v53 = vadd.f32 %v9554_v50, %v9442_v20  ;;  %11000 = vmatprep.mubr.bf16.mxu0 %v10196_v16  ;;  %v10116_v36 = vmax.f32 %v9553_v4, 0.0  ;;  %v9452_v37 = vadd.f32 %v20649_v18, %v9339_v40  ;;  %v20651_v16 = vld [vmem:[#allocation8_spill] sm:$0xff]  ;;  %v20653_v52 = vld [vmem:[#allocation33_spill] sm:$0xff] }
 0x4d8   :  { %v19419_v32 = vpop.f32.mrf.mxu0  ;;  %v9556_v1 = vpop.f32.mrf.mxu1  ;;  %11001 = vmatmul.mubr.bf16.gmra.mxu0 %v10195_v43  ;;  %v9454_v50 = vadd.f32 %v20651_v16, %v9341_v62  ;;  %v20655_v62 = vld [vmem:[#allocation43_spill] sm:$0xff] }
 0x4d9   :  { %20642 = vst [vmem:[#allocation74_spill] sm:$0xff] %v19419_v32  ;;  %v10123_v17 = vmax.f32 %v9555_v53, 0.0  ;;  %v9557_v6 = vadd.f32 %v9556_v1, %v9444_v41  ;;  %v9349_v53 = vadd.f32 %v19237_v59, %v9236_v29  ;;  %v9458_v1 = vadd.f32 %v20653_v52, %v19227_v58  ;;  %v20662_v29 = vld [vmem:[#allocation23_spill] sm:$0xff] }
 0x4da   :  { %v19425_v2 = vpop.f32.mrf.mxu0  ;;  %v9560_v19 = vpop.f32.mrf.mxu1  ;;  %10920 = vmatmul.mubr.bf16.gmra.mxu1 %v20646_v14  ;;  %v20660_v58 = vsub.s32 6, %v20659_v24 }
 0x4db   :  { %20645 = vst [vmem:[#allocation66_spill] sm:$0xff] %v19425_v2  ;;  %v10203_v12 = vpack.c.bf16 %v10123_v17, %v10115_v38  ;;  %v10124_v48 = vmax.f32 %v9557_v6, 0.0  ;;  %v9561_v21 = vadd.f32 %v9560_v19, %v9448_v25  ;;  %10927 = vmatprep.mubr.bf16.mxu1 %v20647_v61  ;;  %v20654_v38 = vld [vmem:[#allocation39_spill] sm:$0xff] }
 0x4dc   :  { %v19430_v54 = vpop.f32.mrf.mxu0  ;;  %v9562_v43 = vpop.f32.mrf.mxu1  ;;  %v9351_v17 = vadd.f32 %v20654_v38, %v9238_v51 }
 0x4dd   :  { %v10204_v56 = vpack.c.bf16 %v10124_v48, %v10116_v36  ;;  %v9563_v57 = vadd.f32 %v9562_v43, %v9450_v46  ;;  %v10131_v60 = vmax.f32 %v9561_v21, 0.0  ;;  %v20657_v48 = vld [vmem:[#allocation24_spill] sm:$0xff] }
 0x4de   :  { %v19437_v39 = vpop.f32.mrf.mxu0  ;;  %v9564_v35 = vpop.f32.mrf.mxu1  ;;  %v20658_v43 = vld [vmem:[#allocation36_spill] sm:$0xff] }
 0x4df   :  { %v9565_v20 = vadd.f32 %v9564_v35, %v9452_v37  ;;  %11008 = vmatprep.mubr.bf16.mxu0 %v10204_v56  ;;  %v10132_v6 = vmax.f32 %v9563_v57, 0.0  ;;  %v9462_v21 = vadd.f32 %v20658_v43, %v9349_v53  ;;  %v20661_v46 = vld [vmem:[#allocation40_spill] sm:$0xff]  ;;  %v9464_v57 = vadd.f32 %v20662_v29, %v9351_v17  ;;  %v20665_v17 = vld [vmem:[#allocation26_spill] sm:$0xff] }
 0x4e0   :  { %v19444_v4 = vpop.f32.mrf.mxu0  ;;  %v9566_v49 = vpop.f32.mrf.mxu1  ;;  %11009 = vmatmul.mubr.bf16.gmra.mxu0 %v10203_v12  ;;  %v20656_v12 = vld [vmem:[#allocation28_spill] sm:$0xff]  ;;  %v19461_v18 = vrot.slane %v20661_v46, %v20660_v58 }
 0x4e1   :  { %v10139_v41 = vmax.f32 %v9565_v20, 0.0  ;;  %v9567_v55 = vadd.f32 %v9566_v49, %v9454_v50  ;;  %v9460_v14 = vadd.f32 %v20657_v48, %v20656_v12  ;;  %v20663_v20 = vsub.s32 7, %v20659_v24 }
 0x4e2   :  { %v19447_v33 = vpop.f32.mrf.mxu0  ;;  %v9570_v40 = vpop.f32.mrf.mxu1  ;;  %10928 = vmatmul.mubr.bf16.gmra.mxu1 %v20655_v62 }
 0x4e3   :  { %v10211_v25 = vpack.c.bf16 %v10139_v41, %v10131_v60  ;;  %v10140_v5 = vmax.f32 %v9567_v55, 0.0  ;;  %v9571_v59 = vadd.f32 %v9570_v40, %v9458_v1  ;;  %v19469_v16 = vrot.slane %v20661_v46, %v20663_v20  ;;  %v20664_v60 = vld [vmem:[#allocation35_spill] sm:$0xff]  ;;  %v20667_v46 = vld [vmem:[#allocation48_spill] sm:$0xff] }
 0x4e4   :  { %v19452_v19 = vpop.f32.mrf.mxu0  ;;  %v9572_v36 = vpop.f32.mrf.mxu1  ;;  %v9614_v41 = vadd.f32 %v20664_v60, %v19461_v18 }
 0x4e5   :  { %v10212_v61 = vpack.c.bf16 %v10140_v5, %v10132_v6  ;;  %v9573_v35 = vadd.f32 %v9572_v36, %v9460_v14  ;;  %v10147_v51 = vmax.f32 %v9571_v59, 0.0  ;;  %v9616_v6 = vadd.f32 %v20665_v17, %v19469_v16 }
 0x4e6   :  { %v19463_v37 = vpop.f32.mrf.mxu0  ;;  %v9574_v56 = vpop.f32.mrf.mxu1 }
 0x4e7   :  { %v9575_v7 = vadd.f32 %v9574_v56, %v9462_v21  ;;  %11016 = vmatprep.mubr.bf16.mxu0 %v10212_v61  ;;  %v10148_v52 = vmax.f32 %v9573_v35, 0.0  ;;  %v20666_v21 = vld [vmem:[#allocation37_spill] sm:$0xff]  ;;  %v9626_v56 = vadd.f32 %v20667_v46, %v19469_v16  ;;  %v9644_v46 = vadd.f32 %v19293_v22, %v19461_v18 }
 0x4e8   :  { %v19471_v50 = vpop.f32.mrf.mxu0  ;;  %v9576_v15 = vpop.f32.mrf.mxu1  ;;  %11017 = vmatmul.mubr.bf16.gmra.mxu0 %v10211_v25  ;;  %v9624_v61 = vadd.f32 %v20666_v21, %v19461_v18  ;;  %v9654_v22 = vadd.f32 %v19327_v30, %v19461_v18  ;;  %v9664_v30 = vadd.f32 %v19361_v27, %v19461_v18  ;;  %v9674_v27 = vadd.f32 %v19386_v28, %v19461_v18 }
 0x4e9   :  { %v10155_v49 = vmax.f32 %v9575_v7, 0.0  ;;  %v9577_v53 = vadd.f32 %v9576_v15, %v9464_v57  ;;  %v9684_v28 = vadd.f32 %v19408_v3, %v19461_v18  ;;  %v20690_v3 = vld [vmem:[#allocation25_spill] sm:$0xff] }
 0x4ea   :  { %v19475_v55 = vpop.f32.mrf.mxu0  ;;  %v9726_v38 = vpop.f32.mrf.mxu1 }
 0x4eb   :  { %v10219_v1 = vpack.c.bf16 %v10155_v49, %v10147_v51  ;;  %v10156_v40 = vmax.f32 %v9577_v53, 0.0  ;;  %v19479_v5 = vadd.f32 %v9726_v38, %v9614_v41  ;;  %v20668_v53 = vld [vmem:[#allocation73_spill] sm:$0xff] }
 0x4ec   :  { %v19481_v62 = vpop.f32.mrf.mxu0  ;;  %v9728_v25 = vpop.f32.mrf.mxu1  ;;  %v9634_v60 = vadd.f32 %v20668_v53, %v19461_v18 }
 0x4ed   :  { %v10220_v36 = vpack.c.bf16 %v10156_v40, %v10148_v52  ;;  %v19483_v59 = vadd.f32 %v9728_v25, %v9616_v6 }
 0x4ee   :  { %v19485_v12 = vpop.f32.mrf.mxu0  ;;  %v19487_v48 = vpop.f32.mrf.mxu1 }
 0x4ef   :  { %11024 = vmatprep.mubr.bf16.mxu0 %v10220_v36 }
 0x4f0   :  { %v19489_v14 = vpop.f32.mrf.mxu0  ;;  %11025 = vmatmul.mubr.bf16.gmra.mxu0 %v10219_v1  ;;  %v19491_v43 = vpop.f32.mrf.mxu1  ;;  %v20669_v1 = vld [vmem:[#allocation29_spill] sm:$0xff] }
 0x4f1   :  { %v9636_v40 = vadd.f32 %v20669_v1, %v19469_v16 }
 0x4f2   :  { %v19495_v24 = vpop.f32.mrf.mxu0  ;;  %v9736_v58 = vpop.f32.mrf.mxu1 }
 0x4f3   :  { %v19499_v35 = vadd.f32 %v9736_v58, %v9624_v61 }
 0x4f4   :  { %v19501_v7 = vpop.f32.mrf.mxu0  ;;  %v9738_v29 = vpop.f32.mrf.mxu1 }
 0x4f5   :  { %v19503_v57 = vadd.f32 %v9738_v29, %v9626_v56  ;;  %v9646_v29 = vadd.f32 %v19299_v8, %v19469_v16  ;;  %v9656_v8 = vadd.f32 %v19333_v63, %v19469_v16  ;;  %v9666_v63 = vadd.f32 %v19367_v10, %v19469_v16 }
 0x4f6   :  { %v19505_v20 = vpop.f32.mrf.mxu0  ;;  %v19507_v15 = vpop.f32.mrf.mxu1  ;;  %v9676_v10 = vadd.f32 %v19392_v13, %v19469_v16  ;;  %v9686_v13 = vadd.f32 %v19414_v42, %v19469_v16 }
 0x4f8   :  { %v19509_v51 = vpop.f32.mrf.mxu0  ;;  %v19511_v49 = vpop.f32.mrf.mxu1 }
 0x4fa   :  { %v19515_v41 = vpop.f32.mrf.mxu0  ;;  %v9746_v52 = vpop.f32.mrf.mxu1 }
 0x4fb   :  { %v19519_v38 = vadd.f32 %v9746_v52, %v9634_v60 }
 0x4fc   :  { %v19521_v17 = vpop.f32.mrf.mxu0  ;;  %v9748_v6 = vpop.f32.mrf.mxu1 }
 0x4fd   :  { %20670 = vst [vmem:[#allocation78_spill] sm:$0xff] %v19521_v17  ;;  %v19523_v25 = vadd.f32 %v9748_v6, %v9636_v40 }
 0x4fe   :  { %v19525_v36 = vpop.f32.mrf.mxu0  ;;  %v19527_v21 = vpop.f32.mrf.mxu1 }
 0x500   :  { %v19529_v61 = vpop.f32.mrf.mxu0  ;;  %v19531_v58 = vpop.f32.mrf.mxu1 }
 0x502   :  { %v9756_v56 = vpop.f32.mrf.mxu1  ;;  %v19537_v53 = vpop.f32.mrf.mxu0 }
 0x503   :  { %20671 = vst [vmem:[#allocation67_spill] sm:$0xff] %v19537_v53  ;;  %v19539_v60 = vadd.f32 %v9756_v56, %v9644_v46 }
 0x504   :  { %v9758_v52 = vpop.f32.mrf.mxu1  ;;  %v19545_v6 = vpop.f32.mrf.mxu0 }
 0x505   :  { %v19541_v1 = vadd.f32 %v9758_v52, %v9646_v29  ;;  %20672 = vst [vmem:[#allocation76_spill] sm:$0xff] %v19545_v6 }
 0x506   :  { %v19543_v40 = vpop.f32.mrf.mxu1  ;;  %v19553_v26 = vpop.f32.mrf.mxu0 }
 0x507   :  { %20673 = vst [vmem:[#allocation68_spill] sm:$0xff] %v19553_v26 }
 0x508   :  { %v19547_v2 = vpop.f32.mrf.mxu1  ;;  %v19561_v11 = vpop.f32.mrf.mxu0 }
 0x509   :  { %20674 = vst [vmem:[#allocation80_spill] sm:$0xff] %v19561_v11 }
 0x50a   :  { %v9766_v32 = vpop.f32.mrf.mxu1  ;;  %v19569_v53 = vpop.f32.mrf.mxu0 }
 0x50b   :  { %v19555_v46 = vadd.f32 %v9766_v32, %v9654_v22  ;;  %20675 = vst [vmem:[#allocation69_spill] sm:$0xff] %v19569_v53 }
 0x50c   :  { %v9768_v56 = vpop.f32.mrf.mxu1  ;;  %v19577_v26 = vpop.f32.mrf.mxu0 }
 0x50d   :  { %v19557_v29 = vadd.f32 %v9768_v56, %v9656_v8  ;;  %20678 = vst [vmem:[#allocation82_spill] sm:$0xff] %v19577_v26 }
 0x50e   :  { %v19559_v52 = vpop.f32.mrf.mxu1  ;;  %v19585_v17 = vpop.f32.mrf.mxu0 }
 0x50f   :  { %20679 = vst [vmem:[#allocation71_spill] sm:$0xff] %v19585_v17 }
 0x510   :  { %v19563_v6 = vpop.f32.mrf.mxu1  ;;  %v19593_v53 = vpop.f32.mrf.mxu0 }
 0x511   :  { %20682 = vst [vmem:[#allocation83_spill] sm:$0xff] %v19593_v53  ;;  %v20688_v53 = vld [vmem:[#allocation38_spill] sm:$0xff] }
 0x512   :  { %v9776_v34 = vpop.f32.mrf.mxu1  ;;  %v9618_v17 = vadd.f32 %v20688_v53, %v19461_v18  ;;  %v9842_v53 = vadd.f32 %v19437_v39, %v19483_v59 }
 0x513   :  { %v19571_v32 = vadd.f32 %v9776_v34, %v9664_v30 }
 0x514   :  { %v9778_v22 = vpop.f32.mrf.mxu1  ;;  %v9731_v42 = vadd.f32 %v19487_v48, %v9618_v17  ;;  %v20693_v48 = vld [vmem:[#allocation27_spill] sm:$0xff] }
 0x515   :  { %20676 = vst [vmem:[#allocation79_spill] sm:$0xff] %v19571_v32  ;;  %v19573_v8 = vadd.f32 %v9778_v22, %v9666_v63  ;;  %v9628_v17 = vadd.f32 %v20693_v48, %v19461_v18 }
 0x516   :  { %v19575_v56 = vpop.f32.mrf.mxu1 }
 0x517   :  { %20677 = vst [vmem:[#allocation70_spill] sm:$0xff] %v19573_v8  ;;  %v19601_v8 = vpop.f32.mrf.mxu0 }
 0x518   :  { %v19579_v11 = vpop.f32.mrf.mxu1  ;;  %20684 = vst [vmem:[#allocation3_spill] sm:$0xff] %v19601_v8 }
 0x51a   :  { %v9786_v44 = vpop.f32.mrf.mxu1 }
 0x51b   :  { %v19587_v34 = vadd.f32 %v9786_v44, %v9674_v27 }
 0x51c   :  { %v9788_v30 = vpop.f32.mrf.mxu1 }
 0x51d   :  { %20680 = vst [vmem:[#allocation81_spill] sm:$0xff] %v19587_v34  ;;  %v19589_v63 = vadd.f32 %v9788_v30, %v9676_v10  ;;  %v19609_v34 = vpop.f32.mrf.mxu0 }
 0x51e   :  { %v19591_v22 = vpop.f32.mrf.mxu1  ;;  %20687 = vst [vmem:[#allocation52_spill] sm:$0xff] %v19609_v34 }
 0x51f   :  { %20681 = vst [vmem:[#allocation49_spill] sm:$0xff] %v19589_v63  ;;  %v19618_v8 = vpop.f32.mrf.mxu0 }
 0x520   :  { %v19595_v26 = vpop.f32.mrf.mxu1  ;;  %20691 = vst [vmem:[#allocation51_spill] sm:$0xff] %v19618_v8 }
 0x521   :  { %20683 = vst [vmem:[#allocation50_spill] sm:$0xff] %v19595_v26  ;;  %v9620_v26 = vadd.f32 %v20690_v3, %v19469_v16 }
 0x522   :  { %v9796_v32 = vpop.f32.mrf.mxu1 }
 0x523   :  { %v19603_v44 = vadd.f32 %v9796_v32, %v9684_v28  ;;  %v9733_v28 = vadd.f32 %v19491_v43, %v9620_v26  ;;  %v20694_v43 = vld [vmem:[#allocation30_spill] sm:$0xff] }
 0x524   :  { %v9798_v27 = vpop.f32.mrf.mxu1 }
 0x525   :  { %20685 = vst [vmem:[#allocation53_spill] sm:$0xff] %v19603_v44  ;;  %v19605_v10 = vadd.f32 %v9798_v27, %v9686_v13  ;;  %v9840_v13 = vadd.f32 %v19430_v54, %v19479_v5  ;;  %v9844_v44 = vadd.f32 %v19444_v4, %v9731_v42  ;;  %v9846_v26 = vadd.f32 %v19447_v33, %v9733_v28 }
 0x526   :  { %v19607_v30 = vpop.f32.mrf.mxu1  ;;  %v9630_v54 = vadd.f32 %v20694_v43, %v19469_v16  ;;  %v9850_v42 = vadd.f32 %v19452_v19, %v19499_v35  ;;  %v9638_v19 = vadd.f32 %v19276_v23, %v19461_v18  ;;  %v9860_v23 = vadd.f32 %v19481_v62, %v19519_v38 }
 0x527   :  { %20686 = vst [vmem:[#allocation84_spill] sm:$0xff] %v19605_v10  ;;  %v19626_v10 = vpop.f32.mrf.mxu0  ;;  %v9648_v62 = vadd.f32 %v19310_v9, %v19461_v18  ;;  %v9870_v9 = vadd.f32 %v19501_v7, %v19539_v60  ;;  %v9658_v7 = vadd.f32 %v19344_v31, %v19461_v18 }
 0x528   :  { %v19613_v63 = vpop.f32.mrf.mxu1  ;;  %20692 = vst [vmem:[#allocation86_spill] sm:$0xff] %v19626_v10 }
 0x529   :  { %20689 = vst [vmem:[#allocation4_spill] sm:$0xff] %v19613_v63  ;;  %v19634_v4 = vpop.f32.mrf.mxu0 }
 0x52a   :  { %v9952_v32 = vpop.f32.mrf.mxu1 }
 0x52b   :  { %v9953_v34 = vadd.f32 %v9952_v32, %v9840_v13  ;;  %v9741_v32 = vadd.f32 %v19507_v15, %v9628_v17  ;;  %v9852_v15 = vadd.f32 %v19463_v37, %v19503_v57  ;;  %v9751_v37 = vadd.f32 %v19527_v21, %v9638_v19 }
 0x52c   :  { %v9954_v27 = vpop.f32.mrf.mxu1  ;;  %v9862_v21 = vadd.f32 %v19485_v12, %v19523_v25  ;;  %v9761_v12 = vadd.f32 %v19543_v40, %v9648_v62  ;;  %v9872_v40 = vadd.f32 %v19505_v20, %v19541_v1  ;;  %v9771_v20 = vadd.f32 %v19559_v52, %v9658_v7  ;;  %v20695_v52 = vld [vmem:[#allocation78_spill] sm:$0xff]  ;;  %v20703_v7 = vld [vmem:[#allocation76_spill] sm:$0xff] }
 0x52d   :  { %v9955_v8 = vadd.f32 %v9954_v27, %v9842_v53  ;;  %v10037_v13 = vmax.f32 %v9953_v34, 0.0  ;;  %v9743_v27 = vadd.f32 %v19511_v49, %v9630_v54  ;;  %v9854_v34 = vadd.f32 %v19471_v50, %v9741_v32 }
 0x52e   :  { %v9956_v3 = vpop.f32.mrf.mxu1 }
 0x52f   :  { %v9957_v63 = vadd.f32 %v9956_v3, %v9844_v44  ;;  %v10038_v44 = vmax.f32 %v9955_v8, 0.0  ;;  %v9856_v49 = vadd.f32 %v19475_v55, %v9743_v27  ;;  %v9640_v8 = vadd.f32 %v19282_v45, %v19469_v16 }
 0x530   :  { %v9958_v5 = vpop.f32.mrf.mxu1  ;;  %v9864_v27 = vadd.f32 %v19489_v14, %v9751_v37 }
 0x531   :  { %v10045_v39 = vmax.f32 %v9957_v63, 0.0  ;;  %v9959_v59 = vadd.f32 %v9958_v5, %v9846_v26  ;;  %v19642_v63 = vpop.f32.mrf.mxu0  ;;  %v9753_v32 = vadd.f32 %v19531_v58, %v9640_v8  ;;  %v9874_v8 = vadd.f32 %v19509_v51, %v9761_v12 }
 0x532   :  { %v9962_v10 = vpop.f32.mrf.mxu1 }
 0x533   :  { %v10165_v53 = vpack.c.bf16 %v10045_v39, %v10037_v13  ;;  %v10046_v33 = vmax.f32 %v9959_v59, 0.0  ;;  %v9963_v48 = vadd.f32 %v9962_v10, %v9850_v42  ;;  %v19650_v54 = vpop.f32.mrf.mxu0  ;;  %v9866_v58 = vadd.f32 %v19495_v24, %v9753_v32 }
 0x534   :  { %v9964_v28 = vpop.f32.mrf.mxu1 }
 0x535   :  { %v10166_v3 = vpack.c.bf16 %v10046_v33, %v10038_v44  ;;  %v9965_v35 = vadd.f32 %v9964_v28, %v9852_v15  ;;  %v10053_v57 = vmax.f32 %v9963_v48, 0.0  ;;  %v19658_v44 = vpop.f32.mrf.mxu0  ;;  %v9650_v28 = vadd.f32 %v19316_v47, %v19469_v16 }
 0x536   :  { %v9966_v17 = vpop.f32.mrf.mxu1 }
 0x537   :  { %v9967_v26 = vadd.f32 %v9966_v17, %v9854_v34  ;;  %11065 = vmatprep.mubr.bf16.mxu1 %v10166_v3  ;;  %v10054_v13 = vmax.f32 %v9965_v35, 0.0  ;;  %v19666_v15 = vpop.f32.mrf.mxu0  ;;  %v9763_v17 = vadd.f32 %v19547_v2, %v9650_v28 }
 0x538   :  { %v9968_v10 = vpop.f32.mrf.mxu1  ;;  %11066 = vmatmul.mubr.bf16.vlgmr.msra.gmra.mxu1 %v10165_v53 }
 0x539   :  { %v10061_v50 = vmax.f32 %v9967_v26, 0.0  ;;  %v9969_v43 = vadd.f32 %v9968_v10, %v9856_v49  ;;  %v19674_v10 = vpop.f32.mrf.mxu0  ;;  %v9876_v2 = vadd.f32 %v19515_v41, %v9763_v17 }
 0x53a   :  { %v9972_v5 = vpop.f32.mrf.mxu1 }
 0x53b   :  { %v10173_v55 = vpack.c.bf16 %v10061_v50, %v10053_v57  ;;  %v10062_v39 = vmax.f32 %v9969_v43, 0.0  ;;  %v9973_v42 = vadd.f32 %v9972_v5, %v9860_v23  ;;  %v9660_v50 = vadd.f32 %v19350_v0, %v19469_v16  ;;  %v19682_v5 = vpop.f32.mrf.mxu0 }
 0x53c   :  { %v9974_v59 = vpop.f32.mrf.mxu1  ;;  %v9882_v0 = vadd.f32 %v19525_v36, %v19557_v29  ;;  %v20698_v36 = vld [vmem:[#allocation32_spill] sm:$0xff] }
 0x53d   :  { %v10174_v45 = vpack.c.bf16 %v10062_v39, %v10054_v13  ;;  %v9975_v38 = vadd.f32 %v9974_v59, %v9862_v21  ;;  %v10069_v25 = vmax.f32 %v9973_v42, 0.0  ;;  %v9773_v31 = vadd.f32 %v19563_v6, %v9660_v50  ;;  %v19688_v42 = vpop.f32.mrf.mxu0 }
 0x53e   :  { %v9976_v53 = vpop.f32.mrf.mxu1  ;;  %v9880_v21 = vadd.f32 %v20695_v52, %v19555_v46 }
 0x53f   :  { %v9977_v33 = vadd.f32 %v9976_v53, %v9864_v27  ;;  %11073 = vmatprep.mubr.bf16.mxu1 %v10174_v45  ;;  %v10070_v19 = vmax.f32 %v9975_v38, 0.0  ;;  %v9884_v45 = vadd.f32 %v19529_v61, %v9771_v20  ;;  %v20696_v53 = vld [vmem:[#allocation75_spill] sm:$0xff]  ;;  %v9670_v61 = vadd.f32 %v20698_v36, %v19469_v16  ;;  %v20705_v20 = vld [vmem:[#allocation69_spill] sm:$0xff] }
 0x540   :  { %v9978_v3 = vpop.f32.mrf.mxu1  ;;  %11074 = vmatmul.mubr.bf16.gmra.mxu1 %v10173_v55  ;;  %v9668_v62 = vadd.f32 %v20696_v53, %v19461_v18  ;;  %v20711_v36 = vld [vmem:[#allocation81_spill] sm:$0xff] }
 0x541   :  { %v10077_v14 = vmax.f32 %v9977_v33, 0.0  ;;  %v9979_v48 = vadd.f32 %v9978_v3, %v9866_v58  ;;  %v20697_v33 = vld [vmem:[#allocation67_spill] sm:$0xff] }
 0x542   :  { %v9982_v34 = vpop.f32.mrf.mxu1  ;;  %v9886_v58 = vadd.f32 %v20697_v33, %v9773_v31  ;;  %v9781_v29 = vadd.f32 %v19575_v56, %v9668_v62 }
 0x543   :  { %v10181_v24 = vpack.c.bf16 %v10077_v14, %v10069_v25  ;;  %v10078_v35 = vmax.f32 %v9979_v48, 0.0  ;;  %v9983_v49 = vadd.f32 %v9982_v34, %v9870_v9  ;;  %v19698_v25 = vpop.f32.mrf.mxu0  ;;  %v9783_v48 = vadd.f32 %v19579_v11, %v9670_v61  ;;  %v20712_v61 = vld [vmem:[#allocation82_spill] sm:$0xff] }
 0x544   :  { %v9984_v26 = vpop.f32.mrf.mxu1 }
 0x545   :  { %v10182_v47 = vpack.c.bf16 %v10078_v35, %v10070_v19  ;;  %v9985_v60 = vadd.f32 %v9984_v26, %v9872_v40  ;;  %v10085_v1 = vmax.f32 %v9983_v49, 0.0  ;;  %v20699_v35 = vld [vmem:[#allocation70_spill] sm:$0xff]  ;;  %v20700_v26 = vld [vmem:[#allocation68_spill] sm:$0xff] }
 0x546   :  { %v9986_v37 = vpop.f32.mrf.mxu1  ;;  %v20701_v49 = vld [vmem:[#allocation80_spill] sm:$0xff] }
 0x547   :  { %v9987_v57 = vadd.f32 %v9986_v37, %v9874_v8  ;;  %11081 = vmatprep.mubr.bf16.mxu1 %v10182_v47  ;;  %v10086_v13 = vmax.f32 %v9985_v60, 0.0  ;;  %v9892_v47 = vadd.f32 %v20700_v26, %v20699_v35  ;;  %v9894_v40 = vadd.f32 %v20701_v49, %v9781_v29  ;;  %v19704_v8 = vpop.f32.mrf.mxu0  ;;  %v20702_v37 = vld [vmem:[#allocation79_spill] sm:$0xff]  ;;  %v20715_v35 = vld [vmem:[#allocation66_spill] sm:$0xff] }
 0x548   :  { %v9988_v43 = vpop.f32.mrf.mxu1  ;;  %11082 = vmatmul.mubr.bf16.gmra.mxu1 %v10181_v24  ;;  %v9890_v60 = vadd.f32 %v20703_v7, %v20702_v37  ;;  %v9900_v29 = vadd.f32 %v20712_v61, %v20711_v36  ;;  %v9690_v26 = vadd.f32 %v20715_v35, %v19469_v16  ;;  %v20716_v7 = vld [vmem:[#allocation4_spill] sm:$0xff] }
 0x549   :  { %v10093_v51 = vmax.f32 %v9987_v57, 0.0  ;;  %v9989_v23 = vadd.f32 %v9988_v43, %v9876_v2  ;;  %v20704_v2 = vld [vmem:[#allocation77_spill] sm:$0xff] }
 0x54a   :  { %v9992_v32 = vpop.f32.mrf.mxu1  ;;  %v9678_v11 = vadd.f32 %v20704_v2, %v19461_v18 }
 0x54b   :  { %v10189_v55 = vpack.c.bf16 %v10093_v51, %v10085_v1  ;;  %v10094_v39 = vmax.f32 %v9989_v23, 0.0  ;;  %v9993_v28 = vadd.f32 %v9992_v32, %v9880_v21  ;;  %v9896_v1 = vadd.f32 %v20705_v20, %v9783_v48  ;;  %v20706_v32 = vld [vmem:[#allocation31_spill] sm:$0xff] }
 0x54c   :  { %v9994_v59 = vpop.f32.mrf.mxu1  ;;  %v9680_v31 = vadd.f32 %v20706_v32, %v19469_v16  ;;  %v20718_v20 = vld [vmem:[#allocation51_spill] sm:$0xff]  ;;  %v20720_v32 = vld [vmem:[#allocation53_spill] sm:$0xff] }
 0x54d   :  { %v10190_v41 = vpack.c.bf16 %v10094_v39, %v10086_v13  ;;  %v9995_v6 = vadd.f32 %v9994_v59, %v9882_v0  ;;  %v10101_v17 = vmax.f32 %v9993_v28, 0.0  ;;  %v9791_v13 = vadd.f32 %v19591_v22, %v9678_v11  ;;  %v19714_v39 = vpop.f32.mrf.mxu0  ;;  %v20707_v0 = vld [vmem:[#allocation50_spill] sm:$0xff] }
 0x54e   :  { %v9996_v27 = vpop.f32.mrf.mxu1 }
 0x54f   :  { %v9997_v38 = vadd.f32 %v9996_v27, %v9884_v45  ;;  %11089 = vmatprep.mubr.bf16.mxu1 %v10190_v41  ;;  %v10102_v9 = vmax.f32 %v9995_v6, 0.0  ;;  %v9793_v45 = vadd.f32 %v20707_v0, %v9680_v31  ;;  %v20708_v6 = vld [vmem:[#allocation49_spill] sm:$0xff]  ;;  %v20721_v31 = vld [vmem:[#allocation52_spill] sm:$0xff] }
 0x550   :  { %v9998_v3 = vpop.f32.mrf.mxu1  ;;  %11090 = vmatmul.mubr.bf16.gmra.mxu1 %v10189_v55 }
 0x551   :  { %v9999_v12 = vadd.f32 %v9998_v3, %v9886_v58  ;;  %v10109_v46 = vmax.f32 %v9997_v38, 0.0  ;;  %v20709_v38 = vld [vmem:[#allocation71_spill] sm:$0xff]  ;;  %v19720_v3 = vpop.f32.mrf.mxu0 }
 0x552   :  { %v10002_v14 = vpop.f32.mrf.mxu1  ;;  %v9902_v33 = vadd.f32 %v20709_v38, %v20708_v6  ;;  %v20710_v58 = vld [vmem:[#allocation83_spill] sm:$0xff] }
 0x553   :  { %v10110_v34 = vmax.f32 %v9999_v12, 0.0  ;;  %v10197_v56 = vpack.c.bf16 %v10109_v46, %v10101_v17  ;;  %v10003_v51 = vadd.f32 %v10002_v14, %v9890_v60  ;;  %v9904_v28 = vadd.f32 %v20710_v58, %v9791_v13  ;;  %v20713_v46 = vld [vmem:[#allocation74_spill] sm:$0xff] }
 0x554   :  { %v10004_v19 = vpop.f32.mrf.mxu1  ;;  %v9688_v14 = vadd.f32 %v20713_v46, %v19461_v18  ;;  %v9803_v18 = vadd.f32 %v20716_v7, %v9690_v26  ;;  %v9910_v13 = vadd.f32 %v20721_v31, %v20720_v32 }
 0x555   :  { %v10198_v24 = vpack.c.bf16 %v10110_v34, %v10102_v9  ;;  %v10005_v50 = vadd.f32 %v10004_v19, %v9892_v47  ;;  %v10117_v27 = vmax.f32 %v10003_v51, 0.0  ;;  %v20714_v34 = vld [vmem:[#allocation3_spill] sm:$0xff]  ;;  %v20719_v51 = vld [vmem:[#allocation86_spill] sm:$0xff] }
 0x556   :  { %v10006_v57 = vpop.f32.mrf.mxu1  ;;  %v9906_v17 = vadd.f32 %v20714_v34, %v9793_v45  ;;  %v9801_v47 = vadd.f32 %v19607_v30, %v9688_v14  ;;  %v9916_v0 = vadd.f32 %v19634_v4, %v9803_v18 }
 0x557   :  { %v10007_v43 = vadd.f32 %v10006_v57, %v9894_v40  ;;  %11097 = vmatprep.mubr.bf16.mxu1 %v10198_v24  ;;  %v10118_v52 = vmax.f32 %v10005_v50, 0.0  ;;  %v19730_v40 = vpop.f32.mrf.mxu0 }
 0x558   :  { %v10008_v23 = vpop.f32.mrf.mxu1  ;;  %11098 = vmatmul.mubr.bf16.gmra.mxu1 %v10197_v56 }
 0x559   :  { %v10009_v55 = vadd.f32 %v10008_v23, %v9896_v1  ;;  %v10125_v59 = vmax.f32 %v10007_v43, 0.0  ;;  %v20717_v43 = vld [vmem:[#allocation84_spill] sm:$0xff]  ;;  %v9914_v23 = vadd.f32 %v20719_v51, %v9801_v47  ;;  %v19736_v16 = vpop.f32.mrf.mxu0 }
 0x55a   :  { %v10012_v41 = vpop.f32.mrf.mxu1  ;;  %v9912_v1 = vadd.f32 %v20718_v20, %v20717_v43 }
 0x55b   :  { %v10126_v21 = vmax.f32 %v10009_v55, 0.0  ;;  %v10205_v22 = vpack.c.bf16 %v10125_v59, %v10117_v27  ;;  %v10013_v19 = vadd.f32 %v10012_v41, %v9900_v29  ;;  %v19741_v27 = vpop.f32.mrf.mxu0 }
 0x55c   :  { %v10014_v53 = vpop.f32.mrf.mxu1 }
 0x55d   :  { %v10206_v62 = vpack.c.bf16 %v10126_v21, %v10118_v52  ;;  %v10015_v48 = vadd.f32 %v10014_v53, %v9902_v33  ;;  %v10133_v2 = vmax.f32 %v10013_v19, 0.0  ;;  %v19743_v58 = vpop.f32.mrf.mxu0 }
 0x55e   :  { %v10016_v12 = vpop.f32.mrf.mxu1 }
 0x55f   :  { %v10017_v9 = vadd.f32 %v10016_v12, %v9904_v28  ;;  %11105 = vmatprep.mubr.bf16.mxu1 %v10206_v62  ;;  %v10134_v60 = vmax.f32 %v10015_v48, 0.0 }
 0x560   :  { %v10018_v24 = vpop.f32.mrf.mxu1  ;;  %11106 = vmatmul.mubr.bf16.gmra.mxu1 %v10205_v22  ;;  %v19745_v22 = vpop.f32.mrf.mxu0 }
 0x561   :  { %v10019_v49 = vadd.f32 %v10018_v24, %v9906_v17  ;;  %v10141_v56 = vmax.f32 %v10017_v9, 0.0 }
 0x562   :  { %v10022_v37 = vpop.f32.mrf.mxu1  ;;  %v19747_v36 = vpop.f32.mrf.mxu0 }
 0x563   :  { %v10142_v57 = vmax.f32 %v10019_v49, 0.0  ;;  %v10213_v30 = vpack.c.bf16 %v10141_v56, %v10133_v2  ;;  %v10023_v45 = vadd.f32 %v10022_v37, %v9910_v13 }
 0x564   :  { %v10024_v11 = vpop.f32.mrf.mxu1  ;;  %v19749_v4 = vpop.f32.mrf.mxu0 }
 0x565   :  { %v10214_v50 = vpack.c.bf16 %v10142_v57, %v10134_v60  ;;  %v10025_v59 = vadd.f32 %v10024_v11, %v9912_v1  ;;  %v10149_v38 = vmax.f32 %v10023_v45, 0.0 }
 0x566   :  { %v10026_v55 = vpop.f32.mrf.mxu1  ;;  %v19753_v29 = vpop.f32.mrf.mxu0 }
 0x567   :  { %v10027_v41 = vadd.f32 %v10026_v55, %v9914_v23  ;;  %11113 = vmatprep.mubr.bf16.mxu1 %v10214_v50  ;;  %v10150_v62 = vmax.f32 %v10025_v59, 0.0  ;;  %20722 = vst [vmem:[#allocation85_spill] sm:$0xff] %v19753_v29 }
 0x568   :  { %v10028_v52 = vpop.f32.mrf.mxu1  ;;  %11114 = vmatmul.mubr.bf16.gmra.mxu1 %v10213_v30  ;;  %v19757_v46 = vpop.f32.mrf.mxu0 }
 0x569   :  { %v10029_v21 = vadd.f32 %v10028_v52, %v9916_v0  ;;  %v10157_v53 = vmax.f32 %v10027_v41, 0.0  ;;  %20723 = vst [vmem:[#allocation60_spill] sm:$0xff] %v19757_v46 }
 0x56a   :  { %v19751_v61 = vpop.f32.mrf.mxu1  ;;  %v19761_v48 = vpop.f32.mrf.mxu0 }
 0x56b   :  { %v10158_v6 = vmax.f32 %v10029_v21, 0.0  ;;  %v10221_v28 = vpack.c.bf16 %v10157_v53, %v10149_v38  ;;  %20724 = vst [vmem:[#allocation59_spill] sm:$0xff] %v19761_v48 }
 0x56c   :  { %v19755_v12 = vpop.f32.mrf.mxu1  ;;  %v19765_v34 = vpop.f32.mrf.mxu0 }
 0x56d   :  { %v10222_v33 = vpack.c.bf16 %v10158_v6, %v10150_v62  ;;  %20725 = vst [vmem:[#allocation64_spill] sm:$0xff] %v19765_v34 }
 0x56e   :  { %v19759_v14 = vpop.f32.mrf.mxu1  ;;  %v19769_v19 = vpop.f32.mrf.mxu0 }
 0x56f   :  { %11121 = vmatprep.mubr.bf16.mxu1 %v10222_v33  ;;  %20726 = vst [vmem:[#allocation61_spill] sm:$0xff] %v19769_v19 }
 0x570   :  { %11122 = vmatmul.mubr.bf16.gmra.mxu1 %v10221_v28  ;;  %v19763_v9 = vpop.f32.mrf.mxu1  ;;  %v19773_v35 = vpop.f32.mrf.mxu0 }
 0x571   :  { %20727 = vst [vmem:[#allocation6_spill] sm:$0xff] %v19773_v35 }
 0x572   :  { %v19767_v17 = vpop.f32.mrf.mxu1  ;;  %v19777_v47 = vpop.f32.mrf.mxu0 }
 0x573   :  { %20728 = vst [vmem:[#allocation10_spill] sm:$0xff] %v19777_v47 }
 0x574   :  { %v19771_v24 = vpop.f32.mrf.mxu1  ;;  %v19781_v56 = vpop.f32.mrf.mxu0 }
 0x575   :  { %20729 = vst [vmem:[#allocation63_spill] sm:$0xff] %v19781_v56 }
 0x576   :  { %v19775_v26 = vpop.f32.mrf.mxu1  ;;  %v19785_v7 = vpop.f32.mrf.mxu0 }
 0x577   :  { %20730 = vst [vmem:[#allocation12_spill] sm:$0xff] %v19785_v7 }
 0x578   :  { %v19779_v49 = vpop.f32.mrf.mxu1  ;;  %v19789_v60 = vpop.f32.mrf.mxu0 }
 0x579   :  { %20731 = vst [vmem:[#allocation46_spill] sm:$0xff] %v19789_v60 }
 0x57a   :  { %v19783_v37 = vpop.f32.mrf.mxu1  ;;  %v19793_v2 = vpop.f32.mrf.mxu0 }
 0x57b   :  { %20732 = vst [vmem:[#allocation18_spill] sm:$0xff] %v19793_v2 }
 0x57c   :  { %v19787_v18 = vpop.f32.mrf.mxu1  ;;  %v19797_v50 = vpop.f32.mrf.mxu0 }
 0x57d   :  { %20733 = vst [vmem:[#allocation16_spill] sm:$0xff] %v19797_v50 }
 0x57e   :  { %v19791_v57 = vpop.f32.mrf.mxu1  ;;  %v19801_v20 = vpop.f32.mrf.mxu0 }
 0x57f   :  { %20734 = vst [vmem:[#allocation42_spill] sm:$0xff] %v19801_v20 }
 0x580   :  { %v19795_v11 = vpop.f32.mrf.mxu1  ;;  %v19805_v51 = vpop.f32.mrf.mxu0 }
 0x581   :  { %20735 = vst [vmem:[#allocation62_spill] sm:$0xff] %v19805_v51 }
 0x582   :  { %v19799_v43 = vpop.f32.mrf.mxu1  ;;  %v12375_v30 = vpop.f32.mrf.mxu0 }
 0x584   :  { %v19803_v1 = vpop.f32.mrf.mxu1  ;;  %v12376_v31 = vpop.f32.mrf.mxu0 }
 0x585   :  { %v12377_v48 = vadd.f32 %v12376_v31, %v12375_v30  ;;  %v12319_v30 = vadd.f32 %v19771_v24, %v19767_v17  ;;  %v12322_v17 = vadd.f32 %v19779_v49, %v19775_v26  ;;  %v12325_v26 = vadd.f32 %v19787_v18, %v19783_v37 }
 0x586   :  { %v19807_v23 = vpop.f32.mrf.mxu1  ;;  %v12378_v55 = vpop.f32.mrf.mxu0  ;;  %v12328_v18 = vadd.f32 %v19795_v11, %v19791_v57  ;;  %v12331_v11 = vadd.f32 %v19803_v1, %v19799_v43 }
 0x588   :  { %v19809_v32 = vpop.f32.mrf.mxu1  ;;  %v12379_v41 = vpop.f32.mrf.mxu0 }
 0x589   :  { %v12334_v43 = vadd.f32 %v19809_v32, %v19807_v23 }
 0x58a   :  { %v19811_v13 = vpop.f32.mrf.mxu1  ;;  %v12381_v45 = vpop.f32.mrf.mxu0 }
 0x58c   :  { %v19813_v59 = vpop.f32.mrf.mxu1  ;;  %v12382_v21 = vpop.f32.mrf.mxu0 }
 0x58d   :  { %v12337_v23 = vadd.f32 %v19813_v59, %v19811_v13 }
 0x58e   :  { %v19815_v0 = vpop.f32.mrf.mxu1  ;;  %v12384_v62 = vpop.f32.mrf.mxu0 }
 0x58f   :  { %20736 = vst [vmem:[#allocation45_spill] sm:$0xff] %v19815_v0  ;;  %v12316_v0 = vadd.f32 %v19763_v9, %v19759_v14  ;;  %v12383_v9 = vadd.f32 %v12382_v21, %v12381_v45 }
 0x590   :  { %v19817_v52 = vpop.f32.mrf.mxu1  ;;  %v12385_v38 = vpop.f32.mrf.mxu0 }
 0x591   :  { %20737 = vst [vmem:[#allocation72_spill] sm:$0xff] %v19817_v52 }
 0x592   :  { %v19819_v53 = vpop.f32.mrf.mxu1  ;;  %v19825_v28 = vpop.f32.mrf.mxu0 }
 0x593   :  { %20738 = vst [vmem:[#allocation17_spill] sm:$0xff] %v19819_v53 }
 0x594   :  { %v19821_v6 = vpop.f32.mrf.mxu1  ;;  %v19829_v20 = vpop.f32.mrf.mxu0 }
 0x595   :  { %20739 = vst [vmem:[#allocation13_spill] sm:$0xff] %v19821_v6 }
 0x596   :  { %v19823_v33 = vpop.f32.mrf.mxu1  ;;  %v19833_v2 = vpop.f32.mrf.mxu0  ;;  %v20754_v13 = vld [vmem:[#allocation45_spill] sm:$0xff] }
 0x597   :  { %20740 = vst [vmem:[#allocation41_spill] sm:$0xff] %v19823_v33 }
 0x598   :  { %v19827_v51 = vpop.f32.mrf.mxu1  ;;  %v19837_v7 = vpop.f32.mrf.mxu0  ;;  %v20755_v59 = vld [vmem:[#allocation72_spill] sm:$0xff] }
 0x599   :  { %20741 = vst [vmem:[#allocation44_spill] sm:$0xff] %v19827_v51 }
 0x59a   :  { %v19831_v50 = vpop.f32.mrf.mxu1  ;;  %v19841_v47 = vpop.f32.mrf.mxu0 }
 0x59b   :  { %20742 = vst [vmem:[#allocation20_spill] sm:$0xff] %v19831_v50 }
 0x59c   :  { %v19835_v60 = vpop.f32.mrf.mxu1  ;;  %v19845_v33 = vpop.f32.mrf.mxu0 }
 0x59d   :  { %20743 = vst [vmem:[#allocation9_spill] sm:$0xff] %v19835_v60  ;;  %v12249_v60 = vadd.f32 %v19650_v54, %v19642_v63 }
 0x59e   :  { %v19839_v56 = vpop.f32.mrf.mxu1  ;;  %v19849_v51 = vpop.f32.mrf.mxu0 }
 0x59f   :  { %20744 = vst [vmem:[#allocation47_spill] sm:$0xff] %v19839_v56  ;;  %v19862_v56 = vld [vmem:[%s20027_s6] ss:$0 sm:$0xff] }
 0x5a0   :  { %v19843_v35 = vpop.f32.mrf.mxu1  ;;  %v19853_v50 = vpop.f32.mrf.mxu0 }
 0x5a1   :  { %20745 = vst [vmem:[#allocation65_spill] sm:$0xff] %v19843_v35 }
 0x5a2   :  { %v19847_v19 = vpop.f32.mrf.mxu1  ;;  %v19864_v35 = vpop.f32.mrf.mxu0 }
 0x5a3   :  { %20746 = vst [vmem:[#allocation19_spill] sm:$0xff] %v19847_v19  ;;  %20749 = vst [vmem:[#allocation22_spill] sm:$0xff] %v19864_v35  ;;  %v12313_v19 = vadd.f32 %v19755_v12, %v19751_v61  ;;  %v12255_v35 = vadd.f32 %v19682_v5, %v19674_v10  ;;  %v12258_v10 = vadd.f32 %v19698_v25, %v19688_v42 }
 0x5a4   :  { %v19851_v6 = vpop.f32.mrf.mxu1  ;;  %v19873_v52 = vpop.f32.mrf.mxu0 }
 0x5a5   :  { %20747 = vst [vmem:[#allocation58_spill] sm:$0xff] %v19851_v6  ;;  %v10777_v6 = vadd.f32 %v12249_v60, %v19862_v56  ;;  %v10785_v31 = vadd.f32 %v12255_v35, %v19862_v56  ;;  %v12261_v35 = vadd.f32 %v19714_v39, %v19704_v8  ;;  %v10788_v42 = vadd.f32 %v12258_v10, %v19862_v56 }
 0x5a6   :  { %v19855_v53 = vpop.f32.mrf.mxu1  ;;  %v19880_v29 = vpop.f32.mrf.mxu0 }
 0x5a7   :  { %20748 = vst [vmem:[#allocation56_spill] sm:$0xff] %v19855_v53  ;;  %v12252_v53 = vadd.f32 %v19666_v15, %v19658_v44  ;;  %v10874_v54 = vadd.f32 %v12313_v19, %v10777_v6  ;;  %v10885_v6 = vadd.f32 %v12322_v17, %v10788_v42  ;;  %v10793_v8 = vadd.f32 %v12261_v35, %v19862_v56  ;;  %v20752_v42 = vld [vmem:[#allocation60_spill] sm:$0xff] }
 0x5a8   :  { %v19868_v34 = vpop.f32.mrf.mxu1 }
 0x5a9   :  { %20750 = vst [vmem:[#allocation34_spill] sm:$0xff] %v19868_v34  ;;  %v10780_v61 = vadd.f32 %v12252_v53, %v19862_v56  ;;  %v10971_v12 = vadd.f32 %v12377_v48, %v10874_v54  ;;  %v12380_v34 = vadd.f32 %v12379_v41, %v12378_v55  ;;  %v19890_v48 = vpop.f32.mrf.mxu0  ;;  %v10882_v41 = vadd.f32 %v12319_v30, %v10785_v31 }
 0x5aa   :  { %v10890_v37 = vadd.f32 %v12325_v26, %v10793_v8 }
 0x5ab   :  { %v10877_v15 = vadd.f32 %v12316_v0, %v10780_v61  ;;  %v10979_v25 = vadd.f32 %v12383_v9, %v10882_v41  ;;  %v19900_v21 = vpop.f32.mrf.mxu0 }
 0x5ad   :  { %v10974_v5 = vadd.f32 %v12380_v34, %v10877_v15  ;;  %v12386_v34 = vadd.f32 %v12385_v38, %v12384_v62  ;;  %v12389_v38 = vadd.f32 %v19829_v20, %v19825_v28  ;;  %v19912_v61 = vpop.f32.mrf.mxu0  ;;  %v12392_v28 = vadd.f32 %v19837_v7, %v19833_v2 }
 0x5ae   :  { %v12395_v2 = vadd.f32 %v19845_v33, %v19841_v47  ;;  %v12398_v47 = vadd.f32 %v19853_v50, %v19849_v51  ;;  %v20753_v50 = vld [vmem:[#allocation22_spill] sm:$0xff] }
 0x5af   :  { %v10982_v62 = vadd.f32 %v12386_v34, %v10885_v6  ;;  %v10987_v20 = vadd.f32 %v12389_v38, %v10890_v37  ;;  %v19924_v30 = vpop.f32.mrf.mxu0  ;;  %v12401_v51 = vadd.f32 %v19873_v52, %v20753_v50  ;;  %v12404_v52 = vadd.f32 %v19890_v48, %v19880_v29 }
 0x5b0   :  { %v12407_v29 = vadd.f32 %v19912_v61, %v19900_v21 }
 0x5f8   :  { %v12439_v63 = vpop.f32.mrf.mxu1 }
 0x5fa   :  { %v12440_v46 = vpop.f32.mrf.mxu1 }
 0x5fb   :  { %v12441_v60 = vadd.f32 %v12440_v46, %v12439_v63  ;;  %v12264_v63 = vadd.f32 %v19730_v40, %v19720_v3  ;;  %v12267_v3 = vadd.f32 %v19741_v27, %v19736_v16 }
 0x5fc   :  { %v12442_v44 = vpop.f32.mrf.mxu1 }
 0x5fd   :  { %v11068_v19 = vadd.f32 %v12441_v60, %v10971_v12  ;;  %v10801_v27 = vadd.f32 %v12267_v3, %v19862_v56 }
 0x5fe   :  { %v12443_v14 = vpop.f32.mrf.mxu1 }
 0x5ff   :  { %11130 = vst [vmem:[%s20028_s7] sm:$0xff] %v11068_v19  ;;  %v12444_v46 = vadd.f32 %v12443_v14, %v12442_v44  ;;  %v10796_v44 = vadd.f32 %v12264_v63, %v19862_v56  ;;  %v12270_v14 = vadd.f32 %v19745_v22, %v19743_v58  ;;  %v20757_v63 = vld [vmem:[#allocation64_spill] sm:$0xff] }
 0x600   :  { %v12445_v55 = vpop.f32.mrf.mxu1 }
 0x601   :  { %v11071_v24 = vadd.f32 %v12444_v46, %v10974_v5  ;;  %v10893_v57 = vadd.f32 %v12328_v18, %v10796_v44  ;;  %v12409_v5 = vpop.f32.mrf.mxu0  ;;  %v10898_v46 = vadd.f32 %v12331_v11, %v10801_v27  ;;  %v10804_v22 = vadd.f32 %v12270_v14, %v19862_v56  ;;  %v20759_v44 = vld [vmem:[#allocation13_spill] sm:$0xff]  ;;  %v20761_v11 = vld [vmem:[#allocation6_spill] sm:$0xff] }
 0x602   :  { %v12446_v0 = vpop.f32.mrf.mxu1  ;;  %v12410_v21 = vadd.f32 %v12409_v5, %v19924_v30 }
 0x603   :  { %11131 = vst [vmem:[%s20028_s7 + $0x8] sm:$0xff] %v11071_v24  ;;  %v12447_v45 = vadd.f32 %v12446_v0, %v12445_v55  ;;  %v10990_v7 = vadd.f32 %v12392_v28, %v10893_v57  ;;  %v12273_v55 = vadd.f32 %v19749_v4, %v19747_v36  ;;  %v10995_v41 = vadd.f32 %v12395_v2, %v10898_v46  ;;  %v12411_v17 = vpop.f32.mrf.mxu0  ;;  %v20751_v0 = vld [vmem:[#allocation85_spill] sm:$0xff] }
 0x604   :  { %v12448_v53 = vpop.f32.mrf.mxu1  ;;  %v10901_v35 = vadd.f32 %v12334_v43, %v10804_v22  ;;  %v20760_v57 = vld [vmem:[#allocation61_spill] sm:$0xff]  ;;  %v20764_v43 = vld [vmem:[#allocation10_spill] sm:$0xff] }
 0x605   :  { %v11076_v49 = vadd.f32 %v12447_v45, %v10979_v25  ;;  %v10809_v36 = vadd.f32 %v12273_v55, %v19862_v56  ;;  %v12276_v25 = vadd.f32 %v20752_v42, %v20751_v0  ;;  %v20762_v2 = vld [vmem:[#allocation41_spill] sm:$0xff]  ;;  %v20768_v42 = vld [vmem:[#allocation12_spill] sm:$0xff] }
 0x606   :  { %v12449_v39 = vpop.f32.mrf.mxu1  ;;  %v10998_v34 = vadd.f32 %v12398_v47, %v10901_v35  ;;  %v20766_v35 = vld [vmem:[#allocation20_spill] sm:$0xff] }
 0x607   :  { %11132 = vst [vmem:[%s20028_s7 + $0x10] sm:$0xff] %v11076_v49  ;;  %v12450_v54 = vadd.f32 %v12449_v39, %v12448_v53  ;;  %v12412_v53 = vpop.f32.mrf.mxu0  ;;  %v10906_v26 = vadd.f32 %v12337_v23, %v10809_v36  ;;  %v12340_v49 = vadd.f32 %v20755_v59, %v20754_v13  ;;  %v20756_v39 = vld [vmem:[#allocation59_spill] sm:$0xff]  ;;  %v20767_v23 = vld [vmem:[#allocation9_spill] sm:$0xff] }
 0x608   :  { %v12451_v12 = vpop.f32.mrf.mxu1  ;;  %v12413_v30 = vadd.f32 %v12412_v53, %v12411_v17  ;;  %v20771_v13 = vld [vmem:[#allocation65_spill] sm:$0xff] }
 0x609   :  { %v11079_v60 = vadd.f32 %v12450_v54, %v10982_v62  ;;  %v12279_v62 = vadd.f32 %v20757_v63, %v20756_v39  ;;  %v10812_v54 = vadd.f32 %v12276_v25, %v19862_v56  ;;  %v12414_v18 = vpop.f32.mrf.mxu0  ;;  %v20769_v25 = vld [vmem:[#allocation46_spill] sm:$0xff]  ;;  %v20773_v39 = vld [vmem:[#allocation16_spill] sm:$0xff] }
 0x60a   :  { %v12452_v40 = vpop.f32.mrf.mxu1 }
 0x60b   :  { %11133 = vst [vmem:[%s20028_s7 + $0x18] sm:$0xff] %v11079_v60  ;;  %v12453_v15 = vadd.f32 %v12452_v40, %v12451_v12  ;;  %v11003_v12 = vadd.f32 %v12401_v51, %v10906_v26  ;;  %v10909_v3 = vadd.f32 %v12340_v49, %v10812_v54  ;;  %v20758_v40 = vld [vmem:[#allocation17_spill] sm:$0xff]  ;;  %v20770_v26 = vld [vmem:[#allocation47_spill] sm:$0xff] }
 0x60c   :  { %v12454_v19 = vpop.f32.mrf.mxu1  ;;  %v12352_v59 = vadd.f32 %v20771_v13, %v20770_v26 }
 0x60d   :  { %v11084_v16 = vadd.f32 %v12453_v15, %v10987_v20  ;;  %v12343_v20 = vadd.f32 %v20759_v44, %v20758_v40  ;;  %v10817_v15 = vadd.f32 %v12279_v62, %v19862_v56  ;;  %v11006_v27 = vadd.f32 %v12404_v52, %v10909_v3  ;;  %v20775_v3 = vld [vmem:[#allocation58_spill] sm:$0xff] }
 0x60e   :  { %v12455_v31 = vpop.f32.mrf.mxu1 }
 0x60f   :  { %11134 = vst [vmem:[%s20028_s7 + $0x20] sm:$0xff] %v11084_v16  ;;  %v12456_v10 = vadd.f32 %v12455_v31, %v12454_v19  ;;  %v12282_v16 = vadd.f32 %v20761_v11, %v20760_v57  ;;  %v12415_v31 = vpop.f32.mrf.mxu0 }
 0x610   :  { %v12457_v9 = vpop.f32.mrf.mxu1  ;;  %v12416_v17 = vadd.f32 %v12415_v31, %v12414_v18  ;;  %v20778_v31 = vld [vmem:[#allocation56_spill] sm:$0xff] }
 0x611   :  { %v11087_v1 = vadd.f32 %v12456_v10, %v10990_v7  ;;  %v10914_v7 = vadd.f32 %v12343_v20, %v10817_v15  ;;  %v20763_v10 = vld [vmem:[#allocation44_spill] sm:$0xff]  ;;  %v10820_v22 = vadd.f32 %v12282_v16, %v19862_v56  ;;  %v12417_v47 = vpop.f32.mrf.mxu0  ;;  %v20776_v15 = vld [vmem:[#allocation42_spill] sm:$0xff] }
 0x612   :  { %v12458_v58 = vpop.f32.mrf.mxu1 }
 0x613   :  { %11135 = vst [vmem:[%s20028_s7 + $0x28] sm:$0xff] %v11087_v1  ;;  %v12459_v33 = vadd.f32 %v12458_v58, %v12457_v9  ;;  %v12346_v9 = vadd.f32 %v20763_v10, %v20762_v2  ;;  %v20765_v1 = vld [vmem:[#allocation63_spill] sm:$0xff]  ;;  %v12418_v51 = vpop.f32.mrf.mxu0 }
 0x614   :  { %v12460_v24 = vpop.f32.mrf.mxu1  ;;  %v12285_v55 = vadd.f32 %v20765_v1, %v20764_v43  ;;  %v12419_v18 = vadd.f32 %v12418_v51, %v12417_v47 }
 0x615   :  { %v11092_v32 = vadd.f32 %v12459_v33, %v10995_v41  ;;  %v11011_v41 = vadd.f32 %v12407_v29, %v10914_v7 }
 0x616   :  { %v12461_v4 = vpop.f32.mrf.mxu1 }
 0x617   :  { %11136 = vst [vmem:[%s20028_s7 + $0x30] sm:$0xff] %v11092_v32  ;;  %v12462_v45 = vadd.f32 %v12461_v4, %v12460_v24  ;;  %v10917_v24 = vadd.f32 %v12346_v9, %v10820_v22  ;;  %v12349_v32 = vadd.f32 %v20767_v23, %v20766_v35  ;;  %v10825_v4 = vadd.f32 %v12285_v55, %v19862_v56 }
 0x618   :  { %v12463_v6 = vpop.f32.mrf.mxu1 }
 0x619   :  { %v11095_v8 = vadd.f32 %v12462_v45, %v10998_v34  ;;  %v12288_v34 = vadd.f32 %v20769_v25, %v20768_v42  ;;  %v11014_v50 = vadd.f32 %v12410_v21, %v10917_v24 }
 0x61a   :  { %v12464_v38 = vpop.f32.mrf.mxu1 }
 0x61b   :  { %11137 = vst [vmem:[%s20028_s7 + $0x38] sm:$0xff] %v11095_v8  ;;  %v12465_v37 = vadd.f32 %v12464_v38, %v12463_v6  ;;  %v10922_v6 = vadd.f32 %v12349_v32, %v10825_v4  ;;  %v20772_v8 = vld [vmem:[#allocation18_spill] sm:$0xff]  ;;  %v10828_v38 = vadd.f32 %v12288_v34, %v19862_v56 }
 0x61c   :  { %v12466_v60 = vpop.f32.mrf.mxu1  ;;  %v12291_v63 = vadd.f32 %v20773_v39, %v20772_v8 }
 0x61d   :  { %v11100_v28 = vadd.f32 %v12465_v37, %v11003_v12  ;;  %v11019_v54 = vadd.f32 %v12413_v30, %v10922_v6  ;;  %v12420_v12 = vpop.f32.mrf.mxu0  ;;  %v10925_v37 = vadd.f32 %v12352_v59, %v10828_v38 }
 0x61e   :  { %v12467_v19 = vpop.f32.mrf.mxu1  ;;  %v10833_v20 = vadd.f32 %v12291_v63, %v19862_v56 }
 0x61f   :  { %11138 = vst [vmem:[%s20028_s7 + $0x40] sm:$0xff] %v11100_v28  ;;  %v12468_v48 = vadd.f32 %v12467_v19, %v12466_v60  ;;  %v20774_v60 = vld [vmem:[#allocation19_spill] sm:$0xff]  ;;  %v20777_v19 = vld [vmem:[#allocation62_spill] sm:$0xff]  ;;  %v11022_v11 = vadd.f32 %v12416_v17, %v10925_v37 }
 0x620   :  { %v12469_v14 = vpop.f32.mrf.mxu1  ;;  %v12355_v40 = vadd.f32 %v20775_v3, %v20774_v60  ;;  %v12294_v57 = vadd.f32 %v20777_v19, %v20776_v15 }
 0x621   :  { %v11103_v46 = vadd.f32 %v12468_v48, %v11006_v27  ;;  %v12421_v27 = vpop.f32.mrf.mxu0 }
 0x622   :  { %v12470_v58 = vpop.f32.mrf.mxu1  ;;  %v10930_v48 = vadd.f32 %v12355_v40, %v10833_v20  ;;  %v10836_v9 = vadd.f32 %v12294_v57, %v19862_v56  ;;  %v12422_v43 = vadd.f32 %v12421_v27, %v12420_v12 }
 0x623   :  { %11139 = vst [vmem:[%s20028_s7 + $0x48] sm:$0xff] %v11103_v46  ;;  %v12471_v61 = vadd.f32 %v12470_v58, %v12469_v14  ;;  %v20779_v14 = vld [vmem:[#allocation34_spill] sm:$0xff] }
 0x624   :  { %v12472_v33 = vpop.f32.mrf.mxu1  ;;  %v12358_v7 = vadd.f32 %v20779_v14, %v20778_v31  ;;  %v11027_v46 = vadd.f32 %v12419_v18, %v10930_v48 }
 0x625   :  { %v11108_v36 = vadd.f32 %v12471_v61, %v11011_v41 }
 0x626   :  { %v12473_v0 = vpop.f32.mrf.mxu1  ;;  %v10933_v58 = vadd.f32 %v12358_v7, %v10836_v9 }
 0x627   :  { %11140 = vst [vmem:[%s20028_s7 + $0x50] sm:$0xff] %v11108_v36  ;;  %v12474_v5 = vadd.f32 %v12473_v0, %v12472_v33 }
 0x628   :  { %v12475_v45 = vpop.f32.mrf.mxu1  ;;  %v11030_v21 = vadd.f32 %v12422_v43, %v10933_v58 }
 0x629   :  { %v11111_v49 = vadd.f32 %v12474_v5, %v11014_v50 }
 0x62a   :  { %v12476_v62 = vpop.f32.mrf.mxu1 }
 0x62b   :  { %11141 = vst [vmem:[%s20028_s7 + $0x58] sm:$0xff] %v11111_v49  ;;  %v12477_v53 = vadd.f32 %v12476_v62, %v12475_v45 }
 0x62c   :  { %v12478_v52 = vpop.f32.mrf.mxu1 }
 0x62d   :  { %v11116_v44 = vadd.f32 %v12477_v53, %v11019_v54 }
 0x62e   :  { %v12479_v28 = vpop.f32.mrf.mxu1 }
 0x62f   :  { %11142 = vst [vmem:[%s20028_s7 + $0x60] sm:$0xff] %v11116_v44  ;;  %v12480_v16 = vadd.f32 %v12479_v28, %v12478_v52 }
 0x630   :  { %v12481_v29 = vpop.f32.mrf.mxu1 }
 0x631   :  { %v11119_v2 = vadd.f32 %v12480_v16, %v11022_v11 }
 0x632   :  { %v12482_v10 = vpop.f32.mrf.mxu1 }
 0x633   :  { %11143 = vst [vmem:[%s20028_s7 + $0x68] sm:$0xff] %v11119_v2  ;;  %v12483_v1 = vadd.f32 %v12482_v10, %v12481_v29 }
 0x634   :  { %v12484_v55 = vpop.f32.mrf.mxu1 }
 0x635   :  { %v11124_v22 = vadd.f32 %v12483_v1, %v11027_v46 }
 0x636   :  { %v12485_v41 = vpop.f32.mrf.mxu1 }
 0x637   :  { %11144 = vst [vmem:[%s20028_s7 + $0x70] sm:$0xff] %v11124_v22  ;;  %v12486_v61 = vadd.f32 %v12485_v41, %v12484_v55 }
 0x639   :  { %v11127_v47 = vadd.f32 %v12486_v61, %v11030_v21 }
 0x63b   :  { %11145 = vst [vmem:[%s20028_s7 + $0x78] sm:$0xff] %v11127_v47 }

</bundles_post_ra>
